<compile_context>
chip_gen: v5e
topology: v5e:2x2
jax: 0.10.0
libtpu: 0.0.40
codegen_flags: <defaults>
</compile_context>

<pallas_src>
import functools
import numpy as np

import jax
import jax.numpy as jnp
from jax.experimental import pallas as pl
from jax.experimental.pallas import tpu as pltpu

LATENT_CHANNELS = 16
_IN_EPS = 1e-5  # torch.nn.InstanceNorm2d default eps


# ---------------------------------------------------------------------------
# Kernel A: per-sample KxK "same" conv + bias (used for the fused style conv
# on z).  Taps accumulated in-kernel, bf16 operands, f32 accumulation.
# ---------------------------------------------------------------------------
def _conv_bias_kernel(xpad_ref, w_ref, b_ref, o_ref, *, H, W, K):
    xv = xpad_ref[0]                                   # (H+K-1, W+K-1, Cin) bf16
    cin = xv.shape[-1]
    cout = o_ref.shape[-1]
    acc = jnp.zeros((H * W, cout), jnp.float32)
    for ky in range(K):
        for kx in range(K):
            win = xv[ky:ky + H, kx:kx + W, :].reshape(H * W, cin)
            acc = acc + jnp.dot(win, w_ref[ky, kx],
                                preferred_element_type=jnp.float32)
    acc = acc + b_ref[...]                             # (1, Cout) broadcast
    o_ref[0] = acc.astype(o_ref.dtype)


# ---------------------------------------------------------------------------
# Kernel B: per-sample fused [KxK conv + bias + noise + InstanceNorm2d +
# (style_mean + style_scale * x) + tanh]  ==  Conv2d + NoisyAdaIn.
# ---------------------------------------------------------------------------
def _conv_adain_kernel(xpad_ref, w_ref, b_ref, noise_ref, mean_ref, scale_ref,
                       o_ref, *, H, W, K):
    xv = xpad_ref[0]                                   # (H+K-1, W+K-1, Cin) bf16
    cin = xv.shape[-1]
    cout = o_ref.shape[-1]
    acc = jnp.zeros((H * W, cout), jnp.float32)
    for ky in range(K):
        for kx in range(K):
            win = xv[ky:ky + H, kx:kx + W, :].reshape(H * W, cin)
            acc = acc + jnp.dot(win, w_ref[ky, kx],
                                preferred_element_type=jnp.float32)
    acc = acc + b_ref[...]                             # conv bias
    acc = acc + noise_ref[0]                           # noise_scale * randn (batch-shared)
    # InstanceNorm2d (affine=False, biased variance, eps=1e-5)
    mu = jnp.mean(acc, axis=0, keepdims=True)
    xc = acc - mu
    var = jnp.mean(xc * xc, axis=0, keepdims=True)
    xn = xc * jax.lax.rsqrt(var + _IN_EPS)
    # AdaIN affine from the style maps, then tanh
    out = jnp.tanh(mean_ref[0] + scale_ref[0] * xn)
    o_ref[0] = out.astype(o_ref.dtype)


# ---------------------------------------------------------------------------
# pallas_call wrappers
# ---------------------------------------------------------------------------
def _conv_bias(xpad, w, b, H, W, out_dtype=jnp.float32):
    """xpad: (N, H+K-1, W+K-1, Cin) bf16; w: (K, K, Cin, Cout) bf16; b: (Cout,)."""
    N = xpad.shape[0]
    K = w.shape[0]
    cout = w.shape[-1]
    HW = H * W
    kern = functools.partial(_conv_bias_kernel, H=H, W=W, K=K)
    return pl.pallas_call(
        kern,
        out_shape=jax.ShapeDtypeStruct((N, HW, cout), out_dtype),
        grid_spec=pltpu.PrefetchScalarGridSpec(
            num_scalar_prefetch=0,
            grid=(N,),
            in_specs=[
                pl.BlockSpec((1,) + xpad.shape[1:], lambda n: (n, 0, 0, 0)),
                pl.BlockSpec(w.shape, lambda n: (0, 0, 0, 0)),
                pl.BlockSpec((1, cout), lambda n: (0, 0)),
            ],
            out_specs=pl.BlockSpec((1, HW, cout), lambda n: (n, 0, 0)),
        ),
        compiler_params=pltpu.CompilerParams(
            dimension_semantics=("parallel",)),
    )(xpad, w, b.reshape(1, cout).astype(jnp.float32))


def _conv_adain(xpad, w, b, noise, mean_map, scale_map, H, W,
                out_dtype=jnp.float32):
    """Fused Conv2d + NoisyAdaIn for one stage.

    xpad:      (N, H+K-1, W+K-1, Cin) bf16
    w:         (K, K, Cin, Cout) bf16
    b:         (Cout,) f32
    noise:     (1, H*W, Cout) f32   (shared across the batch, like the reference)
    mean_map:  (N, H*W, Cout) f32
    scale_map: (N, H*W, Cout) f32
    """
    N = xpad.shape[0]
    K = w.shape[0]
    cout = w.shape[-1]
    HW = H * W
    kern = functools.partial(_conv_adain_kernel, H=H, W=W, K=K)
    return pl.pallas_call(
        kern,
        out_shape=jax.ShapeDtypeStruct((N, HW, cout), out_dtype),
        grid_spec=pltpu.PrefetchScalarGridSpec(
            num_scalar_prefetch=0,
            grid=(N,),
            in_specs=[
                pl.BlockSpec((1,) + xpad.shape[1:], lambda n: (n, 0, 0, 0)),
                pl.BlockSpec(w.shape, lambda n: (0, 0, 0, 0)),
                pl.BlockSpec((1, cout), lambda n: (0, 0)),
                pl.BlockSpec((1, HW, cout), lambda n: (0, 0, 0)),   # noise (batch-shared)
                pl.BlockSpec((1, HW, cout), lambda n: (n, 0, 0)),   # style mean
                pl.BlockSpec((1, HW, cout), lambda n: (n, 0, 0)),   # style scale
            ],
            out_specs=pl.BlockSpec((1, HW, cout), lambda n: (n, 0, 0)),
        ),
        compiler_params=pltpu.CompilerParams(
            dimension_semantics=("parallel",)),
    )(xpad, w, b.reshape(1, cout).astype(jnp.float32),
      noise.astype(jnp.float32),
      mean_map.astype(jnp.float32),
      scale_map.astype(jnp.float32))


# ---------------------------------------------------------------------------
# Bilinear (align_corners=True) interpolation matrix, as in nn.Upsample.
# ---------------------------------------------------------------------------
def _upsample_matrix(size_in, size_out):
    U = np.zeros((size_out, size_in), np.float32)
    if size_in == 1:
        U[:, 0] = 1.0
    else:
        if size_out == 1:
            src = np.zeros(1, np.float64)
        else:
            src = np.arange(size_out) * (size_in - 1) / (size_out - 1)
        i0 = np.clip(np.floor(src).astype(np.int64), 0, size_in - 1)
        i1 = np.clip(i0 + 1, 0, size_in - 1)
        frac = (src - i0).astype(np.float32)
        np.add.at(U, (np.arange(size_out), i0), 1.0 - frac)
        np.add.at(U, (np.arange(size_out), i1), frac)
    return jnp.asarray(U)


# ---------------------------------------------------------------------------
# Parameters + forward
# ---------------------------------------------------------------------------
def init_params(key, in_ch, hid_ch, out_ch, ksize):
    ks = jax.random.split(key, 8)

    def conv_p(k, co, ci, kk):
        kw, kb = jax.random.split(k)
        s = 1.0 / np.sqrt(ci * kk * kk)
        w = jax.random.uniform(kw, (co, ci, kk, kk), jnp.float32, -s, s)
        b = jax.random.uniform(kb, (co,), jnp.float32, -s, s)
        return w, b

    p = {}
    p["conv1_w"], p["conv1_b"] = conv_p(ks[0], hid_ch, in_ch, ksize)
    p["conv2_w"], p["conv2_b"] = conv_p(ks[1], out_ch, hid_ch, ksize)
    p["a1_mean_w"], p["a1_mean_b"] = conv_p(ks[2], hid_ch, LATENT_CHANNELS, 5)
    p["a1_scale_w"], p["a1_scale_b"] = conv_p(ks[3], hid_ch, LATENT_CHANNELS, 5)
    p["a2_mean_w"], p["a2_mean_b"] = conv_p(ks[4], out_ch, LATENT_CHANNELS, 5)
    p["a2_scale_w"], p["a2_scale_b"] = conv_p(ks[5], out_ch, LATENT_CHANNELS, 5)
    p["a1_noise_scale"] = jax.random.normal(ks[6], (1, hid_ch, 1, 1), jnp.float32)
    p["a2_noise_scale"] = jax.random.normal(ks[7], (1, out_ch, 1, 1), jnp.float32)
    return p


def styleganblock_forward(params, x_nchw, z_nchw, noise_key, *,
                          input_shape, kernel_size):
    H, W = input_shape
    HW = H * W
    N = x_nchw.shape[0]
    hid_ch = params["conv1_w"].shape[0]
    out_ch = params["conv2_w"].shape[0]
    pad = (kernel_size - 1) // 2

    # NCHW -> NHWC
    x = jnp.transpose(x_nchw.astype(jnp.float32), (0, 2, 3, 1))
    z = jnp.transpose(z_nchw.astype(jnp.float32), (0, 2, 3, 1))
    Hz, Wz = z.shape[1], z.shape[2]

    # ---- style path: ONE fused 5x5 conv on z producing all four style maps ----
    ws = jnp.concatenate([params["a1_mean_w"], params["a1_scale_w"],
                          params["a2_mean_w"], params["a2_scale_w"]], axis=0)
    bs = jnp.concatenate([params["a1_mean_b"], params["a1_scale_b"],
                          params["a2_mean_b"], params["a2_scale_b"]], axis=0)
    ws_io = jnp.transpose(ws, (2, 3, 1, 0)).astype(jnp.bfloat16)   # (5,5,16,Ctot)
    zp = jnp.pad(z, ((0, 0), (2, 2), (2, 2), (0, 0))).astype(jnp.bfloat16)
    style = _conv_bias(zp, ws_io, bs, Hz, Wz, out_dtype=jnp.float32)
    style = style.reshape(N, Hz, Wz, -1)

    # bilinear upsample to input_shape, align_corners=True (tiny; plain-JAX glue)
    Uh = _upsample_matrix(Hz, H)
    Uw = _upsample_matrix(Wz, W)
    style = jnp.einsum('ha,wb,nabc->nhwc', Uh, Uw, style).reshape(N, HW, -1)
    m1 = style[..., :hid_ch]
    s1 = style[..., hid_ch:2 * hid_ch]
    m2 = style[..., 2 * hid_ch:2 * hid_ch + out_ch]
    s2 = style[..., 2 * hid_ch + out_ch:]

    # ---- per-forward noise (same for every batch element, as in the reference) ----
    k1, k2 = jax.random.split(noise_key)
    n1 = (params["a1_noise_scale"].reshape(1, 1, hid_ch) *
          jax.random.normal(k1, (1, HW, hid_ch), jnp.float32))
    n2 = (params["a2_noise_scale"].reshape(1, 1, out_ch) *
          jax.random.normal(k2, (1, HW, out_ch), jnp.float32))

    # ---- stage 1: conv1 + NoisyAdaIn1 (one fused Pallas kernel) ----
    w1 = jnp.transpose(params["conv1_w"], (2, 3, 1, 0)).astype(jnp.bfloat16)
    xp = jnp.pad(x, ((0, 0), (pad, pad), (pad, pad), (0, 0))).astype(jnp.bfloat16)
    h = _conv_adain(xp, w1, params["conv1_b"], n1, m1, s1, H, W,
                    out_dtype=jnp.bfloat16)            # (N, HW, hid_ch) bf16

    # ---- stage 2: conv2 + NoisyAdaIn2 (one fused Pallas kernel) ----
    w2 = jnp.transpose(params["conv2_w"], (2, 3, 1, 0)).astype(jnp.bfloat16)
    hp = jnp.pad(h.reshape(N, H, W, hid_ch),
                 ((0, 0), (pad, pad), (pad, pad), (0, 0)))
    y = _conv_adain(hp, w2, params["conv2_b"], n2, m2, s2, H, W,
                    out_dtype=jnp.float32)             # (N, HW, out_ch) f32

    y = y.reshape(N, H, W, out_ch)
    return jnp.transpose(y, (0, 3, 1, 2)), z_nchw      # (x, z) like the module


if __name__ == "__main__":
    key = jax.random.PRNGKey(0)
    kp, kx, kz, kn = jax.random.split(key, 4)

    N = 2
    INPUT_SHAPE = (16, 16)
    IN_CH, HID_CH, OUT_CH = 4, 32, 16
    KSIZE = 3
    Z_SPATIAL = (8, 8)

    params = init_params(kp, IN_CH, HID_CH, OUT_CH, KSIZE)
    x = jax.random.normal(kx, (N, IN_CH) + INPUT_SHAPE, jnp.float32)
    z = jax.random.normal(kz, (N, LATENT_CHANNELS) + Z_SPATIAL, jnp.float32)

    fwd = jax.jit(functools.partial(styleganblock_forward,
                                    input_shape=INPUT_SHAPE,
                                    kernel_size=KSIZE))
    out, z_out = fwd(params, x, z, kn)
    out = jax.block_until_ready(out)

    assert out.shape == (N, OUT_CH) + INPUT_SHAPE, out.shape
    assert z_out.shape == z.shape, z_out.shape
    assert bool(jnp.all(jnp.isfinite(out))), "non-finite output"

    print("KERNEL_OK")
</pallas_src>

<mosaic_0001>
module attributes {stable_mosaic.version = 11 : i64} {
  func.func @_conv_bias_kernel(%arg0: i32, %arg1: memref<1x12x12x16xbf16, #tpu.memory_space<vmem>>, %arg2: memref<5x5x16x96xbf16, #tpu.memory_space<vmem>>, %arg3: memref<1x96xf32, #tpu.memory_space<vmem>>, %arg4: memref<1x64x96xf32, #tpu.memory_space<vmem>>) attributes {dimension_semantics = [#tpu.dimension_semantics<parallel>], iteration_bounds = array<i64: 2>, scalar_prefetch = 0 : i64, scratch_operands = 0 : i64, tpu.core_type = #tpu.core_type<tc>, window_params = [{transform_indices = @transform_0, window_bounds = array<i64: 1, 12, 12, 16>}, {pipeline_mode = #tpu.pipeline_mode<synchronous>, transform_indices = @transform_1, window_bounds = array<i64: 5, 5, 16, 96>}, {pipeline_mode = #tpu.pipeline_mode<synchronous>, transform_indices = @transform_2, window_bounds = array<i64: 1, 96>}, {transform_indices = @transform_3, window_bounds = array<i64: 1, 64, 96>}]} {
    %c0 = arith.constant 0 : index
    %c0_0 = arith.constant 0 : index
    %c0_1 = arith.constant 0 : index
    %c0_2 = arith.constant 0 : index
    %0 = vector.load %arg1[%c0, %c0_0, %c0_1, %c0_2] : memref<1x12x12x16xbf16, #tpu.memory_space<vmem>>, vector<1x12x12x16xbf16>
    %1 = vector.shape_cast %0 : vector<1x12x12x16xbf16> to vector<12x12x16xbf16>
    %cst = arith.constant 0.000000e+00 : f32
    %2 = vector.broadcast %cst : f32 to vector<64x96xf32>
    %3 = vector.extract_strided_slice %1 {offsets = [0, 0, 0], sizes = [8, 8, 16], strides = [1, 1, 1]} : vector<12x12x16xbf16> to vector<8x8x16xbf16>
    %4 = vector.shape_cast %3 : vector<8x8x16xbf16> to vector<64x16xbf16>
    %c0_3 = arith.constant 0 : index
    %c0_4 = arith.constant 0 : index
    %c0_5 = arith.constant 0 : index
    %c0_6 = arith.constant 0 : index
    %5 = vector.load %arg2[%c0_3, %c0_4, %c0_5, %c0_6] : memref<5x5x16x96xbf16, #tpu.memory_space<vmem>>, vector<1x1x16x96xbf16>
    %6 = vector.shape_cast %5 : vector<1x1x16x96xbf16> to vector<16x96xbf16>
    %cst_7 = arith.constant dense<0.000000e+00> : vector<64x96xf32>
    %7 = tpu.matmul %4, %6, %cst_7 {dimension_numbers = #tpu.dot_dimension_numbers<[1], [0], [0], [1], [0, 0, 1, 1], [], []>} : vector<64x16xbf16>, vector<16x96xbf16>, vector<64x96xf32> -> vector<64x96xf32>
    %8 = arith.addf %2, %7 : vector<64x96xf32>
    %9 = vector.extract_strided_slice %1 {offsets = [0, 1, 0], sizes = [8, 8, 16], strides = [1, 1, 1]} : vector<12x12x16xbf16> to vector<8x8x16xbf16>
    %10 = vector.shape_cast %9 : vector<8x8x16xbf16> to vector<64x16xbf16>
    %c0_8 = arith.constant 0 : index
    %c1 = arith.constant 1 : index
    %c0_9 = arith.constant 0 : index
    %c0_10 = arith.constant 0 : index
    %11 = vector.load %arg2[%c0_8, %c1, %c0_9, %c0_10] : memref<5x5x16x96xbf16, #tpu.memory_space<vmem>>, vector<1x1x16x96xbf16>
    %12 = vector.shape_cast %11 : vector<1x1x16x96xbf16> to vector<16x96xbf16>
    %cst_11 = arith.constant dense<0.000000e+00> : vector<64x96xf32>
    %13 = tpu.matmul %10, %12, %cst_11 {dimension_numbers = #tpu.dot_dimension_numbers<[1], [0], [0], [1], [0, 0, 1, 1], [], []>} : vector<64x16xbf16>, vector<16x96xbf16>, vector<64x96xf32> -> vector<64x96xf32>
    %14 = arith.addf %8, %13 : vector<64x96xf32>
    %15 = vector.extract_strided_slice %1 {offsets = [0, 2, 0], sizes = [8, 8, 16], strides = [1, 1, 1]} : vector<12x12x16xbf16> to vector<8x8x16xbf16>
    %16 = vector.shape_cast %15 : vector<8x8x16xbf16> to vector<64x16xbf16>
    %c0_12 = arith.constant 0 : index
    %c2 = arith.constant 2 : index
    %c0_13 = arith.constant 0 : index
    %c0_14 = arith.constant 0 : index
    %17 = vector.load %arg2[%c0_12, %c2, %c0_13, %c0_14] : memref<5x5x16x96xbf16, #tpu.memory_space<vmem>>, vector<1x1x16x96xbf16>
    %18 = vector.shape_cast %17 : vector<1x1x16x96xbf16> to vector<16x96xbf16>
    %cst_15 = arith.constant dense<0.000000e+00> : vector<64x96xf32>
    %19 = tpu.matmul %16, %18, %cst_15 {dimension_numbers = #tpu.dot_dimension_numbers<[1], [0], [0], [1], [0, 0, 1, 1], [], []>} : vector<64x16xbf16>, vector<16x96xbf16>, vector<64x96xf32> -> vector<64x96xf32>
    %20 = arith.addf %14, %19 : vector<64x96xf32>
    %21 = vector.extract_strided_slice %1 {offsets = [0, 3, 0], sizes = [8, 8, 16], strides = [1, 1, 1]} : vector<12x12x16xbf16> to vector<8x8x16xbf16>
    %22 = vector.shape_cast %21 : vector<8x8x16xbf16> to vector<64x16xbf16>
    %c0_16 = arith.constant 0 : index
    %c3 = arith.constant 3 : index
    %c0_17 = arith.constant 0 : index
    %c0_18 = arith.constant 0 : index
    %23 = vector.load %arg2[%c0_16, %c3, %c0_17, %c0_18] : memref<5x5x16x96xbf16, #tpu.memory_space<vmem>>, vector<1x1x16x96xbf16>
    %24 = vector.shape_cast %23 : vector<1x1x16x96xbf16> to vector<16x96xbf16>
    %cst_19 = arith.constant dense<0.000000e+00> : vector<64x96xf32>
    %25 = tpu.matmul %22, %24, %cst_19 {dimension_numbers = #tpu.dot_dimension_numbers<[1], [0], [0], [1], [0, 0, 1, 1], [], []>} : vector<64x16xbf16>, vector<16x96xbf16>, vector<64x96xf32> -> vector<64x96xf32>
    %26 = arith.addf %20, %25 : vector<64x96xf32>
    %27 = vector.extract_strided_slice %1 {offsets = [0, 4, 0], sizes = [8, 8, 16], strides = [1, 1, 1]} : vector<12x12x16xbf16> to vector<8x8x16xbf16>
    %28 = vector.shape_cast %27 : vector<8x8x16xbf16> to vector<64x16xbf16>
    %c0_20 = arith.constant 0 : index
    %c4 = arith.constant 4 : index
    %c0_21 = arith.constant 0 : index
    %c0_22 = arith.constant 0 : index
    %29 = vector.load %arg2[%c0_20, %c4, %c0_21, %c0_22] : memref<5x5x16x96xbf16, #tpu.memory_space<vmem>>, vector<1x1x16x96xbf16>
    %30 = vector.shape_cast %29 : vector<1x1x16x96xbf16> to vector<16x96xbf16>
    %cst_23 = arith.constant dense<0.000000e+00> : vector<64x96xf32>
    %31 = tpu.matmul %28, %30, %cst_23 {dimension_numbers = #tpu.dot_dimension_numbers<[1], [0], [0], [1], [0, 0, 1, 1], [], []>} : vector<64x16xbf16>, vector<16x96xbf16>, vector<64x96xf32> -> vector<64x96xf32>
    %32 = arith.addf %26, %31 : vector<64x96xf32>
    %33 = vector.extract_strided_slice %1 {offsets = [1, 0, 0], sizes = [8, 8, 16], strides = [1, 1, 1]} : vector<12x12x16xbf16> to vector<8x8x16xbf16>
    %34 = vector.shape_cast %33 : vector<8x8x16xbf16> to vector<64x16xbf16>
    %c1_24 = arith.constant 1 : index
    %c0_25 = arith.constant 0 : index
    %c0_26 = arith.constant 0 : index
    %c0_27 = arith.constant 0 : index
    %35 = vector.load %arg2[%c1_24, %c0_25, %c0_26, %c0_27] : memref<5x5x16x96xbf16, #tpu.memory_space<vmem>>, vector<1x1x16x96xbf16>
    %36 = vector.shape_cast %35 : vector<1x1x16x96xbf16> to vector<16x96xbf16>
    %cst_28 = arith.constant dense<0.000000e+00> : vector<64x96xf32>
    %37 = tpu.matmul %34, %36, %cst_28 {dimension_numbers = #tpu.dot_dimension_numbers<[1], [0], [0], [1], [0, 0, 1, 1], [], []>} : vector<64x16xbf16>, vector<16x96xbf16>, vector<64x96xf32> -> vector<64x96xf32>
    %38 = arith.addf %32, %37 : vector<64x96xf32>
    %39 = vector.extract_strided_slice %1 {offsets = [1, 1, 0], sizes = [8, 8, 16], strides = [1, 1, 1]} : vector<12x12x16xbf16> to vector<8x8x16xbf16>
    %40 = vector.shape_cast %39 : vector<8x8x16xbf16> to vector<64x16xbf16>
    %c1_29 = arith.constant 1 : index
    %c1_30 = arith.constant 1 : index
    %c0_31 = arith.constant 0 : index
    %c0_32 = arith.constant 0 : index
    %41 = vector.load %arg2[%c1_29, %c1_30, %c0_31, %c0_32] : memref<5x5x16x96xbf16, #tpu.memory_space<vmem>>, vector<1x1x16x96xbf16>
    %42 = vector.shape_cast %41 : vector<1x1x16x96xbf16> to vector<16x96xbf16>
    %cst_33 = arith.constant dense<0.000000e+00> : vector<64x96xf32>
    %43 = tpu.matmul %40, %42, %cst_33 {dimension_numbers = #tpu.dot_dimension_numbers<[1], [0], [0], [1], [0, 0, 1, 1], [], []>} : vector<64x16xbf16>, vector<16x96xbf16>, vector<64x96xf32> -> vector<64x96xf32>
    %44 = arith.addf %38, %43 : vector<64x96xf32>
    %45 = vector.extract_strided_slice %1 {offsets = [1, 2, 0], sizes = [8, 8, 16], strides = [1, 1, 1]} : vector<12x12x16xbf16> to vector<8x8x16xbf16>
    %46 = vector.shape_cast %45 : vector<8x8x16xbf16> to vector<64x16xbf16>
    %c1_34 = arith.constant 1 : index
    %c2_35 = arith.constant 2 : index
    %c0_36 = arith.constant 0 : index
    %c0_37 = arith.constant 0 : index
    %47 = vector.load %arg2[%c1_34, %c2_35, %c0_36, %c0_37] : memref<5x5x16x96xbf16, #tpu.memory_space<vmem>>, vector<1x1x16x96xbf16>
    %48 = vector.shape_cast %47 : vector<1x1x16x96xbf16> to vector<16x96xbf16>
    %cst_38 = arith.constant dense<0.000000e+00> : vector<64x96xf32>
    %49 = tpu.matmul %46, %48, %cst_38 {dimension_numbers = #tpu.dot_dimension_numbers<[1], [0], [0], [1], [0, 0, 1, 1], [], []>} : vector<64x16xbf16>, vector<16x96xbf16>, vector<64x96xf32> -> vector<64x96xf32>
    %50 = arith.addf %44, %49 : vector<64x96xf32>
    %51 = vector.extract_strided_slice %1 {offsets = [1, 3, 0], sizes = [8, 8, 16], strides = [1, 1, 1]} : vector<12x12x16xbf16> to vector<8x8x16xbf16>
    %52 = vector.shape_cast %51 : vector<8x8x16xbf16> to vector<64x16xbf16>
    %c1_39 = arith.constant 1 : index
    %c3_40 = arith.constant 3 : index
    %c0_41 = arith.constant 0 : index
    %c0_42 = arith.constant 0 : index
    %53 = vector.load %arg2[%c1_39, %c3_40, %c0_41, %c0_42] : memref<5x5x16x96xbf16, #tpu.memory_space<vmem>>, vector<1x1x16x96xbf16>
    %54 = vector.shape_cast %53 : vector<1x1x16x96xbf16> to vector<16x96xbf16>
    %cst_43 = arith.constant dense<0.000000e+00> : vector<64x96xf32>
    %55 = tpu.matmul %52, %54, %cst_43 {dimension_numbers = #tpu.dot_dimension_numbers<[1], [0], [0], [1], [0, 0, 1, 1], [], []>} : vector<64x16xbf16>, vector<16x96xbf16>, vector<64x96xf32> -> vector<64x96xf32>
    %56 = arith.addf %50, %55 : vector<64x96xf32>
    %57 = vector.extract_strided_slice %1 {offsets = [1, 4, 0], sizes = [8, 8, 16], strides = [1, 1, 1]} : vector<12x12x16xbf16> to vector<8x8x16xbf16>
    %58 = vector.shape_cast %57 : vector<8x8x16xbf16> to vector<64x16xbf16>
    %c1_44 = arith.constant 1 : index
    %c4_45 = arith.constant 4 : index
    %c0_46 = arith.constant 0 : index
    %c0_47 = arith.constant 0 : index
    %59 = vector.load %arg2[%c1_44, %c4_45, %c0_46, %c0_47] : memref<5x5x16x96xbf16, #tpu.memory_space<vmem>>, vector<1x1x16x96xbf16>
    %60 = vector.shape_cast %59 : vector<1x1x16x96xbf16> to vector<16x96xbf16>
    %cst_48 = arith.constant dense<0.000000e+00> : vector<64x96xf32>
    %61 = tpu.matmul %58, %60, %cst_48 {dimension_numbers = #tpu.dot_dimension_numbers<[1], [0], [0], [1], [0, 0, 1, 1], [], []>} : vector<64x16xbf16>, vector<16x96xbf16>, vector<64x96xf32> -> vector<64x96xf32>
    %62 = arith.addf %56, %61 : vector<64x96xf32>
    %63 = vector.extract_strided_slice %1 {offsets = [2, 0, 0], sizes = [8, 8, 16], strides = [1, 1, 1]} : vector<12x12x16xbf16> to vector<8x8x16xbf16>
    %64 = vector.shape_cast %63 : vector<8x8x16xbf16> to vector<64x16xbf16>
    %c2_49 = arith.constant 2 : index
    %c0_50 = arith.constant 0 : index
    %c0_51 = arith.constant 0 : index
    %c0_52 = arith.constant 0 : index
    %65 = vector.load %arg2[%c2_49, %c0_50, %c0_51, %c0_52] : memref<5x5x16x96xbf16, #tpu.memory_space<vmem>>, vector<1x1x16x96xbf16>
    %66 = vector.shape_cast %65 : vector<1x1x16x96xbf16> to vector<16x96xbf16>
    %cst_53 = arith.constant dense<0.000000e+00> : vector<64x96xf32>
    %67 = tpu.matmul %64, %66, %cst_53 {dimension_numbers = #tpu.dot_dimension_numbers<[1], [0], [0], [1], [0, 0, 1, 1], [], []>} : vector<64x16xbf16>, vector<16x96xbf16>, vector<64x96xf32> -> vector<64x96xf32>
    %68 = arith.addf %62, %67 : vector<64x96xf32>
    %69 = vector.extract_strided_slice %1 {offsets = [2, 1, 0], sizes = [8, 8, 16], strides = [1, 1, 1]} : vector<12x12x16xbf16> to vector<8x8x16xbf16>
    %70 = vector.shape_cast %69 : vector<8x8x16xbf16> to vector<64x16xbf16>
    %c2_54 = arith.constant 2 : index
    %c1_55 = arith.constant 1 : index
    %c0_56 = arith.constant 0 : index
    %c0_57 = arith.constant 0 : index
    %71 = vector.load %arg2[%c2_54, %c1_55, %c0_56, %c0_57] : memref<5x5x16x96xbf16, #tpu.memory_space<vmem>>, vector<1x1x16x96xbf16>
    %72 = vector.shape_cast %71 : vector<1x1x16x96xbf16> to vector<16x96xbf16>
    %cst_58 = arith.constant dense<0.000000e+00> : vector<64x96xf32>
    %73 = tpu.matmul %70, %72, %cst_58 {dimension_numbers = #tpu.dot_dimension_numbers<[1], [0], [0], [1], [0, 0, 1, 1], [], []>} : vector<64x16xbf16>, vector<16x96xbf16>, vector<64x96xf32> -> vector<64x96xf32>
    %74 = arith.addf %68, %73 : vector<64x96xf32>
    %75 = vector.extract_strided_slice %1 {offsets = [2, 2, 0], sizes = [8, 8, 16], strides = [1, 1, 1]} : vector<12x12x16xbf16> to vector<8x8x16xbf16>
    %76 = vector.shape_cast %75 : vector<8x8x16xbf16> to vector<64x16xbf16>
    %c2_59 = arith.constant 2 : index
    %c2_60 = arith.constant 2 : index
    %c0_61 = arith.constant 0 : index
    %c0_62 = arith.constant 0 : index
    %77 = vector.load %arg2[%c2_59, %c2_60, %c0_61, %c0_62] : memref<5x5x16x96xbf16, #tpu.memory_space<vmem>>, vector<1x1x16x96xbf16>
    %78 = vector.shape_cast %77 : vector<1x1x16x96xbf16> to vector<16x96xbf16>
    %cst_63 = arith.constant dense<0.000000e+00> : vector<64x96xf32>
    %79 = tpu.matmul %76, %78, %cst_63 {dimension_numbers = #tpu.dot_dimension_numbers<[1], [0], [0], [1], [0, 0, 1, 1], [], []>} : vector<64x16xbf16>, vector<16x96xbf16>, vector<64x96xf32> -> vector<64x96xf32>
    %80 = arith.addf %74, %79 : vector<64x96xf32>
    %81 = vector.extract_strided_slice %1 {offsets = [2, 3, 0], sizes = [8, 8, 16], strides = [1, 1, 1]} : vector<12x12x16xbf16> to vector<8x8x16xbf16>
    %82 = vector.shape_cast %81 : vector<8x8x16xbf16> to vector<64x16xbf16>
    %c2_64 = arith.constant 2 : index
    %c3_65 = arith.constant 3 : index
    %c0_66 = arith.constant 0 : index
    %c0_67 = arith.constant 0 : index
    %83 = vector.load %arg2[%c2_64, %c3_65, %c0_66, %c0_67] : memref<5x5x16x96xbf16, #tpu.memory_space<vmem>>, vector<1x1x16x96xbf16>
    %84 = vector.shape_cast %83 : vector<1x1x16x96xbf16> to vector<16x96xbf16>
    %cst_68 = arith.constant dense<0.000000e+00> : vector<64x96xf32>
    %85 = tpu.matmul %82, %84, %cst_68 {dimension_numbers = #tpu.dot_dimension_numbers<[1], [0], [0], [1], [0, 0, 1, 1], [], []>} : vector<64x16xbf16>, vector<16x96xbf16>, vector<64x96xf32> -> vector<64x96xf32>
    %86 = arith.addf %80, %85 : vector<64x96xf32>
    %87 = vector.extract_strided_slice %1 {offsets = [2, 4, 0], sizes = [8, 8, 16], strides = [1, 1, 1]} : vector<12x12x16xbf16> to vector<8x8x16xbf16>
    %88 = vector.shape_cast %87 : vector<8x8x16xbf16> to vector<64x16xbf16>
    %c2_69 = arith.constant 2 : index
    %c4_70 = arith.constant 4 : index
    %c0_71 = arith.constant 0 : index
    %c0_72 = arith.constant 0 : index
    %89 = vector.load %arg2[%c2_69, %c4_70, %c0_71, %c0_72] : memref<5x5x16x96xbf16, #tpu.memory_space<vmem>>, vector<1x1x16x96xbf16>
    %90 = vector.shape_cast %89 : vector<1x1x16x96xbf16> to vector<16x96xbf16>
    %cst_73 = arith.constant dense<0.000000e+00> : vector<64x96xf32>
    %91 = tpu.matmul %88, %90, %cst_73 {dimension_numbers = #tpu.dot_dimension_numbers<[1], [0], [0], [1], [0, 0, 1, 1], [], []>} : vector<64x16xbf16>, vector<16x96xbf16>, vector<64x96xf32> -> vector<64x96xf32>
    %92 = arith.addf %86, %91 : vector<64x96xf32>
    %93 = vector.extract_strided_slice %1 {offsets = [3, 0, 0], sizes = [8, 8, 16], strides = [1, 1, 1]} : vector<12x12x16xbf16> to vector<8x8x16xbf16>
    %94 = vector.shape_cast %93 : vector<8x8x16xbf16> to vector<64x16xbf16>
    %c3_74 = arith.constant 3 : index
    %c0_75 = arith.constant 0 : index
    %c0_76 = arith.constant 0 : index
    %c0_77 = arith.constant 0 : index
    %95 = vector.load %arg2[%c3_74, %c0_75, %c0_76, %c0_77] : memref<5x5x16x96xbf16, #tpu.memory_space<vmem>>, vector<1x1x16x96xbf16>
    %96 = vector.shape_cast %95 : vector<1x1x16x96xbf16> to vector<16x96xbf16>
    %cst_78 = arith.constant dense<0.000000e+00> : vector<64x96xf32>
    %97 = tpu.matmul %94, %96, %cst_78 {dimension_numbers = #tpu.dot_dimension_numbers<[1], [0], [0], [1], [0, 0, 1, 1], [], []>} : vector<64x16xbf16>, vector<16x96xbf16>, vector<64x96xf32> -> vector<64x96xf32>
    %98 = arith.addf %92, %97 : vector<64x96xf32>
    %99 = vector.extract_strided_slice %1 {offsets = [3, 1, 0], sizes = [8, 8, 16], strides = [1, 1, 1]} : vector<12x12x16xbf16> to vector<8x8x16xbf16>
    %100 = vector.shape_cast %99 : vector<8x8x16xbf16> to vector<64x16xbf16>
    %c3_79 = arith.constant 3 : index
    %c1_80 = arith.constant 1 : index
    %c0_81 = arith.constant 0 : index
    %c0_82 = arith.constant 0 : index
    %101 = vector.load %arg2[%c3_79, %c1_80, %c0_81, %c0_82] : memref<5x5x16x96xbf16, #tpu.memory_space<vmem>>, vector<1x1x16x96xbf16>
    %102 = vector.shape_cast %101 : vector<1x1x16x96xbf16> to vector<16x96xbf16>
    %cst_83 = arith.constant dense<0.000000e+00> : vector<64x96xf32>
    %103 = tpu.matmul %100, %102, %cst_83 {dimension_numbers = #tpu.dot_dimension_numbers<[1], [0], [0], [1], [0, 0, 1, 1], [], []>} : vector<64x16xbf16>, vector<16x96xbf16>, vector<64x96xf32> -> vector<64x96xf32>
    %104 = arith.addf %98, %103 : vector<64x96xf32>
    %105 = vector.extract_strided_slice %1 {offsets = [3, 2, 0], sizes = [8, 8, 16], strides = [1, 1, 1]} : vector<12x12x16xbf16> to vector<8x8x16xbf16>
    %106 = vector.shape_cast %105 : vector<8x8x16xbf16> to vector<64x16xbf16>
    %c3_84 = arith.constant 3 : index
    %c2_85 = arith.constant 2 : index
    %c0_86 = arith.constant 0 : index
    %c0_87 = arith.constant 0 : index
    %107 = vector.load %arg2[%c3_84, %c2_85, %c0_86, %c0_87] : memref<5x5x16x96xbf16, #tpu.memory_space<vmem>>, vector<1x1x16x96xbf16>
    %108 = vector.shape_cast %107 : vector<1x1x16x96xbf16> to vector<16x96xbf16>
    %cst_88 = arith.constant dense<0.000000e+00> : vector<64x96xf32>
    %109 = tpu.matmul %106, %108, %cst_88 {dimension_numbers = #tpu.dot_dimension_numbers<[1], [0], [0], [1], [0, 0, 1, 1], [], []>} : vector<64x16xbf16>, vector<16x96xbf16>, vector<64x96xf32> -> vector<64x96xf32>
    %110 = arith.addf %104, %109 : vector<64x96xf32>
    %111 = vector.extract_strided_slice %1 {offsets = [3, 3, 0], sizes = [8, 8, 16], strides = [1, 1, 1]} : vector<12x12x16xbf16> to vector<8x8x16xbf16>
    %112 = vector.shape_cast %111 : vector<8x8x16xbf16> to vector<64x16xbf16>
    %c3_89 = arith.constant 3 : index
    %c3_90 = arith.constant 3 : index
    %c0_91 = arith.constant 0 : index
    %c0_92 = arith.constant 0 : index
    %113 = vector.load %arg2[%c3_89, %c3_90, %c0_91, %c0_92] : memref<5x5x16x96xbf16, #tpu.memory_space<vmem>>, vector<1x1x16x96xbf16>
    %114 = vector.shape_cast %113 : vector<1x1x16x96xbf16> to vector<16x96xbf16>
    %cst_93 = arith.constant dense<0.000000e+00> : vector<64x96xf32>
    %115 = tpu.matmul %112, %114, %cst_93 {dimension_numbers = #tpu.dot_dimension_numbers<[1], [0], [0], [1], [0, 0, 1, 1], [], []>} : vector<64x16xbf16>, vector<16x96xbf16>, vector<64x96xf32> -> vector<64x96xf32>
    %116 = arith.addf %110, %115 : vector<64x96xf32>
    %117 = vector.extract_strided_slice %1 {offsets = [3, 4, 0], sizes = [8, 8, 16], strides = [1, 1, 1]} : vector<12x12x16xbf16> to vector<8x8x16xbf16>
    %118 = vector.shape_cast %117 : vector<8x8x16xbf16> to vector<64x16xbf16>
    %c3_94 = arith.constant 3 : index
    %c4_95 = arith.constant 4 : index
    %c0_96 = arith.constant 0 : index
    %c0_97 = arith.constant 0 : index
    %119 = vector.load %arg2[%c3_94, %c4_95, %c0_96, %c0_97] : memref<5x5x16x96xbf16, #tpu.memory_space<vmem>>, vector<1x1x16x96xbf16>
    %120 = vector.shape_cast %119 : vector<1x1x16x96xbf16> to vector<16x96xbf16>
    %cst_98 = arith.constant dense<0.000000e+00> : vector<64x96xf32>
    %121 = tpu.matmul %118, %120, %cst_98 {dimension_numbers = #tpu.dot_dimension_numbers<[1], [0], [0], [1], [0, 0, 1, 1], [], []>} : vector<64x16xbf16>, vector<16x96xbf16>, vector<64x96xf32> -> vector<64x96xf32>
    %122 = arith.addf %116, %121 : vector<64x96xf32>
    %123 = vector.extract_strided_slice %1 {offsets = [4, 0, 0], sizes = [8, 8, 16], strides = [1, 1, 1]} : vector<12x12x16xbf16> to vector<8x8x16xbf16>
    %124 = vector.shape_cast %123 : vector<8x8x16xbf16> to vector<64x16xbf16>
    %c4_99 = arith.constant 4 : index
    %c0_100 = arith.constant 0 : index
    %c0_101 = arith.constant 0 : index
    %c0_102 = arith.constant 0 : index
    %125 = vector.load %arg2[%c4_99, %c0_100, %c0_101, %c0_102] : memref<5x5x16x96xbf16, #tpu.memory_space<vmem>>, vector<1x1x16x96xbf16>
    %126 = vector.shape_cast %125 : vector<1x1x16x96xbf16> to vector<16x96xbf16>
    %cst_103 = arith.constant dense<0.000000e+00> : vector<64x96xf32>
    %127 = tpu.matmul %124, %126, %cst_103 {dimension_numbers = #tpu.dot_dimension_numbers<[1], [0], [0], [1], [0, 0, 1, 1], [], []>} : vector<64x16xbf16>, vector<16x96xbf16>, vector<64x96xf32> -> vector<64x96xf32>
    %128 = arith.addf %122, %127 : vector<64x96xf32>
    %129 = vector.extract_strided_slice %1 {offsets = [4, 1, 0], sizes = [8, 8, 16], strides = [1, 1, 1]} : vector<12x12x16xbf16> to vector<8x8x16xbf16>
    %130 = vector.shape_cast %129 : vector<8x8x16xbf16> to vector<64x16xbf16>
    %c4_104 = arith.constant 4 : index
    %c1_105 = arith.constant 1 : index
    %c0_106 = arith.constant 0 : index
    %c0_107 = arith.constant 0 : index
    %131 = vector.load %arg2[%c4_104, %c1_105, %c0_106, %c0_107] : memref<5x5x16x96xbf16, #tpu.memory_space<vmem>>, vector<1x1x16x96xbf16>
    %132 = vector.shape_cast %131 : vector<1x1x16x96xbf16> to vector<16x96xbf16>
    %cst_108 = arith.constant dense<0.000000e+00> : vector<64x96xf32>
    %133 = tpu.matmul %130, %132, %cst_108 {dimension_numbers = #tpu.dot_dimension_numbers<[1], [0], [0], [1], [0, 0, 1, 1], [], []>} : vector<64x16xbf16>, vector<16x96xbf16>, vector<64x96xf32> -> vector<64x96xf32>
    %134 = arith.addf %128, %133 : vector<64x96xf32>
    %135 = vector.extract_strided_slice %1 {offsets = [4, 2, 0], sizes = [8, 8, 16], strides = [1, 1, 1]} : vector<12x12x16xbf16> to vector<8x8x16xbf16>
    %136 = vector.shape_cast %135 : vector<8x8x16xbf16> to vector<64x16xbf16>
    %c4_109 = arith.constant 4 : index
    %c2_110 = arith.constant 2 : index
    %c0_111 = arith.constant 0 : index
    %c0_112 = arith.constant 0 : index
    %137 = vector.load %arg2[%c4_109, %c2_110, %c0_111, %c0_112] : memref<5x5x16x96xbf16, #tpu.memory_space<vmem>>, vector<1x1x16x96xbf16>
    %138 = vector.shape_cast %137 : vector<1x1x16x96xbf16> to vector<16x96xbf16>
    %cst_113 = arith.constant dense<0.000000e+00> : vector<64x96xf32>
    %139 = tpu.matmul %136, %138, %cst_113 {dimension_numbers = #tpu.dot_dimension_numbers<[1], [0], [0], [1], [0, 0, 1, 1], [], []>} : vector<64x16xbf16>, vector<16x96xbf16>, vector<64x96xf32> -> vector<64x96xf32>
    %140 = arith.addf %134, %139 : vector<64x96xf32>
    %141 = vector.extract_strided_slice %1 {offsets = [4, 3, 0], sizes = [8, 8, 16], strides = [1, 1, 1]} : vector<12x12x16xbf16> to vector<8x8x16xbf16>
    %142 = vector.shape_cast %141 : vector<8x8x16xbf16> to vector<64x16xbf16>
    %c4_114 = arith.constant 4 : index
    %c3_115 = arith.constant 3 : index
    %c0_116 = arith.constant 0 : index
    %c0_117 = arith.constant 0 : index
    %143 = vector.load %arg2[%c4_114, %c3_115, %c0_116, %c0_117] : memref<5x5x16x96xbf16, #tpu.memory_space<vmem>>, vector<1x1x16x96xbf16>
    %144 = vector.shape_cast %143 : vector<1x1x16x96xbf16> to vector<16x96xbf16>
    %cst_118 = arith.constant dense<0.000000e+00> : vector<64x96xf32>
    %145 = tpu.matmul %142, %144, %cst_118 {dimension_numbers = #tpu.dot_dimension_numbers<[1], [0], [0], [1], [0, 0, 1, 1], [], []>} : vector<64x16xbf16>, vector<16x96xbf16>, vector<64x96xf32> -> vector<64x96xf32>
    %146 = arith.addf %140, %145 : vector<64x96xf32>
    %147 = vector.extract_strided_slice %1 {offsets = [4, 4, 0], sizes = [8, 8, 16], strides = [1, 1, 1]} : vector<12x12x16xbf16> to vector<8x8x16xbf16>
    %148 = vector.shape_cast %147 : vector<8x8x16xbf16> to vector<64x16xbf16>
    %c4_119 = arith.constant 4 : index
    %c4_120 = arith.constant 4 : index
    %c0_121 = arith.constant 0 : index
    %c0_122 = arith.constant 0 : index
    %149 = vector.load %arg2[%c4_119, %c4_120, %c0_121, %c0_122] : memref<5x5x16x96xbf16, #tpu.memory_space<vmem>>, vector<1x1x16x96xbf16>
    %150 = vector.shape_cast %149 : vector<1x1x16x96xbf16> to vector<16x96xbf16>
    %cst_123 = arith.constant dense<0.000000e+00> : vector<64x96xf32>
    %151 = tpu.matmul %148, %150, %cst_123 {dimension_numbers = #tpu.dot_dimension_numbers<[1], [0], [0], [1], [0, 0, 1, 1], [], []>} : vector<64x16xbf16>, vector<16x96xbf16>, vector<64x96xf32> -> vector<64x96xf32>
    %152 = arith.addf %146, %151 : vector<64x96xf32>
    %c0_124 = arith.constant 0 : index
    %c0_125 = arith.constant 0 : index
    %153 = vector.load %arg3[%c0_124, %c0_125] : memref<1x96xf32, #tpu.memory_space<vmem>>, vector<1x96xf32>
    %154 = vector.broadcast %153 : vector<1x96xf32> to vector<64x96xf32>
    %155 = arith.addf %152, %154 : vector<64x96xf32>
    %c0_126 = arith.constant 0 : index
    %c0_127 = arith.constant 0 : index
    %c0_128 = arith.constant 0 : index
    %156 = vector.load %arg4[%c0_126, %c0_127, %c0_128] : memref<1x64x96xf32, #tpu.memory_space<vmem>>, vector<1x64x96xf32>
    %157 = vector.shape_cast %156 : vector<1x64x96xf32> to vector<64x96xf32>
    %158 = vector.shape_cast %155 : vector<64x96xf32> to vector<1x64x96xf32>
    tpu.vector_store %arg4[%c0_126, %c0_127, %c0_128], %158 {strides = array<i32>} : memref<1x64x96xf32, #tpu.memory_space<vmem>>, vector<1x64x96xf32>,
    return
  }
  func.func @transform_0(%arg0: i32) -> (i32, i32, i32, i32) {
    %c0_i32 = arith.constant 0 : i32
    %c0_i32_0 = arith.constant 0 : i32
    %c0_i32_1 = arith.constant 0 : i32
    %c0_i32_2 = arith.constant 0 : i32
    return %arg0, %c0_i32, %c0_i32_0, %c0_i32_1 : i32, i32, i32, i32
  }
  func.func @transform_1(%arg0: i32) -> (i32, i32, i32, i32) {
    %c0_i32 = arith.constant 0 : i32
    %c0_i32_0 = arith.constant 0 : i32
    %c0_i32_1 = arith.constant 0 : i32
    %c0_i32_2 = arith.constant 0 : i32
    %c0_i32_3 = arith.constant 0 : i32
    return %c0_i32, %c0_i32_0, %c0_i32_1, %c0_i32_2 : i32, i32, i32, i32
  }
  func.func @transform_2(%arg0: i32) -> (i32, i32) {
    %c0_i32 = arith.constant 0 : i32
    %c0_i32_0 = arith.constant 0 : i32
    %c0_i32_1 = arith.constant 0 : i32
    return %c0_i32, %c0_i32_0 : i32, i32
  }
  func.func @transform_3(%arg0: i32) -> (i32, i32, i32) {
    %c0_i32 = arith.constant 0 : i32
    %c0_i32_0 = arith.constant 0 : i32
    %c0_i32_1 = arith.constant 0 : i32
    return %arg0, %c0_i32, %c0_i32_0 : i32, i32, i32
  }
}

module attributes {stable_mosaic.version = 11 : i64} {
  func.func @_conv_adain_kernel(%arg0: i32, %arg1: memref<1x18x18x4xbf16, #tpu.memory_space<vmem>>, %arg2: memref<3x3x4x32xbf16, #tpu.memory_space<vmem>>, %arg3: memref<1x32xf32, #tpu.memory_space<vmem>>, %arg4: memref<1x256x32xf32, #tpu.memory_space<vmem>>, %arg5: memref<1x256x32xf32, #tpu.memory_space<vmem>>, %arg6: memref<1x256x32xf32, #tpu.memory_space<vmem>>, %arg7: memref<1x256x32xbf16, #tpu.memory_space<vmem>>) attributes {dimension_semantics = [#tpu.dimension_semantics<parallel>], iteration_bounds = array<i64: 2>, scalar_prefetch = 0 : i64, scratch_operands = 0 : i64, tpu.core_type = #tpu.core_type<tc>, window_params = [{transform_indices = @transform_0, window_bounds = array<i64: 1, 18, 18, 4>}, {pipeline_mode = #tpu.pipeline_mode<synchronous>, transform_indices = @transform_1, window_bounds = array<i64: 3, 3, 4, 32>}, {pipeline_mode = #tpu.pipeline_mode<synchronous>, transform_indices = @transform_2, window_bounds = array<i64: 1, 32>}, {pipeline_mode = #tpu.pipeline_mode<synchronous>, transform_indices = @transform_3, window_bounds = array<i64: 1, 256, 32>}, {transform_indices = @transform_4, window_bounds = array<i64: 1, 256, 32>}, {transform_indices = @transform_5, window_bounds = array<i64: 1, 256, 32>}, {transform_indices = @transform_6, window_bounds = array<i64: 1, 256, 32>}]} {
    %c0 = arith.constant 0 : index
    %c0_0 = arith.constant 0 : index
    %c0_1 = arith.constant 0 : index
    %c0_2 = arith.constant 0 : index
    %0 = vector.load %arg1[%c0, %c0_0, %c0_1, %c0_2] : memref<1x18x18x4xbf16, #tpu.memory_space<vmem>>, vector<1x18x18x4xbf16>
    %1 = vector.shape_cast %0 : vector<1x18x18x4xbf16> to vector<18x18x4xbf16>
    %cst = arith.constant 0.000000e+00 : f32
    %2 = vector.broadcast %cst : f32 to vector<256x32xf32>
    %3 = vector.extract_strided_slice %1 {offsets = [0, 0, 0], sizes = [16, 16, 4], strides = [1, 1, 1]} : vector<18x18x4xbf16> to vector<16x16x4xbf16>
    %4 = vector.shape_cast %3 : vector<16x16x4xbf16> to vector<256x4xbf16>
    %c0_3 = arith.constant 0 : index
    %c0_4 = arith.constant 0 : index
    %c0_5 = arith.constant 0 : index
    %c0_6 = arith.constant 0 : index
    %5 = vector.load %arg2[%c0_3, %c0_4, %c0_5, %c0_6] : memref<3x3x4x32xbf16, #tpu.memory_space<vmem>>, vector<1x1x4x32xbf16>
    %6 = vector.shape_cast %5 : vector<1x1x4x32xbf16> to vector<4x32xbf16>
    %cst_7 = arith.constant dense<0.000000e+00> : vector<256x32xf32>
    %7 = tpu.matmul %4, %6, %cst_7 {dimension_numbers = #tpu.dot_dimension_numbers<[1], [0], [0], [1], [0, 0, 1, 1], [], []>} : vector<256x4xbf16>, vector<4x32xbf16>, vector<256x32xf32> -> vector<256x32xf32>
    %8 = arith.addf %2, %7 : vector<256x32xf32>
    %9 = vector.extract_strided_slice %1 {offsets = [0, 1, 0], sizes = [16, 16, 4], strides = [1, 1, 1]} : vector<18x18x4xbf16> to vector<16x16x4xbf16>
    %10 = vector.shape_cast %9 : vector<16x16x4xbf16> to vector<256x4xbf16>
    %c0_8 = arith.constant 0 : index
    %c1 = arith.constant 1 : index
    %c0_9 = arith.constant 0 : index
    %c0_10 = arith.constant 0 : index
    %11 = vector.load %arg2[%c0_8, %c1, %c0_9, %c0_10] : memref<3x3x4x32xbf16, #tpu.memory_space<vmem>>, vector<1x1x4x32xbf16>
    %12 = vector.shape_cast %11 : vector<1x1x4x32xbf16> to vector<4x32xbf16>
    %cst_11 = arith.constant dense<0.000000e+00> : vector<256x32xf32>
    %13 = tpu.matmul %10, %12, %cst_11 {dimension_numbers = #tpu.dot_dimension_numbers<[1], [0], [0], [1], [0, 0, 1, 1], [], []>} : vector<256x4xbf16>, vector<4x32xbf16>, vector<256x32xf32> -> vector<256x32xf32>
    %14 = arith.addf %8, %13 : vector<256x32xf32>
    %15 = vector.extract_strided_slice %1 {offsets = [0, 2, 0], sizes = [16, 16, 4], strides = [1, 1, 1]} : vector<18x18x4xbf16> to vector<16x16x4xbf16>
    %16 = vector.shape_cast %15 : vector<16x16x4xbf16> to vector<256x4xbf16>
    %c0_12 = arith.constant 0 : index
    %c2 = arith.constant 2 : index
    %c0_13 = arith.constant 0 : index
    %c0_14 = arith.constant 0 : index
    %17 = vector.load %arg2[%c0_12, %c2, %c0_13, %c0_14] : memref<3x3x4x32xbf16, #tpu.memory_space<vmem>>, vector<1x1x4x32xbf16>
    %18 = vector.shape_cast %17 : vector<1x1x4x32xbf16> to vector<4x32xbf16>
    %cst_15 = arith.constant dense<0.000000e+00> : vector<256x32xf32>
    %19 = tpu.matmul %16, %18, %cst_15 {dimension_numbers = #tpu.dot_dimension_numbers<[1], [0], [0], [1], [0, 0, 1, 1], [], []>} : vector<256x4xbf16>, vector<4x32xbf16>, vector<256x32xf32> -> vector<256x32xf32>
    %20 = arith.addf %14, %19 : vector<256x32xf32>
    %21 = vector.extract_strided_slice %1 {offsets = [1, 0, 0], sizes = [16, 16, 4], strides = [1, 1, 1]} : vector<18x18x4xbf16> to vector<16x16x4xbf16>
    %22 = vector.shape_cast %21 : vector<16x16x4xbf16> to vector<256x4xbf16>
    %c1_16 = arith.constant 1 : index
    %c0_17 = arith.constant 0 : index
    %c0_18 = arith.constant 0 : index
    %c0_19 = arith.constant 0 : index
    %23 = vector.load %arg2[%c1_16, %c0_17, %c0_18, %c0_19] : memref<3x3x4x32xbf16, #tpu.memory_space<vmem>>, vector<1x1x4x32xbf16>
    %24 = vector.shape_cast %23 : vector<1x1x4x32xbf16> to vector<4x32xbf16>
    %cst_20 = arith.constant dense<0.000000e+00> : vector<256x32xf32>
    %25 = tpu.matmul %22, %24, %cst_20 {dimension_numbers = #tpu.dot_dimension_numbers<[1], [0], [0], [1], [0, 0, 1, 1], [], []>} : vector<256x4xbf16>, vector<4x32xbf16>, vector<256x32xf32> -> vector<256x32xf32>
    %26 = arith.addf %20, %25 : vector<256x32xf32>
    %27 = vector.extract_strided_slice %1 {offsets = [1, 1, 0], sizes = [16, 16, 4], strides = [1, 1, 1]} : vector<18x18x4xbf16> to vector<16x16x4xbf16>
    %28 = vector.shape_cast %27 : vector<16x16x4xbf16> to vector<256x4xbf16>
    %c1_21 = arith.constant 1 : index
    %c1_22 = arith.constant 1 : index
    %c0_23 = arith.constant 0 : index
    %c0_24 = arith.constant 0 : index
    %29 = vector.load %arg2[%c1_21, %c1_22, %c0_23, %c0_24] : memref<3x3x4x32xbf16, #tpu.memory_space<vmem>>, vector<1x1x4x32xbf16>
    %30 = vector.shape_cast %29 : vector<1x1x4x32xbf16> to vector<4x32xbf16>
    %cst_25 = arith.constant dense<0.000000e+00> : vector<256x32xf32>
    %31 = tpu.matmul %28, %30, %cst_25 {dimension_numbers = #tpu.dot_dimension_numbers<[1], [0], [0], [1], [0, 0, 1, 1], [], []>} : vector<256x4xbf16>, vector<4x32xbf16>, vector<256x32xf32> -> vector<256x32xf32>
    %32 = arith.addf %26, %31 : vector<256x32xf32>
    %33 = vector.extract_strided_slice %1 {offsets = [1, 2, 0], sizes = [16, 16, 4], strides = [1, 1, 1]} : vector<18x18x4xbf16> to vector<16x16x4xbf16>
    %34 = vector.shape_cast %33 : vector<16x16x4xbf16> to vector<256x4xbf16>
    %c1_26 = arith.constant 1 : index
    %c2_27 = arith.constant 2 : index
    %c0_28 = arith.constant 0 : index
    %c0_29 = arith.constant 0 : index
    %35 = vector.load %arg2[%c1_26, %c2_27, %c0_28, %c0_29] : memref<3x3x4x32xbf16, #tpu.memory_space<vmem>>, vector<1x1x4x32xbf16>
    %36 = vector.shape_cast %35 : vector<1x1x4x32xbf16> to vector<4x32xbf16>
    %cst_30 = arith.constant dense<0.000000e+00> : vector<256x32xf32>
    %37 = tpu.matmul %34, %36, %cst_30 {dimension_numbers = #tpu.dot_dimension_numbers<[1], [0], [0], [1], [0, 0, 1, 1], [], []>} : vector<256x4xbf16>, vector<4x32xbf16>, vector<256x32xf32> -> vector<256x32xf32>
    %38 = arith.addf %32, %37 : vector<256x32xf32>
    %39 = vector.extract_strided_slice %1 {offsets = [2, 0, 0], sizes = [16, 16, 4], strides = [1, 1, 1]} : vector<18x18x4xbf16> to vector<16x16x4xbf16>
    %40 = vector.shape_cast %39 : vector<16x16x4xbf16> to vector<256x4xbf16>
    %c2_31 = arith.constant 2 : index
    %c0_32 = arith.constant 0 : index
    %c0_33 = arith.constant 0 : index
    %c0_34 = arith.constant 0 : index
    %41 = vector.load %arg2[%c2_31, %c0_32, %c0_33, %c0_34] : memref<3x3x4x32xbf16, #tpu.memory_space<vmem>>, vector<1x1x4x32xbf16>
    %42 = vector.shape_cast %41 : vector<1x1x4x32xbf16> to vector<4x32xbf16>
    %cst_35 = arith.constant dense<0.000000e+00> : vector<256x32xf32>
    %43 = tpu.matmul %40, %42, %cst_35 {dimension_numbers = #tpu.dot_dimension_numbers<[1], [0], [0], [1], [0, 0, 1, 1], [], []>} : vector<256x4xbf16>, vector<4x32xbf16>, vector<256x32xf32> -> vector<256x32xf32>
    %44 = arith.addf %38, %43 : vector<256x32xf32>
    %45 = vector.extract_strided_slice %1 {offsets = [2, 1, 0], sizes = [16, 16, 4], strides = [1, 1, 1]} : vector<18x18x4xbf16> to vector<16x16x4xbf16>
    %46 = vector.shape_cast %45 : vector<16x16x4xbf16> to vector<256x4xbf16>
    %c2_36 = arith.constant 2 : index
    %c1_37 = arith.constant 1 : index
    %c0_38 = arith.constant 0 : index
    %c0_39 = arith.constant 0 : index
    %47 = vector.load %arg2[%c2_36, %c1_37, %c0_38, %c0_39] : memref<3x3x4x32xbf16, #tpu.memory_space<vmem>>, vector<1x1x4x32xbf16>
    %48 = vector.shape_cast %47 : vector<1x1x4x32xbf16> to vector<4x32xbf16>
    %cst_40 = arith.constant dense<0.000000e+00> : vector<256x32xf32>
    %49 = tpu.matmul %46, %48, %cst_40 {dimension_numbers = #tpu.dot_dimension_numbers<[1], [0], [0], [1], [0, 0, 1, 1], [], []>} : vector<256x4xbf16>, vector<4x32xbf16>, vector<256x32xf32> -> vector<256x32xf32>
    %50 = arith.addf %44, %49 : vector<256x32xf32>
    %51 = vector.extract_strided_slice %1 {offsets = [2, 2, 0], sizes = [16, 16, 4], strides = [1, 1, 1]} : vector<18x18x4xbf16> to vector<16x16x4xbf16>
    %52 = vector.shape_cast %51 : vector<16x16x4xbf16> to vector<256x4xbf16>
    %c2_41 = arith.constant 2 : index
    %c2_42 = arith.constant 2 : index
    %c0_43 = arith.constant 0 : index
    %c0_44 = arith.constant 0 : index
    %53 = vector.load %arg2[%c2_41, %c2_42, %c0_43, %c0_44] : memref<3x3x4x32xbf16, #tpu.memory_space<vmem>>, vector<1x1x4x32xbf16>
    %54 = vector.shape_cast %53 : vector<1x1x4x32xbf16> to vector<4x32xbf16>
    %cst_45 = arith.constant dense<0.000000e+00> : vector<256x32xf32>
    %55 = tpu.matmul %52, %54, %cst_45 {dimension_numbers = #tpu.dot_dimension_numbers<[1], [0], [0], [1], [0, 0, 1, 1], [], []>} : vector<256x4xbf16>, vector<4x32xbf16>, vector<256x32xf32> -> vector<256x32xf32>
    %56 = arith.addf %50, %55 : vector<256x32xf32>
    %c0_46 = arith.constant 0 : index
    %c0_47 = arith.constant 0 : index
    %57 = vector.load %arg3[%c0_46, %c0_47] : memref<1x32xf32, #tpu.memory_space<vmem>>, vector<1x32xf32>
    %58 = vector.broadcast %57 : vector<1x32xf32> to vector<256x32xf32>
    %59 = arith.addf %56, %58 : vector<256x32xf32>
    %c0_48 = arith.constant 0 : index
    %c0_49 = arith.constant 0 : index
    %c0_50 = arith.constant 0 : index
    %60 = vector.load %arg4[%c0_48, %c0_49, %c0_50] : memref<1x256x32xf32, #tpu.memory_space<vmem>>, vector<1x256x32xf32>
    %61 = vector.shape_cast %60 : vector<1x256x32xf32> to vector<256x32xf32>
    %62 = arith.addf %59, %61 : vector<256x32xf32>
    %cst_51 = arith.constant dense<0.000000e+00> : vector<32xf32>
    %63 = vector.multi_reduction <add>, %62, %cst_51 [0] : vector<256x32xf32> to vector<32xf32>
    %64 = vector.shape_cast %63 : vector<32xf32> to vector<1x32xf32>
    %cst_52 = arith.constant 2.560000e+02 : f32
    %65 = vector.broadcast %cst_52 : f32 to vector<1x32xf32>
    %66 = arith.divf %64, %65 : vector<1x32xf32>
    %67 = vector.broadcast %66 : vector<1x32xf32> to vector<256x32xf32>
    %68 = arith.subf %62, %67 : vector<256x32xf32>
    %69 = arith.mulf %68, %68 : vector<256x32xf32>
    %cst_53 = arith.constant dense<0.000000e+00> : vector<32xf32>
    %70 = vector.multi_reduction <add>, %69, %cst_53 [0] : vector<256x32xf32> to vector<32xf32>
    %71 = vector.shape_cast %70 : vector<32xf32> to vector<1x32xf32>
    %cst_54 = arith.constant 2.560000e+02 : f32
    %72 = vector.broadcast %cst_54 : f32 to vector<1x32xf32>
    %73 = arith.divf %71, %72 : vector<1x32xf32>
    %cst_55 = arith.constant 9.99999974E-6 : f32
    %74 = vector.broadcast %cst_55 : f32 to vector<1x32xf32>
    %75 = arith.addf %73, %74 : vector<1x32xf32>
    %76 = math.rsqrt %75 : vector<1x32xf32>
    %77 = vector.broadcast %76 : vector<1x32xf32> to vector<256x32xf32>
    %78 = arith.mulf %68, %77 : vector<256x32xf32>
    %c0_56 = arith.constant 0 : index
    %c0_57 = arith.constant 0 : index
    %c0_58 = arith.constant 0 : index
    %79 = vector.load %arg5[%c0_56, %c0_57, %c0_58] : memref<1x256x32xf32, #tpu.memory_space<vmem>>, vector<1x256x32xf32>
    %80 = vector.shape_cast %79 : vector<1x256x32xf32> to vector<256x32xf32>
    %c0_59 = arith.constant 0 : index
    %c0_60 = arith.constant 0 : index
    %c0_61 = arith.constant 0 : index
    %81 = vector.load %arg6[%c0_59, %c0_60, %c0_61] : memref<1x256x32xf32, #tpu.memory_space<vmem>>, vector<1x256x32xf32>
    %82 = vector.shape_cast %81 : vector<1x256x32xf32> to vector<256x32xf32>
    %83 = arith.mulf %82, %78 : vector<256x32xf32>
    %84 = arith.addf %80, %83 : vector<256x32xf32>
    %85 = math.tanh %84 : vector<256x32xf32>
    %86 = arith.truncf %85 : vector<256x32xf32> to vector<256x32xbf16>
    %c0_62 = arith.constant 0 : index
    %c0_63 = arith.constant 0 : index
    %c0_64 = arith.constant 0 : index
    %87 = vector.load %arg7[%c0_62, %c0_63, %c0_64] : memref<1x256x32xbf16, #tpu.memory_space<vmem>>, vector<1x256x32xbf16>
    %88 = vector.shape_cast %87 : vector<1x256x32xbf16> to vector<256x32xbf16>
    %89 = vector.shape_cast %86 : vector<256x32xbf16> to vector<1x256x32xbf16>
    tpu.vector_store %arg7[%c0_62, %c0_63, %c0_64], %89 {strides = array<i32>} : memref<1x256x32xbf16, #tpu.memory_space<vmem>>, vector<1x256x32xbf16>,
    return
  }
  func.func @transform_0(%arg0: i32) -> (i32, i32, i32, i32) {
    %c0_i32 = arith.constant 0 : i32
    %c0_i32_0 = arith.constant 0 : i32
    %c0_i32_1 = arith.constant 0 : i32
    %c0_i32_2 = arith.constant 0 : i32
    return %arg0, %c0_i32, %c0_i32_0, %c0_i32_1 : i32, i32, i32, i32
  }
  func.func @transform_1(%arg0: i32) -> (i32, i32, i32, i32) {
    %c0_i32 = arith.constant 0 : i32
    %c0_i32_0 = arith.constant 0 : i32
    %c0_i32_1 = arith.constant 0 : i32
    %c0_i32_2 = arith.constant 0 : i32
    %c0_i32_3 = arith.constant 0 : i32
    return %c0_i32, %c0_i32_0, %c0_i32_1, %c0_i32_2 : i32, i32, i32, i32
  }
  func.func @transform_2(%arg0: i32) -> (i32, i32) {
    %c0_i32 = arith.constant 0 : i32
    %c0_i32_0 = arith.constant 0 : i32
    %c0_i32_1 = arith.constant 0 : i32
    return %c0_i32, %c0_i32_0 : i32, i32
  }
  func.func @transform_3(%arg0: i32) -> (i32, i32, i32) {
    %c0_i32 = arith.constant 0 : i32
    %c0_i32_0 = arith.constant 0 : i32
    %c0_i32_1 = arith.constant 0 : i32
    %c0_i32_2 = arith.constant 0 : i32
    return %c0_i32, %c0_i32_0, %c0_i32_1 : i32, i32, i32
  }
  func.func @transform_4(%arg0: i32) -> (i32, i32, i32) {
    %c0_i32 = arith.constant 0 : i32
    %c0_i32_0 = arith.constant 0 : i32
    %c0_i32_1 = arith.constant 0 : i32
    return %arg0, %c0_i32, %c0_i32_0 : i32, i32, i32
  }
  func.func @transform_5(%arg0: i32) -> (i32, i32, i32) {
    %c0_i32 = arith.constant 0 : i32
    %c0_i32_0 = arith.constant 0 : i32
    %c0_i32_1 = arith.constant 0 : i32
    return %arg0, %c0_i32, %c0_i32_0 : i32, i32, i32
  }
  func.func @transform_6(%arg0: i32) -> (i32, i32, i32) {
    %c0_i32 = arith.constant 0 : i32
    %c0_i32_0 = arith.constant 0 : i32
    %c0_i32_1 = arith.constant 0 : i32
    return %arg0, %c0_i32, %c0_i32_0 : i32, i32, i32
  }
}

module attributes {stable_mosaic.version = 11 : i64} {
  func.func @_conv_adain_kernel(%arg0: i32, %arg1: memref<1x18x18x32xbf16, #tpu.memory_space<vmem>>, %arg2: memref<3x3x32x16xbf16, #tpu.memory_space<vmem>>, %arg3: memref<1x16xf32, #tpu.memory_space<vmem>>, %arg4: memref<1x256x16xf32, #tpu.memory_space<vmem>>, %arg5: memref<1x256x16xf32, #tpu.memory_space<vmem>>, %arg6: memref<1x256x16xf32, #tpu.memory_space<vmem>>, %arg7: memref<1x256x16xf32, #tpu.memory_space<vmem>>) attributes {dimension_semantics = [#tpu.dimension_semantics<parallel>], iteration_bounds = array<i64: 2>, scalar_prefetch = 0 : i64, scratch_operands = 0 : i64, tpu.core_type = #tpu.core_type<tc>, window_params = [{transform_indices = @transform_0, window_bounds = array<i64: 1, 18, 18, 32>}, {pipeline_mode = #tpu.pipeline_mode<synchronous>, transform_indices = @transform_1, window_bounds = array<i64: 3, 3, 32, 16>}, {pipeline_mode = #tpu.pipeline_mode<synchronous>, transform_indices = @transform_2, window_bounds = array<i64: 1, 16>}, {pipeline_mode = #tpu.pipeline_mode<synchronous>, transform_indices = @transform_3, window_bounds = array<i64: 1, 256, 16>}, {transform_indices = @transform_4, window_bounds = array<i64: 1, 256, 16>}, {transform_indices = @transform_5, window_bounds = array<i64: 1, 256, 16>}, {transform_indices = @transform_6, window_bounds = array<i64: 1, 256, 16>}]} {
    %c0 = arith.constant 0 : index
    %c0_0 = arith.constant 0 : index
    %c0_1 = arith.constant 0 : index
    %c0_2 = arith.constant 0 : index
    %0 = vector.load %arg1[%c0, %c0_0, %c0_1, %c0_2] : memref<1x18x18x32xbf16, #tpu.memory_space<vmem>>, vector<1x18x18x32xbf16>
    %1 = vector.shape_cast %0 : vector<1x18x18x32xbf16> to vector<18x18x32xbf16>
    %cst = arith.constant 0.000000e+00 : f32
    %2 = vector.broadcast %cst : f32 to vector<256x16xf32>
    %3 = vector.extract_strided_slice %1 {offsets = [0, 0, 0], sizes = [16, 16, 32], strides = [1, 1, 1]} : vector<18x18x32xbf16> to vector<16x16x32xbf16>
    %4 = vector.shape_cast %3 : vector<16x16x32xbf16> to vector<256x32xbf16>
    %c0_3 = arith.constant 0 : index
    %c0_4 = arith.constant 0 : index
    %c0_5 = arith.constant 0 : index
    %c0_6 = arith.constant 0 : index
    %5 = vector.load %arg2[%c0_3, %c0_4, %c0_5, %c0_6] : memref<3x3x32x16xbf16, #tpu.memory_space<vmem>>, vector<1x1x32x16xbf16>
    %6 = vector.shape_cast %5 : vector<1x1x32x16xbf16> to vector<32x16xbf16>
    %cst_7 = arith.constant dense<0.000000e+00> : vector<256x16xf32>
    %7 = tpu.matmul %4, %6, %cst_7 {dimension_numbers = #tpu.dot_dimension_numbers<[1], [0], [0], [1], [0, 0, 1, 1], [], []>} : vector<256x32xbf16>, vector<32x16xbf16>, vector<256x16xf32> -> vector<256x16xf32>
    %8 = arith.addf %2, %7 : vector<256x16xf32>
    %9 = vector.extract_strided_slice %1 {offsets = [0, 1, 0], sizes = [16, 16, 32], strides = [1, 1, 1]} : vector<18x18x32xbf16> to vector<16x16x32xbf16>
    %10 = vector.shape_cast %9 : vector<16x16x32xbf16> to vector<256x32xbf16>
    %c0_8 = arith.constant 0 : index
    %c1 = arith.constant 1 : index
    %c0_9 = arith.constant 0 : index
    %c0_10 = arith.constant 0 : index
    %11 = vector.load %arg2[%c0_8, %c1, %c0_9, %c0_10] : memref<3x3x32x16xbf16, #tpu.memory_space<vmem>>, vector<1x1x32x16xbf16>
    %12 = vector.shape_cast %11 : vector<1x1x32x16xbf16> to vector<32x16xbf16>
    %cst_11 = arith.constant dense<0.000000e+00> : vector<256x16xf32>
    %13 = tpu.matmul %10, %12, %cst_11 {dimension_numbers = #tpu.dot_dimension_numbers<[1], [0], [0], [1], [0, 0, 1, 1], [], []>} : vector<256x32xbf16>, vector<32x16xbf16>, vector<256x16xf32> -> vector<256x16xf32>
    %14 = arith.addf %8, %13 : vector<256x16xf32>
    %15 = vector.extract_strided_slice %1 {offsets = [0, 2, 0], sizes = [16, 16, 32], strides = [1, 1, 1]} : vector<18x18x32xbf16> to vector<16x16x32xbf16>
    %16 = vector.shape_cast %15 : vector<16x16x32xbf16> to vector<256x32xbf16>
    %c0_12 = arith.constant 0 : index
    %c2 = arith.constant 2 : index
    %c0_13 = arith.constant 0 : index
    %c0_14 = arith.constant 0 : index
    %17 = vector.load %arg2[%c0_12, %c2, %c0_13, %c0_14] : memref<3x3x32x16xbf16, #tpu.memory_space<vmem>>, vector<1x1x32x16xbf16>
    %18 = vector.shape_cast %17 : vector<1x1x32x16xbf16> to vector<32x16xbf16>
    %cst_15 = arith.constant dense<0.000000e+00> : vector<256x16xf32>
    %19 = tpu.matmul %16, %18, %cst_15 {dimension_numbers = #tpu.dot_dimension_numbers<[1], [0], [0], [1], [0, 0, 1, 1], [], []>} : vector<256x32xbf16>, vector<32x16xbf16>, vector<256x16xf32> -> vector<256x16xf32>
    %20 = arith.addf %14, %19 : vector<256x16xf32>
    %21 = vector.extract_strided_slice %1 {offsets = [1, 0, 0], sizes = [16, 16, 32], strides = [1, 1, 1]} : vector<18x18x32xbf16> to vector<16x16x32xbf16>
    %22 = vector.shape_cast %21 : vector<16x16x32xbf16> to vector<256x32xbf16>
    %c1_16 = arith.constant 1 : index
    %c0_17 = arith.constant 0 : index
    %c0_18 = arith.constant 0 : index
    %c0_19 = arith.constant 0 : index
    %23 = vector.load %arg2[%c1_16, %c0_17, %c0_18, %c0_19] : memref<3x3x32x16xbf16, #tpu.memory_space<vmem>>, vector<1x1x32x16xbf16>
    %24 = vector.shape_cast %23 : vector<1x1x32x16xbf16> to vector<32x16xbf16>
    %cst_20 = arith.constant dense<0.000000e+00> : vector<256x16xf32>
    %25 = tpu.matmul %22, %24, %cst_20 {dimension_numbers = #tpu.dot_dimension_numbers<[1], [0], [0], [1], [0, 0, 1, 1], [], []>} : vector<256x32xbf16>, vector<32x16xbf16>, vector<256x16xf32> -> vector<256x16xf32>
    %26 = arith.addf %20, %25 : vector<256x16xf32>
    %27 = vector.extract_strided_slice %1 {offsets = [1, 1, 0], sizes = [16, 16, 32], strides = [1, 1, 1]} : vector<18x18x32xbf16> to vector<16x16x32xbf16>
    %28 = vector.shape_cast %27 : vector<16x16x32xbf16> to vector<256x32xbf16>
    %c1_21 = arith.constant 1 : index
    %c1_22 = arith.constant 1 : index
    %c0_23 = arith.constant 0 : index
    %c0_24 = arith.constant 0 : index
    %29 = vector.load %arg2[%c1_21, %c1_22, %c0_23, %c0_24] : memref<3x3x32x16xbf16, #tpu.memory_space<vmem>>, vector<1x1x32x16xbf16>
    %30 = vector.shape_cast %29 : vector<1x1x32x16xbf16> to vector<32x16xbf16>
    %cst_25 = arith.constant dense<0.000000e+00> : vector<256x16xf32>
    %31 = tpu.matmul %28, %30, %cst_25 {dimension_numbers = #tpu.dot_dimension_numbers<[1], [0], [0], [1], [0, 0, 1, 1], [], []>} : vector<256x32xbf16>, vector<32x16xbf16>, vector<256x16xf32> -> vector<256x16xf32>
    %32 = arith.addf %26, %31 : vector<256x16xf32>
    %33 = vector.extract_strided_slice %1 {offsets = [1, 2, 0], sizes = [16, 16, 32], strides = [1, 1, 1]} : vector<18x18x32xbf16> to vector<16x16x32xbf16>
    %34 = vector.shape_cast %33 : vector<16x16x32xbf16> to vector<256x32xbf16>
    %c1_26 = arith.constant 1 : index
    %c2_27 = arith.constant 2 : index
    %c0_28 = arith.constant 0 : index
    %c0_29 = arith.constant 0 : index
    %35 = vector.load %arg2[%c1_26, %c2_27, %c0_28, %c0_29] : memref<3x3x32x16xbf16, #tpu.memory_space<vmem>>, vector<1x1x32x16xbf16>
    %36 = vector.shape_cast %35 : vector<1x1x32x16xbf16> to vector<32x16xbf16>
    %cst_30 = arith.constant dense<0.000000e+00> : vector<256x16xf32>
    %37 = tpu.matmul %34, %36, %cst_30 {dimension_numbers = #tpu.dot_dimension_numbers<[1], [0], [0], [1], [0, 0, 1, 1], [], []>} : vector<256x32xbf16>, vector<32x16xbf16>, vector<256x16xf32> -> vector<256x16xf32>
    %38 = arith.addf %32, %37 : vector<256x16xf32>
    %39 = vector.extract_strided_slice %1 {offsets = [2, 0, 0], sizes = [16, 16, 32], strides = [1, 1, 1]} : vector<18x18x32xbf16> to vector<16x16x32xbf16>
    %40 = vector.shape_cast %39 : vector<16x16x32xbf16> to vector<256x32xbf16>
    %c2_31 = arith.constant 2 : index
    %c0_32 = arith.constant 0 : index
    %c0_33 = arith.constant 0 : index
    %c0_34 = arith.constant 0 : index
    %41 = vector.load %arg2[%c2_31, %c0_32, %c0_33, %c0_34] : memref<3x3x32x16xbf16, #tpu.memory_space<vmem>>, vector<1x1x32x16xbf16>
    %42 = vector.shape_cast %41 : vector<1x1x32x16xbf16> to vector<32x16xbf16>
    %cst_35 = arith.constant dense<0.000000e+00> : vector<256x16xf32>
    %43 = tpu.matmul %40, %42, %cst_35 {dimension_numbers = #tpu.dot_dimension_numbers<[1], [0], [0], [1], [0, 0, 1, 1], [], []>} : vector<256x32xbf16>, vector<32x16xbf16>, vector<256x16xf32> -> vector<256x16xf32>
    %44 = arith.addf %38, %43 : vector<256x16xf32>
    %45 = vector.extract_strided_slice %1 {offsets = [2, 1, 0], sizes = [16, 16, 32], strides = [1, 1, 1]} : vector<18x18x32xbf16> to vector<16x16x32xbf16>
    %46 = vector.shape_cast %45 : vector<16x16x32xbf16> to vector<256x32xbf16>
    %c2_36 = arith.constant 2 : index
    %c1_37 = arith.constant 1 : index
    %c0_38 = arith.constant 0 : index
    %c0_39 = arith.constant 0 : index
    %47 = vector.load %arg2[%c2_36, %c1_37, %c0_38, %c0_39] : memref<3x3x32x16xbf16, #tpu.memory_space<vmem>>, vector<1x1x32x16xbf16>
    %48 = vector.shape_cast %47 : vector<1x1x32x16xbf16> to vector<32x16xbf16>
    %cst_40 = arith.constant dense<0.000000e+00> : vector<256x16xf32>
    %49 = tpu.matmul %46, %48, %cst_40 {dimension_numbers = #tpu.dot_dimension_numbers<[1], [0], [0], [1], [0, 0, 1, 1], [], []>} : vector<256x32xbf16>, vector<32x16xbf16>, vector<256x16xf32> -> vector<256x16xf32>
    %50 = arith.addf %44, %49 : vector<256x16xf32>
    %51 = vector.extract_strided_slice %1 {offsets = [2, 2, 0], sizes = [16, 16, 32], strides = [1, 1, 1]} : vector<18x18x32xbf16> to vector<16x16x32xbf16>
    %52 = vector.shape_cast %51 : vector<16x16x32xbf16> to vector<256x32xbf16>
    %c2_41 = arith.constant 2 : index
    %c2_42 = arith.constant 2 : index
    %c0_43 = arith.constant 0 : index
    %c0_44 = arith.constant 0 : index
    %53 = vector.load %arg2[%c2_41, %c2_42, %c0_43, %c0_44] : memref<3x3x32x16xbf16, #tpu.memory_space<vmem>>, vector<1x1x32x16xbf16>
    %54 = vector.shape_cast %53 : vector<1x1x32x16xbf16> to vector<32x16xbf16>
    %cst_45 = arith.constant dense<0.000000e+00> : vector<256x16xf32>
    %55 = tpu.matmul %52, %54, %cst_45 {dimension_numbers = #tpu.dot_dimension_numbers<[1], [0], [0], [1], [0, 0, 1, 1], [], []>} : vector<256x32xbf16>, vector<32x16xbf16>, vector<256x16xf32> -> vector<256x16xf32>
    %56 = arith.addf %50, %55 : vector<256x16xf32>
    %c0_46 = arith.constant 0 : index
    %c0_47 = arith.constant 0 : index
    %57 = vector.load %arg3[%c0_46, %c0_47] : memref<1x16xf32, #tpu.memory_space<vmem>>, vector<1x16xf32>
    %58 = vector.broadcast %57 : vector<1x16xf32> to vector<256x16xf32>
    %59 = arith.addf %56, %58 : vector<256x16xf32>
    %c0_48 = arith.constant 0 : index
    %c0_49 = arith.constant 0 : index
    %c0_50 = arith.constant 0 : index
    %60 = vector.load %arg4[%c0_48, %c0_49, %c0_50] : memref<1x256x16xf32, #tpu.memory_space<vmem>>, vector<1x256x16xf32>
    %61 = vector.shape_cast %60 : vector<1x256x16xf32> to vector<256x16xf32>
    %62 = arith.addf %59, %61 : vector<256x16xf32>
    %cst_51 = arith.constant dense<0.000000e+00> : vector<16xf32>
    %63 = vector.multi_reduction <add>, %62, %cst_51 [0] : vector<256x16xf32> to vector<16xf32>
    %64 = vector.shape_cast %63 : vector<16xf32> to vector<1x16xf32>
    %cst_52 = arith.constant 2.560000e+02 : f32
    %65 = vector.broadcast %cst_52 : f32 to vector<1x16xf32>
    %66 = arith.divf %64, %65 : vector<1x16xf32>
    %67 = vector.broadcast %66 : vector<1x16xf32> to vector<256x16xf32>
    %68 = arith.subf %62, %67 : vector<256x16xf32>
    %69 = arith.mulf %68, %68 : vector<256x16xf32>
    %cst_53 = arith.constant dense<0.000000e+00> : vector<16xf32>
    %70 = vector.multi_reduction <add>, %69, %cst_53 [0] : vector<256x16xf32> to vector<16xf32>
    %71 = vector.shape_cast %70 : vector<16xf32> to vector<1x16xf32>
    %cst_54 = arith.constant 2.560000e+02 : f32
    %72 = vector.broadcast %cst_54 : f32 to vector<1x16xf32>
    %73 = arith.divf %71, %72 : vector<1x16xf32>
    %cst_55 = arith.constant 9.99999974E-6 : f32
    %74 = vector.broadcast %cst_55 : f32 to vector<1x16xf32>
    %75 = arith.addf %73, %74 : vector<1x16xf32>
    %76 = math.rsqrt %75 : vector<1x16xf32>
    %77 = vector.broadcast %76 : vector<1x16xf32> to vector<256x16xf32>
    %78 = arith.mulf %68, %77 : vector<256x16xf32>
    %c0_56 = arith.constant 0 : index
    %c0_57 = arith.constant 0 : index
    %c0_58 = arith.constant 0 : index
    %79 = vector.load %arg5[%c0_56, %c0_57, %c0_58] : memref<1x256x16xf32, #tpu.memory_space<vmem>>, vector<1x256x16xf32>
    %80 = vector.shape_cast %79 : vector<1x256x16xf32> to vector<256x16xf32>
    %c0_59 = arith.constant 0 : index
    %c0_60 = arith.constant 0 : index
    %c0_61 = arith.constant 0 : index
    %81 = vector.load %arg6[%c0_59, %c0_60, %c0_61] : memref<1x256x16xf32, #tpu.memory_space<vmem>>, vector<1x256x16xf32>
    %82 = vector.shape_cast %81 : vector<1x256x16xf32> to vector<256x16xf32>
    %83 = arith.mulf %82, %78 : vector<256x16xf32>
    %84 = arith.addf %80, %83 : vector<256x16xf32>
    %85 = math.tanh %84 : vector<256x16xf32>
    %c0_62 = arith.constant 0 : index
    %c0_63 = arith.constant 0 : index
    %c0_64 = arith.constant 0 : index
    %86 = vector.load %arg7[%c0_62, %c0_63, %c0_64] : memref<1x256x16xf32, #tpu.memory_space<vmem>>, vector<1x256x16xf32>
    %87 = vector.shape_cast %86 : vector<1x256x16xf32> to vector<256x16xf32>
    %88 = vector.shape_cast %85 : vector<256x16xf32> to vector<1x256x16xf32>
    tpu.vector_store %arg7[%c0_62, %c0_63, %c0_64], %88 {strides = array<i32>} : memref<1x256x16xf32, #tpu.memory_space<vmem>>, vector<1x256x16xf32>,
    return
  }
  func.func @transform_0(%arg0: i32) -> (i32, i32, i32, i32) {
    %c0_i32 = arith.constant 0 : i32
    %c0_i32_0 = arith.constant 0 : i32
    %c0_i32_1 = arith.constant 0 : i32
    %c0_i32_2 = arith.constant 0 : i32
    return %arg0, %c0_i32, %c0_i32_0, %c0_i32_1 : i32, i32, i32, i32
  }
  func.func @transform_1(%arg0: i32) -> (i32, i32, i32, i32) {
    %c0_i32 = arith.constant 0 : i32
    %c0_i32_0 = arith.constant 0 : i32
    %c0_i32_1 = arith.constant 0 : i32
    %c0_i32_2 = arith.constant 0 : i32
    %c0_i32_3 = arith.constant 0 : i32
    return %c0_i32, %c0_i32_0, %c0_i32_1, %c0_i32_2 : i32, i32, i32, i32
  }
  func.func @transform_2(%arg0: i32) -> (i32, i32) {
    %c0_i32 = arith.constant 0 : i32
    %c0_i32_0 = arith.constant 0 : i32
    %c0_i32_1 = arith.constant 0 : i32
    return %c0_i32, %c0_i32_0 : i32, i32
  }
  func.func @transform_3(%arg0: i32) -> (i32, i32, i32) {
    %c0_i32 = arith.constant 0 : i32
    %c0_i32_0 = arith.constant 0 : i32
    %c0_i32_1 = arith.constant 0 : i32
    %c0_i32_2 = arith.constant 0 : i32
    return %c0_i32, %c0_i32_0, %c0_i32_1 : i32, i32, i32
  }
  func.func @transform_4(%arg0: i32) -> (i32, i32, i32) {
    %c0_i32 = arith.constant 0 : i32
    %c0_i32_0 = arith.constant 0 : i32
    %c0_i32_1 = arith.constant 0 : i32
    return %arg0, %c0_i32, %c0_i32_0 : i32, i32, i32
  }
  func.func @transform_5(%arg0: i32) -> (i32, i32, i32) {
    %c0_i32 = arith.constant 0 : i32
    %c0_i32_0 = arith.constant 0 : i32
    %c0_i32_1 = arith.constant 0 : i32
    return %arg0, %c0_i32, %c0_i32_0 : i32, i32, i32
  }
  func.func @transform_6(%arg0: i32) -> (i32, i32, i32) {
    %c0_i32 = arith.constant 0 : i32
    %c0_i32_0 = arith.constant 0 : i32
    %c0_i32_1 = arith.constant 0 : i32
    return %arg0, %c0_i32, %c0_i32_0 : i32, i32, i32
  }
}

</mosaic_0001>

<bundles_post_ra>
// kernel: styleganblock_forward.5
= control target key start
LH: loop header
LB: loop body
LE: loop exit
PB: predicated region body
PF: predicated region fallthrough
CT: control target
= control target key end

     0   :  { %s2455_s12 = smov 0   ;;  %s3625_s0 = inlined_call_operand.vmem [shape: bf16[2,12,12,16], index: 0, kind: input, shape index: {}]   ;;  %s3626_s1 = inlined_call_operand.vmem [shape: bf16[5,5,16,96], index: 1, kind: input, shape index: {}]   ;;  %s3627_s2 = inlined_call_operand.vmem [shape: f32[1,96], index: 2, kind: input, shape index: {}]   ;;  %s3628_s3 = inlined_call_operand.vmem [shape: f32[2,64,96], index: 3, kind: output, shape index: {}]  }
   0x1 LB: > { %s2106_s13 = sadd.s32 4294967295, %s2433_s12   ;;  %p2110_p0 = scmp.ge.s32.totalorder %s2433_s12, 1  ;;  %s2433_s12 = sphi %s2455_s12, %s13_s12  }
   0x2   : > { %p137_p1 = scmp.lt.s32.totalorder %s2433_s12, 3 }
   0x4   : > { %p138_p2 = pnand %p2110_p0, %p137_p1 }
   0x5   : > { %p161_p3 = scmp.lt.s32.totalorder (!%p138_p2), %s2106_s13, 1 }
   0x6   : > { %141 = sbr.rel (%p138_p2) target bundleno = 571 (0x23b), region = 32 }
   0xb   : > { %v2390_v0 = vld [vmem:[%s3626_s1 + $0x8] sm:$0xff]  ;;  %v2391_v1 = vld [vmem:[%s3626_s1 + $0x10] sm:$0xff]  ;;  %s3695_s13 = smov (!%p161_p3, %s2106_s13), 1  ;;  %v2392_v2 = vld [vmem:[%s3626_s1 + $0x18] sm:$0xff]  ;;  %vm198_vm0 = vsmask.f32 3328 }
   0xc   : > { %2414 = vmatpush.bf16.msra.mxu1 %v2390_v0  ;;  %2415 = vmatpush.bf16.msra.mxu2 %v2390_v0  ;;  %s2417_s18 = smul.u32 96, %s3695_s13  ;;  %v2389_v3 = vld [vmem:[%s3626_s1] sm:$0xff]  ;;  %vm199_vm1 = vsmask.f32 7440  ;;  %vm334_vm2 = vcmask 130048   ;;  %vm451_vm4 = vcmask 1042432  }
   0xd   : > { %2416 = vmatpush.bf16.msra.mxu3 %v2390_v0  ;;  %354 = vmatpush.bf16.msra.mxu0 %v2390_v0  ;;  %v2393_v4 = vld [vmem:[%s3626_s1 + $0x20] sm:$0xff]  ;;  %vm2538_vm3 = vmor %vm198_vm0, %vm199_vm1  ;;  %vm452_vm5 = vcmask 1046532   ;;  %vm556_vm7 = vsmask.f32 2304  ;;  %vm557_vm8 = vsmask.f32 6416 }
   0xe   : > { %s2484_s27 = scalar_lea.vmem %s3625_s0, %s2417_s18  ;;  %vm2647_vm6 = vmor %vm451_vm4, %vm452_vm5  ;;  %vm709_vm9 = vcmask 1041408   ;;  %vm710_vm11 = vcmask 1045508   ;;  %vm2042_vm13 = vcmask 785408  }
   0xf   : > { %v2487_v5 = vld [vmem:[%s2484_s27 + $0x10] sm:$0xf]  ;;  %v2490_v6 = vld [vmem:[%s2484_s27 + $0x14] sm:$0x3]  ;;  %v2493_v7 = vld [vmem:[%s2484_s27 + $0x18] sm:$0xf] }
  0x10   : > { %526 = vmatpush.bf16.msrb.mxu2 %v2391_v1  ;;  %421 = vmatpush.bf16.msrb.mxu1 %v2389_v3  ;;  %v2496_v8 = vld [vmem:[%s2484_s27 + $0x1c] sm:$0x3]  ;;  %v230_v9 = vshrl.u32 %v2487_v5, 16  ;;  %v233_v10 = vshll.u32 %v2487_v5, 16  ;;  %v239_v11 = vshll.u32 %v2490_v6, 16  ;;  %v244_v12 = vshrl.u32 %v2493_v7, 16  ;;  %vm2691_vm10 = vmor %vm556_vm7, %vm557_vm8 }
  0x11   : > { %679 = vmatpush.bf16.msrb.mxu3 %v2392_v2  ;;  %784 = vmatpush.bf16.msrb.mxu0 %v2393_v4  ;;  %v247_v13 = vshll.u32 %v2493_v7, 16  ;;  %v253_v14 = vshll.u32 %v2496_v8, 16  ;;  %v2505_v15 = vld [vmem:[%s2484_s27 + $0x20] sm:$0xf]  ;;  %v2508_v16 = vld [vmem:[%s2484_s27 + $0x24] sm:$0x3]  ;;  %vm2696_vm12 = vmor %vm709_vm9, %vm710_vm11 }
  0x12   : > { %v232_v17 = vrot.slane %v230_v9, 4  ;;  %v235_v18 = vrot.slane %v233_v10, 5  ;;  %v241_v19 = vrot.slane %v239_v11, 5  ;;  %v246_v20 = vrot.slane %v244_v12, 4  ;;  %v2519_v21 = vld [vmem:[%s2484_s27 + $0x28] sm:$0xf] }
  0x13   : > { %v249_v22 = vrot.slane %v247_v13, 5  ;;  %v255_v23 = vrot.slane %v253_v14, 5  ;;  %v2526_v24 = vld [vmem:[%s2484_s27 + $0x2c] sm:$0x3]  ;;  %v258_v25 = vshrl.u32 %v2505_v15, 16  ;;  %v261_v26 = vshll.u32 %v2505_v15, 16 }
  0x14   : > { %v236_v27 = vor.u32 %v235_v18, %v232_v17  ;;  %v267_v28 = vshll.u32 %v2508_v16, 16  ;;  %v272_v29 = vshrl.u32 %v2519_v21, 16  ;;  %v275_v30 = vshll.u32 %v2519_v21, 16  ;;  %v2534_v31 = vld [vmem:[%s2484_s27 + $0x30] sm:$0xf] }
  0x15   : > { %v250_v33 = vor.u32 %v249_v22, %v246_v20  ;;  %v260_v34 = vrot.slane %v258_v25, 4  ;;  %v263_v35 = vrot.slane %v261_v26, 5  ;;  %v281_v36 = vshll.u32 %v2526_v24, 16  ;;  %v2548_v37 = vld [vmem:[%s2484_s27 + $0x34] sm:$0x3] }
  0x16   : > { %v237_v38 = vrot.slane %v236_v27, 4  ;;  %v269_v39 = vrot.slane %v267_v28, 5  ;;  %v274_v40 = vrot.slane %v272_v29, 4  ;;  %v277_v41 = vrot.slane %v275_v30, 5  ;;  %v2562_v48 = vld [vmem:[%s2484_s27 + $0x38] sm:$0xf] }
  0x17   : > { %v251_v42 = vrot.slane %v250_v33, 4  ;;  %v264_v43 = vor.u32 %v263_v35, %v260_v34  ;;  %v283_v44 = vrot.slane %v281_v36, 5  ;;  %v286_v45 = vshrl.u32 %v2534_v31, 16  ;;  %v2565_v49 = vld [vmem:[%s2484_s27 + $0x3c] sm:$0x3] }
  0x18   : > { %v242_v46 = vsel %vm2538_vm3, %v237_v38, %v241_v19  ;;  %v278_v47 = vor.u32 %v277_v41, %v274_v40  ;;  %v3634_v50 = vshll.u32 %v2534_v31, 16  ;;  %v3633_v51 = vshll.u32 %v2548_v37, 16  ;;  %v2582_v60 = vld [vmem:[%s2484_s27] sm:$0xf]  ;;  %v2590_v1 = vld [vmem:[%s2484_s27 + $0x4] sm:$0x3] }
  0x19   : > { %v256_v52 = vsel %vm2538_vm3, %v251_v42, %v255_v23  ;;  %v2571_v53 = vunpack.c.l.b16 %v242_v46  ;;  %v265_v54 = vrot.slane %v264_v43, 4  ;;  %v288_v55 = vrot.slane %v286_v45, 4  ;;  %v2601_v18 = vld [vmem:[%s2484_s27 + $0x8] sm:$0xf]  ;;  %v2627_v42 = vld [vmem:[%s2484_s27 + $0xc] sm:$0x3] }
  0x1a   : > { %v2575_v56 = vunpack.c.l.b16 %v256_v52  ;;  %v279_v57 = vrot.slane %v278_v47, 4  ;;  %v291_v58 = vrot.slane %v3634_v50, 5  ;;  %v297_v59 = vrot.slane %v3633_v51, 5  ;;  %v2394_v19 = vld [vmem:[%s3626_s1 + $0x28] sm:$0xff] }
  0x1b   : > { %v270_v61 = vsel %vm2538_vm3, %v265_v54, %v269_v39  ;;  %v3631_v62 = vshrl.u32 %v2562_v48, 16  ;;  %v3630_v63 = vshll.u32 %v2562_v48, 16  ;;  %v3629_v0 = vshll.u32 %v2565_v49, 16  ;;  %v2395_v39 = vld [vmem:[%s3626_s1 + $0x30] sm:$0xff] }
  0x1c   : > { %v2594_v2 = vpack.c.b16 %v2575_v56, %v2571_v53  ;;  %v284_v3 = vsel %vm2538_vm3, %v279_v57, %v283_v44  ;;  %v2598_v4 = vunpack.c.l.b16 %v270_v61  ;;  %v292_v17 = vor.u32 %v291_v58, %v288_v55 }
  0x1d   : > { %v2606_v20 = vunpack.c.l.b16 %v284_v3  ;;  %v302_v22 = vrot.slane %v3631_v62, 4  ;;  %v305_v23 = vrot.slane %v3630_v63, 5  ;;  %v311_v27 = vrot.slane %v3629_v0, 5 }
  0x1e   : > { %2121 = vmatmul.msk.bf16.vlgmr.msra.gmra.mxu1 %vm334_vm2, %v2594_v2  ;;  %v293_v33 = vrot.slane %v292_v17, 4  ;;  %v202_v34 = vshrl.u32 %v2582_v60, 16  ;;  %v205_v35 = vshll.u32 %v2582_v60, 16  ;;  %v211_v38 = vshll.u32 %v2590_v1, 16 }
  0x1f   : > { %v2624_v40 = vpack.c.b16 %v2606_v20, %v2598_v4  ;;  %v306_v41 = vor.u32 %v305_v23, %v302_v22  ;;  %v216_v43 = vshrl.u32 %v2601_v18, 16  ;;  %v219_v44 = vshll.u32 %v2601_v18, 16  ;;  %848 = vmatpush.bf16.msra.mxu1 %v2394_v19 }
  0x20   : > { %v298_v46 = vsel %vm2538_vm3, %v293_v33, %v297_v59  ;;  %v204_v47 = vrot.slane %v202_v34, 4  ;;  %v207_v52 = vrot.slane %v205_v35, 5  ;;  %v213_v54 = vrot.slane %v211_v38, 5 }
  0x21   : > { %2122 = vmatmul.msk.bf16.vlgmr.msra.gmra.mxu2 %vm334_vm2, %v2624_v40  ;;  %v307_v55 = vrot.slane %v306_v41, 4  ;;  %v2635_v57 = vunpack.c.l.b16 %v298_v46  ;;  %v218_v58 = vrot.slane %v216_v43, 4  ;;  %v221_v61 = vrot.slane %v219_v44, 5 }
  0x22   : > { %v208_v3 = vor.u32 %v207_v52, %v204_v47  ;;  %v225_v17 = vshll.u32 %v2627_v42, 16  ;;  %v566_v22 = vrot.slane %v211_v38, 6  ;;  %v384_v19 = vunpack.c.l.b16 %v2582_v60  ;;  %925 = vmatpush.bf16.msra.mxu2 %v2395_v39 }
  0x23   : > { %v312_v59 = vsel %vm2538_vm3, %v307_v55, %v311_v27  ;;  %v222_v23 = vor.u32 %v221_v61, %v218_v58  ;;  %v3632_v33 = vunpack.c.l.b16 %v2601_v18  ;;  %v2132_v0 = vrot.slane %v2582_v60, 9  ;;  %v2396_v55 = vld [vmem:[%s3626_s1 + $0x38] sm:$0xff] }
  0x24   : > { %v2643_v41 = vunpack.c.l.b16 %v312_v59  ;;  %v209_v46 = vrot.slane %v208_v3, 4  ;;  %v227_v63 = vrot.slane %v225_v17, 5  ;;  %v576_v62 = vrot.slane %v225_v17, 6 }
  0x25   : > { %v223_v39 = vrot.slane %v222_v23, 4  ;;  %v392_v27 = vpack.c.b16 %v3632_v33, %v384_v19  ;;  %v456_v47 = vrot.slane %v2590_v1, 5  ;;  %v2133_v52 = vrot.slane %v2601_v18, 9 }
  0x26   : > { %v2660_v58 = vpack.c.b16 %v2643_v41, %v2635_v57  ;;  %v214_v61 = vsel %vm2538_vm3, %v209_v46, %v213_v54  ;;  %v460_v3 = vrot.slane %v2627_v42, 5  ;;  %v559_v46 = vrot.slane %v202_v34, 5 }
  0x27   : > { %v228_v17 = vsel %vm2538_vm3, %v223_v39, %v227_v63  ;;  %v316_v19 = vunpack.c.l.b16 %v214_v61  ;;  %v457_v59 = vsel %vm2647_vm6, %v2132_v0, %v456_v47  ;;  %v560_v50 = vrot.slane %v205_v35, 6  ;;  %v2397_v0 = vld [vmem:[%s3626_s1 + $0x40] sm:$0xff] }
  0x28   : > { %2123 = vmatmul.msk.bf16.vlgmr.msra.gmra.mxu3 %vm334_vm2, %v2660_v58  ;;  %v2671_v23 = vunpack.c.l.b16 %v228_v17  ;;  %v2675_v33 = vsel %vm2647_vm6, %v2133_v52, %v460_v3  ;;  %v489_v54 = vunpack.c.l.b16 %v457_v59  ;;  %v563_v63 = vshrl.u32 %v2590_v1, 16 }
  0x29   : > { %v3646_v51 = vunpack.c.l.b16 %v2675_v33  ;;  %v569_v39 = vrot.slane %v216_v43, 5  ;;  %993 = vmatpush.bf16.msra.mxu3 %v2396_v55  ;;  %v570_v52 = vrot.slane %v219_v44, 6  ;;  %v573_v3 = vshrl.u32 %v2627_v42, 16 }
  0x2a   : > { %v324_v47 = vpack.c.b16 %v2671_v23, %v316_v19  ;;  %v561_v35 = vor.u32 %v560_v50, %v559_v46  ;;  %v565_v17 = vrot.slane %v563_v63, 5  ;;  %v2160_v44 = vrot.slane %v2582_v60, 10 }
  0x2b   : > { %v497_v34 = vpack.c.b16 %v3646_v51, %v489_v54  ;;  %v571_v55 = vor.u32 %v570_v52, %v569_v39  ;;  %v575_v19 = vrot.slane %v573_v3, 5  ;;  %v714_v50 = vrot.slane %v2590_v1, 6 }
  0x2c   : > { %2120 = vmatmul.msk.bf16.vlgmr.msra.gmra.mxu0 %vm334_vm2, %v324_v47  ;;  %v562_v59 = vrot.slane %v561_v35, 4  ;;  %v567_v61 = vor.u32 %v566_v22, %v565_v17  ;;  %v2161_v46 = vrot.slane %v2601_v18, 10  ;;  %v718_v39 = vrot.slane %v2627_v42, 6 }
  0x2d   : > { %1066 = vmatpush.bf16.msra.mxu0 %v2397_v0  ;;  %v572_v63 = vrot.slane %v571_v55, 4  ;;  %v577_v47 = vor.u32 %v576_v62, %v575_v19  ;;  %v715_v22 = vsel %vm2696_vm12, %v2160_v44, %v714_v50  ;;  %v2135_v3 = vrot.slane %v2493_v7, 9 }
  0x2e   : > { %2128 = vmatmul.msk.bf16.vlgmr.msrb.gmra.mxu1 %vm334_vm2, %v392_v27  ;;  %v568_v60 = vsel %vm2691_vm10, %v562_v59, %v567_v61  ;;  %v719_v0 = vsel %vm2696_vm12, %v2161_v46, %v718_v39  ;;  %v2134_v27 = vrot.slane %v2487_v5, 9  ;;  %v747_v42 = vunpack.c.l.b16 %v715_v22 }
  0x2f   : > { %v2710_v52 = vsel %vm2691_vm10, %v572_v63, %v577_v47  ;;  %v642_v1 = vunpack.c.l.b16 %v568_v60  ;;  %v464_v61 = vrot.slane %v2490_v6, 5  ;;  %v468_v35 = vrot.slane %v2496_v8, 5 }
  0x30   : > { %v3637_v62 = vunpack.c.l.b16 %v2710_v52  ;;  %v579_v17 = vrot.slane %v230_v9, 5  ;;  %v748_v19 = vunpack.c.l.b16 %v719_v0  ;;  %v580_v44 = vrot.slane %v233_v10, 6 }
  0x31   : > { %2146 = vmatmul.msk.bf16.vlgmr.msrb.gmra.mxu2 %vm334_vm2, %v497_v34  ;;  %v583_v34 = vshrl.u32 %v2490_v6, 16  ;;  %v2729_v59 = vsel %vm2647_vm6, %v2134_v27, %v464_v61  ;;  %v2733_v50 = vsel %vm2647_vm6, %v2135_v3, %v468_v35  ;;  %v586_v9 = vrot.slane %v239_v11, 6 }
  0x32   : > { %v650_v55 = vpack.c.b16 %v3637_v62, %v642_v1  ;;  %v589_v46 = vrot.slane %v244_v12, 5  ;;  %v3647_v63 = vunpack.c.l.b16 %v2487_v5  ;;  %v3636_v10 = vunpack.c.l.b16 %v2493_v7 }
  0x33   : > { %v581_v47 = vor.u32 %v580_v44, %v579_v17  ;;  %v585_v39 = vrot.slane %v583_v34, 5  ;;  %v590_v60 = vrot.slane %v247_v13, 6  ;;  %v593_v22 = vshrl.u32 %v2496_v8, 16 }
  0x34   : > { %v596_v1 = vrot.slane %v253_v14, 6  ;;  %v2162_v0 = vrot.slane %v2487_v5, 10  ;;  %v755_v11 = vpack.c.b16 %v748_v19, %v747_v42  ;;  %v3645_v27 = vunpack.c.l.b16 %v2729_v59 }
  0x35   : > { %v3635_v12 = vunpack.c.l.b16 %v2733_v50  ;;  %v582_v61 = vrot.slane %v581_v47, 4  ;;  %v587_v3 = vor.u32 %v586_v9, %v585_v39  ;;  %v591_v35 = vor.u32 %v590_v60, %v589_v46 }
  0x36   : > { %v595_v17 = vrot.slane %v593_v22, 5  ;;  %v722_v13 = vrot.slane %v2490_v6, 6  ;;  %v2755_v14 = vpack.c.b16 %v3636_v10, %v3647_v63  ;;  %v2163_v9 = vrot.slane %v2493_v7, 10 }
  0x37   : > { %v592_v44 = vrot.slane %v591_v35, 4  ;;  %v2769_v46 = vsel %vm2691_vm10, %v582_v61, %v587_v3  ;;  %v726_v47 = vrot.slane %v2496_v8, 6  ;;  %v2136_v39 = vrot.slane %v2505_v15, 9 }
  0x38   : > { %2156 = vmatmul.msk.bf16.vlgmr.msrb.gmra.mxu3 %vm334_vm2, %v650_v55  ;;  %v597_v42 = vor.u32 %v596_v1, %v595_v17  ;;  %v723_v34 = vsel %vm2696_vm12, %v2162_v0, %v722_v13  ;;  %v2763_v55 = vpack.c.b16 %v3635_v12, %v3645_v27  ;;  %v472_v60 = vrot.slane %v2508_v16, 5 }
  0x39   : > { %v749_v6 = vunpack.c.l.b16 %v723_v34  ;;  %v2137_v0 = vrot.slane %v2519_v21, 9  ;;  %v599_v8 = vrot.slane %v258_v25, 5  ;;  %v600_v61 = vrot.slane %v261_v26, 6 }
  0x3a   : > { %v2776_v22 = vsel %vm2691_vm10, %v592_v44, %v597_v42  ;;  %v603_v3 = vshrl.u32 %v2508_v16, 16  ;;  %v3644_v35 = vunpack.c.l.b16 %v2769_v46  ;;  %v2793_v17 = vsel %vm2696_vm12, %v2163_v9, %v726_v47 }
  0x3b   : > { %v2778_v1 = vpack.c.b16 %v749_v6, %v748_v19  ;;  %v3640_v19 = vunpack.c.l.b16 %v2776_v22  ;;  %v2797_v13 = vsel %vm2647_vm6, %v2136_v39, %v472_v60  ;;  %v609_v26 = vrot.slane %v272_v29, 5 }
  0x3c   : > { %2174 = vmatmul.msk.bf16.vlgmr.msrb.gmra.mxu0 %vm334_vm2, %v755_v11  ;;  %v476_v11 = vrot.slane %v2526_v24, 5  ;;  %v610_v44 = vrot.slane %v275_v30, 6  ;;  %v613_v42 = vshrl.u32 %v2526_v24, 16  ;;  %v3643_v34 = vunpack.c.l.b16 %v2505_v15 }
  0x3d   : > { %v3639_v9 = vunpack.c.l.b16 %v2519_v21  ;;  %v3638_v47 = vunpack.c.l.b16 %v2793_v17  ;;  %v601_v39 = vor.u32 %v600_v61, %v599_v8  ;;  %v605_v60 = vrot.slane %v603_v3, 5 }
  0x3e   : > { %2129 = vmatmul.msk.bf16.gmra.mxu1 %vm334_vm2, %v2755_v14  ;;  %v2803_v25 = vsel %vm2647_vm6, %v2137_v0, %v476_v11  ;;  %v606_v0 = vrot.slane %v267_v28, 6  ;;  %v2819_v29 = vpack.c.b16 %v3640_v19, %v3644_v35  ;;  %v3642_v30 = vunpack.c.l.b16 %v2797_v13 }
  0x3f   : > { %v3641_v11 = vunpack.c.l.b16 %v2803_v25  ;;  %v611_v12 = vor.u32 %v610_v44, %v609_v26  ;;  %v615_v10 = vrot.slane %v613_v42, 5  ;;  %v616_v62 = vrot.slane %v281_v36, 6 }
  0x40   : > { %v2827_v8 = vpack.c.b16 %v3638_v47, %v749_v6  ;;  %v2833_v28 = vpack.c.b16 %v3639_v9, %v3643_v34  ;;  %v602_v61 = vrot.slane %v601_v39, 4  ;;  %v607_v3 = vor.u32 %v606_v0, %v605_v60 }
  0x41   : > { %2147 = vmatmul.msk.bf16.gmra.mxu2 %vm334_vm2, %v2763_v55  ;;  %v2841_v36 = vpack.c.b16 %v3641_v11, %v3642_v30  ;;  %v2164_v6 = vrot.slane %v2505_v15, 10  ;;  %v619_v26 = vrot.slane %v286_v45, 5  ;;  %v3665_v44 = vshll.u32 %v2534_v31, 16 }
  0x42   : > { %v612_v47 = vrot.slane %v611_v12, 4  ;;  %v617_v39 = vor.u32 %v616_v62, %v615_v10  ;;  %v623_v60 = vshrl.u32 %v2548_v37, 16  ;;  %v3666_v0 = vshll.u32 %v2548_v37, 16 }
  0x43   : > { %v620_v42 = vrot.slane %v3665_v44, 6  ;;  %v730_v19 = vrot.slane %v2508_v16, 6  ;;  %v2165_v11 = vrot.slane %v2519_v21, 10  ;;  %v734_v30 = vrot.slane %v2526_v24, 6 }
  0x44   : > { %v626_v9 = vrot.slane %v3666_v0, 6  ;;  %v2856_v45 = vsel %vm2691_vm10, %v602_v61, %v607_v3  ;;  %v625_v35 = vrot.slane %v623_v60, 5  ;;  %v3667_v12 = vshrl.u32 %v2562_v48, 16 }
  0x45   : > { %v621_v34 = vor.u32 %v620_v42, %v619_v26  ;;  %v3668_v10 = vshll.u32 %v2562_v48, 16  ;;  %v633_v0 = vshrl.u32 %v2565_v49, 16  ;;  %v3669_v24 = vshll.u32 %v2565_v49, 16 }
  0x46   : > { %v629_v62 = vrot.slane %v3667_v12, 5  ;;  %v2166_v42 = vrot.slane %v2534_v31, 10  ;;  %v618_v61 = vsel %vm2691_vm10, %v612_v47, %v617_v39  ;;  %v627_v3 = vor.u32 %v626_v9, %v625_v35 }
  0x47   : > { %v630_v44 = vrot.slane %v3668_v10, 6  ;;  %v622_v16 = vrot.slane %v621_v34, 4  ;;  %v636_v26 = vrot.slane %v3669_v24, 6  ;;  %v738_v12 = vrot.slane %v2548_v37, 6 }
  0x48   : > { %2157 = vmatmul.msk.bf16.gmra.mxu3 %vm334_vm2, %v2819_v29  ;;  %v635_v10 = vrot.slane %v633_v0, 5  ;;  %v2167_v34 = vrot.slane %v2562_v48, 10  ;;  %v742_v27 = vrot.slane %v2565_v49, 6  ;;  %v646_v35 = vunpack.c.l.b16 %v2856_v45 }
  0x49   : > { %v631_v60 = vor.u32 %v630_v44, %v629_v62  ;;  %v628_v24 = vsel %vm2691_vm10, %v622_v16, %v627_v3  ;;  %v2879_v63 = vsel %vm2696_vm12, %v2166_v42, %v738_v12  ;;  %v647_v9 = vunpack.c.l.b16 %v618_v61 }
  0x4a   : > { %v637_v47 = vor.u32 %v636_v26, %v635_v10  ;;  %v2884_v39 = vsel %vm2696_vm12, %v2167_v34, %v742_v27  ;;  %v2890_v62 = vsel %vm2696_vm12, %v2164_v6, %v730_v19  ;;  %v2894_v44 = vsel %vm2696_vm12, %v2165_v11, %v734_v30 }
  0x4b   : > { %v632_v51 = vrot.slane %v631_v60, 4  ;;  %v2138_v16 = vrot.slane %v2534_v31, 9  ;;  %v648_v45 = vunpack.c.l.b16 %v628_v24  ;;  %v480_v0 = vrot.slane %v2548_v37, 5  ;;  %v2400_v24 = vld [vmem:[%s3626_s1 + $0x58] sm:$0xff] }
  0x4c   : > { %2175 = vmatmul.msk.bf16.gmra.mxu0 %vm334_vm2, %v2827_v8  ;;  %v2139_v26 = vrot.slane %v2562_v48, 9  ;;  %v484_v27 = vrot.slane %v2565_v49, 5  ;;  %v2905_v6 = vpack.c.b16 %v647_v9, %v646_v35  ;;  %v751_v30 = vunpack.c.l.b16 %v2890_v62  ;;  %1250 = vmatpush.bf16.msrb.mxu3 %v2400_v24 }
  0x4d   : > { %v2902_v42 = vsel %vm2691_vm10, %v632_v51, %v637_v47  ;;  %v3648_v11 = vunpack.c.l.b16 %v2894_v44  ;;  %v390_v37 = vunpack.c.l.b16 %v2534_v31  ;;  %v391_v49 = vunpack.c.l.b16 %v2562_v48  ;;  %v2399_v31 = vld [vmem:[%s3626_s1 + $0x50] sm:$0xff]  ;;  %v2398_v47 = vld [vmem:[%s3626_s1 + $0x48] sm:$0xff] }
  0x4e   : > { %2130 = vmatmul.msk.bf16.gmra.mxu1 %vm334_vm2, %v2833_v28  ;;  %v649_v19 = vunpack.c.l.b16 %v2902_v42  ;;  %v481_v51 = vsel %vm2647_vm6, %v2138_v16, %v480_v0  ;;  %v2919_v3 = vsel %vm2647_vm6, %v2139_v26, %v484_v27  ;;  %1185 = vmatpush.bf16.msrb.mxu2 %v2399_v31  ;;  %v2401_v16 = vld [vmem:[%s3626_s1 + $0x60] sm:$0xff]  ;;  %v3650_v26 = vunpack.c.l.b16 %v2879_v63 }
  0x4f   : > { %v2927_v60 = vpack.c.b16 %v3648_v11, %v751_v30  ;;  %v495_v12 = vunpack.c.l.b16 %v481_v51  ;;  %v496_v10 = vunpack.c.l.b16 %v2919_v3  ;;  %v2935_v34 = vpack.c.b16 %v391_v49, %v390_v37  ;;  %1133 = vmatpush.bf16.msrb.mxu1 %v2398_v47  ;;  %1306 = vmatpush.bf16.msrb.mxu0 %v2401_v16 }
  0x50   : > { %v2911_v61 = vpack.c.b16 %v649_v19, %v648_v45  ;;  %v3649_v27 = vunpack.c.l.b16 %v2884_v39  ;;  %v3670_v31 = vunpack.c.l.b16 %v2601_v18  ;;  %v3671_v24 = vunpack.c.l.b16 %v2487_v5 }
  0x51   : > { %2148 = vmatmul.msk.bf16.gmra.mxu2 %vm334_vm2, %v2841_v36  ;;  %v2950_v0 = vpack.c.b16 %v496_v10, %v495_v12  ;;  %v3672_v16 = vpack.c.b16 %v2571_v53, %v2671_v23  ;;  %v3673_v11 = vunpack.c.l.b16 %v2675_v33  ;;  %v3675_v18 = vunpack.c.l.b16 %v2710_v52  ;;  %v3004_v52 = vld [vmem:[%s2484_s27 + $0x40] sm:$0xf] }
  0x52   : > { %v2964_v51 = vpack.c.b16 %v3649_v27, %v3650_v26  ;;  %v819_v47 = vpack.c.b16 %v3671_v24, %v3670_v31  ;;  %v3674_v27 = vunpack.c.l.b16 %v2729_v59  ;;  %v3676_v5 = vunpack.c.l.b16 %v2769_v46 }
  0x53   : > { %v2986_v24 = vpack.c.b16 %v648_v45, %v647_v9  ;;  %v3678_v53 = vunpack.c.l.b16 %v2505_v15  ;;  %v2997_v33 = vpack.c.b16 %v2598_v4, %v2575_v56  ;;  %v3680_v15 = vunpack.c.l.b16 %v2797_v13  ;;  %v3025_v13 = vld [vmem:[%s2484_s27 + $0x44] sm:$0x3] }
  0x54   : > { %v964_v26 = vpack.c.b16 %v3674_v27, %v3673_v11  ;;  %v1037_v31 = vpack.c.b16 %v3676_v5, %v3675_v18  ;;  %v879_v46 = vshrl.u32 %v3004_v52, 16  ;;  %v882_v9 = vshll.u32 %v3004_v52, 16 }
  0x55   : > { %v3681_v56 = vunpack.c.l.b16 %v2776_v22  ;;  %v3682_v45 = vunpack.c.l.b16 %v2519_v21  ;;  %v3031_v27 = vpack.c.b16 %v2635_v57, %v2606_v20  ;;  %v1027_v20 = vshrl.u32 %v3025_v13, 16 }
  0x56   : > { %v1023_v5 = vrot.slane %v879_v46, 5  ;;  %v818_v57 = vunpack.c.l.b16 %v3004_v52 }
  0x57   : > { %v3018_v4 = vpack.c.b16 %v646_v35, %v3681_v56  ;;  %v3022_v11 = vpack.c.b16 %v390_v37, %v3682_v45  ;;  %v888_v35 = vshll.u32 %v3025_v13, 16 }
  0x58   : > { %2158 = vmatmul.msk.bf16.gmra.mxu3 %vm334_vm2, %v2905_v6  ;;  %v3059_v56 = vpack.c.b16 %v818_v57, %v391_v49 }
  0x59   : > { %v890_v37 = vrot.slane %v888_v35, 5 }
  0x5c   : > { %2176 = vmatmul.msk.bf16.gmra.mxu0 %vm334_vm2, %v2927_v60 }
  0x5e   : > { %2131 = vmatmul.msk.bf16.gmra.mxu1 %vm334_vm2, %v2935_v34 }
  0x61   : > { %2149 = vmatmul.msk.bf16.gmra.mxu2 %vm334_vm2, %v2950_v0 }
  0x68   : > { %2159 = vmatmul.msk.bf16.gmra.mxu3 %vm334_vm2, %v2911_v61 }
  0x6c   : > { %2177 = vmatmul.msk.bf16.gmra.mxu0 %vm334_vm2, %v2964_v51 }
  0x6e   : > { %2184 = vmatmul.msk.bf16.vlgmr.msra.gmra.mxu1 %vm334_vm2, %v819_v47  ;;  %v3677_v47 = vunpack.c.l.b16 %v2493_v7  ;;  %v3679_v7 = vunpack.c.l.b16 %v2733_v50  ;;  %v881_v50 = vrot.slane %v879_v46, 4  ;;  %v1030_v46 = vrot.slane %v888_v35, 6 }
  0x70   : > { %v2992_v23 = vpack.c.b16 %v3678_v53, %v3677_v47  ;;  %v3010_v59 = vpack.c.b16 %v3680_v15, %v3679_v7  ;;  %v2198_v53 = vrot.slane %v3004_v52, 9  ;;  %v958_v7 = vrot.slane %v3025_v13, 5 }
  0x71   : > { %2194 = vmatmul.msk.bf16.vlgmr.msra.gmra.mxu2 %vm334_vm2, %v3672_v16  ;;  %v3683_v16 = vunpack.c.l.b16 %v2803_v25 }
  0x72   : > { %v3075_v49 = vsel %vm2647_vm6, %v2198_v53, %v958_v7 }
  0x73   : > { %v3040_v18 = vpack.c.b16 %v495_v12, %v3683_v16  ;;  %v1029_v12 = vrot.slane %v1027_v20, 5 }
  0x75   : > { %v1031_v35 = vor.u32 %v1030_v46, %v1029_v12 }
  0x78   : > { %2205 = vmatmul.msk.bf16.vlgmr.msra.gmra.mxu3 %vm334_vm2, %v964_v26  ;;  %v884_v26 = vrot.slane %v882_v9, 5 }
  0x7a   : > { %v885_v22 = vor.u32 %v884_v26, %v881_v50  ;;  %v2404_v50 = vld [vmem:[%s3626_s1 + $0x78] sm:$0xff]  ;;  %v2402_v26 = vld [vmem:[%s3626_s1 + $0x68] sm:$0xff] }
  0x7b   : > { %1474 = vmatpush.bf16.msra.mxu3 %v2404_v50  ;;  %1367 = vmatpush.bf16.msra.mxu1 %v2402_v26 }
  0x7c   : > { %2215 = vmatmul.msk.bf16.vlgmr.msra.gmra.mxu0 %vm334_vm2, %v1037_v31  ;;  %v886_v21 = vrot.slane %v885_v22, 4  ;;  %v1024_v31 = vrot.slane %v882_v9, 6  ;;  %v2403_v9 = vld [vmem:[%s3626_s1 + $0x70] sm:$0xff] }
  0x7d   : > { %1422 = vmatpush.bf16.msra.mxu2 %v2403_v9 }
  0x7e   : > { %2185 = vmatmul.msk.bf16.gmra.mxu1 %vm334_vm2, %v2992_v23  ;;  %v891_v47 = vsel %vm2538_vm3, %v886_v21, %v890_v37  ;;  %v1025_v25 = vor.u32 %v1024_v31, %v1023_v5  ;;  %v3654_v21 = vunpack.c.l.b16 %v3075_v49  ;;  %v2405_v37 = vld [vmem:[%s3626_s1 + $0x80] sm:$0xff] }
  0x7f   : > { %v3050_v15 = vunpack.c.l.b16 %v891_v47  ;;  %1539 = vmatpush.bf16.msra.mxu0 %v2405_v37 }
  0x80   : > { %v1026_v22 = vrot.slane %v1025_v25, 4  ;;  %v3093_v5 = vpack.c.b16 %v3654_v21, %v496_v10 }
  0x81   : > { %2195 = vmatmul.msk.bf16.gmra.mxu2 %vm334_vm2, %v2997_v33  ;;  %v3071_v48 = vpack.c.b16 %v3050_v15, %v2643_v41 }
  0x82   : > { %v3084_v41 = vsel %vm2691_vm10, %v1026_v22, %v1031_v35  ;;  %v3684_v22 = vunpack.c.l.b16 %v2793_v17 }
  0x83   : > { %v3651_v31 = vunpack.c.l.b16 %v3084_v41 }
  0x84   : > { %v3120_v35 = vpack.c.b16 %v751_v30, %v3684_v22  ;;  %v3686_v22 = vunpack.c.l.b16 %v2879_v63 }
  0x85   : > { %v3102_v47 = vpack.c.b16 %v3651_v31, %v649_v19 }
  0x88   : > { %2206 = vmatmul.msk.bf16.gmra.mxu3 %vm334_vm2, %v3010_v59 }
  0x8c   : > { %2216 = vmatmul.msk.bf16.gmra.mxu0 %vm334_vm2, %v3018_v4 }
  0x8e   : > { %2186 = vmatmul.msk.bf16.gmra.mxu1 %vm334_vm2, %v3022_v11 }
  0x91   : > { %2196 = vmatmul.msk.bf16.gmra.mxu2 %vm334_vm2, %v3031_v27 }
  0x98   : > { %2207 = vmatmul.msk.bf16.gmra.mxu3 %vm334_vm2, %v3040_v18 }
  0x9b   : > { %v361_v45 = vpop.f32.mrf.mxu1 }
  0x9c   : > { %2217 = vmatmul.msk.bf16.gmra.mxu0 %vm334_vm2, %v2986_v24 }
  0x9e   : > { %2187 = vmatmul.msk.bf16.gmra.mxu1 %vm334_vm2, %v3059_v56 }
  0xa1   : > { %2197 = vmatmul.msk.bf16.gmra.mxu2 %vm334_vm2, %v3071_v48 }
  0xa3   : > { %v363_v16 = vpop.f32.mrf.mxu1 }
  0xa4   : > { %v366_v20 = vpop.f32.mrf.mxu2 }
  0xa8   : > { %2208 = vmatmul.msk.bf16.gmra.mxu3 %vm334_vm2, %v3093_v5 }
  0xa9   : > { %v356_v53 = vpop.f32.mrf.mxu0 }
  0xab   : > { %v3104_v7 = vpop.f32.mrf.mxu3  ;;  %v423_v3 = vpop.f32.mrf.mxu1 }
  0xac   : > { %2218 = vmatmul.msk.bf16.gmra.mxu0 %vm334_vm2, %v3102_v47  ;;  %v368_v10 = vpop.f32.mrf.mxu2  ;;  %v424_v25 = vadd.f32 %v423_v3, %v356_v53 }
  0xae   : > { %2226 = vmatmul.msk.bf16.vlgmr.msrb.gmra.mxu1 %vm334_vm2, %v2778_v1 }
  0xb1   : > { %v358_v12 = vpop.f32.mrf.mxu0  ;;  %2236 = vmatmul.msk.bf16.vlgmr.msrb.gmra.mxu2 %vm334_vm2, %v2755_v14 }
  0xb3   : > { %v3112_v42 = vpop.f32.mrf.mxu3  ;;  %v425_v19 = vpop.f32.mrf.mxu1 }
  0xb4   : > { %v528_v46 = vpop.f32.mrf.mxu2  ;;  %v426_v9 = vadd.f32 %v425_v19, %v358_v12 }
  0xb5   : > { %v548_v50 = vadd.f32 %v528_v46, %v424_v25 }
  0xb8   : > { %2246 = vmatmul.msk.bf16.vlgmr.msrb.gmra.mxu3 %vm334_vm2, %v2594_v2 }
  0xb9   : > { %v786_v26 = vpop.f32.mrf.mxu0 }
  0xbb   : > { %v681_v1 = vpop.f32.mrf.mxu3  ;;  %v428_v37 = vpop.f32.mrf.mxu1 }
  0xbc   : > { %2257 = vmatmul.msk.bf16.vlgmr.msrb.gmra.mxu0 %vm334_vm2, %v2763_v55  ;;  %v701_v14 = vadd.f32 %v681_v1, %v548_v50  ;;  %v530_v53 = vpop.f32.mrf.mxu2  ;;  %v429_v3 = vadd.f32 %v428_v37, %v361_v45 }
  0xbd   : > { %v549_v25 = vadd.f32 %v530_v53, %v426_v9  ;;  %v3135_v9 = vld [vmem:[%s2484_s27 + $0x48] sm:$0xf] }
  0xbe   : > { %2227 = vmatmul.msk.bf16.gmra.mxu1 %vm334_vm2, %v3120_v35  ;;  %v3126_v2 = vadd.f32 %v786_v26, %v701_v14  ;;  %v3685_v26 = vunpack.c.l.b16 %v2894_v44  ;;  %v2219_v44 = vrot.slane %v3004_v52, 10 }
  0xc0   : > { %v3141_v1 = vpack.c.b16 %v3686_v22, %v3685_v26 }
  0xc1   : > { %v788_v17 = vpop.f32.mrf.mxu0  ;;  %2237 = vmatmul.msk.bf16.gmra.mxu2 %vm334_vm2, %v2833_v28 }
  0xc3   : > { %v683_v62 = vpop.f32.mrf.mxu3  ;;  %v430_v30 = vpop.f32.mrf.mxu1 }
  0xc4   : > { %v702_v12 = vadd.f32 %v683_v62, %v549_v25  ;;  %v533_v19 = vpop.f32.mrf.mxu2  ;;  %v431_v46 = vadd.f32 %v430_v30, %v363_v16  ;;  %v3653_v25 = vshrl.u32 %v3135_v9, 16  ;;  %v1098_v30 = vrot.slane %v3025_v13, 6 }
  0xc5   : > { %v550_v55 = vadd.f32 %v533_v19, %v429_v3 }
  0xc6   : > { %v3130_v50 = vadd.f32 %v788_v17, %v702_v12  ;;  %v3652_v17 = vshll.u32 %v3135_v9, 16  ;;  %v1218_v12 = vrot.slane %v3653_v25, 4 }
  0xc8   : > { %2247 = vmatmul.msk.bf16.gmra.mxu3 %vm334_vm2, %v2624_v40 }
  0xc9   : > { %v791_v45 = vpop.f32.mrf.mxu0 }
  0xcb   : > { %v686_v37 = vpop.f32.mrf.mxu3  ;;  %v433_v14 = vpop.f32.mrf.mxu1 }
  0xcc   : > { %2258 = vmatmul.msk.bf16.gmra.mxu0 %vm334_vm2, %v2841_v36  ;;  %v703_v16 = vadd.f32 %v686_v37, %v550_v55  ;;  %v535_v53 = vpop.f32.mrf.mxu2  ;;  %v434_v3 = vadd.f32 %v433_v14, %v366_v20  ;;  %v1221_v20 = vrot.slane %v3652_v17, 5 }
  0xcd   : > { %v551_v62 = vadd.f32 %v535_v53, %v431_v46  ;;  %v3160_v46 = vld [vmem:[%s2484_s27 + $0x4c] sm:$0x3] }
  0xce   : > { %2228 = vmatmul.msk.bf16.gmra.mxu1 %vm334_vm2, %v3141_v1  ;;  %v3149_v63 = vadd.f32 %v791_v45, %v703_v16  ;;  %v3164_v45 = vsel %vm2696_vm12, %v2219_v44, %v1098_v30  ;;  %v1222_v14 = vor.u32 %v1221_v20, %v1218_v12  ;;  %v1225_v16 = vshll.u32 %v3160_v46, 16 }
  0xcf   : > { %v1103_v31 = vunpack.c.l.b16 %v3164_v45  ;;  %v2413_v45 = vld [vmem:[%s3626_s1 + $0xc0] sm:$0xff] }
  0xd0   : > { %v1223_v25 = vrot.slane %v1222_v14, 4  ;;  %v1227_v21 = vrot.slane %v1225_v16, 5 }
  0xd1   : > { %v793_v19 = vpop.f32.mrf.mxu0  ;;  %2238 = vmatmul.msk.bf16.gmra.mxu2 %vm334_vm2, %v2935_v34 }
  0xd3   : > { %v688_v55 = vpop.f32.mrf.mxu3  ;;  %v435_v26 = vpop.f32.mrf.mxu1 }
  0xd4   : > { %v704_v22 = vadd.f32 %v688_v55, %v551_v62  ;;  %v538_v13 = vpop.f32.mrf.mxu2  ;;  %v436_v37 = vadd.f32 %v435_v26, %v368_v10  ;;  %v3656_v62 = vunpack.c.l.b16 %v3135_v9  ;;  %v2407_v10 = vld [vmem:[%s3626_s1 + $0x90] sm:$0xff] }
  0xd5   : > { %v552_v53 = vadd.f32 %v538_v13, %v434_v3  ;;  %v3687_v3 = vunpack.c.l.b16 %v2884_v39  ;;  %1656 = vmatpush.bf16.msrb.mxu2 %v2407_v10  ;;  %v2408_v39 = vld [vmem:[%s3626_s1 + $0x98] sm:$0xff]  ;;  %v2406_v13 = vld [vmem:[%s3626_s1 + $0x88] sm:$0xff]  ;;  %v1283_v10 = vrot.slane %v3160_v46, 5 }
  0xd6   : > { %v3168_v17 = vadd.f32 %v793_v19, %v704_v22  ;;  %v1228_v22 = vsel %vm2538_vm3, %v1223_v25, %v1227_v21  ;;  %1711 = vmatpush.bf16.msrb.mxu3 %v2408_v39  ;;  %1595 = vmatpush.bf16.msrb.mxu1 %v2406_v13 }
  0xd7   : > { %v3182_v30 = vpack.c.b16 %v1103_v31, %v3687_v3  ;;  %v3207_v25 = vunpack.c.l.b16 %v1228_v22 }
  0xd8   : > { %2248 = vmatmul.msk.bf16.gmra.mxu3 %vm334_vm2, %v2660_v58 }
  0xd9   : > { %v796_v44 = vpop.f32.mrf.mxu0 }
  0xdb   : > { %v691_v12 = vpop.f32.mrf.mxu3  ;;  %v438_v20 = vpop.f32.mrf.mxu1 }
  0xdc   : > { %2259 = vmatmul.msk.bf16.gmra.mxu0 %vm334_vm2, %v2950_v0  ;;  %v705_v19 = vadd.f32 %v691_v12, %v552_v53  ;;  %v540_v55 = vpop.f32.mrf.mxu2  ;;  %v439_v26 = vadd.f32 %v438_v20, %v3104_v7  ;;  %v3199_v53 = vpack.c.b16 %v3656_v62, %v818_v57  ;;  %v2250_v7 = vrot.slane %v3135_v9, 9  ;;  %v2409_v57 = vld [vmem:[%s3626_s1 + $0xa0] sm:$0xff] }
  0xdd   : > { %v553_v14 = vadd.f32 %v540_v55, %v436_v37  ;;  %1763 = vmatpush.bf16.msrb.mxu0 %v2409_v57  ;;  %v3220_v20 = vpack.c.b16 %v3207_v25, %v3050_v15 }
  0xde   : > { %2229 = vmatmul.msk.bf16.gmra.mxu1 %vm334_vm2, %v3182_v30  ;;  %v3205_v21 = vadd.f32 %v796_v44, %v705_v19  ;;  %v3213_v52 = vsel %vm2647_vm6, %v2250_v7, %v1283_v10  ;;  %v3688_v7 = vunpack.c.l.b16 %v3075_v49 }
  0xdf   : > { %v3655_v19 = vunpack.c.l.b16 %v3213_v52 }
  0xe1   : > { %v798_v37 = vpop.f32.mrf.mxu0  ;;  %2239 = vmatmul.msk.bf16.gmra.mxu2 %vm334_vm2, %v3199_v53 }
  0xe3   : > { %v693_v3 = vpop.f32.mrf.mxu3  ;;  %v440_v12 = vpop.f32.mrf.mxu1 }
  0xe4   : > { %v706_v44 = vadd.f32 %v693_v3, %v553_v14  ;;  %v543_v55 = vpop.f32.mrf.mxu2  ;;  %v441_v22 = vadd.f32 %v440_v12, %v3112_v42  ;;  %v3232_v14 = vpack.c.b16 %v3655_v19, %v3688_v7 }
  0xe5   : > { %v554_v39 = vadd.f32 %v543_v55, %v439_v26 }
  0xe6   : > { %v3224_v13 = vadd.f32 %v798_v37, %v706_v44 }
  0xe8   : > { %2249 = vmatmul.msk.bf16.gmra.mxu3 %vm334_vm2, %v3220_v20 }
  0xe9   : > { %v801_v10 = vpop.f32.mrf.mxu0 }
  0xeb   : > { %v696_v15 = vpop.f32.mrf.mxu3  ;;  %v850_v57 = vpop.f32.mrf.mxu1 }
  0xec   : > { %2260 = vmatmul.msk.bf16.gmra.mxu0 %vm334_vm2, %v3232_v14  ;;  %v707_v3 = vadd.f32 %v696_v15, %v554_v39  ;;  %v545_v42 = vpop.f32.mrf.mxu2  ;;  %v870_v26 = vadd.f32 %v850_v57, %v3126_v2 }
  0xed   : > { %v555_v37 = vadd.f32 %v545_v42, %v441_v22 }
  0xee   : > { %2267 = vmatmul.msk.bf16.vlgmr.msra.gmra.mxu1 %vm334_vm2, %v2819_v29  ;;  %v3239_v12 = vadd.f32 %v801_v10, %v707_v3 }
  0xf1   : > { %v803_v49 = vpop.f32.mrf.mxu0  ;;  %2278 = vmatmul.msk.bf16.vlgmr.msra.gmra.mxu2 %vm334_vm2, %v2827_v8 }
  0xf3   : > { %v698_v44 = vpop.f32.mrf.mxu3  ;;  %v852_v55 = vpop.f32.mrf.mxu1 }
  0xf4   : > { %v708_v7 = vadd.f32 %v698_v44, %v555_v37  ;;  %v927_v19 = vpop.f32.mrf.mxu2  ;;  %v871_v62 = vadd.f32 %v852_v55, %v3130_v50  ;;  %v3689_v44 = vshrl.u32 %v3135_v9, 16 }
  0xf5   : > { %v947_v39 = vadd.f32 %v927_v19, %v870_v26 }
  0xf6   : > { %v3244_v15 = vadd.f32 %v803_v49, %v708_v7  ;;  %v1340_v7 = vshrl.u32 %v3160_v46, 16 }
  0xf8   : > { %2288 = vmatmul.msk.bf16.vlgmr.msra.gmra.mxu3 %vm334_vm2, %v2992_v23 }
  0xf9   : > { %v1068_v2 = vpop.f32.mrf.mxu0 }
  0xfb   : > { %v995_v29 = vpop.f32.mrf.mxu3  ;;  %v855_v22 = vpop.f32.mrf.mxu1 }
  0xfc   : > { %2298 = vmatmul.msk.bf16.vlgmr.msra.gmra.mxu0 %vm334_vm2, %v2997_v33  ;;  %v1015_v10 = vadd.f32 %v995_v29, %v947_v39  ;;  %v929_v8 = vpop.f32.mrf.mxu2  ;;  %v872_v57 = vadd.f32 %v855_v22, %v3149_v63  ;;  %v1336_v63 = vrot.slane %v3689_v44, 5 }
  0xfd   : > { %v948_v3 = vadd.f32 %v929_v8, %v871_v62  ;;  %v3690_v62 = vshll.u32 %v3135_v9, 16  ;;  %v1343_v8 = vrot.slane %v1225_v16, 6  ;;  %2000 = vmatpush.bf16.msra.mxu0 %v2413_v45 }
  0xfe   : > { %2268 = vmatmul.msk.bf16.gmra.mxu1 %vm334_vm2, %v2905_v6  ;;  %v3253_v50 = vadd.f32 %v1068_v2, %v1015_v10 }
  0xff   : > { %v1337_v55 = vrot.slane %v3690_v62, 6 }
 0x101   : > { %v1070_v19 = vpop.f32.mrf.mxu0  ;;  %2279 = vmatmul.msk.bf16.gmra.mxu2 %vm334_vm2, %v2927_v60  ;;  %v1338_v10 = vor.u32 %v1337_v55, %v1336_v63 }
 0x103   : > { %v997_v23 = vpop.f32.mrf.mxu3  ;;  %v857_v42 = vpop.f32.mrf.mxu1 }
 0x104   : > { %v1016_v26 = vadd.f32 %v997_v23, %v948_v3  ;;  %v932_v37 = vpop.f32.mrf.mxu2  ;;  %v873_v33 = vadd.f32 %v857_v42, %v3168_v17  ;;  %v1342_v17 = vrot.slane %v1340_v7, 5 }
 0x105   : > { %v949_v49 = vadd.f32 %v932_v37, %v872_v57 }
 0x106   : > { %v3263_v39 = vadd.f32 %v1070_v19, %v1016_v26  ;;  %v1339_v26 = vrot.slane %v1338_v10, 4  ;;  %v1344_v37 = vor.u32 %v1343_v8, %v1342_v17  ;;  %v3300_v8 = vld [vmem:[%s2484_s27 + $0x54] sm:$0x3] }
 0x108   : > { %2289 = vmatmul.msk.bf16.gmra.mxu3 %vm334_vm2, %v3022_v11  ;;  %v3275_v11 = vld [vmem:[%s2484_s27 + $0x50] sm:$0xf]  ;;  %v3287_v62 = vsel %vm2691_vm10, %v1339_v26, %v1344_v37  ;;  %v3691_v37 = vunpack.c.l.b16 %v3084_v41  ;;  %v2410_v41 = vld [vmem:[%s3626_s1 + $0xa8] sm:$0xff] }
 0x109   : > { %v1073_v2 = vpop.f32.mrf.mxu0  ;;  %v1508_v16 = vshll.u32 %v3275_v11, 16  ;;  %v1349_v17 = vunpack.c.l.b16 %v3287_v62  ;;  %v2411_v26 = vld [vmem:[%s3626_s1 + $0xb0] sm:$0xff]  ;;  %1828 = vmatpush.bf16.msra.mxu1 %v2410_v41 }
 0x10a   : > { %1884 = vmatpush.bf16.msra.mxu2 %v2411_v26 }
 0x10b   : > { %v1000_v29 = vpop.f32.mrf.mxu3  ;;  %v860_v22 = vpop.f32.mrf.mxu1  ;;  %v1510_v10 = vrot.slane %v1508_v16, 5 }
 0x10c   : > { %2299 = vmatmul.msk.bf16.gmra.mxu0 %vm334_vm2, %v3031_v27  ;;  %v1017_v57 = vadd.f32 %v1000_v29, %v949_v49  ;;  %v934_v3 = vpop.f32.mrf.mxu2  ;;  %v874_v23 = vadd.f32 %v860_v22, %v3205_v21  ;;  %v1505_v27 = vshrl.u32 %v3275_v11, 16  ;;  %v2271_v21 = vrot.slane %v3135_v9, 10 }
 0x10d   : > { %v950_v19 = vadd.f32 %v934_v3, %v873_v33  ;;  %v1399_v33 = vrot.slane %v3160_v46, 6 }
 0x10e   : > { %2269 = vmatmul.msk.bf16.gmra.mxu1 %vm334_vm2, %v2911_v61  ;;  %v3277_v42 = vadd.f32 %v1073_v2, %v1017_v57  ;;  %v1507_v22 = vrot.slane %v1505_v27, 4 }
 0x10f   : > { %v3297_v46 = vsel %vm2696_vm12, %v2271_v21, %v1399_v33  ;;  %v3315_v21 = vpack.c.b16 %v1349_v17, %v3691_v37 }
 0x110   : > { %v1404_v3 = vunpack.c.l.b16 %v3297_v46 }
 0x111   : > { %v1075_v44 = vpop.f32.mrf.mxu0  ;;  %2280 = vmatmul.msk.bf16.gmra.mxu2 %vm334_vm2, %v2964_v51 }
 0x113   : > { %v1002_v49 = vpop.f32.mrf.mxu3  ;;  %v862_v63 = vpop.f32.mrf.mxu1 }
 0x114   : > { %v1018_v55 = vadd.f32 %v1002_v49, %v950_v19  ;;  %v937_v7 = vpop.f32.mrf.mxu2  ;;  %v875_v2 = vadd.f32 %v862_v63, %v3224_v13  ;;  %v1514_v19 = vshll.u32 %v3300_v8, 16 }
 0x115   : > { %v951_v29 = vadd.f32 %v937_v7, %v874_v23  ;;  %v1511_v23 = vor.u32 %v1510_v10, %v1507_v22  ;;  %v3330_v22 = vpack.c.b16 %v1404_v3, %v1103_v31  ;;  %v1456_v10 = vunpack.c.l.b16 %v3275_v11 }
 0x116   : > { %v3302_v57 = vadd.f32 %v1075_v44, %v1018_v55  ;;  %v2412_v55 = vld [vmem:[%s3626_s1 + $0xb8] sm:$0xff] }
 0x117   : > { %1945 = vmatpush.bf16.msra.mxu3 %v2412_v55 }
 0x118   : > { %2290 = vmatmul.msk.bf16.gmra.mxu3 %vm334_vm2, %v3059_v56 }
 0x119   : > { %v1078_v13 = vpop.f32.mrf.mxu0 }
 0x11b   : > { %v1005_v44 = vpop.f32.mrf.mxu3  ;;  %v865_v33 = vpop.f32.mrf.mxu1 }
 0x11c   : > { %2300 = vmatmul.msk.bf16.gmra.mxu0 %vm334_vm2, %v3071_v48  ;;  %v1019_v56 = vadd.f32 %v1005_v44, %v951_v29  ;;  %v939_v49 = vpop.f32.mrf.mxu2  ;;  %v876_v63 = vadd.f32 %v865_v33, %v3239_v12  ;;  %v1512_v48 = vrot.slane %v1511_v23, 4  ;;  %v1516_v29 = vrot.slane %v1514_v19, 5 }
 0x11d   : > { %v952_v7 = vadd.f32 %v939_v49, %v875_v2 }
 0x11e   : > { %2270 = vmatmul.msk.bf16.gmra.mxu1 %vm334_vm2, %v3315_v21  ;;  %v3336_v12 = vadd.f32 %v1078_v13, %v1019_v56  ;;  %v1517_v31 = vsel %vm2538_vm3, %v1512_v48, %v1516_v29  ;;  %v3692_v13 = vunpack.c.l.b16 %v3135_v9 }
 0x11f   : > { %v3350_v33 = vunpack.c.l.b16 %v1517_v31 }
 0x120   : > { %v1457_v44 = vpack.c.b16 %v1456_v10, %v3692_v13 }
 0x121   : > { %v1080_v2 = vpop.f32.mrf.mxu0  ;;  %2281 = vmatmul.msk.bf16.gmra.mxu2 %vm334_vm2, %v3330_v22  ;;  %v1522_v48 = vpack.c.b16 %v3350_v33, %v3207_v25 }
 0x123   : > { %v1007_v23 = vpop.f32.mrf.mxu3  ;;  %v867_v26 = vpop.f32.mrf.mxu1 }
 0x124   : > { %v1020_v37 = vadd.f32 %v1007_v23, %v952_v7  ;;  %v942_v56 = vpop.f32.mrf.mxu2  ;;  %v877_v49 = vadd.f32 %v867_v26, %v3244_v15 }
 0x125   : > { %v953_v55 = vadd.f32 %v942_v56, %v876_v63 }
 0x126   : > { %v3353_v41 = vadd.f32 %v1080_v2, %v1020_v37 }
 0x128   : > { %2291 = vmatmul.msk.bf16.gmra.mxu3 %vm334_vm2, %v1457_v44 }
 0x129   : > { %v1083_v29 = vpop.f32.mrf.mxu0 }
 0x12b   : > { %v1010_v7 = vpop.f32.mrf.mxu3  ;;  %v1135_v45 = vpop.f32.mrf.mxu1 }
 0x12c   : > { %2301 = vmatmul.msk.bf16.gmra.mxu0 %vm334_vm2, %v1522_v48  ;;  %v1021_v9 = vadd.f32 %v1010_v7, %v953_v55  ;;  %v944_v23 = vpop.f32.mrf.mxu2  ;;  %v1155_v31 = vadd.f32 %v1135_v45, %v3253_v50 }
 0x12d   : > { %v954_v13 = vadd.f32 %v944_v23, %v877_v49 }
 0x12e   : > { %2309 = vmatmul.msk.bf16.vlgmr.msrb.gmra.mxu1 %vm334_vm2, %v3010_v59  ;;  %v3362_v15 = vadd.f32 %v1083_v29, %v1021_v9 }
 0x131   : > { %v1085_v63 = vpop.f32.mrf.mxu0  ;;  %2319 = vmatmul.msk.bf16.vlgmr.msrb.gmra.mxu2 %vm334_vm2, %v3018_v4 }
 0x133   : > { %v1012_v25 = vpop.f32.mrf.mxu3  ;;  %v1137_v2 = vpop.f32.mrf.mxu1 }
 0x134   : > { %v1022_v26 = vadd.f32 %v1012_v25, %v954_v13  ;;  %v1187_v37 = vpop.f32.mrf.mxu2  ;;  %v1156_v44 = vadd.f32 %v1137_v2, %v3263_v39  ;;  %v1626_v25 = vrot.slane %v1508_v16, 6  ;;  %v1632_v16 = vrot.slane %v1514_v19, 6 }
 0x135   : > { %v1207_v56 = vadd.f32 %v1187_v37, %v1155_v31 }
 0x136   : > { %v3367_v55 = vadd.f32 %v1085_v63, %v1022_v26 }
 0x138   : > { %2330 = vmatmul.msk.bf16.vlgmr.msrb.gmra.mxu3 %vm334_vm2, %v3120_v35 }
 0x139   : > { %v1308_v50 = vpop.f32.mrf.mxu0 }
 0x13b   : > { %v1252_v59 = vpop.f32.mrf.mxu3  ;;  %v1140_v49 = vpop.f32.mrf.mxu1 }
 0x13c   : > { %2340 = vmatmul.msk.bf16.vlgmr.msrb.gmra.mxu0 %vm334_vm2, %v2833_v28  ;;  %v1272_v48 = vadd.f32 %v1252_v59, %v1207_v56  ;;  %v1189_v4 = vpop.f32.mrf.mxu2  ;;  %v1157_v29 = vadd.f32 %v1140_v49, %v3277_v42  ;;  %v2302_v59 = vrot.slane %v3275_v11, 9  ;;  %v1572_v49 = vrot.slane %v3300_v8, 5 }
 0x13d   : > { %v1208_v7 = vadd.f32 %v1189_v4, %v1156_v44 }
 0x13e   : > { %2310 = vmatmul.msk.bf16.gmra.mxu1 %vm334_vm2, %v3040_v18  ;;  %v3376_v39 = vadd.f32 %v1308_v50, %v1272_v48  ;;  %v1625_v18 = vrot.slane %v1505_v27, 5 }
 0x141   : > { %v1310_v45 = vpop.f32.mrf.mxu0  ;;  %2320 = vmatmul.msk.bf16.gmra.mxu2 %vm334_vm2, %v2986_v24  ;;  %v1629_v24 = vshrl.u32 %v3300_v8, 16 }
 0x143   : > { %v1254_v35 = vpop.f32.mrf.mxu3  ;;  %v1142_v9 = vpop.f32.mrf.mxu1  ;;  %v1631_v27 = vrot.slane %v1629_v24, 5 }
 0x144   : > { %v1273_v23 = vadd.f32 %v1254_v35, %v1208_v7  ;;  %v1192_v31 = vpop.f32.mrf.mxu2  ;;  %v1158_v28 = vadd.f32 %v1142_v9, %v3302_v57 }
 0x145   : > { %v1209_v13 = vadd.f32 %v1192_v31, %v1157_v29  ;;  %v1633_v48 = vor.u32 %v1632_v16, %v1631_v27 }
 0x146   : > { %v3381_v63 = vadd.f32 %v1310_v45, %v1273_v23 }
 0x148   : > { %2331 = vmatmul.msk.bf16.gmra.mxu3 %vm334_vm2, %v3141_v1  ;;  %v1627_v1 = vor.u32 %v1626_v25, %v1625_v18 }
 0x149   : > { %v1313_v42 = vpop.f32.mrf.mxu0 }
 0x14b   : > { %v1257_v2 = vpop.f32.mrf.mxu3  ;;  %v1145_v26 = vpop.f32.mrf.mxu1 }
 0x14c   : > { %2341 = vmatmul.msk.bf16.gmra.mxu0 %vm334_vm2, %v2935_v34  ;;  %v1274_v57 = vadd.f32 %v1257_v2, %v1209_v13  ;;  %v1194_v37 = vpop.f32.mrf.mxu2  ;;  %v1159_v44 = vadd.f32 %v1145_v26, %v3336_v12  ;;  %v1628_v12 = vrot.slane %v1627_v1, 4  ;;  %v2323_v13 = vrot.slane %v3275_v11, 10 }
 0x14d   : > { %v1210_v56 = vadd.f32 %v1194_v37, %v1158_v28 }
 0x14e   : > { %2311 = vmatmul.msk.bf16.gmra.mxu1 %vm334_vm2, %v3093_v5  ;;  %v3397_v50 = vadd.f32 %v1313_v42, %v1274_v57  ;;  %v3405_v5 = vsel %vm2647_vm6, %v2302_v59, %v1572_v49  ;;  %v3411_v23 = vsel %vm2691_vm10, %v1628_v12, %v1633_v48  ;;  %v1688_v42 = vrot.slane %v3300_v8, 6 }
 0x14f   : > { %v1577_v9 = vunpack.c.l.b16 %v3405_v5  ;;  %v1638_v28 = vunpack.c.l.b16 %v3411_v23 }
 0x151   : > { %v1315_v34 = vpop.f32.mrf.mxu0  ;;  %2321 = vmatmul.msk.bf16.gmra.mxu2 %vm334_vm2, %v3102_v47  ;;  %v1639_v8 = vpack.c.b16 %v1638_v28, %v1349_v17 }
 0x153   : > { %v1259_v4 = vpop.f32.mrf.mxu3  ;;  %v1147_v29 = vpop.f32.mrf.mxu1 }
 0x154   : > { %v1275_v7 = vadd.f32 %v1259_v4, %v1210_v56  ;;  %v1197_v19 = vpop.f32.mrf.mxu2  ;;  %v1160_v45 = vadd.f32 %v1147_v29, %v3353_v41  ;;  %v3693_v41 = vunpack.c.l.b16 %v3213_v52  ;;  %v3433_v52 = vsel %vm2696_vm12, %v2323_v13, %v1688_v42 }
 0x155   : > { %v1211_v35 = vadd.f32 %v1197_v19, %v1159_v44 }
 0x156   : > { %v3413_v47 = vadd.f32 %v1315_v34, %v1275_v7  ;;  %v1578_v18 = vpack.c.b16 %v1577_v9, %v3693_v41 }
 0x158   : > { %2332 = vmatmul.msk.bf16.gmra.mxu3 %vm334_vm2, %v3182_v30 }
 0x159   : > { %v1318_v31 = vpop.f32.mrf.mxu0 }
 0x15b   : > { %v1262_v25 = vpop.f32.mrf.mxu3  ;;  %v1150_v24 = vpop.f32.mrf.mxu1 }
 0x15c   : > { %2342 = vmatmul.msk.bf16.gmra.mxu0 %vm334_vm2, %v3199_v53  ;;  %v1276_v2 = vadd.f32 %v1262_v25, %v1211_v35  ;;  %v1199_v30 = vpop.f32.mrf.mxu2  ;;  %v1161_v26 = vadd.f32 %v1150_v24, %v3362_v15  ;;  %v1693_v53 = vunpack.c.l.b16 %v3433_v52  ;;  %v3441_v15 = vld [vmem:[%s2484_s27 + $0x58] sm:$0xf] }
 0x15d   : > { %v1212_v57 = vadd.f32 %v1199_v30, %v1160_v45  ;;  %v1745_v27 = vunpack.c.l.b16 %v3441_v15 }
 0x15e   : > { %2312 = vmatmul.msk.bf16.gmra.mxu1 %vm334_vm2, %v1578_v18  ;;  %v3436_v37 = vadd.f32 %v1318_v31, %v1276_v2  ;;  %v1694_v17 = vpack.c.b16 %v1693_v53, %v1404_v3 }
 0x15f   : > { %v1746_v12 = vpack.c.b16 %v1745_v27, %v1456_v10 }
 0x161   : > { %v1320_v44 = vpop.f32.mrf.mxu0  ;;  %2322 = vmatmul.msk.bf16.gmra.mxu2 %vm334_vm2, %v1639_v8 }
 0x163   : > { %v1264_v56 = vpop.f32.mrf.mxu3  ;;  %v1152_v62 = vpop.f32.mrf.mxu1 }
 0x164   : > { %v1277_v1 = vadd.f32 %v1264_v56, %v1212_v57  ;;  %v1202_v16 = vpop.f32.mrf.mxu2  ;;  %v1162_v59 = vadd.f32 %v1152_v62, %v3367_v55  ;;  %v1794_v57 = vshrl.u32 %v3441_v15, 16 }
 0x165   : > { %v1213_v49 = vadd.f32 %v1202_v16, %v1161_v26 }
 0x166   : > { %v3449_v34 = vadd.f32 %v1320_v44, %v1277_v1  ;;  %v1796_v62 = vrot.slane %v1794_v57, 4 }
 0x168   : > { %2333 = vmatmul.msk.bf16.gmra.mxu3 %vm334_vm2, %v1694_v17 }
 0x169   : > { %v1323_v48 = vpop.f32.mrf.mxu0 }
 0x16b   : > { %v1267_v4 = vpop.f32.mrf.mxu3  ;;  %v1369_v29 = vpop.f32.mrf.mxu1 }
 0x16c   : > { %2343 = vmatmul.msk.bf16.gmra.mxu0 %vm334_vm2, %v1746_v12  ;;  %v1278_v46 = vadd.f32 %v1267_v4, %v1213_v49  ;;  %v1204_v3 = vpop.f32.mrf.mxu2  ;;  %v1389_v7 = vadd.f32 %v1369_v29, %v3376_v39 }
 0x16d   : > { %v1214_v19 = vadd.f32 %v1204_v3, %v1162_v59 }
 0x16e   : > { %2350 = vmatmul.msk.bf16.vlgmr.msra.gmra.mxu1 %vm334_vm2, %v2624_v40  ;;  %v3458_v55 = vadd.f32 %v1323_v48, %v1278_v46 }
 0x171   : > { %v1325_v45 = vpop.f32.mrf.mxu0  ;;  %2361 = vmatmul.msk.bf16.vlgmr.msra.gmra.mxu2 %vm334_vm2, %v2841_v36 }
 0x173   : > { %v1269_v11 = vpop.f32.mrf.mxu3  ;;  %v1371_v10 = vpop.f32.mrf.mxu1 }
 0x174   : > { %v1279_v35 = vadd.f32 %v1269_v11, %v1214_v19  ;;  %v1424_v31 = vpop.f32.mrf.mxu2  ;;  %v1390_v13 = vadd.f32 %v1371_v10, %v3381_v63 }
 0x175   : > { %v1444_v42 = vadd.f32 %v1424_v31, %v1389_v7  ;;  %v1914_v7 = vrot.slane %v1794_v57, 5 }
 0x176   : > { %v3463_v41 = vadd.f32 %v1325_v45, %v1279_v35  ;;  %v2354_v45 = vrot.slane %v3441_v15, 9 }
 0x178   : > { %2371 = vmatmul.msk.bf16.vlgmr.msra.gmra.mxu3 %vm334_vm2, %v2905_v6 }
 0x179   : > { %v1541_v39 = vpop.f32.mrf.mxu0 }
 0x17b   : > { %v1476_v40 = vpop.f32.mrf.mxu3  ;;  %v1374_v18 = vpop.f32.mrf.mxu1 }
 0x17c   : > { %2382 = vmatmul.msk.bf16.vlgmr.msra.gmra.mxu0 %vm334_vm2, %v2927_v60  ;;  %v1496_v25 = vadd.f32 %v1476_v40, %v1444_v42  ;;  %v1426_v36 = vpop.f32.mrf.mxu2  ;;  %v1391_v24 = vadd.f32 %v1374_v18, %v3397_v50  ;;  %v1797_v60 = vshll.u32 %v3441_v15, 16 }
 0x17d   : > { %v1445_v2 = vadd.f32 %v1426_v36, %v1390_v13 }
 0x17e   : > { %2351 = vmatmul.msk.bf16.gmra.mxu1 %vm334_vm2, %v2660_v58  ;;  %v3472_v63 = vadd.f32 %v1541_v39, %v1496_v25  ;;  %v1799_v58 = vrot.slane %v1797_v60, 5  ;;  %v1915_v19 = vrot.slane %v1797_v60, 6 }
 0x180   : > { %v1800_v59 = vor.u32 %v1799_v58, %v1796_v62  ;;  %v1916_v39 = vor.u32 %v1915_v19, %v1914_v7 }
 0x181   : > { %v1543_v30 = vpop.f32.mrf.mxu0  ;;  %2362 = vmatmul.msk.bf16.gmra.mxu2 %vm334_vm2, %v2950_v0  ;;  %v195_v0 = vld [vmem:[%s2484_s27 + $0x5c] sm:$0x3]  ;;  %s2388_s27 = sshll.u32 %s3695_s13, 6 }
 0x182   : > { %v1803_v4 = vshll.u32 %v195_v0, 16  ;;  %v1861_v11 = vrot.slane %v195_v0, 5  ;;  %s3575_s23 = scalar_lea.vmem %s3628_s3, %s2388_s27 }
 0x183   : > { %v1478_v6 = vpop.f32.mrf.mxu3  ;;  %v1376_v26 = vpop.f32.mrf.mxu1 }
 0x184   : > { %v1497_v8 = vadd.f32 %v1478_v6, %v1445_v2  ;;  %v1429_v44 = vpop.f32.mrf.mxu2  ;;  %v1392_v50 = vadd.f32 %v1376_v26, %v3413_v47  ;;  %v1805_v46 = vrot.slane %v1803_v4, 5  ;;  %v1921_v18 = vrot.slane %v1803_v4, 6 }
 0x185   : > { %v1446_v56 = vadd.f32 %v1429_v44, %v1391_v24  ;;  %v1862_v25 = vsel %vm2647_vm6, %v2354_v45, %v1861_v11  ;;  %v1917_v2 = vrot.slane %v1916_v39, 4 }
 0x186   : > { %v3479_v1 = vadd.f32 %v1543_v30, %v1497_v8  ;;  %v1866_v32 = vunpack.c.l.b16 %v1862_v25  ;;  %v2375_v8 = vrot.slane %v3441_v15, 10 }
 0x188   : > { %2372 = vmatmul.msk.bf16.gmra.mxu3 %vm334_vm2, %v2911_v61  ;;  %v1801_v61 = vrot.slane %v1800_v59, 4 }
 0x189   : > { %v1546_v17 = vpop.f32.mrf.mxu0 }
 0x18a   : > { %v1806_v35 = vsel %vm2538_vm3, %v1801_v61, %v1805_v46 }
 0x18b   : > { %v1481_v27 = vpop.f32.mrf.mxu3  ;;  %v1379_v16 = vpop.f32.mrf.mxu1 }
 0x18c   : > { %2383 = vmatmul.msk.bf16.gmra.mxu0 %vm334_vm2, %v2964_v51  ;;  %v1498_v49 = vadd.f32 %v1481_v27, %v1446_v56  ;;  %v1431_v12 = vpop.f32.mrf.mxu2  ;;  %v1393_v47 = vadd.f32 %v1379_v16, %v3436_v37  ;;  %v1918_v51 = vshrl.u32 %v195_v0, 16  ;;  %v1977_v56 = vrot.slane %v195_v0, 6 }
 0x18d   : > { %v1447_v48 = vadd.f32 %v1431_v12, %v1392_v50 }
 0x18e   : > { %2352 = vmatmul.msk.bf16.gmra.mxu1 %vm334_vm2, %v3220_v20  ;;  %v3489_v29 = vadd.f32 %v1546_v17, %v1498_v49  ;;  %v1920_v40 = vrot.slane %v1918_v51, 5 }
 0x190   : > { %v1922_v30 = vor.u32 %v1921_v18, %v1920_v40 }
 0x191   : > { %v1548_v3 = vpop.f32.mrf.mxu0  ;;  %2363 = vmatmul.msk.bf16.gmra.mxu2 %vm334_vm2, %v3232_v14  ;;  %v1810_v14 = vunpack.c.l.b16 %v1806_v35 }
 0x192   : > { %v1923_v50 = vsel %vm2691_vm10, %v1917_v2, %v1922_v30 }
 0x193   : > { %v1483_v37 = vpop.f32.mrf.mxu3  ;;  %v1381_v10 = vpop.f32.mrf.mxu1  ;;  %v1811_v6 = vpack.c.b16 %v1810_v14, %v3350_v33  ;;  %v1927_v62 = vunpack.c.l.b16 %v1923_v50 }
 0x194   : > { %v1499_v20 = vadd.f32 %v1483_v37, %v1447_v48  ;;  %v1434_v31 = vpop.f32.mrf.mxu2  ;;  %v1394_v13 = vadd.f32 %v1381_v10, %v3449_v34 }
 0x195   : > { %v1448_v42 = vadd.f32 %v1434_v31, %v1393_v47  ;;  %v1928_v5 = vpack.c.b16 %v1927_v62, %v1638_v28 }
 0x196   : > { %v3499_v36 = vadd.f32 %v1548_v3, %v1499_v20 }
 0x198   : > { %2373 = vmatmul.msk.bf16.gmra.mxu3 %vm334_vm2, %v3315_v21  ;;  %v1867_v21 = vpack.c.b16 %v1866_v32, %v1577_v9 }
 0x199   : > { %v1551_v24 = vpop.f32.mrf.mxu0 }
 0x19b   : > { %v1486_v34 = vpop.f32.mrf.mxu3  ;;  %v1384_v26 = vpop.f32.mrf.mxu1 }
 0x19c   : > { %2384 = vmatmul.msk.bf16.gmra.mxu0 %vm334_vm2, %v3330_v22  ;;  %v1500_v57 = vadd.f32 %v1486_v34, %v1448_v42  ;;  %v1436_v60 = vpop.f32.mrf.mxu2  ;;  %v1395_v38 = vadd.f32 %v1384_v26, %v3458_v55  ;;  %v1978_v55 = vsel %vm2696_vm12, %v2375_v8, %v1977_v56 }
 0x19d   : > { %v1449_v44 = vadd.f32 %v1436_v60, %v1394_v13  ;;  %v1982_v43 = vunpack.c.l.b16 %v1978_v55 }
 0x19e   : > { %2353 = vmatmul.msk.bf16.gmra.mxu1 %vm334_vm2, %v1811_v6  ;;  %v3513_v33 = vadd.f32 %v1551_v24, %v1500_v57 }
 0x19f   : > { %v1983_v59 = vpack.c.b16 %v1982_v43, %v1693_v53 }
 0x1a1   : > { %v1553_v22 = vpop.f32.mrf.mxu0  ;;  %2364 = vmatmul.msk.bf16.gmra.mxu2 %vm334_vm2, %v1867_v21 }
 0x1a3   : > { %v1488_v15 = vpop.f32.mrf.mxu3  ;;  %v1386_v58 = vpop.f32.mrf.mxu1 }
 0x1a4   : > { %v1501_v17 = vadd.f32 %v1488_v15, %v1449_v44  ;;  %v1439_v9 = vpop.f32.mrf.mxu2  ;;  %v1396_v0 = vadd.f32 %v1386_v58, %v3463_v41 }
 0x1a5   : > { %v1450_v27 = vadd.f32 %v1439_v9, %v1395_v38 }
 0x1a6   : > { %v3521_v16 = vadd.f32 %v1553_v22, %v1501_v17 }
 0x1a8   : > { %2374 = vmatmul.msk.bf16.gmra.mxu3 %vm334_vm2, %v1928_v5 }
 0x1a9   : > { %v1556_v54 = vpop.f32.mrf.mxu0 }
 0x1ab   : > { %v1491_v49 = vpop.f32.mrf.mxu3  ;;  %v1597_v12 = vpop.f32.mrf.mxu1 }
 0x1ac   : > { %2385 = vmatmul.msk.bf16.gmra.mxu0 %vm334_vm2, %v1983_v59  ;;  %v1502_v47 = vadd.f32 %v1491_v49, %v1450_v27  ;;  %v1441_v23 = vpop.f32.mrf.mxu2  ;;  %v1617_v57 = vadd.f32 %v1597_v12, %v3472_v63 }
 0x1ad   : > { %v1451_v28 = vadd.f32 %v1441_v23, %v1396_v0 }
 0x1ae   : > { %v3527_v48 = vadd.f32 %v1556_v54, %v1502_v47 }
 0x1b1   : > { %v1558_v4 = vpop.f32.mrf.mxu0 }
 0x1b3   : > { %v1493_v41 = vpop.f32.mrf.mxu3  ;;  %v1599_v61 = vpop.f32.mrf.mxu1 }
 0x1b4   : > { %v1503_v46 = vadd.f32 %v1493_v41, %v1451_v28  ;;  %v1658_v3 = vpop.f32.mrf.mxu2  ;;  %v1618_v56 = vadd.f32 %v1599_v61, %v3479_v1  ;;  %v3570_v1 = vld [vmem:[%s3627_s2] ss:$0 sm:$0xff] }
 0x1b5   : > { %v1678_v8 = vadd.f32 %v1658_v3, %v1617_v57 }
 0x1b6   : > { %v3529_v7 = vadd.f32 %v1558_v4, %v1503_v46 }
 0x1b9   : > { %v1765_v19 = vpop.f32.mrf.mxu0 }
 0x1bb   : > { %v1713_v52 = vpop.f32.mrf.mxu3  ;;  %v1602_v53 = vpop.f32.mrf.mxu1 }
 0x1bc   : > { %v1660_v51 = vpop.f32.mrf.mxu2  ;;  %v1733_v21 = vadd.f32 %v1713_v52, %v1678_v8  ;;  %v1619_v9 = vadd.f32 %v1602_v53, %v3489_v29 }
 0x1bd   : > { %v1679_v55 = vadd.f32 %v1660_v51, %v1618_v56 }
 0x1be   : > { %v1785_v15 = vadd.f32 %v1765_v19, %v1733_v21 }
 0x1c1   : > { %v1767_v45 = vpop.f32.mrf.mxu0 }
 0x1c3   : > { %v1715_v11 = vpop.f32.mrf.mxu3  ;;  %v1604_v37 = vpop.f32.mrf.mxu1 }
 0x1c4   : > { %v1663_v10 = vpop.f32.mrf.mxu2  ;;  %v1734_v63 = vadd.f32 %v1715_v11, %v1679_v55  ;;  %v1620_v61 = vadd.f32 %v1604_v37, %v3499_v36 }
 0x1c5   : > { %v1680_v59 = vadd.f32 %v1663_v10, %v1619_v9 }
 0x1c6   : > { %v1786_v49 = vadd.f32 %v1767_v45, %v1734_v63 }
 0x1c9   : > { %v1770_v35 = vpop.f32.mrf.mxu0 }
 0x1cb   : > { %v1718_v20 = vpop.f32.mrf.mxu3  ;;  %v3531_v31 = vpop.f32.mrf.mxu1 }
 0x1cc   : > { %v1665_v13 = vpop.f32.mrf.mxu2  ;;  %v1735_v29 = vadd.f32 %v1718_v20, %v1680_v59  ;;  %v1621_v8 = vadd.f32 %v3531_v31, %v3513_v33 }
 0x1cd   : > { %v1681_v19 = vadd.f32 %v1665_v13, %v1620_v61 }
 0x1ce   : > { %v1787_v53 = vadd.f32 %v1770_v35, %v1735_v29 }
 0x1d1   : > { %v3533_v42 = vpop.f32.mrf.mxu0 }
 0x1d3   : > { %v1720_v39 = vpop.f32.mrf.mxu3  ;;  %v3535_v40 = vpop.f32.mrf.mxu1 }
 0x1d4   : > { %v1668_v18 = vpop.f32.mrf.mxu2  ;;  %v1736_v10 = vadd.f32 %v1720_v39, %v1681_v19  ;;  %v1622_v33 = vadd.f32 %v3535_v40, %v3521_v16 }
 0x1d5   : > { %v1682_v37 = vadd.f32 %v1668_v18, %v1621_v8 }
 0x1d6   : > { %v1788_v13 = vadd.f32 %v3533_v42, %v1736_v10 }
 0x1d9   : > { %v3537_v14 = vpop.f32.mrf.mxu0 }
 0x1db   : > { %v3539_v25 = vpop.f32.mrf.mxu3  ;;  %v3541_v24 = vpop.f32.mrf.mxu1 }
 0x1dc   : > { %v3543_v32 = vpop.f32.mrf.mxu2  ;;  %v1737_v39 = vadd.f32 %v3539_v25, %v1682_v37  ;;  %v1623_v16 = vadd.f32 %v3541_v24, %v3527_v48 }
 0x1dd   : > { %v1683_v18 = vadd.f32 %v3543_v32, %v1622_v33 }
 0x1de   : > { %v1789_v63 = vadd.f32 %v3537_v14, %v1737_v39 }
 0x1e1   : > { %v3545_v2 = vpop.f32.mrf.mxu0 }
 0x1e3   : > { %v3547_v30 = vpop.f32.mrf.mxu3  ;;  %v3549_v6 = vpop.f32.mrf.mxu1 }
 0x1e4   : > { %v3551_v34 = vpop.f32.mrf.mxu2  ;;  %v1624_v48 = vadd.f32 %v3549_v6, %v3529_v7 }
 0x1e5   : > { %v1684_v32 = vadd.f32 %v3551_v34, %v1623_v16 }
 0x1e9   : > { %v3553_v26 = vpop.f32.mrf.mxu0 }
 0x1eb   : > { %v3556_v60 = vpop.f32.mrf.mxu3  ;;  %v1830_v38 = vpop.f32.mrf.mxu1 }
 0x1ec   : > { %v3558_v44 = vpop.f32.mrf.mxu2  ;;  %v1850_v17 = vadd.f32 %v1830_v38, %v1785_v15 }
 0x1ed   : > { %v1685_v34 = vadd.f32 %v3558_v44, %v1624_v48 }
 0x1f1   : > { %v3560_v50 = vpop.f32.mrf.mxu0 }
 0x1f3   : > { %v3563_v62 = vpop.f32.mrf.mxu3  ;;  %v1832_v22 = vpop.f32.mrf.mxu1 }
 0x1f4   : > { %v1886_v58 = vpop.f32.mrf.mxu2  ;;  %v1851_v23 = vadd.f32 %v1832_v22, %v1786_v49  ;;  %v1740_v19 = vadd.f32 %v3563_v62, %v1685_v34 }
 0x1f5   : > { %v1906_v5 = vadd.f32 %v1886_v58, %v1850_v17 }
 0x1f6   : > { %v1792_v44 = vadd.f32 %v3560_v50, %v1740_v19 }
 0x1f9   : > { %v2002_v43 = vpop.f32.mrf.mxu0 }
 0x1fb   : > { %v1947_v0 = vpop.f32.mrf.mxu3  ;;  %v1835_v27 = vpop.f32.mrf.mxu1 }
 0x1fc   : > { %v1967_v54 = vadd.f32 %v1947_v0, %v1906_v5  ;;  %v1888_v12 = vpop.f32.mrf.mxu2  ;;  %v1852_v11 = vadd.f32 %v1835_v27, %v1787_v53  ;;  %v1738_v0 = vadd.f32 %v3547_v30, %v1683_v18  ;;  %v1739_v30 = vadd.f32 %v3556_v60, %v1684_v32 }
 0x1fd   : > { %v1907_v4 = vadd.f32 %v1888_v12, %v1851_v23 }
 0x1fe   : > { %v2022_v47 = vadd.f32 %v2002_v43, %v1967_v54  ;;  %v1790_v49 = vadd.f32 %v3545_v2, %v1738_v0  ;;  %v1791_v61 = vadd.f32 %v3553_v26, %v1739_v30 }
 0x200   : > { %v2034_v28 = vadd.f32 %v3570_v1, %v2022_v47 }
 0x201   : > { %v2004_v41 = vpop.f32.mrf.mxu0 }
 0x202   : > { %2043 = vst.msk [vmem:[%s3575_s23] sm:$0xff] %vm2042_vm13, %v2034_v28 }
 0x203   : > { %v1949_v46 = vpop.f32.mrf.mxu3  ;;  %v1837_v3 = vpop.f32.mrf.mxu1 }
 0x204   : > { %v1968_v52 = vadd.f32 %v1949_v46, %v1907_v4  ;;  %v1891_v51 = vpop.f32.mrf.mxu2  ;;  %v1853_v55 = vadd.f32 %v1837_v3, %v1788_v13 }
 0x205   : > { %v1908_v57 = vadd.f32 %v1891_v51, %v1852_v11 }
 0x206   : > { %v2023_v45 = vadd.f32 %v2004_v41, %v1968_v52 }
 0x208   : > { %v2035_v20 = vadd.f32 %v3570_v1, %v2023_v45 }
 0x209   : > { %v2007_v38 = vpop.f32.mrf.mxu0 }
 0x20a   : > { %2044 = vst.msk [vmem:[%s3575_s23 + $0x8] sm:$0xff] %vm2042_vm13, %v2035_v20 }
 0x20b   : > { %v1952_v36 = vpop.f32.mrf.mxu3  ;;  %v1840_v56 = vpop.f32.mrf.mxu1 }
 0x20c   : > { %v1969_v21 = vadd.f32 %v1952_v36, %v1908_v57  ;;  %v1893_v35 = vpop.f32.mrf.mxu2  ;;  %v1854_v9 = vadd.f32 %v1840_v56, %v1789_v63 }
 0x20d   : > { %v1909_v58 = vadd.f32 %v1893_v35, %v1853_v55 }
 0x20e   : > { %v2024_v22 = vadd.f32 %v2007_v38, %v1969_v21 }
 0x210   : > { %v2036_v15 = vadd.f32 %v3570_v1, %v2024_v22 }
 0x211   : > { %v2009_v17 = vpop.f32.mrf.mxu0 }
 0x212   : > { %2045 = vst.msk [vmem:[%s3575_s23 + $0x10] sm:$0xff] %vm2042_vm13, %v2036_v15 }
 0x213   : > { %v1954_v31 = vpop.f32.mrf.mxu3  ;;  %v1842_v25 = vpop.f32.mrf.mxu1 }
 0x214   : > { %v1970_v42 = vadd.f32 %v1954_v31, %v1909_v58  ;;  %v1896_v5 = vpop.f32.mrf.mxu2  ;;  %v1855_v23 = vadd.f32 %v1842_v25, %v1790_v49 }
 0x215   : > { %v1910_v59 = vadd.f32 %v1896_v5, %v1854_v9 }
 0x216   : > { %v2025_v43 = vadd.f32 %v2009_v17, %v1970_v42 }
 0x218   : > { %v2037_v27 = vadd.f32 %v3570_v1, %v2025_v43 }
 0x219   : > { %v2012_v54 = vpop.f32.mrf.mxu0 }
 0x21a   : > { %2046 = vst.msk [vmem:[%s3575_s23 + $0x18] sm:$0xff] %vm2042_vm13, %v2037_v27 }
 0x21b   : > { %v1957_v40 = vpop.f32.mrf.mxu3  ;;  %v1845_v4 = vpop.f32.mrf.mxu1 }
 0x21c   : > { %v1971_v14 = vadd.f32 %v1957_v40, %v1910_v59  ;;  %v1898_v12 = vpop.f32.mrf.mxu2  ;;  %v1856_v60 = vadd.f32 %v1845_v4, %v1791_v61 }
 0x21d   : > { %v1911_v28 = vadd.f32 %v1898_v12, %v1855_v23 }
 0x21e   : > { %v2026_v47 = vadd.f32 %v2012_v54, %v1971_v14 }
 0x220   : > { %v2038_v29 = vadd.f32 %v3570_v1, %v2026_v47 }
 0x221   : > { %v2014_v41 = vpop.f32.mrf.mxu0 }
 0x222   : > { %2047 = vst.msk [vmem:[%s3575_s23 + $0x20] sm:$0xff] %vm2042_vm13, %v2038_v29 }
 0x223   : > { %v1959_v24 = vpop.f32.mrf.mxu3  ;;  %v1847_v7 = vpop.f32.mrf.mxu1 }
 0x224   : > { %v1972_v2 = vadd.f32 %v1959_v24, %v1911_v28  ;;  %v1901_v46 = vpop.f32.mrf.mxu2  ;;  %v1857_v10 = vadd.f32 %v1847_v7, %v1792_v44 }
 0x225   : > { %v1912_v53 = vadd.f32 %v1901_v46, %v1856_v60 }
 0x226   : > { %v2027_v3 = vadd.f32 %v2014_v41, %v1972_v2 }
 0x228   : > { %v2039_v52 = vadd.f32 %v3570_v1, %v2027_v3 }
 0x229   : > { %v2017_v6 = vpop.f32.mrf.mxu0 }
 0x22a   : > { %2048 = vst.msk [vmem:[%s3575_s23 + $0x28] sm:$0xff] %vm2042_vm13, %v2039_v52 }
 0x22b   : > { %v1962_v51 = vpop.f32.mrf.mxu3 }
 0x22c   : > { %v1973_v45 = vadd.f32 %v1962_v51, %v1912_v53  ;;  %v1903_v11 = vpop.f32.mrf.mxu2 }
 0x22d   : > { %v1913_v57 = vadd.f32 %v1903_v11, %v1857_v10 }
 0x22e   : > { %v2028_v26 = vadd.f32 %v2017_v6, %v1973_v45 }
 0x230   : > { %v2040_v20 = vadd.f32 %v3570_v1, %v2028_v26 }
 0x231   : > { %v2019_v8 = vpop.f32.mrf.mxu0 }
 0x232   : > { %2049 = vst.msk [vmem:[%s3575_s23 + $0x30] sm:$0xff] %vm2042_vm13, %v2040_v20 }
 0x233   : > { %v1964_v62 = vpop.f32.mrf.mxu3 }
 0x234   : > { %v1974_v38 = vadd.f32 %v1964_v62, %v1913_v57 }
 0x236   : > { %v2029_v36 = vadd.f32 %v2019_v8, %v1974_v38 }
 0x238   : > { %v2041_v37 = vadd.f32 %v3570_v1, %v2029_v36 }
 0x23a   : > { %2050 = vst.msk [vmem:[%s3575_s23 + $0x38] sm:$0xff] %vm2042_vm13, %v2041_v37 }
 0x23b PF: > { %s13_s12 = sadd.s32 1, %s2433_s12  }
 0x23c   : > { %p10_p4 = scmp.ge.s32.totalorder %s13_s12, 4  }
 0x23e   :  { %12 = sbr.rel (!%p10_p4) target bundleno = 1 (0x1), region = 86 }

// kernel: styleganblock_forward.6
= control target key start
LH: loop header
LB: loop body
LE: loop exit
PB: predicated region body
PF: predicated region fallthrough
CT: control target
= control target key end

     0   :  { %s3430_s21 = smov 0   ;;  %s5334_s0 = inlined_call_operand.vmem [shape: bf16[2,18,18,4], index: 0, kind: input, shape index: {}]   ;;  %s5335_s1 = inlined_call_operand.vmem [shape: bf16[3,3,4,32], index: 1, kind: input, shape index: {}]   ;;  %s5336_s2 = inlined_call_operand.vmem [shape: f32[1,32], index: 2, kind: input, shape index: {}]   ;;  %s5337_s3 = inlined_call_operand.vmem [shape: f32[1,256,32], index: 3, kind: input, shape index: {}]   ;;  %s5338_s4 = inlined_call_operand.vmem [shape: f32[2,256,32], index: 4, kind: input, shape index: {}]   ;;  %s5339_s5 = inlined_call_operand.vmem [shape: f32[2,256,32], index: 5, kind: input, shape index: {}]   ;;  %s5340_s6 = inlined_call_operand.vmem [shape: bf16[2,256,32], index: 6, kind: output, shape index: {}]  }
   0x1 LB: > { %s3019_s22 = sadd.s32 4294967295, %s3392_s21   ;;  %p3023_p0 = scmp.ge.s32.totalorder %s3392_s21, 1  ;;  %s3392_s21 = sphi %s3430_s21, %s16_s21  }
   0x2   : > { %p232_p1 = scmp.lt.s32.totalorder %s3392_s21, 3 }
   0x4   : > { %p233_p2 = pnand %p3023_p0, %p232_p1 }
   0x6   : > { %236 = sbr.rel (%p233_p2) target bundleno = 927 (0x39f), region = 44 }
   0xb   : > { %v3031_v0 = vld [vmem:[%s5335_s1 + $0x2] sm:$0x3]  ;;  %vm834_vm0 = vcmask 1041408   ;;  %p272_p3 = scmp.lt.s32.totalorder %s3019_s22, 1  ;;  %v3144_v2 = vld [vmem:[%s5335_s1 + $0x4] sm:$0x3] }
   0xc   : > { %v836_v1 = vsel %vm834_vm0, %v3031_v0, 0  ;;  %v1377_v3 = vsel %vm834_vm0, %v3144_v2, 0  ;;  %v3161_v4 = vld [vmem:[%s5335_s1 + $0x6] sm:$0x3]  ;;  %v347_v5 = vld [vmem:[%s5335_s1] sm:$0x3] }
   0xd   : > { %3296 = vmatpush.bf16.msra.mxu1 %v836_v1  ;;  %3297 = vmatpush.bf16.msra.mxu2 %v836_v1  ;;  %s5480_s22 = smov (!%p272_p3, %s3019_s22), 1  ;;  %v3182_v6 = vld [vmem:[%s5335_s1 + $0x8] sm:$0x3]  ;;  %v1511_v7 = vsel %vm834_vm0, %v3161_v4, 0  ;;  %v1056_v8 = vsel %vm834_vm0, %v347_v5, 0  ;;  %vm785_vm4 = vcmask 31744  }
   0xe   : > { %3298 = vmatpush.bf16.msra.mxu3 %v836_v1  ;;  %845 = vmatpush.bf16.msra.mxu0 %v836_v1  ;;  %s3299_s9 = smul.u32 216, %s5480_s22  ;;  %v1667_v9 = vsel %vm834_vm0, %v3182_v6, 0  ;;  %vm348_vm1 = vsmask.f32 3328  ;;  %vm349_vm2 = vsmask.f32 7440 }
   0xf   : > { %vm3491_vm3 = vmor %vm348_vm1, %vm349_vm2  ;;  %vm1163_vm5 = vcmask 1042432   ;;  %vm1164_vm6 = vcmask 1046532   ;;  %vm2460_vm8 = vcmask 261120   ;;  %s3275_s23 = sshll.u32 %s5480_s22, 8  ;;  %s3277_s30 = sshll.u32 %s5480_s22, 7  ;;  %vm2907_vm13 = vcmask 257024  }
  0x10   : > { %s3464_s12 = scalar_lea.vmem %s5334_s0, %s3299_s9  ;;  %vm3794_vm7 = vmor %vm1163_vm5, %vm1164_vm6  ;;  %s5066_s26 = scalar_lea.vmem %s5339_s5, %s3275_s23 }
  0x11   : > { %1386 = vmatpush.bf16.msrb.mxu2 %v1377_v3  ;;  %1065 = vmatpush.bf16.msrb.mxu1 %v1056_v8  ;;  %v3467_v10 = vld [vmem:[%s3464_s12 + $0x30] sm:$0xf]  ;;  %v3470_v11 = vld [vmem:[%s3464_s12 + $0x34] sm:$0xf]  ;;  %v3473_v12 = vld [vmem:[%s3464_s12 + $0x38] sm:$0x1]  ;;  %s5076_s29 = scalar_lea.vmem %s5338_s4, %s3275_s23  ;;  %s5213_s8 = scalar_lea.vmem %s5340_s6, %s3277_s30 }
  0x12   : > { %1520 = vmatpush.bf16.msrb.mxu3 %v1511_v7  ;;  %1676 = vmatpush.bf16.msrb.mxu0 %v1667_v9  ;;  %v448_v13 = vshrl.u32 %v3467_v10, 16  ;;  %v451_v14 = vshll.u32 %v3467_v10, 16  ;;  %v457_v15 = vshll.u32 %v3470_v11, 16  ;;  %v461_v16 = vshrl.u32 %v3470_v11, 16  ;;  %v317_v17 = vld [vmem:[%s3464_s12 + $0x60] sm:$0xf] }
  0x13   : > { %v467_v18 = vshll.u32 %v3473_v12, 16  ;;  %v3482_v19 = vld [vmem:[%s3464_s12 + $0x64] sm:$0xf]  ;;  %v319_v20 = vld [vmem:[%s3464_s12 + $0x68] sm:$0x1]  ;;  %v544_v21 = vshrl.u32 %v317_v17, 16 }
  0x14   : > { %v450_v22 = vrot.slane %v448_v13, 4  ;;  %v453_v23 = vrot.slane %v451_v14, 5  ;;  %v459_v24 = vrot.slane %v457_v15, 5  ;;  %v463_v25 = vrot.slane %v461_v16, 4  ;;  %v329_v26 = vld [vmem:[%s3464_s12 + $0x90] sm:$0xf] }
  0x15   : > { %v469_v27 = vrot.slane %v467_v18, 5  ;;  %v546_v28 = vrot.slane %v544_v21, 4  ;;  %v547_v29 = vshll.u32 %v317_v17, 16  ;;  %v553_v30 = vshll.u32 %v3482_v19, 16  ;;  %v330_v35 = vld [vmem:[%s3464_s12 + $0x94] sm:$0xf] }
  0x16   : > { %v454_v31 = vor.u32 %v453_v23, %v450_v22  ;;  %v464_v32 = vor.u32 %v463_v25, %v459_v24  ;;  %v557_v33 = vshrl.u32 %v3482_v19, 16  ;;  %v563_v34 = vshll.u32 %v319_v20, 16  ;;  %v331_v45 = vld [vmem:[%s3464_s12 + $0x98] sm:$0x1]  ;;  %v3501_v61 = vld [vmem:[%s3464_s12] sm:$0xf] }
  0x17   : > { %v549_v37 = vrot.slane %v547_v29, 5  ;;  %v555_v38 = vrot.slane %v553_v30, 5  ;;  %v640_v39 = vshrl.u32 %v329_v26, 16  ;;  %v643_v47 = vshll.u32 %v329_v26, 16  ;;  %v3508_v1 = vld [vmem:[%s3464_s12 + $0x4] sm:$0xf] }
  0x18   : > { %v455_v40 = vrot.slane %v454_v31, 4  ;;  %v465_v41 = vrot.slane %v464_v32, 4  ;;  %v559_v42 = vrot.slane %v557_v33, 4  ;;  %v565_v43 = vrot.slane %v563_v34, 5  ;;  %v3511_v2 = vld [vmem:[%s3464_s12 + $0x8] sm:$0x1] }
  0x19   : > { %v550_v44 = vor.u32 %v549_v37, %v546_v28  ;;  %v642_v46 = vrot.slane %v640_v39, 4  ;;  %v649_v48 = vshll.u32 %v330_v35, 16  ;;  %v653_v52 = vshrl.u32 %v330_v35, 16  ;;  %v3527_v23 = vld [vmem:[%s3464_s12 + $0x3c] sm:$0xf] }
  0x1a   : > { %v460_v49 = vsel %vm3491_vm3, %v455_v40, %v459_v24  ;;  %v470_v50 = vsel %vm3491_vm3, %v465_v41, %v469_v27  ;;  %v560_v51 = vor.u32 %v559_v42, %v555_v38  ;;  %v645_v56 = vrot.slane %v643_v47, 5  ;;  %v3530_v24 = vld [vmem:[%s3464_s12 + $0x40] sm:$0xf]  ;;  %v3535_v29 = vld [vmem:[%s3464_s12 + $0x44] sm:$0x1] }
  0x1b   : > { %v745_v53 = vunpack.c.l.b16 %v460_v49  ;;  %v746_v54 = vunpack.c.l.b16 %v470_v50  ;;  %v551_v55 = vrot.slane %v550_v44, 4  ;;  %v651_v58 = vrot.slane %v649_v48, 5  ;;  %v3550_v47 = vld [vmem:[%s3464_s12 + $0x70] sm:$0xf] }
  0x1c   : > { %v561_v57 = vrot.slane %v560_v51, 4  ;;  %v655_v59 = vrot.slane %v653_v52, 4  ;;  %v659_v60 = vshll.u32 %v331_v45, 16  ;;  %v646_v0 = vor.u32 %v645_v56, %v642_v46  ;;  %v3557_v51 = vld [vmem:[%s3464_s12 + $0x74] sm:$0x1] }
  0x1d   : > { %v3503_v62 = vpack.c.b16 %v746_v54, %v745_v53  ;;  %v556_v63 = vsel %vm3491_vm3, %v551_v55, %v555_v38  ;;  %v352_v9 = vshrl.u32 %v3501_v61, 16  ;;  %v355_v13 = vshll.u32 %v3501_v61, 16  ;;  %v3543_v38 = vld [vmem:[%s3464_s12 + $0x6c] sm:$0xf] }
  0x1e   : > { %v566_v3 = vsel %vm3491_vm3, %v561_v57, %v565_v43  ;;  %v753_v4 = vunpack.c.l.b16 %v556_v63  ;;  %v656_v5 = vor.u32 %v655_v59, %v651_v58  ;;  %v661_v6 = vrot.slane %v659_v60, 5 }
  0x1f   : > { %3036 = vmatmul.msk.bf16.vlgmr.msra.gmra.mxu1 %vm785_vm4, %v3503_v62  ;;  %v754_v7 = vunpack.c.l.b16 %v566_v3  ;;  %v647_v8 = vrot.slane %v646_v0, 4  ;;  %v361_v15 = vshll.u32 %v3508_v1, 16  ;;  %v365_v16 = vshrl.u32 %v3508_v1, 16 }
  0x20   : > { %v657_v14 = vrot.slane %v656_v5, 4  ;;  %v371_v17 = vshll.u32 %v3511_v2, 16  ;;  %v354_v21 = vrot.slane %v352_v9, 4  ;;  %v357_v22 = vrot.slane %v355_v13, 5  ;;  %v332_v5 = vld [vmem:[%s3464_s12 + $0x9c] sm:$0xf] }
  0x21   : > { %v3522_v18 = vpack.c.b16 %v754_v7, %v753_v4  ;;  %v652_v20 = vsel %vm3491_vm3, %v647_v8, %v651_v58  ;;  %v363_v27 = vrot.slane %v361_v15, 5  ;;  %v367_v28 = vrot.slane %v365_v16, 4  ;;  %v333_v9 = vld [vmem:[%s3464_s12 + $0xa0] sm:$0xf] }
  0x22   : > { %v662_v25 = vsel %vm3491_vm3, %v657_v14, %v661_v6  ;;  %v761_v26 = vunpack.c.l.b16 %v652_v20  ;;  %v358_v31 = vor.u32 %v357_v22, %v354_v21  ;;  %v373_v32 = vrot.slane %v371_v17, 5  ;;  %v334_v17 = vld [vmem:[%s3464_s12 + $0xa4] sm:$0x1] }
  0x23   : > { %5383 = vst [vmem:[#allocation2_spill] sm:$0xff] %v3522_v18  ;;  %3040 = vmatmul.msk.bf16.vlgmr.msra.gmra.mxu2 %vm785_vm4, %v3522_v18  ;;  %v762_v30 = vunpack.c.l.b16 %v662_v25  ;;  %v368_v33 = vor.u32 %v367_v28, %v363_v27  ;;  %v472_v34 = vshrl.u32 %v3527_v23, 16  ;;  %v475_v35 = vshll.u32 %v3527_v23, 16 }
  0x24   : > { %v481_v37 = vshll.u32 %v3530_v24, 16  ;;  %v359_v40 = vrot.slane %v358_v31, 4  ;;  %v485_v41 = vshrl.u32 %v3530_v24, 16  ;;  %v491_v42 = vshll.u32 %v3535_v29, 16 }
  0x25   : > { %v3545_v39 = vpack.c.b16 %v762_v30, %v761_v26  ;;  %v369_v43 = vrot.slane %v368_v33, 4  ;;  %v474_v44 = vrot.slane %v472_v34, 4  ;;  %v477_v45 = vrot.slane %v475_v35, 5  ;;  %v3575_v35 = vld [vmem:[%s3464_s12 + $0xc] sm:$0xf] }
  0x26   : > { %v483_v46 = vrot.slane %v481_v37, 5  ;;  %v364_v48 = vsel %vm3491_vm3, %v359_v40, %v363_v27  ;;  %v487_v49 = vrot.slane %v485_v41, 4  ;;  %v493_v50 = vrot.slane %v491_v42, 5 }
  0x27   : > { %5384 = vst [vmem:[#allocation3_spill] sm:$0xff] %v3545_v39  ;;  %3044 = vmatmul.msk.bf16.vlgmr.msra.gmra.mxu3 %vm785_vm4, %v3545_v39  ;;  %v568_v52 = vshrl.u32 %v3543_v38, 16  ;;  %v374_v53 = vsel %vm3491_vm3, %v369_v43, %v373_v32  ;;  %v737_v54 = vunpack.c.l.b16 %v364_v48  ;;  %v478_v55 = vor.u32 %v477_v45, %v474_v44  ;;  %v3582_v43 = vld [vmem:[%s3464_s12 + $0x10] sm:$0xf]  ;;  %v3585_v48 = vld [vmem:[%s3464_s12 + $0x14] sm:$0x1] }
  0x28   : > { %v571_v56 = vshll.u32 %v3543_v38, 16  ;;  %v738_v57 = vunpack.c.l.b16 %v374_v53  ;;  %v488_v58 = vor.u32 %v487_v49, %v483_v46  ;;  %v577_v60 = vshll.u32 %v3550_v47, 16  ;;  %v3762_v39 = vld [vmem:[%s3464_s12 + $0x2c] sm:$0x1] }
  0x29   : > { %v570_v59 = vrot.slane %v568_v52, 4  ;;  %v479_v63 = vrot.slane %v478_v55, 4  ;;  %v581_v3 = vshrl.u32 %v3550_v47, 16  ;;  %v587_v4 = vshll.u32 %v3557_v51, 16 }
  0x2a   : > { %v573_v0 = vrot.slane %v571_v56, 5  ;;  %v769_v6 = vpack.c.b16 %v738_v57, %v737_v54  ;;  %v489_v7 = vrot.slane %v488_v58, 4  ;;  %v579_v8 = vrot.slane %v577_v60, 5  ;;  %v3595_v58 = vld [vmem:[%s3464_s12 + $0x48] sm:$0xf] }
  0x2b   : > { %v484_v13 = vsel %vm3491_vm3, %v479_v63, %v483_v46  ;;  %v583_v15 = vrot.slane %v581_v3, 4  ;;  %v589_v16 = vrot.slane %v587_v4, 5  ;;  %v664_v22 = vshrl.u32 %v332_v5, 16  ;;  %v3600_v3 = vld [vmem:[%s3464_s12 + $0x4c] sm:$0xf] }
  0x2c   : > { %v574_v14 = vor.u32 %v573_v0, %v570_v59  ;;  %3032 = vmatmul.msk.bf16.vlgmr.msra.gmra.mxu0 %vm785_vm4, %v769_v6  ;;  %v494_v20 = vsel %vm3491_vm3, %v489_v7, %v493_v50  ;;  %v747_v21 = vunpack.c.l.b16 %v484_v13  ;;  %v667_v25 = vshll.u32 %v332_v5, 16 }
  0x2d   : > { %v748_v26 = vunpack.c.l.b16 %v494_v20  ;;  %v584_v28 = vor.u32 %v583_v15, %v579_v8  ;;  %v673_v30 = vshll.u32 %v333_v9, 16  ;;  %v666_v31 = vrot.slane %v664_v22, 4  ;;  %v3607_v15 = vld [vmem:[%s3464_s12 + $0x50] sm:$0x1] }
  0x2e   : > { %v575_v27 = vrot.slane %v574_v14, 4  ;;  %v669_v32 = vrot.slane %v667_v25, 5  ;;  %v677_v33 = vshrl.u32 %v333_v9, 16  ;;  %v683_v34 = vshll.u32 %v334_v17, 16 }
  0x2f   : > { %v3577_v37 = vpack.c.b16 %v748_v26, %v747_v21  ;;  %v585_v41 = vrot.slane %v584_v28, 4  ;;  %v675_v42 = vrot.slane %v673_v30, 5  ;;  %v376_v52 = vshrl.u32 %v3575_v35, 16  ;;  %v3618_v28 = vld [vmem:[%s3464_s12 + $0x78] sm:$0xf] }
  0x30   : > { %v580_v40 = vsel %vm3491_vm3, %v575_v27, %v579_v8  ;;  %v670_v45 = vor.u32 %v669_v32, %v666_v31  ;;  %v679_v46 = vrot.slane %v677_v33, 4  ;;  %v685_v50 = vrot.slane %v683_v34, 5  ;;  %v3622_v34 = vld [vmem:[%s3464_s12 + $0x7c] sm:$0xf] }
  0x31   : > { %v755_v44 = vunpack.c.l.b16 %v580_v40  ;;  %3037 = vmatmul.msk.bf16.gmra.mxu1 %vm785_vm4, %v3577_v37  ;;  %v590_v49 = vsel %vm3491_vm3, %v585_v41, %v589_v16  ;;  %v379_v53 = vshll.u32 %v3575_v35, 16  ;;  %v385_v57 = vshll.u32 %v3582_v43, 16 }
  0x32   : > { %v756_v54 = vunpack.c.l.b16 %v590_v49  ;;  %v671_v55 = vrot.slane %v670_v45, 4  ;;  %v680_v56 = vor.u32 %v679_v46, %v675_v42  ;;  %v378_v59 = vrot.slane %v376_v52, 4 }
  0x33   : > { %v381_v60 = vrot.slane %v379_v53, 5  ;;  %v389_v63 = vshrl.u32 %v3582_v43, 16  ;;  %v395_v0 = vshll.u32 %v3585_v48, 16  ;;  %v387_v7 = vrot.slane %v385_v57, 5 }
  0x34   : > { %v3602_v4 = vpack.c.b16 %v756_v54, %v755_v44  ;;  %v676_v5 = vsel %vm3491_vm3, %v671_v55, %v675_v42  ;;  %v681_v6 = vrot.slane %v680_v56, 4  ;;  %v496_v17 = vshrl.u32 %v3595_v58, 16 }
  0x35   : > { %v763_v8 = vunpack.c.l.b16 %v676_v5  ;;  %v382_v9 = vor.u32 %v381_v60, %v378_v59  ;;  %v391_v13 = vrot.slane %v389_v63, 4  ;;  %v397_v14 = vrot.slane %v395_v0, 5 }
  0x36   : > { %3041 = vmatmul.msk.bf16.gmra.mxu2 %vm785_vm4, %v3602_v4  ;;  %v686_v16 = vsel %vm3491_vm3, %v681_v6, %v685_v50  ;;  %v499_v20 = vshll.u32 %v3595_v58, 16  ;;  %v505_v21 = vshll.u32 %v3600_v3, 16  ;;  %v509_v27 = vshrl.u32 %v3600_v3, 16  ;;  %v3629_v50 = vld [vmem:[%s3464_s12 + $0x80] sm:$0x1] }
  0x37   : > { %v764_v22 = vunpack.c.l.b16 %v686_v16  ;;  %v383_v25 = vrot.slane %v382_v9, 4  ;;  %v392_v26 = vor.u32 %v391_v13, %v387_v7  ;;  %v498_v30 = vrot.slane %v496_v17, 4  ;;  %v3648_v16 = vld [vmem:[%s3464_s12 + $0xac] sm:$0xf]  ;;  %v3651_v17 = vld [vmem:[%s3464_s12 + $0xb0] sm:$0x1] }
  0x38   : > { %v501_v31 = vrot.slane %v499_v20, 5  ;;  %v507_v32 = vrot.slane %v505_v21, 5  ;;  %v515_v33 = vshll.u32 %v3607_v15, 16  ;;  %v511_v44 = vrot.slane %v509_v27, 4  ;;  %5387 = vst [vmem:[#allocation6_spill] sm:$0xff] %v3648_v16 }
  0x39   : > { %v3624_v40 = vpack.c.b16 %v764_v22, %v763_v8  ;;  %v388_v41 = vsel %vm3491_vm3, %v383_v25, %v387_v7  ;;  %v393_v42 = vrot.slane %v392_v26, 4  ;;  %v592_v52 = vshrl.u32 %v3618_v28, 16  ;;  %v3641_v8 = vld [vmem:[%s3464_s12 + $0xa8] sm:$0xf]  ;;  %5388 = vst [vmem:[#allocation7_spill] sm:$0xff] %v3651_v17 }
  0x3a   : > { %v739_v45 = vunpack.c.l.b16 %v388_v41  ;;  %v502_v46 = vor.u32 %v501_v31, %v498_v30  ;;  %v517_v49 = vrot.slane %v515_v33, 5  ;;  %v512_v54 = vor.u32 %v511_v44, %v507_v32  ;;  %5386 = vst [vmem:[#allocation5_spill] sm:$0xff] %v3641_v8 }
  0x3b   : > { %5385 = vst [vmem:[#allocation4_spill] sm:$0xff] %v3624_v40  ;;  %3045 = vmatmul.msk.bf16.gmra.mxu3 %vm785_vm4, %v3624_v40  ;;  %v398_v53 = vsel %vm3491_vm3, %v393_v42, %v397_v14  ;;  %v595_v55 = vshll.u32 %v3618_v28, 16  ;;  %v601_v56 = vshll.u32 %v3622_v34, 16  ;;  %v594_v60 = vrot.slane %v592_v52, 4  ;;  %v3665_v52 = vld [vmem:[%s3464_s12 + $0x18] sm:$0xf] }
  0x3c   : > { %v740_v57 = vunpack.c.l.b16 %v398_v53  ;;  %v503_v59 = vrot.slane %v502_v46, 4  ;;  %v605_v63 = vshrl.u32 %v3622_v34, 16  ;;  %v513_v0 = vrot.slane %v512_v54, 4  ;;  %v3751_v40 = vld [vmem:[%s3464_s12 + $0x24] sm:$0xf] }
  0x3d   : > { %v597_v5 = vrot.slane %v595_v55, 5  ;;  %v603_v6 = vrot.slane %v601_v56, 5  ;;  %v611_v7 = vshll.u32 %v3629_v50, 16  ;;  %v688_v30 = vshrl.u32 %v3641_v8, 16  ;;  %v3670_v56 = vld [vmem:[%s3464_s12 + $0x1c] sm:$0xf] }
  0x3e   : > { %v3643_v9 = vpack.c.b16 %v740_v57, %v739_v45  ;;  %v508_v13 = vsel %vm3491_vm3, %v503_v59, %v507_v32  ;;  %v607_v14 = vrot.slane %v605_v63, 4  ;;  %v518_v20 = vsel %vm3491_vm3, %v513_v0, %v517_v49  ;;  %v3673_v57 = vld [vmem:[%s3464_s12 + $0x20] sm:$0x1] }
  0x3f   : > { %v749_v21 = vunpack.c.l.b16 %v508_v13  ;;  %v598_v22 = vor.u32 %v597_v5, %v594_v60  ;;  %v613_v25 = vrot.slane %v611_v7, 5  ;;  %v750_v26 = vunpack.c.l.b16 %v518_v20 }
  0x40   : > { %3033 = vmatmul.msk.bf16.gmra.mxu0 %vm785_vm4, %v3643_v9  ;;  %v608_v27 = vor.u32 %v607_v14, %v603_v6  ;;  %v691_v31 = vshll.u32 %v3641_v8, 16  ;;  %v697_v33 = vshll.u32 %v3648_v16, 16  ;;  %v701_v41 = vshrl.u32 %v3648_v16, 16 }
  0x41   : > { %v599_v32 = vrot.slane %v598_v22, 4  ;;  %v707_v42 = vshll.u32 %v3651_v17, 16  ;;  %v3662_v44 = vpack.c.b16 %v750_v26, %v749_v21  ;;  %v690_v46 = vrot.slane %v688_v30, 4  ;;  %v3685_v26 = vld [vmem:[%s3464_s12 + $0x54] sm:$0xf] }
  0x42   : > { %v609_v45 = vrot.slane %v608_v27, 4  ;;  %v693_v49 = vrot.slane %v691_v31, 5  ;;  %v699_v54 = vrot.slane %v697_v33, 5  ;;  %v703_v55 = vrot.slane %v701_v41, 4  ;;  %v3729_v17 = vld [vmem:[%s3464_s12 + $0xb4] sm:$0xf] }
  0x43   : > { %5389 = vst [vmem:[#allocation8_spill] sm:$0xff] %v3662_v44  ;;  %v604_v53 = vsel %vm3491_vm3, %v599_v32, %v603_v6  ;;  %3038 = vmatmul.msk.bf16.gmra.mxu1 %vm785_vm4, %v3662_v44  ;;  %v709_v0 = vrot.slane %v707_v42, 5  ;;  %v400_v6 = vshrl.u32 %v3665_v52, 16  ;;  %v403_v13 = vshll.u32 %v3665_v52, 16  ;;  %v3690_v32 = vld [vmem:[%s3464_s12 + $0x58] sm:$0xf] }
  0x44   : > { %v614_v59 = vsel %vm3491_vm3, %v609_v45, %v613_v25  ;;  %v757_v60 = vunpack.c.l.b16 %v604_v53  ;;  %v694_v63 = vor.u32 %v693_v49, %v690_v46  ;;  %v704_v7 = vor.u32 %v703_v55, %v699_v54  ;;  %v3695_v46 = vld [vmem:[%s3464_s12 + $0x5c] sm:$0x1]  ;;  %5392 = vst [vmem:[#allocation11_spill] sm:$0xff] %v3729_v17 }
  0x45   : > { %v758_v5 = vunpack.c.l.b16 %v614_v59  ;;  %v409_v20 = vshll.u32 %v3670_v56, 16  ;;  %v413_v21 = vshrl.u32 %v3670_v56, 16  ;;  %v419_v22 = vshll.u32 %v3673_v57, 16 }
  0x46   : > { %v695_v14 = vrot.slane %v694_v63, 4  ;;  %v705_v27 = vrot.slane %v704_v7, 4  ;;  %v402_v30 = vrot.slane %v400_v6, 4  ;;  %v405_v31 = vrot.slane %v403_v13, 5  ;;  %v3705_v7 = vld [vmem:[%s3464_s12 + $0x84] sm:$0xf] }
  0x47   : > { %v3687_v25 = vpack.c.b16 %v758_v5, %v757_v60  ;;  %v411_v41 = vrot.slane %v409_v20, 5  ;;  %v415_v42 = vrot.slane %v413_v21, 4  ;;  %v421_v45 = vrot.slane %v419_v22, 5  ;;  %5390 = vst [vmem:[#allocation9_spill] sm:$0xff] %v3705_v7 }
  0x48   : > { %v700_v33 = vsel %vm3491_vm3, %v695_v14, %v699_v54  ;;  %v710_v49 = vsel %vm3491_vm3, %v705_v27, %v709_v0  ;;  %v406_v55 = vor.u32 %v405_v31, %v402_v30  ;;  %v520_v59 = vshrl.u32 %v3685_v26, 16  ;;  %v3712_v30 = vld [vmem:[%s3464_s12 + $0x88] sm:$0xf] }
  0x49   : > { %3042 = vmatmul.msk.bf16.gmra.mxu2 %vm785_vm4, %v3687_v25  ;;  %v765_v53 = vunpack.c.l.b16 %v700_v33  ;;  %v766_v60 = vunpack.c.l.b16 %v710_v49  ;;  %v416_v63 = vor.u32 %v415_v42, %v411_v41  ;;  %v523_v54 = vshll.u32 %v3685_v26, 16  ;;  %v3717_v49 = vld [vmem:[%s3464_s12 + $0x8c] sm:$0x1] }
  0x4a   : > { %v529_v5 = vshll.u32 %v3690_v32, 16  ;;  %v407_v6 = vrot.slane %v406_v55, 4  ;;  %v522_v13 = vrot.slane %v520_v59, 4  ;;  %v533_v14 = vshrl.u32 %v3690_v32, 16 }
  0x4b   : > { %v539_v0 = vshll.u32 %v3695_v46, 16  ;;  %v3709_v20 = vpack.c.b16 %v766_v60, %v765_v53  ;;  %v417_v21 = vrot.slane %v416_v63, 4  ;;  %v525_v22 = vrot.slane %v523_v54, 5 }
  0x4c   : > { %v531_v27 = vrot.slane %v529_v5, 5  ;;  %v412_v31 = vsel %vm3491_vm3, %v407_v6, %v411_v41  ;;  %v535_v33 = vrot.slane %v533_v14, 4  ;;  %v616_v55 = vshrl.u32 %v3705_v7, 16 }
  0x4d   : > { %5391 = vst [vmem:[#allocation10_spill] sm:$0xff] %v3709_v20  ;;  %v541_v42 = vrot.slane %v539_v0, 5  ;;  %3046 = vmatmul.msk.bf16.gmra.mxu3 %vm785_vm4, %v3709_v20  ;;  %v422_v53 = vsel %vm3491_vm3, %v417_v21, %v421_v45  ;;  %v741_v59 = vunpack.c.l.b16 %v412_v31  ;;  %v526_v60 = vor.u32 %v525_v22, %v522_v13  ;;  %v3734_v22 = vld [vmem:[%s3464_s12 + $0xb8] sm:$0xf] }
  0x4e   : > { %v619_v63 = vshll.u32 %v3705_v7, 16  ;;  %v742_v54 = vunpack.c.l.b16 %v422_v53  ;;  %v536_v41 = vor.u32 %v535_v33, %v531_v27  ;;  %v618_v5 = vrot.slane %v616_v55, 4  ;;  %5393 = vst [vmem:[#allocation12_spill] sm:$0xff] %v3734_v22 }
  0x4f   : > { %v625_v6 = vshll.u32 %v3712_v30, 16  ;;  %v527_v14 = vrot.slane %v526_v60, 4  ;;  %v629_v8 = vshrl.u32 %v3712_v30, 16  ;;  %v635_v20 = vshll.u32 %v3717_v49, 16  ;;  %v3739_v60 = vld [vmem:[%s3464_s12 + $0xbc] sm:$0x1] }
  0x50   : > { %v621_v0 = vrot.slane %v619_v63, 5  ;;  %v3731_v45 = vpack.c.b16 %v742_v54, %v741_v59  ;;  %v537_v21 = vrot.slane %v536_v41, 4  ;;  %5394 = vst [vmem:[#allocation13_spill] sm:$0xff] %v3739_v60  ;;  %v712_v54 = vshrl.u32 %v3729_v17, 16 }
  0x51   : > { %v627_v13 = vrot.slane %v625_v6, 5  ;;  %v532_v31 = vsel %vm3491_vm3, %v527_v14, %v531_v27  ;;  %v631_v55 = vrot.slane %v629_v8, 4  ;;  %v637_v53 = vrot.slane %v635_v20, 5 }
  0x52   : > { %v622_v33 = vor.u32 %v621_v0, %v618_v5  ;;  %3034 = vmatmul.msk.bf16.gmra.mxu0 %vm785_vm4, %v3731_v45  ;;  %v542_v59 = vsel %vm3491_vm3, %v537_v21, %v541_v42  ;;  %v751_v63 = vunpack.c.l.b16 %v532_v31  ;;  %v715_v41 = vshll.u32 %v3729_v17, 16 }
  0x53   : > { %v752_v6 = vunpack.c.l.b16 %v542_v59  ;;  %v632_v5 = vor.u32 %v631_v55, %v627_v13  ;;  %v721_v8 = vshll.u32 %v3734_v22, 16  ;;  %v714_v20 = vrot.slane %v712_v54, 4 }
  0x54   : > { %v623_v27 = vrot.slane %v622_v33, 4  ;;  %v717_v14 = vrot.slane %v715_v41, 5  ;;  %v725_v0 = vshrl.u32 %v3734_v22, 16  ;;  %v731_v16 = vshll.u32 %v3739_v60, 16  ;;  %v3758_v33 = vld [vmem:[%s3464_s12 + $0x28] sm:$0xf] }
  0x55   : > { %v3753_v42 = vpack.c.b16 %v752_v6, %v751_v63  ;;  %v633_v31 = vrot.slane %v632_v5, 4  ;;  %v723_v59 = vrot.slane %v721_v8, 5  ;;  %v1171_v55 = vrot.slane %v3511_v2, 5 }
  0x56   : > { %v628_v21 = vsel %vm3491_vm3, %v623_v27, %v627_v13  ;;  %v718_v54 = vor.u32 %v717_v14, %v714_v20  ;;  %v727_v41 = vrot.slane %v725_v0, 4  ;;  %v733_v6 = vrot.slane %v731_v16, 5 }
  0x57   : > { %5395 = vst [vmem:[#allocation14_spill] sm:$0xff] %v3753_v42  ;;  %v759_v17 = vunpack.c.l.b16 %v628_v21  ;;  %3039 = vmatmul.msk.bf16.gmra.mxu1 %vm785_vm4, %v3753_v42  ;;  %v638_v63 = vsel %vm3491_vm3, %v633_v31, %v637_v53  ;;  %v424_v13 = vshrl.u32 %v3751_v40, 16  ;;  %v427_v27 = vshll.u32 %v3751_v40, 16 }
  0x58   : > { %v760_v5 = vunpack.c.l.b16 %v638_v63  ;;  %v719_v8 = vrot.slane %v718_v54, 4  ;;  %v728_v60 = vor.u32 %v727_v41, %v723_v59  ;;  %v433_v2 = vshll.u32 %v3758_v33, 16  ;;  %v3217_v54 = vld [vmem:[%s5335_s1 + $0xc] sm:$0x3]  ;;  %v3238_v41 = vld [vmem:[%s5335_s1 + $0xe] sm:$0x3] }
  0x59   : > { %v426_v20 = vrot.slane %v424_v13, 4  ;;  %v429_v14 = vrot.slane %v427_v27, 5  ;;  %v437_v0 = vshrl.u32 %v3758_v33, 16  ;;  %v443_v21 = vshll.u32 %v3762_v39, 16 }
  0x5a   : > { %v3773_v22 = vpack.c.b16 %v760_v5, %v759_v17  ;;  %v724_v16 = vsel %vm3491_vm3, %v719_v8, %v723_v59  ;;  %v729_v53 = vrot.slane %v728_v60, 4  ;;  %v435_v31 = vrot.slane %v433_v2, 5  ;;  %v3200_v17 = vld [vmem:[%s5335_s1 + $0xa] sm:$0x3]  ;;  %v3256_v60 = vld [vmem:[%s5335_s1 + $0x10] sm:$0x3] }
  0x5b   : > { %v767_v63 = vunpack.c.l.b16 %v724_v16  ;;  %v430_v13 = vor.u32 %v429_v14, %v426_v20  ;;  %v439_v27 = vrot.slane %v437_v0, 4  ;;  %v445_v7 = vrot.slane %v443_v21, 5 }
  0x5c   : > { %5396 = vst [vmem:[#allocation15_spill] sm:$0xff] %v3773_v22  ;;  %3043 = vmatmul.msk.bf16.gmra.mxu2 %vm785_vm4, %v3773_v22  ;;  %v734_v59 = vsel %vm3491_vm3, %v729_v53, %v733_v6  ;;  %v3128_v5 = vrot.slane %v3501_v61, 9  ;;  %v1168_v0 = vrot.slane %v3508_v1, 5  ;;  %v1941_v21 = vsel %vm834_vm0, %v3217_v54, 0 }
  0x5d   : > { %v768_v8 = vunpack.c.l.b16 %v734_v59  ;;  %v431_v2 = vrot.slane %v430_v13, 4  ;;  %v440_v20 = vor.u32 %v439_v27, %v435_v31  ;;  %v2097_v16 = vsel %vm834_vm0, %v3238_v41, 0  ;;  %1950 = vmatpush.bf16.msra.mxu2 %v1941_v21  ;;  %v3279_v21 = vld [vmem:[%s3464_s12 + $0xc] sm:$0xff] }
  0x5e   : > { %v1807_v22 = vsel %vm834_vm0, %v3200_v17, 0  ;;  %v2237_v6 = vsel %vm834_vm0, %v3256_v60, 0  ;;  %v1169_v27 = vsel %vm3794_vm7, %v3128_v5, %v1168_v0  ;;  %2106 = vmatpush.bf16.msra.mxu3 %v2097_v16  ;;  %v1170_v54 = vrot.slane %v1168_v0, 4 }
  0x5f   : > { %v3803_v53 = vpack.c.b16 %v768_v8, %v767_v63  ;;  %v436_v61 = vsel %vm3491_vm3, %v431_v2, %v435_v31  ;;  %v441_v13 = vrot.slane %v440_v20, 4  ;;  %1816 = vmatpush.bf16.msra.mxu1 %v1807_v22  ;;  %2246 = vmatpush.bf16.msra.mxu0 %v2237_v6  ;;  %v3129_v41 = vrot.slane %v3575_v35, 9  ;;  %v3278_v22 = vld [vmem:[%s3464_s12] sm:$0xff]  ;;  %v3840_v6 = vld [vmem:[%s3464_s12 + $0x18] sm:$0xff] }
  0x60   : > { %v743_v1 = vunpack.c.l.b16 %v436_v61  ;;  %v1280_v31 = vunpack.c.l.b16 %v1169_v27  ;;  %v1175_v17 = vrot.slane %v3582_v43, 5  ;;  %v1178_v60 = vrot.slane %v3585_v48, 5 }
  0x61   : > { %3047 = vmatmul.msk.bf16.gmra.mxu3 %vm785_vm4, %v3803_v53  ;;  %v446_v63 = vsel %vm3491_vm3, %v441_v13, %v445_v7  ;;  %v1172_v5 = vsel %vm3794_vm7, %v1170_v54, %v1171_v55  ;;  %v1182_v16 = vrot.slane %v3670_v56, 5  ;;  %v3130_v61 = vrot.slane %v3665_v52, 9 }
  0x62   : > { %v744_v59 = vunpack.c.l.b16 %v446_v63  ;;  %v1281_v8 = vunpack.c.l.b16 %v1172_v5  ;;  %v1176_v35 = vsel %vm3794_vm7, %v3129_v41, %v1175_v17  ;;  %v1177_v2 = vrot.slane %v1175_v17, 4  ;;  %v3860_v41 = vld [vmem:[%s3464_s12 + $0x24] sm:$0xff] }
  0x63   : > { %v1282_v7 = vunpack.c.l.b16 %v1176_v35  ;;  %v1184_v13 = vrot.slane %v1182_v16, 4  ;;  %v1185_v27 = vrot.slane %v3673_v57, 5  ;;  %v1189_v57 = vrot.slane %v3758_v33, 5 }
  0x64   : > { %v3821_v20 = vpack.c.b16 %v744_v59, %v743_v1  ;;  %v1312_v0 = vpack.c.b16 %v1281_v8, %v1280_v31  ;;  %v1179_v43 = vsel %vm3794_vm7, %v1177_v2, %v1178_v60  ;;  %v3131_v63 = vrot.slane %v3751_v40, 9  ;;  %v3882_v8 = vld [vmem:[%s3464_s12 + $0x30] sm:$0xff] }
  0x65   : > { %v1283_v48 = vunpack.c.l.b16 %v1179_v43  ;;  %v1186_v56 = vsel %vm3794_vm7, %v1184_v13, %v1185_v27  ;;  %v1191_v31 = vrot.slane %v1189_v57, 4  ;;  %v1192_v17 = vrot.slane %v3762_v39, 5  ;;  %v3910_v27 = vld [vmem:[%s3464_s12 + $0x3c] sm:$0xff] }
  0x66   : > { %3035 = vmatmul.msk.bf16.gmra.mxu0 %vm785_vm4, %v3821_v20  ;;  %v1285_v54 = vunpack.c.l.b16 %v1186_v56  ;;  %v1190_v60 = vsel %vm3794_vm7, %v3131_v63, %v1189_v57  ;;  %v1196_v39 = vrot.slane %v3470_v11, 5  ;;  %v3132_v35 = vrot.slane %v3467_v10, 9 }
  0x67   : > { %3112 = vmatmul.msk.bf16.vlgmr.msrb.gmra.mxu1 %vm785_vm4, %v3278_v22  ;;  %v3828_v55 = vpack.c.b16 %v1283_v48, %v1282_v7  ;;  %v1193_v33 = vsel %vm3794_vm7, %v1191_v31, %v1192_v17  ;;  %v1286_v59 = vunpack.c.l.b16 %v1190_v60  ;;  %v1199_v7 = vrot.slane %v3473_v12, 5 }
  0x68   : > { %v1287_v5 = vunpack.c.l.b16 %v1193_v33  ;;  %v1198_v2 = vrot.slane %v1196_v39, 4  ;;  %v1203_v13 = vrot.slane %v3530_v24, 5  ;;  %v3133_v56 = vrot.slane %v3527_v23, 9 }
  0x6a   : > { %v3874_v40 = vpack.c.b16 %v1287_v5, %v1286_v59  ;;  %v1200_v11 = vsel %vm3794_vm7, %v1198_v2, %v1199_v7  ;;  %v1204_v24 = vsel %vm3794_vm7, %v3133_v56, %v1203_v13  ;;  %v1210_v5 = vrot.slane %v3600_v3, 5 }
  0x6b   : > { %v1290_v23 = vunpack.c.l.b16 %v1204_v24  ;;  %v3134_v7 = vrot.slane %v3595_v58, 9  ;;  %v1217_v24 = vrot.slane %v3690_v32, 5 }
  0x6c   : > { %3145 = vmatmul.msk.bf16.vlgmr.msrb.gmra.mxu2 %vm785_vm4, %v1312_v0  ;;  %v1197_v0 = vsel %vm3794_vm7, %v3132_v35, %v1196_v39  ;;  %v3944_v35 = vld [vmem:[%s3464_s12 + $0x48] sm:$0xff] }
  0x6d   : > { %v1288_v48 = vunpack.c.l.b16 %v1197_v0  ;;  %5401 = vst [vmem:[#allocation18_spill] sm:$0xff] %v3944_v35  ;;  %v1212_v0 = vrot.slane %v1210_v5, 4 }
  0x71   : > { %3166 = vmatmul.msk.bf16.vlgmr.msrb.gmra.mxu3 %vm785_vm4, %v3279_v21 }
  0x76   : > { %3183 = vmatmul.msk.bf16.vlgmr.msrb.gmra.mxu0 %vm785_vm4, %v3643_v9  ;;  %v1183_v9 = vsel %vm3794_vm7, %v3130_v61, %v1182_v16 }
  0x77   : > { %3113 = vmatmul.msk.bf16.gmra.mxu1 %vm785_vm4, %v3279_v21  ;;  %v1284_v1 = vunpack.c.l.b16 %v1183_v9  ;;  %v1289_v21 = vunpack.c.l.b16 %v1200_v11  ;;  %v1213_v11 = vrot.slane %v3607_v15, 5 }
  0x79   : > { %v3854_v52 = vpack.c.b16 %v1285_v54, %v1284_v1  ;;  %v3902_v12 = vpack.c.b16 %v1289_v21, %v1288_v48  ;;  %v1205_v1 = vrot.slane %v1203_v13, 4  ;;  %v1206_v54 = vrot.slane %v3535_v29, 5 }
  0x7a   : > { %v1211_v21 = vsel %vm3794_vm7, %v3134_v7, %v1210_v5  ;;  %v1214_v13 = vsel %vm3794_vm7, %v1212_v0, %v1213_v11  ;;  %v3135_v5 = vrot.slane %v3685_v26, 9  ;;  %v1219_v7 = vrot.slane %v1217_v24, 4 }
  0x7b   : > { %v1207_v63 = vsel %vm3794_vm7, %v1205_v1, %v1206_v54  ;;  %v1292_v56 = vunpack.c.l.b16 %v1211_v21  ;;  %v1293_v1 = vunpack.c.l.b16 %v1214_v13  ;;  %v1220_v0 = vrot.slane %v3695_v46, 5 }
  0x7c   : > { %3146 = vmatmul.msk.bf16.gmra.mxu2 %vm785_vm4, %v3828_v55  ;;  %v1291_v60 = vunpack.c.l.b16 %v1207_v63  ;;  %v1218_v32 = vsel %vm3794_vm7, %v3135_v5, %v1217_v24  ;;  %v1224_v5 = vrot.slane %v3482_v19, 5 }
  0x7d   : > { %v3968_v54 = vpack.c.b16 %v1293_v1, %v1292_v56  ;;  %v1221_v13 = vsel %vm3794_vm7, %v1219_v7, %v1220_v0  ;;  %v1294_v56 = vunpack.c.l.b16 %v1218_v32  ;;  %v3378_v32 = vld [vmem:[%s3464_s12 + $0x68] sm:$0x1] }
  0x7e   : > { %v3934_v33 = vpack.c.b16 %v1291_v60, %v1290_v23  ;;  %v3978_v60 = vld [vmem:[%s3464_s12 + $0x54] sm:$0xff]  ;;  %v1295_v46 = vunpack.c.l.b16 %v1221_v13  ;;  %v1227_v13 = vrot.slane %v3378_v32, 5 }
  0x7f   : > { %5404 = vst [vmem:[#allocation21_spill] sm:$0xff] %v3968_v54 }
  0x80   : > { %5405 = vst [vmem:[#allocation22_spill] sm:$0xff] %v3978_v60 }
  0x81   : > { %3167 = vmatmul.msk.bf16.gmra.mxu3 %vm785_vm4, %v3840_v6 }
  0x86   : > { %3184 = vmatmul.msk.bf16.gmra.mxu0 %vm785_vm4, %v3731_v45 }
  0x87   : > { %3114 = vmatmul.msk.bf16.gmra.mxu1 %vm785_vm4, %v3840_v6 }
  0x8c   : > { %3147 = vmatmul.msk.bf16.gmra.mxu2 %vm785_vm4, %v3854_v52 }
  0x91   : > { %3168 = vmatmul.msk.bf16.gmra.mxu3 %vm785_vm4, %v3860_v41 }
  0x96   : > { %3185 = vmatmul.msk.bf16.gmra.mxu0 %vm785_vm4, %v3821_v20 }
  0x97   : > { %3115 = vmatmul.msk.bf16.gmra.mxu1 %vm785_vm4, %v3860_v41 }
  0x9c   : > { %v3877_v22 = vpop.f32.mrf.mxu1  ;;  %3148 = vmatmul.msk.bf16.gmra.mxu2 %vm785_vm4, %v3874_v40 }
  0xa1   : > { %3169 = vmatmul.msk.bf16.gmra.mxu3 %vm785_vm4, %v3882_v8 }
  0xa4   : > { %v3892_v43 = vpop.f32.mrf.mxu1 }
  0xa6   : > { %v3894_v16 = vpop.f32.mrf.mxu2  ;;  %3186 = vmatmul.msk.bf16.gmra.mxu0 %vm785_vm4, %v3503_v62 }
  0xa7   : > { %3116 = vmatmul.msk.bf16.gmra.mxu1 %vm785_vm4, %v3882_v8 }
  0xa9   : > { %v3900_v10 = vpop.f32.mrf.mxu0 }
  0xaa   : > { %v3904_v61 = vpop.f32.mrf.mxu3 }
  0xab   : > { %5399 = vst [vmem:[#allocation16_spill] sm:$0xff] %v3904_v61 }
  0xac   : > { %3149 = vmatmul.msk.bf16.gmra.mxu2 %vm785_vm4, %v3902_v12 }
  0xae   : > { %v3912_v9 = vpop.f32.mrf.mxu1  ;;  %v3916_v57 = vpop.f32.mrf.mxu2 }
  0xb1   : > { %3170 = vmatmul.msk.bf16.gmra.mxu3 %vm785_vm4, %v3910_v27  ;;  %v3924_v31 = vpop.f32.mrf.mxu0 }
  0xb2   : > { %v3926_v17 = vpop.f32.mrf.mxu3 }
  0xb3   : > { %5400 = vst [vmem:[#allocation17_spill] sm:$0xff] %v3926_v17 }
  0xb6   : > { %3187 = vmatmul.msk.bf16.gmra.mxu0 %vm785_vm4, %v3577_v37  ;;  %v3930_v29 = vpop.f32.mrf.mxu1 }
  0xb7   : > { %3117 = vmatmul.msk.bf16.gmra.mxu1 %vm785_vm4, %v3910_v27 }
  0xb9   : > { %v3936_v59 = vpop.f32.mrf.mxu2 }
  0xbc   : > { %3150 = vmatmul.msk.bf16.gmra.mxu2 %vm785_vm4, %v3934_v33 }
  0xbd   : > { %v3939_v39 = vpop.f32.mrf.mxu0 }
  0xbe   : > { %v3946_v2 = vpop.f32.mrf.mxu3 }
  0xbf   : > { %5402 = vst [vmem:[#allocation19_spill] sm:$0xff] %v3946_v2 }
  0xc0   : > { %v3950_v48 = vpop.f32.mrf.mxu1 }
  0xc1   : > { %3171 = vmatmul.msk.bf16.gmra.mxu3 %vm785_vm4, %v3944_v35  ;;  %v3954_v3 = vpop.f32.mrf.mxu2 }
  0xc5   : > { %v3960_v58 = vpop.f32.mrf.mxu0 }
  0xc6   : > { %3188 = vmatmul.msk.bf16.gmra.mxu0 %vm785_vm4, %v3662_v44  ;;  %v3964_v15 = vpop.f32.mrf.mxu3 }
  0xc7   : > { %5403 = vst [vmem:[#allocation20_spill] sm:$0xff] %v3964_v15  ;;  %3118 = vmatmul.msk.bf16.gmra.mxu1 %vm785_vm4, %v3944_v35  ;;  %v4013_v15 = vld [vmem:[%s3464_s12 + $0x60] sm:$0xff] }
  0xc8   : > { %v3971_v63 = vpop.f32.mrf.mxu1  ;;  %5409 = vst [vmem:[#allocation26_spill] sm:$0xff] %v4013_v15 }
  0xcc   : > { %v3973_v23 = vpop.f32.mrf.mxu2  ;;  %3151 = vmatmul.msk.bf16.gmra.mxu2 %vm785_vm4, %v3968_v54 }
  0xcf   : > { %v3982_v11 = vpop.f32.mrf.mxu0 }
  0xd0   : > { %v3984_v21 = vpop.f32.mrf.mxu3 }
  0xd1   : > { %5406 = vst [vmem:[#allocation23_spill] sm:$0xff] %v3984_v21  ;;  %3172 = vmatmul.msk.bf16.gmra.mxu3 %vm785_vm4, %v3978_v60  ;;  %v4000_v21 = vpack.c.b16 %v1295_v46, %v1294_v56 }
  0xd3   : > { %5407 = vst [vmem:[#allocation24_spill] sm:$0xff] %v4000_v21 }
  0xd4   : > { %v3992_v26 = vpop.f32.mrf.mxu1  ;;  %v3994_v1 = vpop.f32.mrf.mxu2 }
  0xd6   : > { %3189 = vmatmul.msk.bf16.gmra.mxu0 %vm785_vm4, %v3753_v42  ;;  %v3379_v42 = vld [vmem:[%s3464_s12 + $0x60] sm:$0xf] }
  0xd7   : > { %3119 = vmatmul.msk.bf16.gmra.mxu1 %vm785_vm4, %v3978_v60  ;;  %v4002_v24 = vpop.f32.mrf.mxu0  ;;  %v3136_v2 = vrot.slane %v3379_v42, 9  ;;  %v1226_v60 = vrot.slane %v1224_v5, 4 }
  0xd8   : > { %v4005_v7 = vpop.f32.mrf.mxu3 }
  0xd9   : > { %5408 = vst [vmem:[#allocation25_spill] sm:$0xff] %v4005_v7  ;;  %v1225_v19 = vsel %vm3794_vm7, %v3136_v2, %v1224_v5  ;;  %v1228_v46 = vsel %vm3794_vm7, %v1226_v60, %v1227_v13  ;;  %v1231_v60 = vrot.slane %v3550_v47, 5 }
  0xda   : > { %v1296_v17 = vunpack.c.l.b16 %v1225_v19  ;;  %v1297_v42 = vunpack.c.l.b16 %v1228_v46  ;;  %v4046_v19 = vld [vmem:[%s3464_s12 + $0x6c] sm:$0xff] }
  0xdc   : > { %3152 = vmatmul.msk.bf16.gmra.mxu2 %vm785_vm4, %v4000_v21  ;;  %v4009_v0 = vpop.f32.mrf.mxu1  ;;  %v4035_v2 = vpack.c.b16 %v1297_v42, %v1296_v17  ;;  %v1233_v17 = vrot.slane %v1231_v60, 4 }
  0xde   : > { %5411 = vst [vmem:[#allocation28_spill] sm:$0xff] %v4035_v2 }
  0xdf   : > { %v4016_v56 = vpop.f32.mrf.mxu2 }
  0xe1   : > { %3173 = vmatmul.msk.bf16.gmra.mxu3 %vm785_vm4, %v4013_v15 }
  0xe3   : > { %v4024_v7 = vpop.f32.mrf.mxu0 }
  0xe4   : > { %v4026_v32 = vpop.f32.mrf.mxu3  ;;  %v1067_v21 = vpop.f32.mrf.mxu1 }
  0xe5   : > { %5410 = vst [vmem:[#allocation27_spill] sm:$0xff] %v4026_v32  ;;  %v1068_v54 = vadd.f32 %v1067_v21, %v3900_v10  ;;  %v1234_v21 = vrot.slane %v3557_v51, 5  ;;  %v3137_v32 = vrot.slane %v3543_v38, 9 }
  0xe6   : > { %3190 = vmatmul.msk.bf16.gmra.mxu0 %vm785_vm4, %v3522_v18 }
  0xe7   : > { %v4031_v44 = vpop.f32.mrf.mxu2  ;;  %3120 = vmatmul.msk.bf16.gmra.mxu1 %vm785_vm4, %v4013_v15  ;;  %v1232_v47 = vsel %vm3794_vm7, %v3137_v32, %v1231_v60 }
  0xe8   : > { %v1298_v61 = vunpack.c.l.b16 %v1232_v47 }
  0xeb   : > { %v4038_v5 = vpop.f32.mrf.mxu0 }
  0xec   : > { %v4040_v13 = vpop.f32.mrf.mxu3  ;;  %3153 = vmatmul.msk.bf16.gmra.mxu2 %vm785_vm4, %v4035_v2  ;;  %v1069_v10 = vpop.f32.mrf.mxu1 }
  0xed   : > { %5412 = vst [vmem:[#allocation29_spill] sm:$0xff] %v4040_v13  ;;  %v1070_v46 = vadd.f32 %v1069_v10, %v3924_v31  ;;  %v1235_v13 = vsel %vm3794_vm7, %v1233_v17, %v1234_v21  ;;  %v1238_v21 = vrot.slane %v3622_v34, 5 }
  0xee   : > { %v1299_v35 = vunpack.c.l.b16 %v1235_v13  ;;  %v1241_v13 = vrot.slane %v3629_v50, 5 }
  0xef   : > { %v1388_v42 = vpop.f32.mrf.mxu2 }
  0xf0   : > { %v1468_v18 = vadd.f32 %v1388_v42, %v1068_v54  ;;  %v4063_v10 = vpack.c.b16 %v1299_v35, %v1298_v61  ;;  %v4070_v42 = vld [vmem:[%s3464_s12 + $0x78] sm:$0xff] }
  0xf1   : > { %3174 = vmatmul.msk.bf16.gmra.mxu3 %vm785_vm4, %v4046_v19 }
  0xf3   : > { %v1678_v2 = vpop.f32.mrf.mxu0 }
  0xf4   : > { %v1522_v51 = vpop.f32.mrf.mxu3  ;;  %v1072_v15 = vpop.f32.mrf.mxu1 }
  0xf5   : > { %v1602_v31 = vadd.f32 %v1522_v51, %v1468_v18  ;;  %v1073_v38 = vadd.f32 %v1072_v15, %v3939_v39 }
  0xf6   : > { %3191 = vmatmul.msk.bf16.gmra.mxu0 %vm785_vm4, %v3602_v4 }
  0xf7   : > { %v1390_v54 = vpop.f32.mrf.mxu2  ;;  %3121 = vmatmul.msk.bf16.gmra.mxu1 %vm785_vm4, %v4046_v19  ;;  %v4061_v32 = vadd.f32 %v1678_v2, %v1602_v31  ;;  %v3138_v2 = vrot.slane %v3618_v28, 9 }
  0xf8   : > { %v1469_v60 = vadd.f32 %v1390_v54, %v1070_v46  ;;  %v1240_v46 = vrot.slane %v1238_v21, 4 }
  0xf9   : > { %v1239_v50 = vsel %vm3794_vm7, %v3138_v2, %v1238_v21 }
  0xfa   : > { %v1242_v51 = vsel %vm3794_vm7, %v1240_v46, %v1241_v13  ;;  %v1248_v46 = vrot.slane %v3717_v49, 5 }
  0xfb   : > { %v1680_v17 = vpop.f32.mrf.mxu0 }
  0xfc   : > { %v1524_v18 = vpop.f32.mrf.mxu3  ;;  %3154 = vmatmul.msk.bf16.gmra.mxu2 %vm785_vm4, %v4063_v10  ;;  %v1074_v39 = vpop.f32.mrf.mxu1 }
  0xfd   : > { %v1603_v15 = vadd.f32 %v1524_v18, %v1469_v60  ;;  %v1075_v47 = vadd.f32 %v1074_v39, %v3960_v58  ;;  %v1300_v58 = vunpack.c.l.b16 %v1239_v50  ;;  %v1301_v18 = vunpack.c.l.b16 %v1242_v51  ;;  %v4096_v50 = vld [vmem:[%s3464_s12 + $0x84] sm:$0xff] }
  0xff   : > { %v1393_v61 = vpop.f32.mrf.mxu2  ;;  %v4074_v35 = vadd.f32 %v1680_v17, %v1603_v15  ;;  %v4089_v13 = vpack.c.b16 %v1301_v18, %v1300_v58  ;;  %v1245_v15 = vrot.slane %v3712_v30, 5 }
 0x100   : > { %v1470_v34 = vadd.f32 %v1393_v61, %v1073_v38 }
 0x101   : > { %3175 = vmatmul.msk.bf16.gmra.mxu3 %vm785_vm4, %v4070_v42 }
 0x103   : > { %v1683_v31 = vpop.f32.mrf.mxu0 }
 0x104   : > { %v1527_v54 = vpop.f32.mrf.mxu3  ;;  %v1077_v60 = vpop.f32.mrf.mxu1 }
 0x105   : > { %v1604_v28 = vadd.f32 %v1527_v54, %v1470_v34  ;;  %v1078_v17 = vadd.f32 %v1077_v60, %v3982_v11 }
 0x106   : > { %3192 = vmatmul.msk.bf16.gmra.mxu0 %vm785_vm4, %v3687_v25 }
 0x107   : > { %v1395_v38 = vpop.f32.mrf.mxu2  ;;  %3122 = vmatmul.msk.bf16.gmra.mxu1 %vm785_vm4, %v4070_v42  ;;  %v4087_v21 = vadd.f32 %v1683_v31, %v1604_v28  ;;  %v5413_v31 = vld [vmem:[#allocation9_spill] sm:$0xff] }
 0x108   : > { %v1471_v39 = vadd.f32 %v1395_v38, %v1075_v47  ;;  %v3139_v54 = vrot.slane %v5413_v31, 9  ;;  %v1247_v47 = vrot.slane %v1245_v15, 4 }
 0x10a   : > { %v1246_v49 = vsel %vm3794_vm7, %v3139_v54, %v1245_v15  ;;  %v1249_v18 = vsel %vm3794_vm7, %v1247_v47, %v1248_v46  ;;  %v3380_v54 = vld [vmem:[%s3464_s12 + $0x94] sm:$0xf] }
 0x10b   : > { %v1685_v2 = vpop.f32.mrf.mxu0  ;;  %v1252_v47 = vrot.slane %v3380_v54, 5 }
 0x10c   : > { %v1529_v61 = vpop.f32.mrf.mxu3  ;;  %3155 = vmatmul.msk.bf16.gmra.mxu2 %vm785_vm4, %v4089_v13  ;;  %v1079_v11 = vpop.f32.mrf.mxu1 }
 0x10d   : > { %v1605_v34 = vadd.f32 %v1529_v61, %v1471_v39  ;;  %v1080_v51 = vadd.f32 %v1079_v11, %v4002_v24  ;;  %v1302_v39 = vunpack.c.l.b16 %v1246_v49  ;;  %v1303_v61 = vunpack.c.l.b16 %v1249_v18 }
 0x10f   : > { %v1398_v60 = vpop.f32.mrf.mxu2  ;;  %v4100_v58 = vadd.f32 %v1685_v2, %v1605_v34  ;;  %v4115_v31 = vpack.c.b16 %v1303_v61, %v1302_v39 }
 0x110   : > { %v1472_v30 = vadd.f32 %v1398_v60, %v1078_v17  ;;  %v5415_v17 = vld [vmem:[#allocation15_spill] sm:$0xff] }
 0x111   : > { %5414 = vst [vmem:[#allocation9_spill] sm:$0xff] %v4100_v58  ;;  %3176 = vmatmul.msk.bf16.gmra.mxu3 %vm785_vm4, %v4096_v50 }
 0x112   : > { %5417 = vst [vmem:[#allocation31_spill] sm:$0xff] %v4115_v31 }
 0x113   : > { %v1688_v28 = vpop.f32.mrf.mxu0 }
 0x114   : > { %v1532_v24 = vpop.f32.mrf.mxu3  ;;  %v1082_v38 = vpop.f32.mrf.mxu1 }
 0x115   : > { %v1606_v11 = vadd.f32 %v1532_v24, %v1472_v30  ;;  %v1083_v2 = vadd.f32 %v1082_v38, %v4024_v7  ;;  %v3381_v30 = vld [vmem:[%s3464_s12 + $0x98] sm:$0x1]  ;;  %v4122_v38 = vld [vmem:[%s3464_s12 + $0x90] sm:$0xff] }
 0x116   : > { %3193 = vmatmul.msk.bf16.gmra.mxu0 %vm785_vm4, %v5415_v17  ;;  %v1255_v49 = vrot.slane %v3381_v30, 5  ;;  %5418 = vst [vmem:[#allocation32_spill] sm:$0xff] %v4122_v38 }
 0x117   : > { %v1400_v34 = vpop.f32.mrf.mxu2  ;;  %3123 = vmatmul.msk.bf16.gmra.mxu1 %vm785_vm4, %v4096_v50  ;;  %v4113_v15 = vadd.f32 %v1688_v28, %v1606_v11  ;;  %v3382_v28 = vld [vmem:[%s3464_s12 + $0x90] sm:$0xf] }
 0x118   : > { %v1473_v46 = vadd.f32 %v1400_v34, %v1080_v51  ;;  %v3140_v11 = vrot.slane %v3382_v28, 9  ;;  %v1254_v51 = vrot.slane %v1252_v47, 4 }
 0x119   : > { %5416 = vst [vmem:[#allocation30_spill] sm:$0xff] %v4113_v15  ;;  %v3385_v15 = vld [vmem:[%s3464_s12 + $0x9c] sm:$0xf] }
 0x11a   : > { %v1253_v54 = vsel %vm3794_vm7, %v3140_v11, %v1252_v47  ;;  %v3383_v11 = vld [vmem:[%s3464_s12 + $0xa0] sm:$0xf] }
 0x11b   : > { %v1690_v60 = vpop.f32.mrf.mxu0 }
 0x11c   : > { %v1534_v7 = vpop.f32.mrf.mxu3  ;;  %3156 = vmatmul.msk.bf16.gmra.mxu2 %vm785_vm4, %v4115_v31  ;;  %v1084_v18 = vpop.f32.mrf.mxu1 }
 0x11d   : > { %v1607_v24 = vadd.f32 %v1534_v7, %v1473_v46  ;;  %v1085_v17 = vadd.f32 %v1084_v18, %v4038_v5  ;;  %v1256_v46 = vsel %vm3794_vm7, %v1254_v51, %v1255_v49  ;;  %v1304_v18 = vunpack.c.l.b16 %v1253_v54 }
 0x11e   : > { %v1305_v28 = vunpack.c.l.b16 %v1256_v46  ;;  %v1259_v51 = vrot.slane %v3383_v11, 5  ;;  %v3384_v46 = vld [vmem:[%s3464_s12 + $0xa4] sm:$0x1] }
 0x11f   : > { %v1403_v39 = vpop.f32.mrf.mxu2  ;;  %v4126_v61 = vadd.f32 %v1690_v60, %v1607_v24  ;;  %v5420_v60 = vld [vmem:[#allocation3_spill] sm:$0xff] }
 0x120   : > { %v1474_v34 = vadd.f32 %v1403_v39, %v1083_v2  ;;  %v4140_v49 = vpack.c.b16 %v1305_v28, %v1304_v18 }
 0x121   : > { %5419 = vst [vmem:[#allocation33_spill] sm:$0xff] %v4126_v61  ;;  %3177 = vmatmul.msk.bf16.gmra.mxu3 %vm785_vm4, %v4122_v38  ;;  %v4147_v61 = vld [vmem:[%s3464_s12 + $0x9c] sm:$0xff] }
 0x122   : > { %5422 = vst [vmem:[#allocation35_spill] sm:$0xff] %v4140_v49 }
 0x123   : > { %v1693_v30 = vpop.f32.mrf.mxu0  ;;  %5423 = vst [vmem:[#allocation36_spill] sm:$0xff] %v4147_v61 }
 0x124   : > { %v1537_v7 = vpop.f32.mrf.mxu3  ;;  %v1087_v5 = vpop.f32.mrf.mxu1 }
 0x125   : > { %v1608_v31 = vadd.f32 %v1537_v7, %v1474_v34  ;;  %v1262_v7 = vrot.slane %v3384_v46, 5 }
 0x126   : > { %3194 = vmatmul.msk.bf16.gmra.mxu0 %vm785_vm4, %v5420_v60 }
 0x127   : > { %v1405_v2 = vpop.f32.mrf.mxu2  ;;  %3124 = vmatmul.msk.bf16.gmra.mxu1 %vm785_vm4, %v4122_v38  ;;  %v4138_v47 = vadd.f32 %v1693_v30, %v1608_v31  ;;  %v3141_v38 = vrot.slane %v3385_v15, 9  ;;  %v1261_v31 = vrot.slane %v1259_v51, 4 }
 0x128   : > { %v1475_v24 = vadd.f32 %v1405_v2, %v1085_v17  ;;  %v1088_v17 = vadd.f32 %v1087_v5, %v3877_v22  ;;  %v5425_v5 = vld [vmem:[#allocation4_spill] sm:$0xff] }
 0x129   : > { %5421 = vst [vmem:[#allocation34_spill] sm:$0xff] %v4138_v47  ;;  %v1260_v2 = vsel %vm3794_vm7, %v3141_v38, %v1259_v51 }
 0x12a   : > { %v1306_v15 = vunpack.c.l.b16 %v1260_v2 }
 0x12b   : > { %v1695_v39 = vpop.f32.mrf.mxu0 }
 0x12c   : > { %v1539_v54 = vpop.f32.mrf.mxu3  ;;  %3157 = vmatmul.msk.bf16.gmra.mxu2 %vm785_vm4, %v4140_v49  ;;  %v1089_v34 = vpop.f32.mrf.mxu1 }
 0x12d   : > { %v1609_v60 = vadd.f32 %v1539_v54, %v1475_v24  ;;  %v1263_v24 = vsel %vm3794_vm7, %v1261_v31, %v1262_v7  ;;  %v5428_v31 = vld [vmem:[#allocation6_spill] sm:$0xff] }
 0x12e   : > { %v1307_v49 = vunpack.c.l.b16 %v1263_v24  ;;  %v5429_v24 = vld [vmem:[#allocation7_spill] sm:$0xff] }
 0x12f   : > { %v1408_v30 = vpop.f32.mrf.mxu2  ;;  %v4151_v18 = vadd.f32 %v1695_v39, %v1609_v60  ;;  %v1090_v60 = vadd.f32 %v1089_v34, %v3892_v43  ;;  %v4173_v34 = vld [vmem:[%s3464_s12 + $0xa8] sm:$0xff] }
 0x130   : > { %v1476_v28 = vadd.f32 %v1408_v30, %v1088_v17  ;;  %v4166_v7 = vpack.c.b16 %v1307_v49, %v1306_v15  ;;  %v1266_v17 = vrot.slane %v5428_v31, 5  ;;  %5430 = vst [vmem:[#allocation6_spill] sm:$0xff] %v4173_v34 }
 0x131   : > { %5424 = vst [vmem:[#allocation37_spill] sm:$0xff] %v4151_v18  ;;  %3178 = vmatmul.msk.bf16.gmra.mxu3 %vm785_vm4, %v4147_v61 }
 0x132   : > { %5427 = vst [vmem:[#allocation39_spill] sm:$0xff] %v4166_v7 }
 0x133   : > { %v1698_v11 = vpop.f32.mrf.mxu0 }
 0x134   : > { %v1542_v54 = vpop.f32.mrf.mxu3  ;;  %v1092_v46 = vpop.f32.mrf.mxu1 }
 0x135   : > { %v1610_v22 = vadd.f32 %v1542_v54, %v1476_v28  ;;  %v1269_v54 = vrot.slane %v5429_v24, 5 }
 0x136   : > { %3195 = vmatmul.msk.bf16.gmra.mxu0 %vm785_vm4, %v5425_v5  ;;  %v5431_v5 = vld [vmem:[#allocation5_spill] sm:$0xff] }
 0x137   : > { %v1410_v39 = vpop.f32.mrf.mxu2  ;;  %3125 = vmatmul.msk.bf16.gmra.mxu1 %vm785_vm4, %v4147_v61  ;;  %v4164_v38 = vadd.f32 %v1698_v11, %v1610_v22  ;;  %v3142_v18 = vrot.slane %v5431_v5, 9  ;;  %v1268_v11 = vrot.slane %v1266_v17, 4  ;;  %v1093_v22 = vadd.f32 %v1092_v46, %v3912_v9 }
 0x138   : > { %v1477_v51 = vadd.f32 %v1410_v39, %v1090_v60 }
 0x139   : > { %5426 = vst [vmem:[#allocation38_spill] sm:$0xff] %v4164_v38  ;;  %v1267_v39 = vsel %vm3794_vm7, %v3142_v18, %v1266_v17  ;;  %v4191_v18 = vld [vmem:[%s3464_s12 + $0xc0] sm:$0xf] }
 0x13a   : > { %v1308_v24 = vunpack.c.l.b16 %v1267_v39  ;;  %5434 = vst [vmem:[#allocation5_spill] sm:$0xff] %v4191_v18  ;;  %v1635_v39 = vshrl.u32 %v4191_v18, 16 }
 0x13b   : > { %v1700_v30 = vpop.f32.mrf.mxu0 }
 0x13c   : > { %v1544_v2 = vpop.f32.mrf.mxu3  ;;  %3158 = vmatmul.msk.bf16.gmra.mxu2 %vm785_vm4, %v4166_v7  ;;  %v1094_v28 = vpop.f32.mrf.mxu1  ;;  %v5433_v7 = vld [vmem:[#allocation10_spill] sm:$0xff] }
 0x13d   : > { %v1611_v43 = vadd.f32 %v1544_v2, %v1477_v51  ;;  %v1270_v51 = vsel %vm3794_vm7, %v1268_v11, %v1269_v54 }
 0x13e   : > { %v1309_v9 = vunpack.c.l.b16 %v1270_v51 }
 0x13f   : > { %v1413_v49 = vpop.f32.mrf.mxu2  ;;  %v4177_v15 = vadd.f32 %v1700_v30, %v1611_v43  ;;  %v1095_v30 = vadd.f32 %v1094_v28, %v3930_v29  ;;  %v1638_v29 = vshll.u32 %v4191_v18, 16 }
 0x140   : > { %v1478_v60 = vadd.f32 %v1413_v49, %v1093_v22  ;;  %v4195_v11 = vpack.c.b16 %v1309_v9, %v1308_v24  ;;  %v4198_v22 = vld [vmem:[%s3464_s12 + $0xc4] sm:$0xf]  ;;  %v5438_v49 = vld [vmem:[#allocation12_spill] sm:$0xff]  ;;  %v5439_v24 = vld [vmem:[#allocation13_spill] sm:$0xff] }
 0x141   : > { %5432 = vst [vmem:[#allocation7_spill] sm:$0xff] %v4177_v15  ;;  %3179 = vmatmul.msk.bf16.gmra.mxu3 %vm785_vm4, %v4173_v34  ;;  %v1644_v28 = vshll.u32 %v4198_v22, 16  ;;  %v1276_v9 = vrot.slane %v5439_v24, 5  ;;  %v1637_v15 = vrot.slane %v1635_v39, 4  ;;  %v1640_v38 = vrot.slane %v1638_v29, 5 }
 0x142   : > { %5436 = vst [vmem:[#allocation41_spill] sm:$0xff] %v4195_v11 }
 0x143   : > { %v1703_v31 = vpop.f32.mrf.mxu0  ;;  %5437 = vst [vmem:[#allocation42_spill] sm:$0xff] %v4198_v22 }
 0x144   : > { %v1547_v5 = vpop.f32.mrf.mxu3  ;;  %v1097_v2 = vpop.f32.mrf.mxu1 }
 0x145   : > { %v1612_v46 = vadd.f32 %v1547_v5, %v1478_v60  ;;  %v1273_v60 = vrot.slane %v5438_v49, 5  ;;  %v1648_v5 = vshrl.u32 %v4198_v22, 16  ;;  %v1098_v18 = vadd.f32 %v1097_v2, %v3950_v48 }
 0x146   : > { %3196 = vmatmul.msk.bf16.gmra.mxu0 %vm785_vm4, %v5433_v7  ;;  %v1646_v22 = vrot.slane %v1644_v28, 5  ;;  %v1641_v2 = vor.u32 %v1640_v38, %v1637_v15 }
 0x147   : > { %v1415_v43 = vpop.f32.mrf.mxu2  ;;  %3126 = vmatmul.msk.bf16.gmra.mxu1 %vm785_vm4, %v4173_v34  ;;  %v4193_v17 = vadd.f32 %v1703_v31, %v1612_v46  ;;  %v1650_v61 = vrot.slane %v1648_v5, 4 }
 0x148   : > { %v1479_v54 = vadd.f32 %v1415_v43, %v1095_v30  ;;  %v4209_v30 = vld [vmem:[%s3464_s12 + $0xb4] sm:$0xff]  ;;  %v5440_v43 = vld [vmem:[#allocation11_spill] sm:$0xff] }
 0x149   : > { %5435 = vst [vmem:[#allocation40_spill] sm:$0xff] %v4193_v17  ;;  %v3143_v49 = vrot.slane %v5440_v43, 9  ;;  %v1275_v17 = vrot.slane %v1273_v60, 4  ;;  %v1651_v39 = vor.u32 %v1650_v61, %v1646_v22 }
 0x14b   : > { %v1705_v51 = vpop.f32.mrf.mxu0  ;;  %v1652_v38 = vrot.slane %v1651_v39, 4 }
 0x14c   : > { %v1549_v7 = vpop.f32.mrf.mxu3  ;;  %3159 = vmatmul.msk.bf16.gmra.mxu2 %vm785_vm4, %v4195_v11  ;;  %v1099_v31 = vpop.f32.mrf.mxu1  ;;  %v4216_v11 = vld [vmem:[%s3464_s12 + $0xc8] sm:$0x1] }
 0x14d   : > { %v1613_v46 = vadd.f32 %v1549_v7, %v1479_v54  ;;  %v1274_v7 = vsel %vm3794_vm7, %v3143_v49, %v1273_v60  ;;  %v1277_v54 = vsel %vm3794_vm7, %v1275_v17, %v1276_v9  ;;  %v1654_v29 = vshll.u32 %v4216_v11, 16 }
 0x14e   : > { %v1310_v5 = vunpack.c.l.b16 %v1274_v7  ;;  %v1100_v24 = vadd.f32 %v1099_v31, %v3971_v63  ;;  %v1642_v17 = vrot.slane %v1641_v2, 4 }
 0x14f   : > { %v1418_v34 = vpop.f32.mrf.mxu2  ;;  %v4213_v47 = vadd.f32 %v1705_v51, %v1613_v46  ;;  %v1656_v61 = vrot.slane %v1654_v29, 5 }
 0x150   : > { %v1480_v58 = vadd.f32 %v1418_v34, %v1098_v18  ;;  %v1311_v34 = vunpack.c.l.b16 %v1277_v54  ;;  %v4241_v54 = vld [vmem:[%s3464_s12 + $0xc0] sm:$0xff] }
 0x151   : > { %3180 = vmatmul.msk.bf16.gmra.mxu3 %vm785_vm4, %v4209_v30  ;;  %v1657_v63 = vsel %vm3491_vm3, %v1652_v38, %v1656_v61 }
 0x152   : > { %v4232_v46 = vpack.c.b16 %v1311_v34, %v1310_v5  ;;  %v1661_v39 = vunpack.c.l.b16 %v1657_v63 }
 0x153   : > { %v1708_v48 = vpop.f32.mrf.mxu0 }
 0x154   : > { %v1552_v28 = vpop.f32.mrf.mxu3  ;;  %v1102_v51 = vpop.f32.mrf.mxu1 }
 0x155   : > { %v1614_v18 = vadd.f32 %v1552_v28, %v1480_v58  ;;  %v1647_v58 = vsel %vm3491_vm3, %v1642_v17, %v1646_v22 }
 0x156   : > { %3197 = vmatmul.msk.bf16.gmra.mxu0 %vm785_vm4, %v3803_v53  ;;  %v1660_v2 = vunpack.c.l.b16 %v1647_v58 }
 0x157   : > { %v1420_v60 = vpop.f32.mrf.mxu2  ;;  %3127 = vmatmul.msk.bf16.gmra.mxu1 %vm785_vm4, %v4209_v30  ;;  %v4230_v15 = vadd.f32 %v1708_v48, %v1614_v18  ;;  %v1103_v48 = vadd.f32 %v1102_v51, %v3992_v26 }
 0x158   : > { %v1481_v9 = vadd.f32 %v1420_v60, %v1100_v24  ;;  %v4248_v22 = vpack.c.b16 %v1661_v39, %v1660_v2 }
 0x15b   : > { %v1710_v43 = vpop.f32.mrf.mxu0 }
 0x15c   : > { %v1554_v31 = vpop.f32.mrf.mxu3  ;;  %3160 = vmatmul.msk.bf16.gmra.mxu2 %vm785_vm4, %v4232_v46  ;;  %v1104_v49 = vpop.f32.mrf.mxu1 }
 0x15d   : > { %v1615_v7 = vadd.f32 %v1554_v31, %v1481_v9  ;;  %v1105_v26 = vadd.f32 %v1104_v49, %v4009_v0 }
 0x15f   : > { %v1423_v29 = vpop.f32.mrf.mxu2  ;;  %v4244_v28 = vadd.f32 %v1710_v43, %v1615_v7 }
 0x160   : > { %v1482_v5 = vadd.f32 %v1423_v29, %v1103_v48 }
 0x161   : > { %3181 = vmatmul.msk.bf16.gmra.mxu3 %vm785_vm4, %v4241_v54 }
 0x163   : > { %v1713_v34 = vpop.f32.mrf.mxu0 }
 0x164   : > { %v1557_v18 = vpop.f32.mrf.mxu3  ;;  %v1107_v24 = vpop.f32.mrf.mxu1 }
 0x165   : > { %v1616_v60 = vadd.f32 %v1557_v18, %v1482_v5  ;;  %v1108_v63 = vadd.f32 %v1107_v24, %v3894_v16 }
 0x166   : > { %3198 = vmatmul.msk.bf16.gmra.mxu0 %vm785_vm4, %v4248_v22 }
 0x167   : > { %v1425_v51 = vpop.f32.mrf.mxu2  ;;  %3201 = vmatmul.msk.bf16.vlgmr.msra.gmra.mxu1 %vm785_vm4, %v3828_v55  ;;  %v4255_v17 = vadd.f32 %v1713_v34, %v1616_v60 }
 0x168   : > { %v1483_v38 = vadd.f32 %v1425_v51, %v1105_v26 }
 0x16b   : > { %v1715_v61 = vpop.f32.mrf.mxu0 }
 0x16c   : > { %v1559_v9 = vpop.f32.mrf.mxu3  ;;  %3222 = vmatmul.msk.bf16.vlgmr.msra.gmra.mxu2 %vm785_vm4, %v3840_v6  ;;  %v1109_v43 = vpop.f32.mrf.mxu1 }
 0x16d   : > { %v1617_v58 = vadd.f32 %v1559_v9, %v1483_v38  ;;  %v1110_v6 = vadd.f32 %v1109_v43, %v3916_v57 }
 0x16f   : > { %v1428_v31 = vpop.f32.mrf.mxu2  ;;  %v4260_v7 = vadd.f32 %v1715_v61, %v1617_v58 }
 0x170   : > { %v1484_v0 = vadd.f32 %v1428_v31, %v1108_v63 }
 0x171   : > { %3239 = vmatmul.msk.bf16.vlgmr.msra.gmra.mxu3 %vm785_vm4, %v3731_v45 }
 0x173   : > { %v1718_v55 = vpop.f32.mrf.mxu0 }
 0x174   : > { %v1562_v49 = vpop.f32.mrf.mxu3  ;;  %v1112_v48 = vpop.f32.mrf.mxu1 }
 0x175   : > { %v1618_v2 = vadd.f32 %v1562_v49, %v1484_v0  ;;  %v1113_v24 = vadd.f32 %v1112_v48, %v3936_v59 }
 0x176   : > { %3257 = vmatmul.msk.bf16.vlgmr.msra.gmra.mxu0 %vm785_vm4, %v3854_v52 }
 0x177   : > { %v1430_v39 = vpop.f32.mrf.mxu2  ;;  %3202 = vmatmul.msk.bf16.gmra.mxu1 %vm785_vm4, %v3854_v52  ;;  %v4269_v16 = vadd.f32 %v1718_v55, %v1618_v2 }
 0x178   : > { %v1485_v29 = vadd.f32 %v1430_v39, %v1110_v6 }
 0x17b   : > { %v1720_v5 = vpop.f32.mrf.mxu0 }
 0x17c   : > { %v1564_v34 = vpop.f32.mrf.mxu3  ;;  %3223 = vmatmul.msk.bf16.gmra.mxu2 %vm785_vm4, %v3860_v41  ;;  %v1114_v45 = vpop.f32.mrf.mxu1 }
 0x17d   : > { %v1619_v18 = vadd.f32 %v1564_v34, %v1485_v29  ;;  %v1115_v41 = vadd.f32 %v1114_v45, %v3954_v3 }
 0x17f   : > { %v1433_v60 = vpop.f32.mrf.mxu2  ;;  %v4274_v26 = vadd.f32 %v1720_v5, %v1619_v18 }
 0x180   : > { %v1486_v57 = vadd.f32 %v1433_v60, %v1113_v24 }
 0x181   : > { %3240 = vmatmul.msk.bf16.gmra.mxu3 %vm785_vm4, %v3821_v20 }
 0x183   : > { %v1723_v52 = vpop.f32.mrf.mxu0 }
 0x184   : > { %v1567_v51 = vpop.f32.mrf.mxu3  ;;  %v1117_v38 = vpop.f32.mrf.mxu1 }
 0x185   : > { %v1620_v61 = vadd.f32 %v1567_v51, %v1486_v57  ;;  %v1118_v0 = vadd.f32 %v1117_v38, %v3973_v23 }
 0x186   : > { %3258 = vmatmul.msk.bf16.gmra.mxu0 %vm785_vm4, %v3874_v40 }
 0x187   : > { %v1435_v9 = vpop.f32.mrf.mxu2  ;;  %3203 = vmatmul.msk.bf16.gmra.mxu1 %vm785_vm4, %v3874_v40  ;;  %v4283_v59 = vadd.f32 %v1723_v52, %v1620_v61 }
 0x188   : > { %v1487_v43 = vadd.f32 %v1435_v9, %v1115_v41 }
 0x18b   : > { %v1725_v58 = vpop.f32.mrf.mxu0 }
 0x18c   : > { %v1569_v63 = vpop.f32.mrf.mxu3  ;;  %3224 = vmatmul.msk.bf16.gmra.mxu2 %vm785_vm4, %v3882_v8  ;;  %v1119_v20 = vpop.f32.mrf.mxu1 }
 0x18d   : > { %v1621_v31 = vadd.f32 %v1569_v63, %v1487_v43  ;;  %v1120_v8 = vadd.f32 %v1119_v20, %v3994_v1  ;;  %v5441_v43 = vld [vmem:[#allocation18_spill] sm:$0xff]  ;;  %v5442_v63 = vld [vmem:[#allocation16_spill] sm:$0xff] }
 0x18f   : > { %v1438_v55 = vpop.f32.mrf.mxu2  ;;  %v4288_v49 = vadd.f32 %v1725_v58, %v1621_v31 }
 0x190   : > { %v1488_v3 = vadd.f32 %v1438_v55, %v1118_v0  ;;  %v5443_v55 = vld [vmem:[#allocation8_spill] sm:$0xff] }
 0x191   : > { %3241 = vmatmul.msk.bf16.gmra.mxu3 %vm785_vm4, %v3503_v62 }
 0x193   : > { %v1728_v40 = vpop.f32.mrf.mxu0 }
 0x194   : > { %v1572_v48 = vpop.f32.mrf.mxu3  ;;  %v1122_v2 = vpop.f32.mrf.mxu1 }
 0x195   : > { %v1622_v6 = vadd.f32 %v1572_v48, %v1488_v3  ;;  %v1123_v18 = vadd.f32 %v1122_v2, %v4016_v56  ;;  %v5444_v2 = vld [vmem:[#allocation21_spill] sm:$0xff] }
 0x196   : > { %3259 = vmatmul.msk.bf16.gmra.mxu0 %vm785_vm4, %v3902_v12 }
 0x197   : > { %v1440_v39 = vpop.f32.mrf.mxu2  ;;  %3204 = vmatmul.msk.bf16.gmra.mxu1 %vm785_vm4, %v3902_v12  ;;  %v4297_v23 = vadd.f32 %v1728_v40, %v1622_v6  ;;  %v5445_v6 = vld [vmem:[#allocation17_spill] sm:$0xff] }
 0x198   : > { %v1489_v29 = vadd.f32 %v1440_v39, %v1120_v8 }
 0x19b   : > { %v1730_v5 = vpop.f32.mrf.mxu0 }
 0x19c   : > { %v1574_v34 = vpop.f32.mrf.mxu3  ;;  %3225 = vmatmul.msk.bf16.gmra.mxu2 %vm785_vm4, %v3910_v27  ;;  %v1124_v62 = vpop.f32.mrf.mxu1 }
 0x19d   : > { %v1623_v45 = vadd.f32 %v1574_v34, %v1489_v29  ;;  %v1125_v27 = vadd.f32 %v1124_v62, %v4031_v44 }
 0x19f   : > { %v1443_v24 = vpop.f32.mrf.mxu2  ;;  %v4302_v60 = vadd.f32 %v1730_v5, %v1623_v45  ;;  %v5446_v45 = vld [vmem:[#allocation22_spill] sm:$0xff] }
 0x1a0   : > { %v1490_v1 = vadd.f32 %v1443_v24, %v1123_v18 }
 0x1a1   : > { %3242 = vmatmul.msk.bf16.gmra.mxu3 %vm785_vm4, %v3577_v37 }
 0x1a3   : > { %v1733_v12 = vpop.f32.mrf.mxu0 }
 0x1a4   : > { %v1577_v57 = vpop.f32.mrf.mxu3  ;;  %v1127_v52 = vpop.f32.mrf.mxu1 }
 0x1a5   : > { %v1624_v51 = vadd.f32 %v1577_v57, %v1490_v1  ;;  %v1128_v20 = vadd.f32 %v1127_v52, %v5442_v63  ;;  %v5447_v1 = vld [vmem:[#allocation19_spill] sm:$0xff] }
 0x1a6   : > { %3260 = vmatmul.msk.bf16.gmra.mxu0 %vm785_vm4, %v3934_v33 }
 0x1a7   : > { %v1445_v38 = vpop.f32.mrf.mxu2  ;;  %3205 = vmatmul.msk.bf16.gmra.mxu1 %vm785_vm4, %v3934_v33  ;;  %v4311_v56 = vadd.f32 %v1733_v12, %v1624_v51 }
 0x1a8   : > { %v1491_v61 = vadd.f32 %v1445_v38, %v1125_v27  ;;  %v5448_v27 = vld [vmem:[#allocation14_spill] sm:$0xff] }
 0x1ab   : > { %v1735_v41 = vpop.f32.mrf.mxu0 }
 0x1ac   : > { %v1579_v9 = vpop.f32.mrf.mxu3  ;;  %3226 = vmatmul.msk.bf16.gmra.mxu2 %vm785_vm4, %v5441_v43  ;;  %v1129_v37 = vpop.f32.mrf.mxu1  ;;  %v5449_v43 = vld [vmem:[#allocation24_spill] sm:$0xff] }
 0x1ad   : > { %v1625_v58 = vadd.f32 %v1579_v9, %v1491_v61  ;;  %v1130_v8 = vadd.f32 %v1129_v37, %v5445_v6  ;;  %v5450_v37 = vld [vmem:[#allocation20_spill] sm:$0xff] }
 0x1af   : > { %v1448_v31 = vpop.f32.mrf.mxu2  ;;  %v4316_v0 = vadd.f32 %v1735_v41, %v1625_v58 }
 0x1b0   : > { %v1492_v44 = vadd.f32 %v1448_v31, %v1128_v20 }
 0x1b1   : > { %3243 = vmatmul.msk.bf16.gmra.mxu3 %vm785_vm4, %v5443_v55 }
 0x1b3   : > { %v1738_v33 = vpop.f32.mrf.mxu0 }
 0x1b4   : > { %v1582_v3 = vpop.f32.mrf.mxu3  ;;  %v1132_v40 = vpop.f32.mrf.mxu1 }
 0x1b5   : > { %v1626_v48 = vadd.f32 %v1582_v3, %v1492_v44  ;;  %v1133_v12 = vadd.f32 %v1132_v40, %v5447_v1  ;;  %v5455_v1 = vld [vmem:[#allocation25_spill] sm:$0xff] }
 0x1b6   : > { %3261 = vmatmul.msk.bf16.gmra.mxu0 %vm785_vm4, %v5444_v2 }
 0x1b7   : > { %v1450_v39 = vpop.f32.mrf.mxu2  ;;  %3206 = vmatmul.msk.bf16.gmra.mxu1 %vm785_vm4, %v5444_v2  ;;  %v4325_v29 = vadd.f32 %v1738_v33, %v1626_v48  ;;  %v5451_v33 = vld [vmem:[#allocation26_spill] sm:$0xff]  ;;  %v5452_v48 = vld [vmem:[#allocation23_spill] sm:$0xff] }
 0x1b8   : > { %v1493_v5 = vadd.f32 %v1450_v39, %v1130_v8 }
 0x1bb   : > { %v1740_v34 = vpop.f32.mrf.mxu0 }
 0x1bc   : > { %v1584_v62 = vpop.f32.mrf.mxu3  ;;  %3227 = vmatmul.msk.bf16.gmra.mxu2 %vm785_vm4, %v5446_v45  ;;  %v1134_v18 = vpop.f32.mrf.mxu1 }
 0x1bd   : > { %v1627_v24 = vadd.f32 %v1584_v62, %v1493_v5  ;;  %v1135_v58 = vadd.f32 %v1134_v18, %v5450_v37  ;;  %v5453_v5 = vld [vmem:[#allocation2_spill] sm:$0xff] }
 0x1bf   : > { %v1453_v57 = vpop.f32.mrf.mxu2  ;;  %v4330_v52 = vadd.f32 %v1740_v34, %v1627_v24  ;;  %v5454_v24 = vld [vmem:[#allocation28_spill] sm:$0xff] }
 0x1c0   : > { %v1494_v51 = vadd.f32 %v1453_v57, %v1133_v12 }
 0x1c1   : > { %3244 = vmatmul.msk.bf16.gmra.mxu3 %vm785_vm4, %v5448_v27 }
 0x1c3   : > { %v1743_v38 = vpop.f32.mrf.mxu0 }
 0x1c4   : > { %v1587_v61 = vpop.f32.mrf.mxu3  ;;  %v1137_v41 = vpop.f32.mrf.mxu1 }
 0x1c5   : > { %v1628_v9 = vadd.f32 %v1587_v61, %v1494_v51  ;;  %v1138_v2 = vadd.f32 %v1137_v41, %v5452_v48 }
 0x1c6   : > { %3262 = vmatmul.msk.bf16.gmra.mxu0 %vm785_vm4, %v5449_v43 }
 0x1c7   : > { %v1455_v63 = vpop.f32.mrf.mxu2  ;;  %3207 = vmatmul.msk.bf16.gmra.mxu1 %vm785_vm4, %v5449_v43  ;;  %v4339_v20 = vadd.f32 %v1743_v38, %v1628_v9  ;;  %v5456_v43 = vld [vmem:[#allocation27_spill] sm:$0xff] }
 0x1c8   : > { %v1495_v31 = vadd.f32 %v1455_v63, %v1135_v58 }
 0x1cb   : > { %v1745_v44 = vpop.f32.mrf.mxu0 }
 0x1cc   : > { %v1589_v55 = vpop.f32.mrf.mxu3  ;;  %3228 = vmatmul.msk.bf16.gmra.mxu2 %vm785_vm4, %v5451_v33  ;;  %v1139_v3 = vpop.f32.mrf.mxu1 }
 0x1cd   : > { %v1629_v40 = vadd.f32 %v1589_v55, %v1495_v31  ;;  %v1140_v12 = vadd.f32 %v1139_v3, %v5455_v1 }
 0x1cf   : > { %v1458_v6 = vpop.f32.mrf.mxu2  ;;  %v4344_v8 = vadd.f32 %v1745_v44, %v1629_v40 }
 0x1d0   : > { %v1496_v39 = vadd.f32 %v1458_v6, %v1138_v2 }
 0x1d1   : > { %3245 = vmatmul.msk.bf16.gmra.mxu3 %vm785_vm4, %v5453_v5 }
 0x1d3   : > { %v1748_v34 = vpop.f32.mrf.mxu0 }
 0x1d4   : > { %v1592_v62 = vpop.f32.mrf.mxu3  ;;  %v1142_v45 = vpop.f32.mrf.mxu1 }
 0x1d5   : > { %v1630_v18 = vadd.f32 %v1592_v62, %v1496_v39  ;;  %v1143_v37 = vadd.f32 %v1142_v45, %v5456_v43  ;;  %v5458_v43 = vld [vmem:[#allocation9_spill] sm:$0xff] }
 0x1d6   : > { %3263 = vmatmul.msk.bf16.gmra.mxu0 %vm785_vm4, %v5454_v24 }
 0x1d7   : > { %v1460_v57 = vpop.f32.mrf.mxu2  ;;  %3208 = vmatmul.msk.bf16.gmra.mxu1 %vm785_vm4, %v5454_v24  ;;  %v4353_v51 = vadd.f32 %v1748_v34, %v1630_v18 }
 0x1d8   : > { %v1497_v27 = vadd.f32 %v1460_v57, %v1140_v12 }
 0x1db   : > { %v1750_v38 = vpop.f32.mrf.mxu0 }
 0x1dc   : > { %v1594_v61 = vpop.f32.mrf.mxu3  ;;  %3229 = vmatmul.msk.bf16.gmra.mxu2 %vm785_vm4, %v4046_v19  ;;  %v1144_v41 = vpop.f32.mrf.mxu1  ;;  %v5457_v19 = vld [vmem:[#allocation29_spill] sm:$0xff] }
 0x1dd   : > { %v1631_v9 = vadd.f32 %v1594_v61, %v1497_v27  ;;  %v1145_v48 = vadd.f32 %v1144_v41, %v5457_v19 }
 0x1df   : > { %v1463_v58 = vpop.f32.mrf.mxu2  ;;  %v4358_v63 = vadd.f32 %v1750_v38, %v1631_v9 }
 0x1e0   : > { %v1498_v31 = vadd.f32 %v1463_v58, %v1143_v37 }
 0x1e1   : > { %3246 = vmatmul.msk.bf16.gmra.mxu3 %vm785_vm4, %v3602_v4 }
 0x1e3   : > { %v1753_v44 = vpop.f32.mrf.mxu0 }
 0x1e4   : > { %v1597_v55 = vpop.f32.mrf.mxu3  ;;  %v1818_v33 = vpop.f32.mrf.mxu1 }
 0x1e5   : > { %v1632_v3 = vadd.f32 %v1597_v55, %v1498_v31  ;;  %v1898_v40 = vadd.f32 %v1818_v33, %v4061_v32 }
 0x1e6   : > { %3264 = vmatmul.msk.bf16.gmra.mxu0 %vm785_vm4, %v4063_v10 }
 0x1e7   : > { %v1465_v2 = vpop.f32.mrf.mxu2  ;;  %3209 = vmatmul.msk.bf16.gmra.mxu1 %vm785_vm4, %v4063_v10  ;;  %v4368_v6 = vadd.f32 %v1753_v44, %v1632_v3  ;;  %v5459_v44 = vld [vmem:[#allocation15_spill] sm:$0xff] }
 0x1e8   : > { %v1499_v39 = vadd.f32 %v1465_v2, %v1145_v48  ;;  %v5461_v48 = vld [vmem:[#allocation31_spill] sm:$0xff] }
 0x1eb   : > { %v1755_v5 = vpop.f32.mrf.mxu0 }
 0x1ec   : > { %v1599_v4 = vpop.f32.mrf.mxu3  ;;  %3230 = vmatmul.msk.bf16.gmra.mxu2 %vm785_vm4, %v4070_v42  ;;  %v1820_v34 = vpop.f32.mrf.mxu1 }
 0x1ed   : > { %v1633_v62 = vadd.f32 %v1599_v4, %v1499_v39  ;;  %v1899_v32 = vadd.f32 %v1820_v34, %v4074_v35  ;;  %v5462_v34 = vld [vmem:[#allocation32_spill] sm:$0xff] }
 0x1ef   : > { %v1952_v45 = vpop.f32.mrf.mxu2  ;;  %v4373_v18 = vadd.f32 %v1755_v5, %v1633_v62 }
 0x1f0   : > { %v2032_v24 = vadd.f32 %v1952_v45, %v1898_v40  ;;  %v5460_v40 = vld [vmem:[#allocation30_spill] sm:$0xff]  ;;  %v5463_v45 = vld [vmem:[#allocation33_spill] sm:$0xff] }
 0x1f1   : > { %3247 = vmatmul.msk.bf16.gmra.mxu3 %vm785_vm4, %v3687_v25 }
 0x1f3   : > { %v2248_v10 = vpop.f32.mrf.mxu0 }
 0x1f4   : > { %v2108_v1 = vpop.f32.mrf.mxu3  ;;  %v1823_v12 = vpop.f32.mrf.mxu1 }
 0x1f5   : > { %v2188_v57 = vadd.f32 %v2108_v1, %v2032_v24  ;;  %v1900_v27 = vadd.f32 %v1823_v12, %v4087_v21 }
 0x1f6   : > { %3265 = vmatmul.msk.bf16.gmra.mxu0 %vm785_vm4, %v4089_v13 }
 0x1f7   : > { %v4380_v42 = vadd.f32 %v2248_v10, %v2188_v57  ;;  %v1954_v38 = vpop.f32.mrf.mxu2  ;;  %3210 = vmatmul.msk.bf16.gmra.mxu1 %vm785_vm4, %v4089_v13  ;;  %v5464_v57 = vld [vmem:[#allocation3_spill] sm:$0xff] }
 0x1f8   : > { %v2033_v35 = vadd.f32 %v1954_v38, %v1899_v32 }
 0x1fb   : > { %v2250_v61 = vpop.f32.mrf.mxu0 }
 0x1fc   : > { %v2110_v41 = vpop.f32.mrf.mxu3  ;;  %3231 = vmatmul.msk.bf16.gmra.mxu2 %vm785_vm4, %v4096_v50  ;;  %v1825_v25 = vpop.f32.mrf.mxu1 }
 0x1fd   : > { %v2189_v9 = vadd.f32 %v2110_v41, %v2033_v35  ;;  %v1901_v37 = vadd.f32 %v1825_v25, %v5458_v43  ;;  %v5465_v41 = vld [vmem:[#allocation34_spill] sm:$0xff] }
 0x1ff   : > { %v4387_v21 = vadd.f32 %v2250_v61, %v2189_v9  ;;  %v1957_v58 = vpop.f32.mrf.mxu2  ;;  %v5466_v9 = vld [vmem:[#allocation35_spill] sm:$0xff] }
 0x200   : > { %v2034_v31 = vadd.f32 %v1957_v58, %v1900_v27 }
 0x201   : > { %3248 = vmatmul.msk.bf16.gmra.mxu3 %vm785_vm4, %v5459_v44 }
 0x203   : > { %v2253_v55 = vpop.f32.mrf.mxu0 }
 0x204   : > { %v2113_v33 = vpop.f32.mrf.mxu3  ;;  %v1828_v13 = vpop.f32.mrf.mxu1 }
 0x205   : > { %v2190_v3 = vadd.f32 %v2113_v33, %v2034_v31  ;;  %v1902_v19 = vadd.f32 %v1828_v13, %v5460_v40 }
 0x206   : > { %3266 = vmatmul.msk.bf16.gmra.mxu0 %vm785_vm4, %v5461_v48 }
 0x207   : > { %v4394_v50 = vadd.f32 %v2253_v55, %v2190_v3  ;;  %v1959_v2 = vpop.f32.mrf.mxu2  ;;  %3211 = vmatmul.msk.bf16.gmra.mxu1 %vm785_vm4, %v5461_v48  ;;  %v5467_v55 = vld [vmem:[#allocation36_spill] sm:$0xff]  ;;  %v5468_v3 = vld [vmem:[#allocation37_spill] sm:$0xff] }
 0x208   : > { %v2035_v39 = vadd.f32 %v1959_v2, %v1901_v37 }
 0x20b   : > { %v2255_v5 = vpop.f32.mrf.mxu0 }
 0x20c   : > { %v2115_v4 = vpop.f32.mrf.mxu3  ;;  %3232 = vmatmul.msk.bf16.gmra.mxu2 %vm785_vm4, %v5462_v34  ;;  %v1830_v62 = vpop.f32.mrf.mxu1 }
 0x20d   : > { %v2191_v32 = vadd.f32 %v2115_v4, %v2035_v39  ;;  %v1903_v24 = vadd.f32 %v1830_v62, %v5463_v45  ;;  %v5469_v39 = vld [vmem:[#allocation4_spill] sm:$0xff] }
 0x20f   : > { %v4401_v10 = vadd.f32 %v2255_v5, %v2191_v32  ;;  %v1962_v1 = vpop.f32.mrf.mxu2  ;;  %v5470_v32 = vld [vmem:[#allocation38_spill] sm:$0xff] }
 0x210   : > { %v2036_v12 = vadd.f32 %v1962_v1, %v1902_v19 }
 0x211   : > { %3249 = vmatmul.msk.bf16.gmra.mxu3 %vm785_vm4, %v5464_v57 }
 0x213   : > { %v2258_v27 = vpop.f32.mrf.mxu0 }
 0x214   : > { %v2118_v38 = vpop.f32.mrf.mxu3  ;;  %v1833_v35 = vpop.f32.mrf.mxu1 }
 0x215   : > { %v2192_v61 = vadd.f32 %v2118_v38, %v2036_v12  ;;  %v1904_v25 = vadd.f32 %v1833_v35, %v5465_v41  ;;  %v5472_v35 = vld [vmem:[#allocation6_spill] sm:$0xff] }
 0x216   : > { %3267 = vmatmul.msk.bf16.gmra.mxu0 %vm785_vm4, %v5466_v9 }
 0x217   : > { %v4408_v43 = vadd.f32 %v2258_v27, %v2192_v61  ;;  %v1964_v37 = vpop.f32.mrf.mxu2  ;;  %3212 = vmatmul.msk.bf16.gmra.mxu1 %vm785_vm4, %v5466_v9 }
 0x218   : > { %v2037_v58 = vadd.f32 %v1964_v37, %v1903_v24  ;;  %v5471_v24 = vld [vmem:[#allocation39_spill] sm:$0xff] }
 0x21b   : > { %v2260_v31 = vpop.f32.mrf.mxu0 }
 0x21c   : > { %v2120_v44 = vpop.f32.mrf.mxu3  ;;  %3233 = vmatmul.msk.bf16.gmra.mxu2 %vm785_vm4, %v5467_v55  ;;  %v1835_v33 = vpop.f32.mrf.mxu1 }
 0x21d   : > { %v2193_v13 = vadd.f32 %v2120_v44, %v2037_v58  ;;  %v1905_v40 = vadd.f32 %v1835_v33, %v5468_v3  ;;  %v5474_v44 = vld [vmem:[#allocation10_spill] sm:$0xff] }
 0x21f   : > { %v4415_v19 = vadd.f32 %v2260_v31, %v2193_v13  ;;  %v1967_v48 = vpop.f32.mrf.mxu2 }
 0x220   : > { %v2038_v2 = vadd.f32 %v1967_v48, %v1904_v25  ;;  %v5473_v25 = vld [vmem:[#allocation7_spill] sm:$0xff] }
 0x221   : > { %3250 = vmatmul.msk.bf16.gmra.mxu3 %vm785_vm4, %v5469_v39 }
 0x223   : > { %v2263_v5 = vpop.f32.mrf.mxu0 }
 0x224   : > { %v2123_v4 = vpop.f32.mrf.mxu3  ;;  %v1838_v34 = vpop.f32.mrf.mxu1 }
 0x225   : > { %v2194_v62 = vadd.f32 %v2123_v4, %v2038_v2  ;;  %v1906_v45 = vadd.f32 %v1838_v34, %v5470_v32  ;;  %v5476_v2 = vld [vmem:[#allocation41_spill] sm:$0xff] }
 0x226   : > { %3268 = vmatmul.msk.bf16.gmra.mxu0 %vm785_vm4, %v5471_v24 }
 0x227   : > { %v4422_v1 = vadd.f32 %v2263_v5, %v2194_v62  ;;  %v1969_v12 = vpop.f32.mrf.mxu2  ;;  %3213 = vmatmul.msk.bf16.gmra.mxu1 %vm785_vm4, %v5471_v24 }
 0x228   : > { %v2039_v57 = vadd.f32 %v1969_v12, %v1905_v40  ;;  %v5475_v40 = vld [vmem:[#allocation40_spill] sm:$0xff] }
 0x22b   : > { %v2265_v27 = vpop.f32.mrf.mxu0 }
 0x22c   : > { %v2125_v38 = vpop.f32.mrf.mxu3  ;;  %3234 = vmatmul.msk.bf16.gmra.mxu2 %vm785_vm4, %v5472_v35  ;;  %v1840_v61 = vpop.f32.mrf.mxu1  ;;  %v5477_v35 = vld [vmem:[#allocation42_spill] sm:$0xff] }
 0x22d   : > { %v2195_v41 = vadd.f32 %v2125_v38, %v2039_v57  ;;  %v1907_v9 = vadd.f32 %v1840_v61, %v5473_v25  ;;  %v1793_v61 = vrot.slane %v5477_v35, 5  ;;  %v4452_v25 = vld [vmem:[%s3464_s12 + $0xd0] sm:$0xf] }
 0x22f   : > { %v4429_v37 = vadd.f32 %v2265_v27, %v2195_v41  ;;  %v1972_v58 = vpop.f32.mrf.mxu2  ;;  %v4449_v41 = vld [vmem:[%s3464_s12 + $0xcc] sm:$0xf] }
 0x230   : > { %v2040_v31 = vadd.f32 %v1972_v58, %v1906_v45 }
 0x231   : > { %3251 = vmatmul.msk.bf16.gmra.mxu3 %vm785_vm4, %v5474_v44 }
 0x233   : > { %v2268_v55 = vpop.f32.mrf.mxu0 }
 0x234   : > { %v2128_v33 = vpop.f32.mrf.mxu3  ;;  %v1843_v13 = vpop.f32.mrf.mxu1 }
 0x235   : > { %v2196_v3 = vadd.f32 %v2128_v33, %v2040_v31  ;;  %v1908_v48 = vadd.f32 %v1843_v13, %v5475_v40  ;;  %v2074_v33 = vshll.u32 %v4452_v25, 16  ;;  %v2078_v13 = vshrl.u32 %v4452_v25, 16 }
 0x236   : > { %3269 = vmatmul.msk.bf16.gmra.mxu0 %vm785_vm4, %v5476_v2 }
 0x237   : > { %v4436_v39 = vadd.f32 %v2268_v55, %v2196_v3  ;;  %v1974_v5 = vpop.f32.mrf.mxu2  ;;  %3214 = vmatmul.msk.bf16.gmra.mxu1 %vm785_vm4, %v5476_v2  ;;  %v2065_v55 = vshrl.u32 %v4449_v41, 16 }
 0x238   : > { %v2041_v4 = vadd.f32 %v1974_v5, %v1907_v9 }
 0x23b   : > { %v2270_v34 = vpop.f32.mrf.mxu0 }
 0x23c   : > { %v2130_v62 = vpop.f32.mrf.mxu3  ;;  %3235 = vmatmul.msk.bf16.gmra.mxu2 %vm785_vm4, %v4209_v30  ;;  %v1845_v32 = vpop.f32.mrf.mxu1 }
 0x23d   : > { %v2197_v45 = vadd.f32 %v2130_v62, %v2041_v4  ;;  %v1909_v24 = vadd.f32 %v1845_v32, %v4213_v47  ;;  %v5478_v47 = vld [vmem:[#allocation5_spill] sm:$0xff]  ;;  %v2067_v4 = vrot.slane %v2065_v55, 4  ;;  %v2076_v62 = vrot.slane %v2074_v33, 5 }
 0x23e   : > { %v3199_v44 = vrot.slane %v5478_v47, 9  ;;  %v2080_v32 = vrot.slane %v2078_v13, 4 }
 0x23f   : > { %v4443_v12 = vadd.f32 %v2270_v34, %v2197_v45  ;;  %v1977_v57 = vpop.f32.mrf.mxu2 }
 0x240   : > { %v2042_v27 = vadd.f32 %v1977_v57, %v1908_v48  ;;  %v1796_v48 = vrot.slane %v4216_v11, 5  ;;  %v1794_v5 = vsel %vm3794_vm7, %v3199_v44, %v1793_v61 }
 0x241   : > { %3252 = vmatmul.msk.bf16.gmra.mxu3 %vm785_vm4, %v3803_v53  ;;  %v2068_v53 = vshll.u32 %v4449_v41, 16  ;;  %v1800_v11 = vunpack.c.l.b16 %v1794_v5 }
 0x243   : > { %v2273_v38 = vpop.f32.mrf.mxu0  ;;  %v2070_v34 = vrot.slane %v2068_v53, 5 }
 0x244   : > { %v2133_v9 = vpop.f32.mrf.mxu3  ;;  %v1848_v30 = vpop.f32.mrf.mxu1 }
 0x245   : > { %v2198_v58 = vadd.f32 %v2133_v9, %v2042_v27  ;;  %v1910_v31 = vadd.f32 %v1848_v30, %v4230_v15  ;;  %v1795_v15 = vrot.slane %v1793_v61, 4  ;;  %v346_v27 = vld [vmem:[%s3464_s12 + $0xd4] sm:$0x1]  ;;  %v2071_v61 = vor.u32 %v2070_v34, %v2067_v4 }
 0x246   : > { %3270 = vmatmul.msk.bf16.gmra.mxu0 %vm785_vm4, %v4232_v46  ;;  %v2081_v30 = vor.u32 %v2080_v32, %v2076_v62 }
 0x247   : > { %v4462_v3 = vadd.f32 %v2273_v38, %v2198_v58  ;;  %v1979_v40 = vpop.f32.mrf.mxu2  ;;  %3215 = vmatmul.msk.bf16.gmra.mxu1 %vm785_vm4, %v4232_v46  ;;  %v1797_v57 = vsel %vm3794_vm7, %v1795_v15, %v1796_v48  ;;  %v2084_v58 = vshll.u32 %v346_v27, 16  ;;  %v2072_v33 = vrot.slane %v2071_v61, 4 }
 0x248   : > { %v2043_v2 = vadd.f32 %v1979_v40, %v1909_v24  ;;  %v1801_v9 = vunpack.c.l.b16 %v1797_v57  ;;  %v2082_v13 = vrot.slane %v2081_v30, 4  ;;  %v2223_v15 = vrot.slane %v4452_v25, 5 }
 0x249   : > { %v3255_v25 = vrot.slane %v4449_v41, 9 }
 0x24a   : > { %v1802_v53 = vpack.c.b16 %v1801_v9, %v1800_v11  ;;  %v2225_v32 = vrot.slane %v2223_v15, 4 }
 0x24b   : > { %v2275_v45 = vpop.f32.mrf.mxu0 }
 0x24c   : > { %v2135_v38 = vpop.f32.mrf.mxu3  ;;  %3236 = vmatmul.msk.bf16.gmra.mxu2 %vm785_vm4, %v4241_v54  ;;  %v1850_v46 = vpop.f32.mrf.mxu1  ;;  %v2086_v54 = vrot.slane %v2084_v58, 5 }
 0x24d   : > { %v2199_v35 = vadd.f32 %v2135_v38, %v2043_v2  ;;  %v1911_v24 = vadd.f32 %v1850_v46, %v4244_v28  ;;  %v3295_v38 = vld [vmem:[%s3464_s12 + $0xcc] sm:$0xff] }
 0x24f   : > { %v4475_v47 = vadd.f32 %v2275_v45, %v2199_v35  ;;  %v1982_v44 = vpop.f32.mrf.mxu2  ;;  %v2226_v45 = vrot.slane %v346_v27, 5 }
 0x250   : > { %v2044_v55 = vadd.f32 %v1982_v44, %v1910_v31  ;;  %v2077_v31 = vsel %vm3491_vm3, %v2072_v33, %v2076_v62  ;;  %v2224_v62 = vsel %vm3794_vm7, %v3255_v25, %v2223_v15 }
 0x251   : > { %3253 = vmatmul.msk.bf16.gmra.mxu3 %vm785_vm4, %v4248_v22  ;;  %v2087_v22 = vsel %vm3491_vm3, %v2082_v13, %v2086_v54  ;;  %v2227_v36 = vsel %vm3794_vm7, %v2225_v32, %v2226_v45  ;;  %v2230_v27 = vunpack.c.l.b16 %v2224_v62 }
 0x252   : > { %v2091_v46 = vunpack.c.l.b16 %v2087_v22 }
 0x253   : > { %v2278_v40 = vpop.f32.mrf.mxu0 }
 0x254   : > { %v2138_v28 = vpop.f32.mrf.mxu3  ;;  %v1853_v48 = vpop.f32.mrf.mxu1 }
 0x255   : > { %v2200_v2 = vadd.f32 %v2138_v28, %v2044_v55  ;;  %v1912_v5 = vadd.f32 %v1853_v48, %v4255_v17  ;;  %v2090_v17 = vunpack.c.l.b16 %v2077_v31 }
 0x256   : > { %3271 = vmatmul.msk.bf16.gmra.mxu0 %vm785_vm4, %v1802_v53 }
 0x257   : > { %v4486_v4 = vadd.f32 %v2278_v40, %v2200_v2  ;;  %v1984_v34 = vpop.f32.mrf.mxu2  ;;  %3216 = vmatmul.msk.bf16.gmra.mxu1 %vm785_vm4, %v1802_v53  ;;  %v2092_v30 = vpack.c.b16 %v2091_v46, %v2090_v17 }
 0x258   : > { %v2045_v57 = vadd.f32 %v1984_v34, %v1911_v24  ;;  %v2231_v24 = vunpack.c.l.b16 %v2227_v36 }
 0x25a   : > { %v2232_v53 = vpack.c.b16 %v2231_v24, %v2230_v27 }
 0x25b   : > { %v2280_v35 = vpop.f32.mrf.mxu0 }
 0x25c   : > { %v2140_v11 = vpop.f32.mrf.mxu3  ;;  %3237 = vmatmul.msk.bf16.gmra.mxu2 %vm785_vm4, %v3295_v38  ;;  %v1855_v9 = vpop.f32.mrf.mxu1 }
 0x25d   : > { %v2201_v61 = vadd.f32 %v2140_v11, %v2045_v57  ;;  %v1913_v41 = vadd.f32 %v1855_v9, %v4260_v7 }
 0x25f   : > { %v4497_v58 = vadd.f32 %v2280_v35, %v2201_v61  ;;  %v1987_v44 = vpop.f32.mrf.mxu2 }
 0x260   : > { %v2046_v55 = vadd.f32 %v1987_v44, %v1912_v5 }
 0x261   : > { %3254 = vmatmul.msk.bf16.gmra.mxu3 %vm785_vm4, %v2092_v30 }
 0x263   : > { %v2283_v33 = vpop.f32.mrf.mxu0 }
 0x264   : > { %v2143_v14 = vpop.f32.mrf.mxu3  ;;  %v1858_v13 = vpop.f32.mrf.mxu1 }
 0x265   : > { %v2202_v54 = vadd.f32 %v2143_v14, %v2046_v55  ;;  %v1914_v40 = vadd.f32 %v1858_v13, %v4269_v16 }
 0x266   : > { %3272 = vmatmul.msk.bf16.gmra.mxu0 %vm785_vm4, %v2232_v53 }
 0x267   : > { %v4502_v15 = vadd.f32 %v2283_v33, %v2202_v54  ;;  %v1989_v7 = vpop.f32.mrf.mxu2 }
 0x268   : > { %v2047_v28 = vadd.f32 %v1989_v7, %v1913_v41 }
 0x26b   : > { %v2285_v48 = vpop.f32.mrf.mxu0 }
 0x26c   : > { %v2145_v2 = vpop.f32.mrf.mxu3  ;;  %v1860_v31 = vpop.f32.mrf.mxu1 }
 0x26d   : > { %v2203_v22 = vadd.f32 %v2145_v2, %v2047_v28  ;;  %v1915_v5 = vadd.f32 %v1860_v31, %v4274_v26 }
 0x26f   : > { %v4505_v34 = vadd.f32 %v2285_v48, %v2203_v22  ;;  %v1992_v25 = vpop.f32.mrf.mxu2 }
 0x270   : > { %v2048_v32 = vadd.f32 %v1992_v25, %v1914_v40 }
 0x273   : > { %v2288_v45 = vpop.f32.mrf.mxu0 }
 0x274   : > { %v2148_v57 = vpop.f32.mrf.mxu3  ;;  %v1863_v38 = vpop.f32.mrf.mxu1 }
 0x275   : > { %v2204_v16 = vadd.f32 %v2148_v57, %v2048_v32  ;;  %v1916_v17 = vadd.f32 %v1863_v38, %v4283_v59  ;;  %v2397_v38 = vld [vmem:[%s5337_s3 + $0x8] sm:$0xff] }
 0x277   : > { %v4508_v46 = vadd.f32 %v2288_v45, %v2204_v16  ;;  %v1994_v35 = vpop.f32.mrf.mxu2 }
 0x278   : > { %v2049_v62 = vadd.f32 %v1994_v35, %v1915_v5  ;;  %v2396_v35 = vld [vmem:[%s5337_s3] sm:$0xff] }
 0x27b   : > { %v2290_v36 = vpop.f32.mrf.mxu0 }
 0x27c   : > { %v2150_v11 = vpop.f32.mrf.mxu3  ;;  %v1865_v9 = vpop.f32.mrf.mxu1 }
 0x27d   : > { %v2205_v61 = vadd.f32 %v2150_v11, %v2049_v62  ;;  %v1917_v26 = vadd.f32 %v1865_v9, %v4288_v49 }
 0x27f   : > { %v4511_v30 = vadd.f32 %v2290_v36, %v2205_v61  ;;  %v1997_v41 = vpop.f32.mrf.mxu2 }
 0x280   : > { %v2050_v27 = vadd.f32 %v1997_v41, %v1916_v17 }
 0x283   : > { %v2293_v24 = vpop.f32.mrf.mxu0 }
 0x284   : > { %v2153_v44 = vpop.f32.mrf.mxu3  ;;  %v1868_v55 = vpop.f32.mrf.mxu1 }
 0x285   : > { %v2206_v53 = vadd.f32 %v2153_v44, %v2050_v27  ;;  %v1918_v59 = vadd.f32 %v1868_v55, %v4297_v23  ;;  %v4525_v23 = vld [vmem:[%s5336_s2] ss:$0 sm:$0xff] }
 0x286   : > { %v2365_v32 = vadd.f32 %v4525_v23, %v4387_v21  ;;  %v2364_v16 = vadd.f32 %v4525_v23, %v4380_v42  ;;  %v2366_v17 = vadd.f32 %v4525_v23, %v4394_v50  ;;  %v2398_v21 = vld [vmem:[%s5337_s3 + $0x10] sm:$0xff]  ;;  %v2367_v36 = vadd.f32 %v4525_v23, %v4401_v10  ;;  %v2399_v42 = vld [vmem:[%s5337_s3 + $0x18] sm:$0xff]  ;;  %v2400_v10 = vld [vmem:[%s5337_s3 + $0x20] sm:$0xff] }
 0x287   : > { %v4514_v33 = vadd.f32 %v2293_v24, %v2206_v53  ;;  %v1999_v14 = vpop.f32.mrf.mxu2  ;;  %v2368_v41 = vadd.f32 %v4525_v23, %v4408_v43  ;;  %v2369_v44 = vadd.f32 %v4525_v23, %v4415_v19  ;;  %v2401_v53 = vld [vmem:[%s5337_s3 + $0x28] sm:$0xff]  ;;  %v2402_v19 = vld [vmem:[%s5337_s3 + $0x30] sm:$0xff] }
 0x288   : > { %v2051_v13 = vadd.f32 %v1999_v14, %v1917_v26  ;;  %v4546_v62 = vadd.f32 %v2397_v38, %v2365_v32  ;;  %v4559_v61 = vadd.f32 %v2396_v35, %v2364_v16  ;;  %v4561_v26 = vadd.f32 %v2398_v21, %v2366_v17  ;;  %v2404_v17 = vld [vmem:[%s5337_s3 + $0x40] sm:$0xff] }
 0x289   : > { %v4570_v24 = vadd.f32 %v2399_v42, %v2367_v36  ;;  %v4583_v14 = vadd.f32 %v2400_v10, %v2368_v41  ;;  %v2372_v16 = vadd.f32 %v4525_v23, %v4436_v39  ;;  %v2373_v36 = vadd.f32 %v4525_v23, %v4443_v12  ;;  %v2405_v10 = vld [vmem:[%s5337_s3 + $0x48] sm:$0xff] }
 0x28a   : > { %v2462_v27 = vsel %vm2460_vm8, %v4546_v62, 0.0  ;;  %v2461_v43 = vsel %vm2460_vm8, %v4559_v61, 0.0 }
 0x28b   : > { %v2295_v54 = vpop.f32.mrf.mxu0  ;;  %v2468_v32 = vsel %vm2460_vm8, %v4583_v14, 0.0 }
 0x28c   : > { %v2155_v40 = vpop.f32.mrf.mxu3  ;;  %v4516_v7 = vpop.f32.mrf.mxu1 }
 0x28d   : > { %v2207_v28 = vadd.f32 %v2155_v40, %v2051_v13  ;;  %v2370_v13 = vadd.f32 %v4525_v23, %v4422_v1  ;;  %v2466_v40 = vsel %vm2460_vm8, %v4570_v24, 0.0  ;;  %v2403_v1 = vld [vmem:[%s5337_s3 + $0x38] sm:$0xff] }
 0x28f   : > { %v4518_v49 = vadd.f32 %v2295_v54, %v2207_v28  ;;  %v2002_v48 = vpop.f32.mrf.mxu2  ;;  %v2463_v54 = vadd.f32 %v2462_v27, %v2461_v43  ;;  %v4592_v28 = vadd.f32 %v2401_v53, %v2369_v44  ;;  %v4607_v38 = vadd.f32 %v2402_v19, %v2370_v13  ;;  %v2406_v43 = vld [vmem:[%s5337_s3 + $0x50] sm:$0xff] }
 0x290   : > { %v2052_v2 = vadd.f32 %v2002_v48, %v1918_v59  ;;  %v2464_v59 = vsel %vm2460_vm8, %v4561_v26, 0.0  ;;  %v2371_v48 = vadd.f32 %v4525_v23, %v4429_v37  ;;  %v4625_v27 = vadd.f32 %v2404_v17, %v2372_v16 }
 0x291   : > { %v2470_v35 = vsel %vm2460_vm8, %v4592_v28, 0.0  ;;  %v2472_v39 = vsel %vm2460_vm8, %v4607_v38, 0.0  ;;  %v2374_v44 = vadd.f32 %v4525_v23, %v4462_v3  ;;  %v2375_v13 = vadd.f32 %v4525_v23, %v4475_v47  ;;  %v2407_v3 = vld [vmem:[%s5337_s3 + $0x58] sm:$0xff]  ;;  %v2408_v47 = vld [vmem:[%s5337_s3 + $0x60] sm:$0xff] }
 0x292   : > { %v4616_v21 = vadd.f32 %v2403_v1, %v2371_v48 }
 0x293   : > { %v2298_v31 = vpop.f32.mrf.mxu0  ;;  %v4645_v1 = vadd.f32 %v2406_v43, %v2374_v44  ;;  %v4654_v17 = vadd.f32 %v2407_v3, %v2375_v13 }
 0x294   : > { %v2158_v22 = vpop.f32.mrf.mxu3  ;;  %v4520_v5 = vpop.f32.mrf.mxu1  ;;  %v2474_v12 = vsel %vm2460_vm8, %v4616_v21, 0.0 }
 0x295   : > { %v2208_v25 = vadd.f32 %v2158_v22, %v2052_v2  ;;  %v2480_v44 = vsel %vm2460_vm8, %v4645_v1, 0.0  ;;  %v2482_v13 = vsel %vm2460_vm8, %v4654_v17, 0.0 }
 0x297   : > { %v4529_v45 = vadd.f32 %v2298_v31, %v2208_v25  ;;  %v4531_v57 = vpop.f32.mrf.mxu2  ;;  %v2465_v31 = vadd.f32 %v2464_v59, %v2463_v54  ;;  %v4634_v59 = vadd.f32 %v2405_v10, %v2373_v36  ;;  %v2409_v10 = vld [vmem:[%s5337_s3 + $0x68] sm:$0xff] }
 0x299   : > { %v2467_v37 = vadd.f32 %v2466_v40, %v2465_v31  ;;  %v2476_v31 = vsel %vm2460_vm8, %v4625_v27, 0.0 }
 0x29b   : > { %v4550_v11 = vpop.f32.mrf.mxu0  ;;  %v2469_v41 = vadd.f32 %v2468_v32, %v2467_v37  ;;  %v2376_v32 = vadd.f32 %v4525_v23, %v4486_v4  ;;  %v2478_v37 = vsel %vm2460_vm8, %v4634_v59, 0.0  ;;  %v2378_v4 = vadd.f32 %v4525_v23, %v4502_v15 }
 0x29c   : > { %v4555_v50 = vpop.f32.mrf.mxu3  ;;  %v4557_v9 = vpop.f32.mrf.mxu1  ;;  %v1920_v15 = vadd.f32 %v4520_v5, %v4311_v56 }
 0x29d   : > { %v2471_v53 = vadd.f32 %v2470_v35, %v2469_v41  ;;  %v2377_v35 = vadd.f32 %v4525_v23, %v4497_v58  ;;  %v2410_v58 = vld [vmem:[%s5337_s3 + $0x70] sm:$0xff]  ;;  %v1921_v56 = vadd.f32 %v4557_v9, %v4316_v0 }
 0x29f   : > { %v4574_v55 = vpop.f32.mrf.mxu2  ;;  %v2473_v19 = vadd.f32 %v2472_v39, %v2471_v53  ;;  %v1919_v39 = vadd.f32 %v4516_v7, %v4302_v60  ;;  %v4667_v53 = vadd.f32 %v2408_v47, %v2376_v32  ;;  %v2379_v60 = vadd.f32 %v4525_v23, %v4505_v34  ;;  %v2411_v32 = vld [vmem:[%s5337_s3 + $0x78] sm:$0xff] }
 0x2a0   : > { %v2054_v34 = vadd.f32 %v4574_v55, %v1920_v15 }
 0x2a1   : > { %v2475_v16 = vadd.f32 %v2474_v12, %v2473_v19  ;;  %v2053_v12 = vadd.f32 %v4531_v57, %v1919_v39  ;;  %v4675_v19 = vadd.f32 %v2409_v10, %v2377_v35  ;;  %v2484_v47 = vsel %vm2460_vm8, %v4667_v53, 0.0  ;;  %v2412_v35 = vld [vmem:[%s5337_s3 + $0x80] sm:$0xff] }
 0x2a2   : > { %v4701_v39 = vadd.f32 %v2411_v32, %v2379_v60 }
 0x2a3   : > { %v4596_v2 = vpop.f32.mrf.mxu0  ;;  %v2477_v41 = vadd.f32 %v2476_v31, %v2475_v16  ;;  %v4681_v31 = vadd.f32 %v2410_v58, %v2378_v4  ;;  %v2209_v10 = vadd.f32 %v4555_v50, %v2053_v12  ;;  %v2486_v4 = vsel %vm2460_vm8, %v4675_v19, 0.0 }
 0x2a4   : > { %v4601_v22 = vpop.f32.mrf.mxu3  ;;  %v4603_v25 = vpop.f32.mrf.mxu1  ;;  %v2382_v50 = vadd.f32 %v4525_v23, %v4514_v33  ;;  %v2490_v15 = vsel %vm2460_vm8, %v4701_v39, 0.0  ;;  %v2383_v33 = vadd.f32 %v4525_v23, %v4518_v49 }
 0x2a5   : > { %v2479_v43 = vadd.f32 %v2478_v37, %v2477_v41  ;;  %v2380_v37 = vadd.f32 %v4525_v23, %v4508_v46  ;;  %v2381_v41 = vadd.f32 %v4525_v23, %v4511_v30  ;;  %v2413_v46 = vld [vmem:[%s5337_s3 + $0x88] sm:$0xff]  ;;  %v1922_v9 = vadd.f32 %v4603_v25, %v4325_v29 }
 0x2a6   : > { %v2488_v30 = vsel %vm2460_vm8, %v4681_v31, 0.0  ;;  %v2210_v12 = vadd.f32 %v4601_v22, %v2054_v34  ;;  %v2349_v60 = vadd.f32 %v4550_v11, %v2209_v10 }
 0x2a7   : > { %v2009_v42 = vpop.f32.mrf.mxu2  ;;  %v2481_v3 = vadd.f32 %v2480_v44, %v2479_v43  ;;  %v4712_v58 = vadd.f32 %v2412_v35, %v2380_v37  ;;  %v2414_v43 = vld [vmem:[%s5337_s3 + $0x90] sm:$0xff]  ;;  %v4719_v25 = vadd.f32 %v2413_v46, %v2381_v41  ;;  %v2416_v35 = vld [vmem:[%s5337_s3 + $0xa0] sm:$0xff] }
 0x2a8   : > { %v2055_v0 = vadd.f32 %v2009_v42, %v1921_v56  ;;  %v4726_v56 = vadd.f32 %v2414_v43, %v2382_v50  ;;  %v2350_v49 = vadd.f32 %v4596_v2, %v2210_v12  ;;  %v2385_v41 = vadd.f32 %v4525_v23, %v2349_v60 }
 0x2a9   : > { %v2483_v5 = vadd.f32 %v2482_v13, %v2481_v3  ;;  %v2492_v11 = vsel %vm2460_vm8, %v4712_v58, 0.0 }
 0x2ab   : > { %v4638_v54 = vpop.f32.mrf.mxu0  ;;  %v2485_v44 = vadd.f32 %v2484_v47, %v2483_v5  ;;  %v2494_v5 = vsel %vm2460_vm8, %v4719_v25, 0.0 }
 0x2ac   : > { %v2165_v40 = vpop.f32.mrf.mxu3  ;;  %v1880_v48 = vpop.f32.mrf.mxu1 }
 0x2ad   : > { %v1923_v13 = vadd.f32 %v1880_v48, %v4330_v52  ;;  %v2487_v29 = vadd.f32 %v2486_v4, %v2485_v44  ;;  %v2211_v3 = vadd.f32 %v2165_v40, %v2055_v0  ;;  %v2415_v52 = vld [vmem:[%s5337_s3 + $0x98] sm:$0xff]  ;;  %v2417_v4 = vld [vmem:[%s5337_s3 + $0xa8] sm:$0xff]  ;;  %v2386_v44 = vadd.f32 %v4525_v23, %v2350_v49 }
 0x2ae   : > { %v4742_v10 = vadd.f32 %v2415_v52, %v2383_v33  ;;  %v4754_v12 = vadd.f32 %v2417_v4, %v2385_v41 }
 0x2af   : > { %v2012_v36 = vpop.f32.mrf.mxu2  ;;  %v2489_v37 = vadd.f32 %v2488_v30, %v2487_v29 }
 0x2b0   : > { %v2056_v42 = vadd.f32 %v2012_v36, %v1922_v9  ;;  %v2384_v36 = vadd.f32 %v4525_v23, %v4529_v45  ;;  %v2351_v45 = vadd.f32 %v4638_v54, %v2211_v3  ;;  %v2496_v9 = vsel %vm2460_vm8, %v4726_v56, 0.0  ;;  %v2418_v54 = vld [vmem:[%s5337_s3 + $0xb0] sm:$0xff] }
 0x2b1   : > { %v2491_v34 = vadd.f32 %v2490_v15, %v2489_v37  ;;  %v4767_v33 = vadd.f32 %v2418_v54, %v2386_v44 }
 0x2b3   : > { %v2308_v7 = vpop.f32.mrf.mxu0  ;;  %v2493_v0 = vadd.f32 %v2492_v11, %v2491_v34  ;;  %v2504_v41 = vsel %vm2460_vm8, %v4767_v33, 0.0 }
 0x2b4   : > { %v2168_v57 = vpop.f32.mrf.mxu3  ;;  %v1883_v16 = vpop.f32.mrf.mxu1 }
 0x2b5   : > { %v2212_v40 = vadd.f32 %v2168_v57, %v2056_v42  ;;  %v1924_v57 = vadd.f32 %v1883_v16, %v4339_v20  ;;  %v2495_v43 = vadd.f32 %v2494_v5, %v2493_v0  ;;  %v2498_v20 = vsel %vm2460_vm8, %v4742_v10, 0.0 }
 0x2b6   : > { %v2387_v16 = vadd.f32 %v4525_v23, %v2351_v45 }
 0x2b7   : > { %v2014_v55 = vpop.f32.mrf.mxu2  ;;  %v2352_v30 = vadd.f32 %v2308_v7, %v2212_v40  ;;  %v2497_v29 = vadd.f32 %v2496_v9, %v2495_v43  ;;  %v2419_v7 = vld [vmem:[%s5337_s3 + $0xb8] sm:$0xff] }
 0x2b8   : > { %v2057_v47 = vadd.f32 %v2014_v55, %v1923_v13  ;;  %v4751_v55 = vadd.f32 %v2416_v35, %v2384_v36  ;;  %v4775_v11 = vadd.f32 %v2419_v7, %v2387_v16  ;;  %v2421_v35 = vld [vmem:[%s5337_s3 + $0xc8] sm:$0xff] }
 0x2b9   : > { %v2388_v3 = vadd.f32 %v4525_v23, %v2352_v30  ;;  %v2499_v52 = vadd.f32 %v2498_v20, %v2497_v29 }
 0x2ba   : > { %v2500_v15 = vsel %vm2460_vm8, %v4751_v55, 0.0 }
 0x2bb   : > { %v2310_v32 = vpop.f32.mrf.mxu0  ;;  %v2501_v5 = vadd.f32 %v2500_v15, %v2499_v52 }
 0x2bc   : > { %v2170_v22 = vpop.f32.mrf.mxu3  ;;  %v1885_v48 = vpop.f32.mrf.mxu1 }
 0x2bd   : > { %v2213_v2 = vadd.f32 %v2170_v22, %v2057_v47  ;;  %v2420_v22 = vld [vmem:[%s5337_s3 + $0xc0] sm:$0xff]  ;;  %v1925_v40 = vadd.f32 %v1885_v48, %v4344_v8  ;;  %v2506_v8 = vsel %vm2460_vm8, %v4775_v11, 0.0 }
 0x2be   : > { %v4784_v4 = vadd.f32 %v2420_v22, %v2388_v3 }
 0x2bf   : > { %v2017_v46 = vpop.f32.mrf.mxu2  ;;  %v2353_v42 = vadd.f32 %v2310_v32, %v2213_v2  ;;  %v2502_v32 = vsel %vm2460_vm8, %v4754_v12, 0.0 }
 0x2c0   : > { %v2058_v50 = vadd.f32 %v2017_v46, %v1924_v57  ;;  %v2503_v57 = vadd.f32 %v2502_v32, %v2501_v5  ;;  %v2422_v46 = vld [vmem:[%s5337_s3 + $0xd0] sm:$0xff]  ;;  %v2508_v30 = vsel %vm2460_vm8, %v4784_v4, 0.0 }
 0x2c1   : > { %v2389_v36 = vadd.f32 %v4525_v23, %v2353_v42 }
 0x2c2   : > { %v2505_v9 = vadd.f32 %v2504_v41, %v2503_v57  ;;  %v2424_v41 = vld [vmem:[%s5337_s3 + $0xe0] sm:$0xff] }
 0x2c3   : > { %v2313_v13 = vpop.f32.mrf.mxu0  ;;  %v4792_v48 = vadd.f32 %v2421_v35, %v2389_v36 }
 0x2c4   : > { %v2173_v60 = vpop.f32.mrf.mxu3  ;;  %v1888_v37 = vpop.f32.mrf.mxu1  ;;  %v2507_v54 = vadd.f32 %v2506_v8, %v2505_v9 }
 0x2c5   : > { %v2214_v47 = vadd.f32 %v2173_v60, %v2058_v50  ;;  %v2510_v20 = vsel %vm2460_vm8, %v4792_v48, 0.0  ;;  %v1926_v42 = vadd.f32 %v1888_v37, %v4353_v51  ;;  %v2423_v60 = vld [vmem:[%s5337_s3 + $0xd8] sm:$0xff] }
 0x2c6   : > { %v2509_v7 = vadd.f32 %v2508_v30, %v2507_v54 }
 0x2c7   : > { %v2354_v49 = vadd.f32 %v2313_v13, %v2214_v47  ;;  %v2019_v34 = vpop.f32.mrf.mxu2 }
 0x2c8   : > { %v2059_v2 = vadd.f32 %v2019_v34, %v1925_v40  ;;  %v2511_v52 = vadd.f32 %v2510_v20, %v2509_v7  ;;  %v2425_v20 = vld [vmem:[%s5337_s3 + $0xe8] sm:$0xff] }
 0x2c9   : > { %v2390_v45 = vadd.f32 %v4525_v23, %v2354_v49 }
 0x2cb   : > { %v2315_v0 = vpop.f32.mrf.mxu0  ;;  %v4796_v50 = vadd.f32 %v2422_v46, %v2390_v45 }
 0x2cc   : > { %v2175_v44 = vpop.f32.mrf.mxu3  ;;  %v1890_v29 = vpop.f32.mrf.mxu1 }
 0x2cd   : > { %v2215_v43 = vadd.f32 %v2175_v44, %v2059_v2  ;;  %v2512_v15 = vsel %vm2460_vm8, %v4796_v50, 0.0  ;;  %v1927_v5 = vadd.f32 %v1890_v29, %v4358_v63 }
 0x2ce   : > { %v2513_v36 = vadd.f32 %v2512_v15, %v2511_v52 }
 0x2cf   : > { %v2355_v16 = vadd.f32 %v2315_v0, %v2215_v43  ;;  %v2022_v13 = vpop.f32.mrf.mxu2 }
 0x2d0   : > { %v2060_v47 = vadd.f32 %v2022_v13, %v1926_v42 }
 0x2d1   : > { %v2391_v3 = vadd.f32 %v4525_v23, %v2355_v16 }
 0x2d3   : > { %v4807_v32 = vadd.f32 %v2423_v60, %v2391_v3  ;;  %v2318_v22 = vpop.f32.mrf.mxu0 }
 0x2d4   : > { %v2178_v49 = vpop.f32.mrf.mxu3  ;;  %v1893_v57 = vpop.f32.mrf.mxu1 }
 0x2d5   : > { %v2514_v51 = vsel %vm2460_vm8, %v4807_v32, 0.0  ;;  %v2216_v37 = vadd.f32 %v2178_v49, %v2060_v47  ;;  %v1928_v54 = vadd.f32 %v1893_v57, %v4368_v6 }
 0x2d6   : > { %v2515_v40 = vadd.f32 %v2514_v51, %v2513_v36  ;;  %v2426_v36 = vld [vmem:[%s5337_s3 + $0xf0] sm:$0xff] }
 0x2d7   : > { %v2356_v34 = vadd.f32 %v2318_v22, %v2216_v37  ;;  %v2024_v35 = vpop.f32.mrf.mxu2 }
 0x2d8   : > { %v2061_v2 = vadd.f32 %v2024_v35, %v1927_v5 }
 0x2d9   : > { %v2392_v45 = vadd.f32 %v4525_v23, %v2356_v34  ;;  %v3394_v34 = vmov 256.0  }
 0x2da   : > { %3310 = vrcp.f32 %v3394_v34 }
 0x2db   : > { %v2456_v46 = vadd.f32 %v2424_v41, %v2392_v45  ;;  %v2320_v8 = vpop.f32.mrf.mxu0 }
 0x2dc   : > { %v2180_v0 = vpop.f32.mrf.mxu3  ;;  %v1895_v29 = vpop.f32.mrf.mxu1 }
 0x2dd   : > { %v2516_v9 = vsel %vm2460_vm8, %v2456_v46, 0.0  ;;  %v2217_v44 = vadd.f32 %v2180_v0, %v2061_v2  ;;  %v1929_v22 = vadd.f32 %v1895_v29, %v4373_v18  ;;  %v2427_v18 = vld [vmem:[%s5337_s3 + $0xf8] sm:$0xff] }
 0x2de   : > { %v2517_v30 = vadd.f32 %v2516_v9, %v2515_v40 }
 0x2df   : > { %v2357_v43 = vadd.f32 %v2320_v8, %v2217_v44  ;;  %v2027_v63 = vpop.f32.mrf.mxu2 }
 0x2e0   : > { %v2062_v42 = vadd.f32 %v2027_v63, %v1928_v54  ;;  %v3311_v8 = vpop.eup %3310 }
 0x2e1   : > { %v2393_v16 = vadd.f32 %v4525_v23, %v2357_v43  ;;  %v2531_v44 = vmul.f32 256.0, %v3311_v8  ;;  %vm2535_vm9 = vweird.f32 %v3311_v8 }
 0x2e3   : > { %v2457_v13 = vadd.f32 %v2425_v20, %v2393_v16  ;;  %v2323_v7 = vpop.f32.mrf.mxu0  ;;  %v2532_v54 = vsub.f32 1.0, %v2531_v44 }
 0x2e4   : > { %v2183_v60 = vpop.f32.mrf.mxu3 }
 0x2e5   : > { %v2518_v15 = vsel %vm2460_vm8, %v2457_v13, 0.0  ;;  %v2218_v3 = vadd.f32 %v2183_v60, %v2062_v42  ;;  %v2533_v16 = vmul.f32 %v3311_v8, %v2532_v54 }
 0x2e6   : > { %v2519_v47 = vadd.f32 %v2518_v15, %v2517_v30 }
 0x2e7   : > { %v2358_v52 = vadd.f32 %v2323_v7, %v2218_v3  ;;  %v2029_v6 = vpop.f32.mrf.mxu2  ;;  %v2534_v7 = vadd.f32 %v3311_v8, %v2533_v16 }
 0x2e8   : > { %v2063_v51 = vadd.f32 %v2029_v6, %v1929_v22 }
 0x2e9   : > { %v2394_v49 = vadd.f32 %v4525_v23, %v2358_v52  ;;  %v4834_v15 = vsel %vm2535_vm9, %v3311_v8, %v2534_v7 }
 0x2eb   : > { %v2458_v37 = vadd.f32 %v2426_v36, %v2394_v49  ;;  %v2325_v45 = vpop.f32.mrf.mxu0 }
 0x2ec   : > { %v2185_v40 = vpop.f32.mrf.mxu3 }
 0x2ed   : > { %v2520_v5 = vsel %vm2460_vm8, %v2458_v37, 0.0  ;;  %v2219_v35 = vadd.f32 %v2185_v40, %v2063_v51 }
 0x2ee   : > { %v2521_v41 = vadd.f32 %v2520_v5, %v2519_v47 }
 0x2ef   : > { %v2359_v2 = vadd.f32 %v2325_v45, %v2219_v35 }
 0x2f1   : > { %v2395_v57 = vadd.f32 %v4525_v23, %v2359_v2 }
 0x2f3   : > { %v2459_v0 = vadd.f32 %v2427_v18, %v2395_v57 }
 0x2f5   : > { %v2522_v9 = vsel %vm2460_vm8, %v2459_v0, 0.0 }
 0x2f6   : > { %v2523_v30 = vadd.f32 %v2522_v9, %v2521_v41 }
 0x2f8   : > { %v2524_v43 = vrot.slane %v2523_v30, 4 }
 0x2fa   : > { %v2525_v63 = vadd.f32 %v2524_v43, %v2523_v30 }
 0x2fc   : > { %v2526_v20 = vrot.slane %v2525_v63, 2 }
 0x2fe   : > { %v2527_v42 = vadd.f32 %v2526_v20, %v2525_v63 }
 0x300   : > { %v2528_v29 = vrot.slane %v2527_v42, 1 }
 0x302   : > { %v2529_v60 = vadd.f32 %v2528_v29, %v2527_v42 }
 0x304   : > { %v4837_v23 = vmul.f32 %v4834_v15, %v2529_v60 }
 0x306   : > { %v4841_v3 = vsub.f32 %v4796_v50, %v4837_v23  ;;  %v4845_v47 = vsub.f32 %v4807_v32, %v4837_v23  ;;  %v4848_v52 = vsub.f32 %v2456_v46, %v4837_v23  ;;  %v4851_v22 = vsub.f32 %v2457_v13, %v4837_v23 }
 0x307   : > { %v4854_v6 = vsub.f32 %v2458_v37, %v4837_v23  ;;  %v4857_v36 = vsub.f32 %v2459_v0, %v4837_v23  ;;  %v4861_v50 = vsub.f32 %v4559_v61, %v4837_v23  ;;  %v4865_v32 = vsub.f32 %v4546_v62, %v4837_v23 }
 0x308   : > { %v4869_v46 = vsub.f32 %v4561_v26, %v4837_v23  ;;  %v4873_v13 = vsub.f32 %v4570_v24, %v4837_v23  ;;  %v4881_v61 = vsub.f32 %v4583_v14, %v4837_v23  ;;  %v4887_v26 = vsub.f32 %v4592_v28, %v4837_v23 }
 0x309   : > { %v2570_v49 = vmul.f32 %v4861_v50, %v4861_v50  ;;  %v2571_v51 = vmul.f32 %v4865_v32, %v4865_v32  ;;  %v4895_v5 = vsub.f32 %v4607_v38, %v4837_v23  ;;  %v4902_v28 = vsub.f32 %v4616_v21, %v4837_v23 }
 0x30a   : > { %v2572_v62 = vmul.f32 %v4869_v46, %v4869_v46  ;;  %v2573_v24 = vmul.f32 %v4873_v13, %v4873_v13  ;;  %v2574_v14 = vmul.f32 %v4881_v61, %v4881_v61  ;;  %v2575_v45 = vmul.f32 %v4887_v26, %v4887_v26 }
 0x30b   : > { %v2602_v37 = vsel %vm2460_vm8, %v2570_v49, 0.0  ;;  %v2603_v40 = vsel %vm2460_vm8, %v2571_v51, 0.0  ;;  %v4909_v38 = vsub.f32 %v4625_v27, %v4837_v23  ;;  %v2576_v57 = vmul.f32 %v4895_v5, %v4895_v5 }
 0x30c   : > { %v2604_v34 = vadd.f32 %v2603_v40, %v2602_v37  ;;  %v2605_v35 = vsel %vm2460_vm8, %v2572_v62, 0.0  ;;  %v2607_v2 = vsel %vm2460_vm8, %v2573_v24, 0.0  ;;  %v2609_v8 = vsel %vm2460_vm8, %v2574_v14, 0.0 }
 0x30d   : > { %v4916_v21 = vsub.f32 %v4634_v59, %v4837_v23  ;;  %v2577_v9 = vmul.f32 %v4902_v28, %v4902_v28  ;;  %v2611_v44 = vsel %vm2460_vm8, %v2575_v45, 0.0  ;;  %v4923_v27 = vsub.f32 %v4645_v1, %v4837_v23 }
 0x30e   : > { %v2606_v41 = vadd.f32 %v2605_v35, %v2604_v34  ;;  %v2578_v43 = vmul.f32 %v4909_v38, %v4909_v38  ;;  %v2613_v54 = vsel %vm2460_vm8, %v2576_v57, 0.0  ;;  %v4930_v59 = vsub.f32 %v4654_v17, %v4837_v23 }
 0x30f   : > { %v2579_v20 = vmul.f32 %v4916_v21, %v4916_v21  ;;  %v2615_v16 = vsel %vm2460_vm8, %v2577_v9, 0.0  ;;  %v4937_v1 = vsub.f32 %v4667_v53, %v4837_v23  ;;  %v2580_v29 = vmul.f32 %v4923_v27, %v4923_v27 }
 0x310   : > { %v2608_v18 = vadd.f32 %v2607_v2, %v2606_v41  ;;  %v2617_v7 = vsel %vm2460_vm8, %v2578_v43, 0.0  ;;  %v4944_v17 = vsub.f32 %v4675_v19, %v4837_v23  ;;  %v2581_v49 = vmul.f32 %v4930_v59, %v4930_v59 }
 0x311   : > { %v2619_v51 = vsel %vm2460_vm8, %v2579_v20, 0.0  ;;  %v4951_v53 = vsub.f32 %v4681_v31, %v4837_v23  ;;  %v2582_v24 = vmul.f32 %v4937_v1, %v4937_v1  ;;  %v2621_v37 = vsel %vm2460_vm8, %v2580_v29, 0.0 }
 0x312   : > { %v2610_v0 = vadd.f32 %v2609_v8, %v2608_v18  ;;  %v4958_v19 = vsub.f32 %v4701_v39, %v4837_v23  ;;  %v2583_v34 = vmul.f32 %v4944_v17, %v4944_v17  ;;  %v2623_v14 = vsel %vm2460_vm8, %v2581_v49, 0.0 }
 0x313   : > { %v4965_v31 = vsub.f32 %v4712_v58, %v4837_v23  ;;  %v2584_v41 = vmul.f32 %v4951_v53, %v4951_v53  ;;  %v2625_v45 = vsel %vm2460_vm8, %v2582_v24, 0.0  ;;  %v4972_v39 = vsub.f32 %v4719_v25, %v4837_v23 }
 0x314   : > { %v2612_v30 = vadd.f32 %v2611_v44, %v2610_v0  ;;  %v2585_v18 = vmul.f32 %v4958_v19, %v4958_v19  ;;  %v2627_v57 = vsel %vm2460_vm8, %v2583_v34, 0.0  ;;  %v4979_v58 = vsub.f32 %v4726_v56, %v4837_v23 }
 0x315   : > { %v2586_v0 = vmul.f32 %v4965_v31, %v4965_v31  ;;  %v2629_v9 = vsel %vm2460_vm8, %v2584_v41, 0.0  ;;  %v4986_v25 = vsub.f32 %v4742_v10, %v4837_v23  ;;  %v4993_v56 = vsub.f32 %v4751_v55, %v4837_v23 }
 0x316   : > { %v2614_v63 = vadd.f32 %v2613_v54, %v2612_v30  ;;  %v2587_v30 = vmul.f32 %v4972_v39, %v4972_v39  ;;  %v2631_v43 = vsel %vm2460_vm8, %v2585_v18, 0.0  ;;  %v5000_v10 = vsub.f32 %v4754_v12, %v4837_v23 }
 0x317   : > { %v2633_v20 = vsel %vm2460_vm8, %v2586_v0, 0.0  ;;  %v5007_v55 = vsub.f32 %v4767_v33, %v4837_v23  ;;  %v5014_v12 = vsub.f32 %v4775_v11, %v4837_v23  ;;  %v5021_v33 = vsub.f32 %v4784_v4, %v4837_v23 }
 0x318   : > { %v2616_v42 = vadd.f32 %v2615_v16, %v2614_v63  ;;  %v2588_v63 = vmul.f32 %v4979_v58, %v4979_v58  ;;  %v2635_v29 = vsel %vm2460_vm8, %v2587_v30, 0.0  ;;  %v5028_v11 = vsub.f32 %v4792_v48, %v4837_v23 }
 0x319   : > { %v2594_v4 = vmul.f32 %v5021_v33, %v5021_v33  ;;  %v2596_v48 = vmul.f32 %v4841_v3, %v4841_v3 }
 0x31a   : > { %v2618_v60 = vadd.f32 %v2617_v7, %v2616_v42  ;;  %v2589_v42 = vmul.f32 %v4986_v25, %v4986_v25  ;;  %v2637_v49 = vsel %vm2460_vm8, %v2588_v63, 0.0 }
 0x31b   : > { %v2649_v23 = vsel %vm2460_vm8, %v2594_v4, 0.0  ;;  %v2653_v63 = vsel %vm2460_vm8, %v2596_v48, 0.0 }
 0x31c   : > { %v2620_v62 = vadd.f32 %v2619_v51, %v2618_v60  ;;  %v2590_v60 = vmul.f32 %v4993_v56, %v4993_v56  ;;  %v2639_v24 = vsel %vm2460_vm8, %v2589_v42, 0.0 }
 0x31e   : > { %v2622_v40 = vadd.f32 %v2621_v37, %v2620_v62  ;;  %v2591_v62 = vmul.f32 %v5000_v10, %v5000_v10  ;;  %v2641_v34 = vsel %vm2460_vm8, %v2590_v60, 0.0 }
 0x320   : > { %v2624_v35 = vadd.f32 %v2623_v14, %v2622_v40  ;;  %v2592_v40 = vmul.f32 %v5007_v55, %v5007_v55  ;;  %v2643_v41 = vsel %vm2460_vm8, %v2591_v62, 0.0 }
 0x322   : > { %v2626_v2 = vadd.f32 %v2625_v45, %v2624_v35  ;;  %v2593_v35 = vmul.f32 %v5014_v12, %v5014_v12 }
 0x324   : > { %v2628_v8 = vadd.f32 %v2627_v57, %v2626_v2  ;;  %v2645_v2 = vsel %vm2460_vm8, %v2592_v40, 0.0  ;;  %v2595_v57 = vmul.f32 %v5028_v11, %v5028_v11 }
 0x326   : > { %v2630_v44 = vadd.f32 %v2629_v9, %v2628_v8  ;;  %v2647_v8 = vsel %vm2460_vm8, %v2593_v35, 0.0  ;;  %v2651_v30 = vsel %vm2460_vm8, %v2595_v57, 0.0 }
 0x328   : > { %v2632_v54 = vadd.f32 %v2631_v43, %v2630_v44  ;;  %v2597_v44 = vmul.f32 %v4845_v47, %v4845_v47 }
 0x32a   : > { %v2634_v16 = vadd.f32 %v2633_v20, %v2632_v54  ;;  %v2598_v54 = vmul.f32 %v4848_v52, %v4848_v52  ;;  %v2655_v42 = vsel %vm2460_vm8, %v2597_v44, 0.0 }
 0x32c   : > { %v2636_v7 = vadd.f32 %v2635_v29, %v2634_v16  ;;  %v2599_v16 = vmul.f32 %v4851_v22, %v4851_v22  ;;  %v2657_v60 = vsel %vm2460_vm8, %v2598_v54, 0.0 }
 0x32e   : > { %v2638_v51 = vadd.f32 %v2637_v49, %v2636_v7  ;;  %v2600_v7 = vmul.f32 %v4854_v6, %v4854_v6  ;;  %v2659_v62 = vsel %vm2460_vm8, %v2599_v16, 0.0  ;;  %v2748_v16 = vld [vmem:[%s5066_s26 + $0x8] sm:$0xff] }
 0x330   : > { %v2640_v37 = vadd.f32 %v2639_v24, %v2638_v51  ;;  %v2601_v51 = vmul.f32 %v4857_v36, %v4857_v36 }
 0x332   : > { %v2642_v14 = vadd.f32 %v2641_v34, %v2640_v37  ;;  %v2661_v37 = vsel %vm2460_vm8, %v2600_v7, 0.0  ;;  %v2663_v34 = vsel %vm2460_vm8, %v2601_v51, 0.0 }
 0x334   : > { %v2644_v45 = vadd.f32 %v2643_v41, %v2642_v14 }
 0x336   : > { %v2646_v18 = vadd.f32 %v2645_v2, %v2644_v45 }
 0x338   : > { %v2648_v0 = vadd.f32 %v2647_v8, %v2646_v18 }
 0x33a   : > { %v2650_v9 = vadd.f32 %v2649_v23, %v2648_v0 }
 0x33c   : > { %v2652_v43 = vadd.f32 %v2651_v30, %v2650_v9 }
 0x33e   : > { %v2654_v20 = vadd.f32 %v2653_v63, %v2652_v43  ;;  %v2747_v63 = vld [vmem:[%s5066_s26] sm:$0xff] }
 0x340   : > { %v2656_v29 = vadd.f32 %v2655_v42, %v2654_v20 }
 0x342   : > { %v2658_v49 = vadd.f32 %v2657_v60, %v2656_v29  ;;  %v2749_v29 = vld [vmem:[%s5066_s26 + $0x10] sm:$0xff] }
 0x344   : > { %v2660_v24 = vadd.f32 %v2659_v62, %v2658_v49  ;;  %v2750_v49 = vld [vmem:[%s5066_s26 + $0x18] sm:$0xff]  ;;  %v2751_v62 = vld [vmem:[%s5066_s26 + $0x20] sm:$0xff] }
 0x346   : > { %v2662_v40 = vadd.f32 %v2661_v37, %v2660_v24  ;;  %v2752_v37 = vld [vmem:[%s5066_s26 + $0x28] sm:$0xff] }
 0x348   : > { %v2664_v14 = vadd.f32 %v2663_v34, %v2662_v40  ;;  %v2717_v34 = vld [vmem:[%s5076_s29 + $0x10] sm:$0xff] }
 0x34a   : > { %v2665_v35 = vrot.slane %v2664_v14, 4 }
 0x34c   : > { %v2666_v41 = vadd.f32 %v2665_v35, %v2664_v14 }
 0x34e   : > { %v2667_v45 = vrot.slane %v2666_v41, 2 }
 0x350   : > { %v2668_v4 = vadd.f32 %v2667_v45, %v2666_v41  ;;  %v2718_v41 = vld [vmem:[%s5076_s29 + $0x18] sm:$0xff] }
 0x352   : > { %v2669_v2 = vrot.slane %v2668_v4, 1 }
 0x354   : > { %v2670_v18 = vadd.f32 %v2669_v2, %v2668_v4 }
 0x356   : > { %v2671_v57 = vmul.f32 %v2670_v18, %v4834_v15  ;;  %v2755_v18 = vld [vmem:[%s5066_s26 + $0x40] sm:$0xff] }
 0x358   : > { %v2672_v8 = vadd.f32 1e-05, %v2671_v57 }
 0x35a   : > { %3312 = vrsqrt.f32 %v2672_v8  ;;  %vm2679_vm11 = vweird.f32 %v2672_v8 }
 0x360   : > { %v3313_v0 = vpop.eup %3312 }
 0x361   : > { %v2674_v48 = vmul.f32 %v3313_v0, %v2672_v8  ;;  %vm2680_vm10 = vweird.f32 %v3313_v0 }
 0x362   : > { %vm2681_vm12 = vmor %vm2679_vm11, %vm2680_vm10 }
 0x363   : > { %v2675_v23 = vmul.f32 %v3313_v0, %v2674_v48  ;;  %v2756_v48 = vld [vmem:[%s5066_s26 + $0x48] sm:$0xff] }
 0x365   : > { %v2676_v9 = vmul.f32 0.5, %v2675_v23 }
 0x367   : > { %v2677_v44 = vsub.f32 1.5, %v2676_v9 }
 0x369   : > { %v2678_v30 = vmul.f32 %v3313_v0, %v2677_v44 }
 0x36b   : > { %v5061_v43 = vsel %vm2681_vm12, %v3313_v0, %v2678_v30  ;;  %v2757_v30 = vld [vmem:[%s5066_s26 + $0x50] sm:$0xff] }
 0x36c   : > { %v2683_v15 = vmul.f32 %v5061_v43, %v4861_v50  ;;  %v2684_v54 = vmul.f32 %v5061_v43, %v4865_v32  ;;  %v2685_v20 = vmul.f32 %v5061_v43, %v4869_v46  ;;  %v2686_v42 = vmul.f32 %v5061_v43, %v4873_v13 }
 0x36d   : > { %v2687_v50 = vmul.f32 %v5061_v43, %v4881_v61  ;;  %v2688_v32 = vmul.f32 %v5061_v43, %v4887_v26  ;;  %v2689_v7 = vmul.f32 %v5061_v43, %v4895_v5  ;;  %v2690_v60 = vmul.f32 %v5061_v43, %v4902_v28  ;;  %v2715_v5 = vld [vmem:[%s5076_s29] sm:$0xff] }
 0x36e   : > { %v2691_v46 = vmul.f32 %v5061_v43, %v4909_v38  ;;  %v2779_v13 = vmul.f32 %v2747_v63, %v2683_v15  ;;  %v2692_v61 = vmul.f32 %v5061_v43, %v4916_v21  ;;  %v2693_v26 = vmul.f32 %v5061_v43, %v4923_v27  ;;  %v2716_v27 = vld [vmem:[%s5076_s29 + $0x8] sm:$0xff]  ;;  %v2722_v63 = vld [vmem:[%s5076_s29 + $0x38] sm:$0xff] }
 0x36f   : > { %v2694_v51 = vmul.f32 %v5061_v43, %v4930_v59  ;;  %v2780_v28 = vmul.f32 %v2748_v16, %v2684_v54  ;;  %v5105_v38 = vmul.f32 %v5061_v43, %v4937_v1  ;;  %v5109_v24 = vmul.f32 %v5061_v43, %v4944_v17 }
 0x370   : > { %v5113_v21 = vmul.f32 %v5061_v43, %v4951_v53  ;;  %v2781_v59 = vmul.f32 %v2749_v29, %v2685_v20  ;;  %v5119_v40 = vmul.f32 %v5061_v43, %v4958_v19  ;;  %v5123_v1 = vmul.f32 %v5061_v43, %v4965_v31  ;;  %v2753_v53 = vld [vmem:[%s5066_s26 + $0x30] sm:$0xff]  ;;  %v2754_v31 = vld [vmem:[%s5066_s26 + $0x38] sm:$0xff] }
 0x371   : > { %v5127_v17 = vmul.f32 %v5061_v43, %v4972_v39  ;;  %v2782_v14 = vmul.f32 %v2750_v49, %v2686_v42  ;;  %v5133_v35 = vmul.f32 %v5061_v43, %v4979_v58  ;;  %v5137_v19 = vmul.f32 %v5061_v43, %v4986_v25  ;;  %v2719_v58 = vld [vmem:[%s5076_s29 + $0x20] sm:$0xff]  ;;  %v2758_v20 = vld [vmem:[%s5066_s26 + $0x58] sm:$0xff] }
 0x372   : > { %v2783_v45 = vmul.f32 %v2751_v62, %v2687_v50  ;;  %v2811_v4 = vadd.f32 %v2779_v13, %v2715_v5  ;;  %v5143_v39 = vmul.f32 %v5061_v43, %v4993_v56  ;;  %v5147_v2 = vmul.f32 %v5061_v43, %v5000_v10  ;;  %v2720_v56 = vld [vmem:[%s5076_s29 + $0x28] sm:$0xff]  ;;  %v2723_v42 = vld [vmem:[%s5076_s29 + $0x40] sm:$0xff]  ;;  %v2725_v13 = vld [vmem:[%s5076_s29 + $0x50] sm:$0xff] }
 0x373   : > { %v2784_v57 = vmul.f32 %v2752_v37, %v2688_v32  ;;  %v2812_v25 = vadd.f32 %v2780_v28, %v2716_v27  ;;  %v5153_v8 = vmul.f32 %v5061_v43, %v5007_v55  ;;  %v5157_v0 = vmul.f32 %v5061_v43, %v5014_v12  ;;  %v2721_v55 = vld [vmem:[%s5076_s29 + $0x30] sm:$0xff]  ;;  %v2759_v50 = vld [vmem:[%s5066_s26 + $0x60] sm:$0xff]  ;;  %v2762_v28 = vld [vmem:[%s5066_s26 + $0x78] sm:$0xff] }
 0x374   : > { %v2785_v23 = vmul.f32 %v2753_v53, %v2689_v7  ;;  %v2813_v10 = vadd.f32 %v2781_v59, %v2717_v34  ;;  %v5163_v9 = vmul.f32 %v5061_v43, %v5021_v33  ;;  %v5167_v44 = vmul.f32 %v5061_v43, %v5028_v11  ;;  %v2724_v7 = vld [vmem:[%s5076_s29 + $0x48] sm:$0xff]  ;;  %v2763_v59 = vld [vmem:[%s5066_s26 + $0x80] sm:$0xff] }
 0x375   : > { %v2786_v15 = vmul.f32 %v2754_v31, %v2690_v60  ;;  %v2814_v12 = vadd.f32 %v2782_v14, %v2718_v41  ;;  %v5173_v54 = vmul.f32 %v5061_v43, %v4841_v3  ;;  %v2787_v16 = vmul.f32 %v2755_v18, %v2691_v46  ;;  %v2760_v60 = vld [vmem:[%s5066_s26 + $0x68] sm:$0xff]  ;;  %v2765_v31 = vld [vmem:[%s5066_s26 + $0x90] sm:$0xff] }
 0x376   : > { %v2815_v33 = vadd.f32 %v2783_v45, %v2719_v58  ;;  %3314 = vtanh.f32 %v2811_v4  ;;  %v5179_v11 = vmul.f32 %v5061_v43, %v4845_v47  ;;  %v2788_v32 = vmul.f32 %v2756_v48, %v2692_v61  ;;  %v2761_v61 = vld [vmem:[%s5066_s26 + $0x70] sm:$0xff]  ;;  %v2764_v14 = vld [vmem:[%s5066_s26 + $0x88] sm:$0xff] }
 0x377   : > { %v2816_v29 = vadd.f32 %v2784_v57, %v2720_v56  ;;  %3316 = vtanh.f32 %v2812_v25  ;;  %v5185_v3 = vmul.f32 %v5061_v43, %v4848_v52  ;;  %v2789_v46 = vmul.f32 %v2757_v30, %v2693_v26  ;;  %v2726_v26 = vld [vmem:[%s5076_s29 + $0x58] sm:$0xff] }
 0x378   : > { %v2817_v49 = vadd.f32 %v2785_v23, %v2721_v55  ;;  %3318 = vtanh.f32 %v2813_v10  ;;  %v5192_v47 = vmul.f32 %v5061_v43, %v4851_v22  ;;  %v2790_v5 = vmul.f32 %v2758_v20, %v2694_v51  ;;  %v2727_v51 = vld [vmem:[%s5076_s29 + $0x60] sm:$0xff]  ;;  %v2730_v57 = vld [vmem:[%s5076_s29 + $0x78] sm:$0xff] }
 0x379   : > { %v2818_v62 = vadd.f32 %v2786_v15, %v2722_v63  ;;  %3320 = vtanh.f32 %v2814_v12  ;;  %v5198_v52 = vmul.f32 %v5061_v43, %v4854_v6  ;;  %v2791_v27 = vmul.f32 %v2759_v50, %v5105_v38  ;;  %v2728_v38 = vld [vmem:[%s5076_s29 + $0x68] sm:$0xff]  ;;  %v2766_v25 = vld [vmem:[%s5066_s26 + $0x98] sm:$0xff]  ;;  %v2731_v10 = vld [vmem:[%s5076_s29 + $0x80] sm:$0xff] }
 0x37a   : > { %v2819_v37 = vadd.f32 %v2787_v16, %v2723_v42  ;;  %3322 = vtanh.f32 %v2815_v33  ;;  %v5205_v22 = vmul.f32 %v5061_v43, %v4857_v36  ;;  %v2792_v34 = vmul.f32 %v2760_v60, %v5109_v24  ;;  %v2729_v24 = vld [vmem:[%s5076_s29 + $0x70] sm:$0xff]  ;;  %v2767_v55 = vld [vmem:[%s5066_s26 + $0xa0] sm:$0xff]  ;;  %v2732_v63 = vld [vmem:[%s5076_s29 + $0x88] sm:$0xff] }
 0x37b   : > { %v2820_v53 = vadd.f32 %v2788_v32, %v2724_v7  ;;  %3324 = vtanh.f32 %v2816_v29  ;;  %v2793_v36 = vmul.f32 %v2761_v61, %v5113_v21  ;;  %v2821_v43 = vadd.f32 %v2789_v46, %v2725_v13  ;;  %v2733_v42 = vld [vmem:[%s5076_s29 + $0x90] sm:$0xff]  ;;  %v2734_v60 = vld [vmem:[%s5076_s29 + $0x98] sm:$0xff] }
 0x37c   : > { %v3315_v6 = vpop.eup %3314  ;;  %3326 = vtanh.f32 %v2817_v49  ;;  %v2794_v45 = vmul.f32 %v2762_v28, %v5119_v40  ;;  %v2822_v4 = vadd.f32 %v2790_v5, %v2726_v26  ;;  %v2795_v21 = vmul.f32 %v2763_v59, %v5123_v1  ;;  %v2768_v1 = vld [vmem:[%s5066_s26 + $0xa8] sm:$0xff]  ;;  %v2769_v50 = vld [vmem:[%s5066_s26 + $0xb0] sm:$0xff]  ;;  %v2770_v46 = vld [vmem:[%s5066_s26 + $0xb8] sm:$0xff] }
 0x37d   : > { %v3317_v41 = vpop.eup %3316  ;;  %3328 = vtanh.f32 %v2818_v62  ;;  %v2875_v58 = vpack.c.bf16 %v3315_v6, %v3315_v6  ;;  %v2823_v56 = vadd.f32 %v2791_v27, %v2727_v51  ;;  %v2796_v40 = vmul.f32 %v2764_v14, %v5127_v17  ;;  %v2735_v5 = vld [vmem:[%s5076_s29 + $0xa0] sm:$0xff]  ;;  %v2772_v51 = vld [vmem:[%s5066_s26 + $0xc8] sm:$0xff]  ;;  %v2737_v6 = vld [vmem:[%s5076_s29 + $0xb0] sm:$0xff] }
 0x37e   : > { %v3319_v18 = vpop.eup %3318  ;;  %3330 = vtanh.f32 %v2819_v37  ;;  %v2876_v48 = vpack.c.bf16 %v3317_v41, %v3317_v41  ;;  %v2824_v30 = vadd.f32 %v2792_v34, %v2728_v38  ;;  %v2797_v20 = vmul.f32 %v2765_v31, %v5133_v35  ;;  %v2771_v62 = vld [vmem:[%s5066_s26 + $0xc0] sm:$0xff]  ;;  %v2736_v37 = vld [vmem:[%s5076_s29 + $0xa8] sm:$0xff]  ;;  %v2773_v38 = vld [vmem:[%s5066_s26 + $0xd0] sm:$0xff] }
 0x37f   : > { %v3321_v23 = vpop.eup %3320  ;;  %3332 = vtanh.f32 %v2820_v53  ;;  %v2877_v15 = vpack.c.bf16 %v3319_v18, %v3319_v18  ;;  %2908 = vst.msk [vmem:[%s5213_s8] sm:$0xf] %vm2907_vm13, %v2875_v58  ;;  %v2825_v16 = vadd.f32 %v2793_v36, %v2729_v24  ;;  %v2798_v32 = vmul.f32 %v2766_v25, %v5137_v19  ;;  %v2738_v41 = vld [vmem:[%s5076_s29 + $0xb8] sm:$0xff]  ;;  %v2739_v58 = vld [vmem:[%s5076_s29 + $0xc0] sm:$0xff] }
 0x380   : > { %v3323_v12 = vpop.eup %3322  ;;  %3334 = vtanh.f32 %v2821_v43  ;;  %v2878_v33 = vpack.c.bf16 %v3321_v23, %v3321_v23  ;;  %2909 = vst.msk [vmem:[%s5213_s8 + $0x4] sm:$0xf] %vm2907_vm13, %v2876_v48  ;;  %v2826_v29 = vadd.f32 %v2794_v45, %v2730_v57  ;;  %v2799_v49 = vmul.f32 %v2767_v55, %v5143_v39  ;;  %v2774_v24 = vld [vmem:[%s5066_s26 + $0xd8] sm:$0xff]  ;;  %v2775_v18 = vld [vmem:[%s5066_s26 + $0xe0] sm:$0xff]  ;;  %v2776_v48 = vld [vmem:[%s5066_s26 + $0xe8] sm:$0xff] }
 0x381   : > { %v3325_v17 = vpop.eup %3324  ;;  %3336 = vtanh.f32 %v2822_v4  ;;  %v2879_v7 = vpack.c.bf16 %v3323_v12, %v3323_v12  ;;  %2910 = vst.msk [vmem:[%s5213_s8 + $0x8] sm:$0xf] %vm2907_vm13, %v2877_v15  ;;  %v2827_v13 = vadd.f32 %v2795_v21, %v2731_v10  ;;  %v2800_v26 = vmul.f32 %v2768_v1, %v5147_v2 }
 0x382   : > { %v3327_v35 = vpop.eup %3326  ;;  %3338 = vtanh.f32 %v2823_v56  ;;  %v2880_v61 = vpack.c.bf16 %v3325_v17, %v3325_v17  ;;  %2911 = vst.msk [vmem:[%s5213_s8 + $0xc] sm:$0xf] %vm2907_vm13, %v2878_v33  ;;  %v2828_v28 = vadd.f32 %v2796_v40, %v2732_v63  ;;  %v2801_v59 = vmul.f32 %v2769_v50, %v5153_v8  ;;  %v2740_v56 = vld [vmem:[%s5076_s29 + $0xc8] sm:$0xff]  ;;  %v2741_v40 = vld [vmem:[%s5076_s29 + $0xd0] sm:$0xff] }
 0x383   : > { %v3329_v19 = vpop.eup %3328  ;;  %3340 = vtanh.f32 %v2824_v30  ;;  %v2881_v27 = vpack.c.bf16 %v3327_v35, %v3327_v35  ;;  %2912 = vst.msk [vmem:[%s5213_s8 + $0x10] sm:$0xf] %vm2907_vm13, %v2879_v7  ;;  %v2829_v34 = vadd.f32 %v2797_v20, %v2733_v42  ;;  %v2802_v14 = vmul.f32 %v2770_v46, %v5157_v0  ;;  %v2777_v30 = vld [vmem:[%s5066_s26 + $0xf0] sm:$0xff]  ;;  %v2778_v20 = vld [vmem:[%s5066_s26 + $0xf8] sm:$0xff]  ;;  %v2743_v42 = vld [vmem:[%s5076_s29 + $0xe0] sm:$0xff] }
 0x384   : > { %v3331_v39 = vpop.eup %3330  ;;  %3342 = vtanh.f32 %v2825_v16  ;;  %v2882_v53 = vpack.c.bf16 %v3329_v19, %v3329_v19  ;;  %2913 = vst.msk [vmem:[%s5213_s8 + $0x14] sm:$0xf] %vm2907_vm13, %v2880_v61  ;;  %v2830_v36 = vadd.f32 %v2798_v32, %v2734_v60  ;;  %v2803_v31 = vmul.f32 %v2771_v62, %v5163_v9  ;;  %v2746_v62 = vld [vmem:[%s5076_s29 + $0xf8] sm:$0xff] }
 0x385   : > { %v3333_v2 = vpop.eup %3332  ;;  %3344 = vtanh.f32 %v2826_v29  ;;  %v2883_v43 = vpack.c.bf16 %v3331_v39, %v3331_v39  ;;  %2914 = vst.msk [vmem:[%s5213_s8 + $0x18] sm:$0xf] %vm2907_vm13, %v2881_v27  ;;  %v2831_v45 = vadd.f32 %v2799_v49, %v2735_v5  ;;  %v2804_v57 = vmul.f32 %v2772_v51, %v5167_v44 }
 0x386   : > { %v3335_v8 = vpop.eup %3334  ;;  %3346 = vtanh.f32 %v2827_v13  ;;  %v2884_v4 = vpack.c.bf16 %v3333_v2, %v3333_v2  ;;  %2915 = vst.msk [vmem:[%s5213_s8 + $0x1c] sm:$0xf] %vm2907_vm13, %v2882_v53  ;;  %v2832_v25 = vadd.f32 %v2800_v26, %v2736_v37  ;;  %v2805_v23 = vmul.f32 %v2773_v38, %v5173_v54  ;;  %v2742_v54 = vld [vmem:[%s5076_s29 + $0xd8] sm:$0xff]  ;;  %v2745_v13 = vld [vmem:[%s5076_s29 + $0xf0] sm:$0xff] }
 0x387   : > { %v3337_v0 = vpop.eup %3336  ;;  %3348 = vtanh.f32 %v2828_v28  ;;  %v2885_v21 = vpack.c.bf16 %v3335_v8, %v3335_v8  ;;  %2916 = vst.msk [vmem:[%s5213_s8 + $0x20] sm:$0xf] %vm2907_vm13, %v2883_v43  ;;  %v2833_v10 = vadd.f32 %v2801_v59, %v2737_v6  ;;  %v2806_v15 = vmul.f32 %v2774_v24, %v5179_v11 }
 0x388   : > { %v3339_v9 = vpop.eup %3338  ;;  %3350 = vtanh.f32 %v2829_v34  ;;  %v2886_v55 = vpack.c.bf16 %v3337_v0, %v3337_v0  ;;  %2917 = vst.msk [vmem:[%s5213_s8 + $0x24] sm:$0xf] %vm2907_vm13, %v2884_v4  ;;  %v2834_v12 = vadd.f32 %v2802_v14, %v2738_v41  ;;  %v2807_v16 = vmul.f32 %v2775_v18, %v5185_v3  ;;  %v2744_v3 = vld [vmem:[%s5076_s29 + $0xe8] sm:$0xff] }
 0x389   : > { %v3341_v44 = vpop.eup %3340  ;;  %3352 = vtanh.f32 %v2830_v36  ;;  %v2887_v63 = vpack.c.bf16 %v3339_v9, %v3339_v9  ;;  %2918 = vst.msk [vmem:[%s5213_s8 + $0x28] sm:$0xf] %vm2907_vm13, %v2885_v21  ;;  %v2835_v33 = vadd.f32 %v2803_v31, %v2739_v58  ;;  %v2808_v50 = vmul.f32 %v2776_v48, %v5192_v47 }
 0x38a   : > { %v3343_v1 = vpop.eup %3342  ;;  %3354 = vtanh.f32 %v2831_v45  ;;  %v2888_v17 = vpack.c.bf16 %v3341_v44, %v3341_v44  ;;  %2919 = vst.msk [vmem:[%s5213_s8 + $0x2c] sm:$0xf] %vm2907_vm13, %v2886_v55  ;;  %v2836_v32 = vadd.f32 %v2804_v57, %v2740_v56  ;;  %v2809_v35 = vmul.f32 %v2777_v30, %v5198_v52 }
 0x38b   : > { %v3345_v11 = vpop.eup %3344  ;;  %3356 = vtanh.f32 %v2832_v25  ;;  %v2889_v29 = vpack.c.bf16 %v3343_v1, %v3343_v1  ;;  %2920 = vst.msk [vmem:[%s5213_s8 + $0x30] sm:$0xf] %vm2907_vm13, %v2887_v63  ;;  %v2837_v60 = vadd.f32 %v2805_v23, %v2741_v40  ;;  %v2810_v47 = vmul.f32 %v2778_v20, %v5205_v22 }
 0x38c   : > { %v3347_v7 = vpop.eup %3346  ;;  %3358 = vtanh.f32 %v2833_v10  ;;  %v2890_v46 = vpack.c.bf16 %v3345_v11, %v3345_v11  ;;  %2921 = vst.msk [vmem:[%s5213_s8 + $0x34] sm:$0xf] %vm2907_vm13, %v2888_v17  ;;  %v2838_v61 = vadd.f32 %v2806_v15, %v2742_v54  ;;  %v2839_v52 = vadd.f32 %v2807_v16, %v2743_v42 }
 0x38d   : > { %v3349_v49 = vpop.eup %3348  ;;  %3360 = vtanh.f32 %v2834_v12  ;;  %v2891_v19 = vpack.c.bf16 %v3347_v7, %v3347_v7  ;;  %2922 = vst.msk [vmem:[%s5213_s8 + $0x38] sm:$0xf] %vm2907_vm13, %v2889_v29  ;;  %v2840_v27 = vadd.f32 %v2808_v50, %v2744_v3  ;;  %v2841_v37 = vadd.f32 %v2809_v35, %v2745_v13 }
 0x38e   : > { %v3351_v5 = vpop.eup %3350  ;;  %3362 = vtanh.f32 %v2835_v33  ;;  %v2892_v26 = vpack.c.bf16 %v3349_v49, %v3349_v49  ;;  %2923 = vst.msk [vmem:[%s5213_s8 + $0x3c] sm:$0xf] %vm2907_vm13, %v2890_v46  ;;  %v2842_v34 = vadd.f32 %v2810_v47, %v2746_v62 }
 0x38f   : > { %v3353_v28 = vpop.eup %3352  ;;  %3364 = vtanh.f32 %v2836_v32  ;;  %v2893_v39 = vpack.c.bf16 %v3351_v5, %v3351_v5  ;;  %2924 = vst.msk [vmem:[%s5213_s8 + $0x40] sm:$0xf] %vm2907_vm13, %v2891_v19 }
 0x390   : > { %v3355_v22 = vpop.eup %3354  ;;  %3366 = vtanh.f32 %v2837_v60  ;;  %v2894_v51 = vpack.c.bf16 %v3353_v28, %v3353_v28  ;;  %2925 = vst.msk [vmem:[%s5213_s8 + $0x44] sm:$0xf] %vm2907_vm13, %v2892_v26 }
 0x391   : > { %v3357_v59 = vpop.eup %3356  ;;  %3368 = vtanh.f32 %v2838_v61  ;;  %v2895_v53 = vpack.c.bf16 %v3355_v22, %v3355_v22  ;;  %2926 = vst.msk [vmem:[%s5213_s8 + $0x48] sm:$0xf] %vm2907_vm13, %v2893_v39 }
 0x392   : > { %v3359_v2 = vpop.eup %3358  ;;  %3370 = vtanh.f32 %v2839_v52  ;;  %v2896_v6 = vpack.c.bf16 %v3357_v59, %v3357_v59  ;;  %2927 = vst.msk [vmem:[%s5213_s8 + $0x4c] sm:$0xf] %vm2907_vm13, %v2894_v51 }
 0x393   : > { %v3361_v38 = vpop.eup %3360  ;;  %3372 = vtanh.f32 %v2840_v27  ;;  %v2897_v14 = vpack.c.bf16 %v3359_v2, %v3359_v2  ;;  %2928 = vst.msk [vmem:[%s5213_s8 + $0x50] sm:$0xf] %vm2907_vm13, %v2895_v53 }
 0x394   : > { %v3363_v36 = vpop.eup %3362  ;;  %3374 = vtanh.f32 %v2841_v37  ;;  %v2898_v43 = vpack.c.bf16 %v3361_v38, %v3361_v38  ;;  %2929 = vst.msk [vmem:[%s5213_s8 + $0x54] sm:$0xf] %vm2907_vm13, %v2896_v6 }
 0x395   : > { %v3365_v8 = vpop.eup %3364  ;;  %3376 = vtanh.f32 %v2842_v34  ;;  %v2899_v41 = vpack.c.bf16 %v3363_v36, %v3363_v36  ;;  %2930 = vst.msk [vmem:[%s5213_s8 + $0x58] sm:$0xf] %vm2907_vm13, %v2897_v14 }
 0x396   : > { %v3367_v24 = vpop.eup %3366  ;;  %v2900_v31 = vpack.c.bf16 %v3365_v8, %v3365_v8  ;;  %2931 = vst.msk [vmem:[%s5213_s8 + $0x5c] sm:$0xf] %vm2907_vm13, %v2898_v43 }
 0x397   : > { %v3369_v45 = vpop.eup %3368  ;;  %v2901_v4 = vpack.c.bf16 %v3367_v24, %v3367_v24  ;;  %2932 = vst.msk [vmem:[%s5213_s8 + $0x60] sm:$0xf] %vm2907_vm13, %v2899_v41 }
 0x398   : > { %v3371_v0 = vpop.eup %3370  ;;  %v2902_v58 = vpack.c.bf16 %v3369_v45, %v3369_v45  ;;  %2933 = vst.msk [vmem:[%s5213_s8 + $0x64] sm:$0xf] %vm2907_vm13, %v2900_v31 }
 0x399   : > { %v3373_v18 = vpop.eup %3372  ;;  %v2903_v57 = vpack.c.bf16 %v3371_v0, %v3371_v0  ;;  %2934 = vst.msk [vmem:[%s5213_s8 + $0x68] sm:$0xf] %vm2907_vm13, %v2901_v4 }
 0x39a   : > { %v3375_v25 = vpop.eup %3374  ;;  %v2904_v21 = vpack.c.bf16 %v3373_v18, %v3373_v18  ;;  %2935 = vst.msk [vmem:[%s5213_s8 + $0x6c] sm:$0xf] %vm2907_vm13, %v2902_v58 }
 0x39b   : > { %v3377_v9 = vpop.eup %3376  ;;  %v2905_v56 = vpack.c.bf16 %v3375_v25, %v3375_v25  ;;  %2936 = vst.msk [vmem:[%s5213_s8 + $0x70] sm:$0xf] %vm2907_vm13, %v2903_v57 }
 0x39c   : > { %v2906_v48 = vpack.c.bf16 %v3377_v9, %v3377_v9  ;;  %2937 = vst.msk [vmem:[%s5213_s8 + $0x74] sm:$0xf] %vm2907_vm13, %v2904_v21 }
 0x39d   : > { %2938 = vst.msk [vmem:[%s5213_s8 + $0x78] sm:$0xf] %vm2907_vm13, %v2905_v56 }
 0x39e   : > { %2939 = vst.msk [vmem:[%s5213_s8 + $0x7c] sm:$0xf] %vm2907_vm13, %v2906_v48 }
 0x39f PF: > { %s16_s21 = sadd.s32 1, %s3392_s21  }
 0x3a0   : > { %p13_p4 = scmp.ge.s32.totalorder %s16_s21, 4  }
 0x3a2   :  { %15 = sbr.rel (!%p13_p4) target bundleno = 1 (0x1), region = 88 }

// kernel: styleganblock_forward.7
= control target key start
LH: loop header
LB: loop body
LE: loop exit
PB: predicated region body
PF: predicated region fallthrough
CT: control target
= control target key end

     0   :  { %s3622_s21 = smov 0   ;;  %s5484_s0 = inlined_call_operand.vmem [shape: bf16[2,18,18,32], index: 0, kind: input, shape index: {}]   ;;  %s5485_s1 = inlined_call_operand.vmem [shape: bf16[3,3,32,16], index: 1, kind: input, shape index: {}]   ;;  %s5486_s2 = inlined_call_operand.vmem [shape: f32[1,16], index: 2, kind: input, shape index: {}]   ;;  %s5487_s3 = inlined_call_operand.vmem [shape: f32[1,256,16], index: 3, kind: input, shape index: {}]   ;;  %s5488_s4 = inlined_call_operand.vmem [shape: f32[2,256,16], index: 4, kind: input, shape index: {}]   ;;  %s5489_s5 = inlined_call_operand.vmem [shape: f32[2,256,16], index: 5, kind: input, shape index: {}]   ;;  %s5490_s6 = inlined_call_operand.vmem [shape: f32[2,256,16], index: 6, kind: output, shape index: {}]  }
   0x1 LB: > { %s3093_s22 = sadd.s32 4294967295, %s3584_s21   ;;  %p3097_p0 = scmp.ge.s32.totalorder %s3584_s21, 1  ;;  %s3584_s21 = sphi %s3622_s21, %s16_s21  }
   0x2   : > { %p232_p1 = scmp.lt.s32.totalorder %s3584_s21, 3 }
   0x4   : > { %p233_p2 = pnand %p3097_p0, %p232_p1 }
   0x6   : > { %236 = sbr.rel (%p233_p2) target bundleno = 921 (0x399), region = 44 }
   0xb   : > { %v3469_v0 = vld [vmem:[%s5485_s1 + $0x18] sm:$0xff]  ;;  %p272_p3 = scmp.lt.s32.totalorder %s3093_s22, 1  ;;  %v3468_v1 = vld [vmem:[%s5485_s1 + $0x10] sm:$0xff]  ;;  %v3471_v2 = vld [vmem:[%s5485_s1 + $0x28] sm:$0xff]  ;;  %vm351_vm0 = vsmask.f32 3328 }
   0xc   : > { %3484 = vmatpush.bf16.msra.mxu1 %v3469_v0  ;;  %3485 = vmatpush.bf16.msra.mxu2 %v3469_v0  ;;  %v3473_v3 = vld [vmem:[%s5485_s1 + $0x38] sm:$0xff]  ;;  %v3467_v4 = vld [vmem:[%s5485_s1 + $0x8] sm:$0xff]  ;;  %vm352_vm1 = vsmask.f32 7440  ;;  %vm803_vm3 = vcmask 261120   ;;  %vm1186_vm4 = vcmask 1042432  }
   0xd   : > { %s5635_s22 = smov (!%p272_p3, %s3093_s22), 1  ;;  %3486 = vmatpush.bf16.msra.mxu3 %v3469_v0  ;;  %858 = vmatpush.bf16.msra.mxu0 %v3469_v0  ;;  %v3475_v5 = vld [vmem:[%s5485_s1 + $0x48] sm:$0xff]  ;;  %vm3677_vm2 = vmor %vm351_vm0, %vm352_vm1  ;;  %vm1187_vm5 = vcmask 1046532   ;;  %vm2567_vm7 = vcmask 130048  }
   0xe   : > { %s3490_s27 = smul.u32 216, %s5635_s22  ;;  %vm3991_vm6 = vmor %vm1186_vm4, %vm1187_vm5 }
  0x10   : > { %3487 = vmatpush.bf16.msra.mxu1 %v3468_v1  ;;  %3488 = vmatpush.bf16.msra.mxu2 %v3468_v1  ;;  %s3654_s14 = scalar_lea.vmem %s5484_s0, %s3490_s27 }
  0x11   : > { %3489 = vmatpush.bf16.msra.mxu3 %v3468_v1  ;;  %859 = vmatpush.bf16.msra.mxu0 %v3468_v1  ;;  %v3657_v6 = vld [vmem:[%s3654_s14 + $0x30] sm:$0xf]  ;;  %v3660_v7 = vld [vmem:[%s3654_s14 + $0x34] sm:$0xf]  ;;  %v3663_v8 = vld [vmem:[%s3654_s14 + $0x38] sm:$0x1] }
  0x12   : > { %v451_v9 = vshrl.u32 %v3657_v6, 16  ;;  %v454_v10 = vshll.u32 %v3657_v6, 16  ;;  %v460_v11 = vshll.u32 %v3660_v7, 16  ;;  %v464_v12 = vshrl.u32 %v3660_v7, 16  ;;  %v317_v13 = vld [vmem:[%s3654_s14 + $0x60] sm:$0xf] }
  0x13   : > { %v470_v14 = vshll.u32 %v3663_v8, 16  ;;  %v318_v15 = vld [vmem:[%s3654_s14 + $0x64] sm:$0xf]  ;;  %v319_v16 = vld [vmem:[%s3654_s14 + $0x68] sm:$0x1]  ;;  %v547_v17 = vshrl.u32 %v317_v13, 16 }
  0x14   : > { %1420 = vmatpush.bf16.msrb.mxu2 %v3471_v2  ;;  %1087 = vmatpush.bf16.msrb.mxu1 %v3467_v4  ;;  %v453_v18 = vrot.slane %v451_v9, 4  ;;  %v456_v19 = vrot.slane %v454_v10, 5  ;;  %v462_v20 = vrot.slane %v460_v11, 5  ;;  %v466_v21 = vrot.slane %v464_v12, 4  ;;  %v329_v22 = vld [vmem:[%s3654_s14 + $0x90] sm:$0xf] }
  0x15   : > { %1566 = vmatpush.bf16.msrb.mxu3 %v3473_v3  ;;  %1734 = vmatpush.bf16.msrb.mxu0 %v3475_v5  ;;  %v472_v23 = vrot.slane %v470_v14, 5  ;;  %v549_v24 = vrot.slane %v547_v17, 4  ;;  %v550_v25 = vshll.u32 %v317_v13, 16  ;;  %v556_v26 = vshll.u32 %v318_v15, 16  ;;  %v330_v31 = vld [vmem:[%s3654_s14 + $0x94] sm:$0xf] }
  0x16   : > { %v457_v27 = vor.u32 %v456_v19, %v453_v18  ;;  %v467_v28 = vor.u32 %v466_v21, %v462_v20  ;;  %v560_v29 = vshrl.u32 %v318_v15, 16  ;;  %v566_v30 = vshll.u32 %v319_v16, 16  ;;  %v331_v41 = vld [vmem:[%s3654_s14 + $0x98] sm:$0x1]  ;;  %v3687_v57 = vld [vmem:[%s3654_s14] sm:$0xf] }
  0x17   : > { %v552_v33 = vrot.slane %v550_v25, 5  ;;  %v558_v34 = vrot.slane %v556_v26, 5  ;;  %v643_v35 = vshrl.u32 %v329_v22, 16  ;;  %v646_v43 = vshll.u32 %v329_v22, 16  ;;  %v3694_v61 = vld [vmem:[%s3654_s14 + $0x4] sm:$0xf] }
  0x18   : > { %v458_v36 = vrot.slane %v457_v27, 4  ;;  %v468_v37 = vrot.slane %v467_v28, 4  ;;  %v562_v38 = vrot.slane %v560_v29, 4  ;;  %v568_v39 = vrot.slane %v566_v30, 5  ;;  %v3697_v62 = vld [vmem:[%s3654_s14 + $0x8] sm:$0x1] }
  0x19   : > { %v553_v40 = vor.u32 %v552_v33, %v549_v24  ;;  %v645_v42 = vrot.slane %v643_v35, 4  ;;  %v652_v44 = vshll.u32 %v330_v31, 16  ;;  %v656_v48 = vshrl.u32 %v330_v31, 16  ;;  %v3713_v18 = vld [vmem:[%s3654_s14 + $0x3c] sm:$0xf] }
  0x1a   : > { %v463_v45 = vsel %vm3677_vm2, %v458_v36, %v462_v20  ;;  %v473_v46 = vsel %vm3677_vm2, %v468_v37, %v472_v23  ;;  %v563_v47 = vor.u32 %v562_v38, %v558_v34  ;;  %v648_v52 = vrot.slane %v646_v43, 5  ;;  %v3716_v19 = vld [vmem:[%s3654_s14 + $0x40] sm:$0xf]  ;;  %v3721_v24 = vld [vmem:[%s3654_s14 + $0x44] sm:$0x1] }
  0x1b   : > { %v751_v49 = vunpack.c.l.b16 %v463_v45  ;;  %v752_v50 = vunpack.c.l.b16 %v473_v46  ;;  %v554_v51 = vrot.slane %v553_v40, 4  ;;  %v654_v54 = vrot.slane %v652_v44, 5  ;;  %v3729_v33 = vld [vmem:[%s3654_s14 + $0x6c] sm:$0xf]  ;;  %v3743_v46 = vld [vmem:[%s3654_s14 + $0x74] sm:$0x1] }
  0x1c   : > { %v564_v53 = vrot.slane %v563_v47, 4  ;;  %v658_v55 = vrot.slane %v656_v48, 4  ;;  %v662_v56 = vshll.u32 %v331_v41, 16  ;;  %v649_v60 = vor.u32 %v648_v52, %v645_v42  ;;  %v3736_v42 = vld [vmem:[%s3654_s14 + $0x70] sm:$0xf] }
  0x1d   : > { %v3689_v58 = vpack.c.b16 %v752_v50, %v751_v49  ;;  %v559_v59 = vsel %vm3677_vm2, %v554_v51, %v558_v34  ;;  %v355_v5 = vshrl.u32 %v3687_v57, 16  ;;  %v358_v9 = vshll.u32 %v3687_v57, 16 }
  0x1e   : > { %v569_v63 = vsel %vm3677_vm2, %v564_v53, %v568_v39  ;;  %v759_v0 = vunpack.c.l.b16 %v559_v59  ;;  %v659_v1 = vor.u32 %v658_v55, %v654_v54  ;;  %v664_v2 = vrot.slane %v662_v56, 5 }
  0x1f   : > { %3121 = vmatmul.msk.bf16.vlgmr.msra.gmra.mxu1 %vm803_vm3, %v3689_v58  ;;  %v760_v3 = vunpack.c.l.b16 %v569_v63  ;;  %v650_v4 = vrot.slane %v649_v60, 4  ;;  %v364_v11 = vshll.u32 %v3694_v61, 16  ;;  %v368_v12 = vshrl.u32 %v3694_v61, 16 }
  0x20   : > { %v660_v10 = vrot.slane %v659_v1, 4  ;;  %v374_v13 = vshll.u32 %v3697_v62, 16  ;;  %v357_v16 = vrot.slane %v355_v5, 4  ;;  %v360_v17 = vrot.slane %v358_v9, 5 }
  0x21   : > { %v3708_v14 = vpack.c.b16 %v760_v3, %v759_v0  ;;  %v655_v15 = vsel %vm3677_vm2, %v650_v4, %v654_v54  ;;  %v366_v22 = vrot.slane %v364_v11, 5  ;;  %v370_v23 = vrot.slane %v368_v12, 4  ;;  %v332_v0 = vld [vmem:[%s3654_s14 + $0x9c] sm:$0xf]  ;;  %v333_v4 = vld [vmem:[%s3654_s14 + $0xa0] sm:$0xf] }
  0x22   : > { %v665_v20 = vsel %vm3677_vm2, %v660_v10, %v664_v2  ;;  %v767_v21 = vunpack.c.l.b16 %v655_v15  ;;  %v361_v26 = vor.u32 %v360_v17, %v357_v16  ;;  %v376_v27 = vrot.slane %v374_v13, 5  ;;  %v334_v12 = vld [vmem:[%s3654_s14 + $0xa4] sm:$0x1] }
  0x23   : > { %5535 = vst [vmem:[#allocation2_spill] sm:$0xff] %v3708_v14  ;;  %3125 = vmatmul.msk.bf16.vlgmr.msra.gmra.mxu2 %vm803_vm3, %v3708_v14  ;;  %v768_v25 = vunpack.c.l.b16 %v665_v20  ;;  %v371_v28 = vor.u32 %v370_v23, %v366_v22  ;;  %v475_v29 = vshrl.u32 %v3713_v18, 16  ;;  %v478_v30 = vshll.u32 %v3713_v18, 16 }
  0x24   : > { %v484_v31 = vshll.u32 %v3716_v19, 16  ;;  %v362_v35 = vrot.slane %v361_v26, 4  ;;  %v488_v36 = vshrl.u32 %v3716_v19, 16  ;;  %v494_v37 = vshll.u32 %v3721_v24, 16 }
  0x25   : > { %v3731_v34 = vpack.c.b16 %v768_v25, %v767_v21  ;;  %v372_v38 = vrot.slane %v371_v28, 4  ;;  %v477_v39 = vrot.slane %v475_v29, 4  ;;  %v480_v40 = vrot.slane %v478_v30, 5  ;;  %v3761_v25 = vld [vmem:[%s3654_s14 + $0xc] sm:$0xf]  ;;  %v3470_v30 = vld [vmem:[%s5485_s1 + $0x20] sm:$0xff] }
  0x26   : > { %v486_v41 = vrot.slane %v484_v31, 5  ;;  %v367_v43 = vsel %vm3677_vm2, %v362_v35, %v366_v22  ;;  %v490_v44 = vrot.slane %v488_v36, 4  ;;  %v496_v45 = vrot.slane %v494_v37, 5  ;;  %1421 = vmatpush.bf16.msrb.mxu2 %v3470_v30 }
  0x27   : > { %5536 = vst [vmem:[#allocation3_spill] sm:$0xff] %v3731_v34  ;;  %3129 = vmatmul.msk.bf16.vlgmr.msra.gmra.mxu3 %vm803_vm3, %v3731_v34  ;;  %v571_v47 = vshrl.u32 %v3729_v33, 16  ;;  %v377_v48 = vsel %vm3677_vm2, %v372_v38, %v376_v27  ;;  %v743_v49 = vunpack.c.l.b16 %v367_v43  ;;  %v481_v50 = vor.u32 %v480_v40, %v477_v39  ;;  %v3771_v38 = vld [vmem:[%s3654_s14 + $0x10] sm:$0xf]  ;;  %v3774_v43 = vld [vmem:[%s3654_s14 + $0x14] sm:$0x1] }
  0x28   : > { %v574_v51 = vshll.u32 %v3729_v33, 16  ;;  %v744_v52 = vunpack.c.l.b16 %v377_v48  ;;  %v491_v53 = vor.u32 %v490_v44, %v486_v41  ;;  %v580_v55 = vshll.u32 %v3736_v42, 16 }
  0x29   : > { %v573_v54 = vrot.slane %v571_v47, 4  ;;  %v482_v56 = vrot.slane %v481_v50, 4  ;;  %v584_v60 = vshrl.u32 %v3736_v42, 16  ;;  %v590_v63 = vshll.u32 %v3743_v46, 16 }
  0x2a   : > { %v576_v59 = vrot.slane %v574_v51, 5  ;;  %v775_v1 = vpack.c.b16 %v744_v52, %v743_v49  ;;  %v492_v2 = vrot.slane %v491_v53, 4  ;;  %v582_v3 = vrot.slane %v580_v55, 5  ;;  %v3784_v53 = vld [vmem:[%s3654_s14 + $0x48] sm:$0xf] }
  0x2b   : > { %v487_v5 = vsel %vm3677_vm2, %v482_v56, %v486_v41  ;;  %v586_v10 = vrot.slane %v584_v60, 4  ;;  %v592_v11 = vrot.slane %v590_v63, 5  ;;  %v667_v16 = vshrl.u32 %v332_v0, 16  ;;  %v3472_v63 = vld [vmem:[%s5485_s1 + $0x30] sm:$0xff] }
  0x2c   : > { %v577_v9 = vor.u32 %v576_v59, %v573_v54  ;;  %3117 = vmatmul.msk.bf16.vlgmr.msra.gmra.mxu0 %vm803_vm3, %v775_v1  ;;  %v497_v13 = vsel %vm3677_vm2, %v492_v2, %v496_v45  ;;  %v753_v15 = vunpack.c.l.b16 %v487_v5  ;;  %v670_v17 = vshll.u32 %v332_v0, 16  ;;  %v3787_v54 = vld [vmem:[%s3654_s14 + $0x4c] sm:$0xf]  ;;  %v3466_v0 = vld [vmem:[%s5485_s1] sm:$0xff]  ;;  %1567 = vmatpush.bf16.msrb.mxu3 %v3472_v63 }
  0x2d   : > { %v754_v20 = vunpack.c.l.b16 %v497_v13  ;;  %v587_v22 = vor.u32 %v586_v10, %v582_v3  ;;  %v676_v23 = vshll.u32 %v333_v4, 16  ;;  %v669_v26 = vrot.slane %v667_v16, 4  ;;  %v3474_v5 = vld [vmem:[%s5485_s1 + $0x40] sm:$0xff]  ;;  %v3805_v13 = vld [vmem:[%s3654_s14 + $0x50] sm:$0x1]  ;;  %1088 = vmatpush.bf16.msrb.mxu1 %v3466_v0 }
  0x2e   : > { %v578_v21 = vrot.slane %v577_v9, 4  ;;  %v672_v27 = vrot.slane %v670_v17, 5  ;;  %v680_v28 = vshrl.u32 %v333_v4, 16  ;;  %v686_v29 = vshll.u32 %v334_v12, 16  ;;  %1735 = vmatpush.bf16.msrb.mxu0 %v3474_v5  ;;  %v3839_v5 = vld [vmem:[%s3654_s14 + $0xa8] sm:$0xf] }
  0x2f   : > { %v3766_v31 = vpack.c.b16 %v754_v20, %v753_v15  ;;  %v588_v36 = vrot.slane %v587_v22, 4  ;;  %v678_v37 = vrot.slane %v676_v23, 5  ;;  %v379_v47 = vshrl.u32 %v3761_v25, 16  ;;  %5538 = vst [vmem:[#allocation5_spill] sm:$0xff] %v3839_v5 }
  0x30   : > { %v583_v35 = vsel %vm3677_vm2, %v578_v21, %v582_v3  ;;  %v673_v40 = vor.u32 %v672_v27, %v669_v26  ;;  %v682_v41 = vrot.slane %v680_v28, 4  ;;  %v688_v45 = vrot.slane %v686_v29, 5  ;;  %v3816_v27 = vld [vmem:[%s3654_s14 + $0x78] sm:$0xf] }
  0x31   : > { %v761_v39 = vunpack.c.l.b16 %v583_v35  ;;  %3122 = vmatmul.msk.bf16.gmra.mxu1 %vm803_vm3, %v3766_v31  ;;  %v593_v44 = vsel %vm3677_vm2, %v588_v36, %v592_v11  ;;  %v382_v48 = vshll.u32 %v3761_v25, 16  ;;  %v388_v52 = vshll.u32 %v3771_v38, 16  ;;  %v3820_v36 = vld [vmem:[%s3654_s14 + $0x7c] sm:$0xf] }
  0x32   : > { %v762_v49 = vunpack.c.l.b16 %v593_v44  ;;  %v674_v50 = vrot.slane %v673_v40, 4  ;;  %v683_v51 = vor.u32 %v682_v41, %v678_v37  ;;  %v381_v55 = vrot.slane %v379_v47, 4 }
  0x33   : > { %v384_v56 = vrot.slane %v382_v48, 5  ;;  %v392_v59 = vshrl.u32 %v3771_v38, 16  ;;  %v398_v60 = vshll.u32 %v3774_v43, 16  ;;  %v390_v4 = vrot.slane %v388_v52, 5  ;;  %v3827_v48 = vld [vmem:[%s3654_s14 + $0x80] sm:$0x1] }
  0x34   : > { %v3797_v1 = vpack.c.b16 %v762_v49, %v761_v39  ;;  %v679_v2 = vsel %vm3677_vm2, %v674_v50, %v678_v37  ;;  %v684_v3 = vrot.slane %v683_v51, 4  ;;  %v499_v16 = vshrl.u32 %v3784_v53, 16 }
  0x35   : > { %v769_v9 = vunpack.c.l.b16 %v679_v2  ;;  %v385_v10 = vor.u32 %v384_v56, %v381_v55  ;;  %v394_v11 = vrot.slane %v392_v59, 4  ;;  %v400_v12 = vrot.slane %v398_v60, 5 }
  0x36   : > { %3126 = vmatmul.msk.bf16.gmra.mxu2 %vm803_vm3, %v3797_v1  ;;  %v689_v15 = vsel %vm3677_vm2, %v684_v3, %v688_v45  ;;  %v502_v17 = vshll.u32 %v3784_v53, 16  ;;  %v508_v20 = vshll.u32 %v3787_v54, 16  ;;  %v512_v26 = vshrl.u32 %v3787_v54, 16 }
  0x37   : > { %v770_v21 = vunpack.c.l.b16 %v689_v15  ;;  %v386_v22 = vrot.slane %v385_v10, 4  ;;  %v395_v23 = vor.u32 %v394_v11, %v390_v4  ;;  %v501_v28 = vrot.slane %v499_v16, 4  ;;  %v3849_v15 = vld [vmem:[%s3654_s14 + $0xb0] sm:$0x1] }
  0x38   : > { %v504_v29 = vrot.slane %v502_v17, 5  ;;  %v510_v30 = vrot.slane %v508_v20, 5  ;;  %v518_v35 = vshll.u32 %v3805_v13, 16  ;;  %v514_v41 = vrot.slane %v512_v26, 4  ;;  %5540 = vst [vmem:[#allocation7_spill] sm:$0xff] %v3849_v15 }
  0x39   : > { %v3822_v37 = vpack.c.b16 %v770_v21, %v769_v9  ;;  %v391_v39 = vsel %vm3677_vm2, %v386_v22, %v390_v4  ;;  %v396_v40 = vrot.slane %v395_v23, 4  ;;  %v595_v49 = vshrl.u32 %v3816_v27, 16 }
  0x3a   : > { %v745_v44 = vunpack.c.l.b16 %v391_v39  ;;  %v505_v45 = vor.u32 %v504_v29, %v501_v28  ;;  %v520_v47 = vrot.slane %v518_v35, 5  ;;  %v515_v51 = vor.u32 %v514_v41, %v510_v30 }
  0x3b   : > { %5537 = vst [vmem:[#allocation4_spill] sm:$0xff] %v3822_v37  ;;  %3130 = vmatmul.msk.bf16.gmra.mxu3 %vm803_vm3, %v3822_v37  ;;  %v401_v50 = vsel %vm3677_vm2, %v396_v40, %v400_v12  ;;  %v598_v52 = vshll.u32 %v3816_v27, 16  ;;  %v604_v55 = vshll.u32 %v3820_v36, 16  ;;  %v597_v60 = vrot.slane %v595_v49, 4  ;;  %v3846_v12 = vld [vmem:[%s3654_s14 + $0xac] sm:$0xf] }
  0x3c   : > { %v746_v56 = vunpack.c.l.b16 %v401_v50  ;;  %v506_v59 = vrot.slane %v505_v45, 4  ;;  %v608_v63 = vshrl.u32 %v3820_v36, 16  ;;  %v516_v0 = vrot.slane %v515_v51, 4  ;;  %5539 = vst [vmem:[#allocation6_spill] sm:$0xff] %v3846_v12 }
  0x3d   : > { %v600_v2 = vrot.slane %v598_v52, 5  ;;  %v606_v3 = vrot.slane %v604_v55, 5  ;;  %v614_v4 = vshll.u32 %v3827_v48, 16  ;;  %v691_v26 = vshrl.u32 %v3839_v5, 16  ;;  %v3868_v52 = vld [vmem:[%s3654_s14 + $0x1c] sm:$0xf] }
  0x3e   : > { %v3841_v9 = vpack.c.b16 %v746_v56, %v745_v44  ;;  %v511_v10 = vsel %vm3677_vm2, %v506_v59, %v510_v30  ;;  %v610_v11 = vrot.slane %v608_v63, 4  ;;  %v521_v16 = vsel %vm3677_vm2, %v516_v0, %v520_v47  ;;  %v3863_v47 = vld [vmem:[%s3654_s14 + $0x18] sm:$0xf]  ;;  %v3871_v55 = vld [vmem:[%s3654_s14 + $0x20] sm:$0x1] }
  0x3f   : > { %v755_v17 = vunpack.c.l.b16 %v511_v10  ;;  %v601_v20 = vor.u32 %v600_v2, %v597_v60  ;;  %v616_v21 = vrot.slane %v614_v4, 5  ;;  %v756_v22 = vunpack.c.l.b16 %v521_v16 }
  0x40   : > { %3118 = vmatmul.msk.bf16.gmra.mxu0 %vm803_vm3, %v3841_v9  ;;  %v611_v23 = vor.u32 %v610_v11, %v606_v3  ;;  %v694_v28 = vshll.u32 %v3839_v5, 16  ;;  %v700_v30 = vshll.u32 %v3846_v12, 16  ;;  %v704_v35 = vshrl.u32 %v3846_v12, 16  ;;  %v3927_v5 = vld [vmem:[%s3654_s14 + $0xb4] sm:$0xf] }
  0x41   : > { %v602_v29 = vrot.slane %v601_v20, 4  ;;  %v710_v39 = vshll.u32 %v3849_v15, 16  ;;  %v3860_v40 = vpack.c.b16 %v756_v22, %v755_v17  ;;  %v693_v44 = vrot.slane %v691_v26, 4  ;;  %v3883_v20 = vld [vmem:[%s3654_s14 + $0x54] sm:$0xf]  ;;  %5546 = vst [vmem:[#allocation13_spill] sm:$0xff] %v3927_v5 }
  0x42   : > { %v612_v41 = vrot.slane %v611_v23, 4  ;;  %v696_v45 = vrot.slane %v694_v28, 5  ;;  %v702_v50 = vrot.slane %v700_v30, 5  ;;  %v706_v51 = vrot.slane %v704_v35, 4  ;;  %v3888_v28 = vld [vmem:[%s3654_s14 + $0x58] sm:$0xf] }
  0x43   : > { %5541 = vst [vmem:[#allocation8_spill] sm:$0xff] %v3860_v40  ;;  %v607_v49 = vsel %vm3677_vm2, %v602_v29, %v606_v3  ;;  %3123 = vmatmul.msk.bf16.gmra.mxu1 %vm803_vm3, %v3860_v40  ;;  %v712_v63 = vrot.slane %v710_v39, 5  ;;  %v403_v3 = vshrl.u32 %v3863_v47, 16  ;;  %v406_v4 = vshll.u32 %v3863_v47, 16 }
  0x44   : > { %v617_v56 = vsel %vm3677_vm2, %v612_v41, %v616_v21  ;;  %v763_v59 = vunpack.c.l.b16 %v607_v49  ;;  %v697_v60 = vor.u32 %v696_v45, %v693_v44  ;;  %v707_v2 = vor.u32 %v706_v51, %v702_v50  ;;  %v3893_v41 = vld [vmem:[%s3654_s14 + $0x5c] sm:$0x1] }
  0x45   : > { %v764_v0 = vunpack.c.l.b16 %v617_v56  ;;  %v412_v11 = vshll.u32 %v3868_v52, 16  ;;  %v416_v16 = vshrl.u32 %v3868_v52, 16  ;;  %v422_v17 = vshll.u32 %v3871_v55, 16 }
  0x46   : > { %v698_v10 = vrot.slane %v697_v60, 4  ;;  %v708_v22 = vrot.slane %v707_v2, 4  ;;  %v405_v23 = vrot.slane %v403_v3, 4  ;;  %v408_v26 = vrot.slane %v406_v4, 5 }
  0x47   : > { %v3885_v21 = vpack.c.b16 %v764_v0, %v763_v59  ;;  %v414_v30 = vrot.slane %v412_v11, 5  ;;  %v418_v35 = vrot.slane %v416_v16, 4  ;;  %v424_v39 = vrot.slane %v422_v17, 5  ;;  %v3903_v0 = vld [vmem:[%s3654_s14 + $0x84] sm:$0xf] }
  0x48   : > { %v703_v29 = vsel %vm3677_vm2, %v698_v10, %v702_v50  ;;  %v713_v44 = vsel %vm3677_vm2, %v708_v22, %v712_v63  ;;  %v409_v49 = vor.u32 %v408_v26, %v405_v23  ;;  %v523_v51 = vshrl.u32 %v3883_v20, 16  ;;  %5542 = vst [vmem:[#allocation9_spill] sm:$0xff] %v3903_v0  ;;  %v3910_v22 = vld [vmem:[%s3654_s14 + $0x88] sm:$0xf] }
  0x49   : > { %3127 = vmatmul.msk.bf16.gmra.mxu2 %vm803_vm3, %v3885_v21  ;;  %v771_v45 = vunpack.c.l.b16 %v703_v29  ;;  %v772_v56 = vunpack.c.l.b16 %v713_v44  ;;  %v419_v59 = vor.u32 %v418_v35, %v414_v30  ;;  %v526_v50 = vshll.u32 %v3883_v20, 16  ;;  %5544 = vst [vmem:[#allocation11_spill] sm:$0xff] %v3910_v22  ;;  %v3915_v35 = vld [vmem:[%s3654_s14 + $0x8c] sm:$0x1] }
  0x4a   : > { %v532_v60 = vshll.u32 %v3888_v28, 16  ;;  %v410_v2 = vrot.slane %v409_v49, 4  ;;  %v525_v3 = vrot.slane %v523_v51, 4  ;;  %v536_v4 = vshrl.u32 %v3888_v28, 16  ;;  %5545 = vst [vmem:[#allocation12_spill] sm:$0xff] %v3915_v35 }
  0x4b   : > { %v542_v63 = vshll.u32 %v3893_v41, 16  ;;  %v3907_v10 = vpack.c.b16 %v772_v56, %v771_v45  ;;  %v420_v11 = vrot.slane %v419_v59, 4  ;;  %v528_v16 = vrot.slane %v526_v50, 5 }
  0x4c   : > { %v534_v17 = vrot.slane %v532_v60, 5  ;;  %v415_v23 = vsel %vm3677_vm2, %v410_v2, %v414_v30  ;;  %v538_v26 = vrot.slane %v536_v4, 4  ;;  %v619_v44 = vshrl.u32 %v3903_v0, 16 }
  0x4d   : > { %5543 = vst [vmem:[#allocation10_spill] sm:$0xff] %v3907_v10  ;;  %v544_v29 = vrot.slane %v542_v63, 5  ;;  %3131 = vmatmul.msk.bf16.gmra.mxu3 %vm803_vm3, %v3907_v10  ;;  %v425_v45 = vsel %vm3677_vm2, %v420_v11, %v424_v39  ;;  %v747_v49 = vunpack.c.l.b16 %v415_v23  ;;  %v529_v51 = vor.u32 %v528_v16, %v525_v3  ;;  %v3932_v16 = vld [vmem:[%s3654_s14 + $0xb8] sm:$0xf] }
  0x4e   : > { %v622_v56 = vshll.u32 %v3903_v0, 16  ;;  %v748_v59 = vunpack.c.l.b16 %v425_v45  ;;  %v539_v30 = vor.u32 %v538_v26, %v534_v17  ;;  %v621_v50 = vrot.slane %v619_v44, 4  ;;  %5547 = vst [vmem:[#allocation14_spill] sm:$0xff] %v3932_v16 }
  0x4f   : > { %v628_v60 = vshll.u32 %v3910_v22, 16  ;;  %v530_v2 = vrot.slane %v529_v51, 4  ;;  %v632_v63 = vshrl.u32 %v3910_v22, 16  ;;  %v638_v10 = vshll.u32 %v3915_v35, 16  ;;  %v3937_v51 = vld [vmem:[%s3654_s14 + $0xbc] sm:$0x1] }
  0x50   : > { %v624_v4 = vrot.slane %v622_v56, 5  ;;  %v3929_v39 = vpack.c.b16 %v748_v59, %v747_v49  ;;  %v540_v11 = vrot.slane %v539_v30, 4  ;;  %5548 = vst [vmem:[#allocation15_spill] sm:$0xff] %v3937_v51  ;;  %v3479_v56 = vld [vmem:[%s5485_s1 + $0x68] sm:$0xff]  ;;  %v715_v30 = vshrl.u32 %v3927_v5, 16 }
  0x51   : > { %v630_v3 = vrot.slane %v628_v60, 5  ;;  %v535_v23 = vsel %vm3677_vm2, %v530_v2, %v534_v17  ;;  %v634_v44 = vrot.slane %v632_v63, 4  ;;  %v640_v45 = vrot.slane %v638_v10, 5  ;;  %2032 = vmatpush.bf16.msra.mxu2 %v3479_v56 }
  0x52   : > { %v625_v26 = vor.u32 %v624_v4, %v621_v50  ;;  %3119 = vmatmul.msk.bf16.gmra.mxu0 %vm803_vm3, %v3929_v39  ;;  %v545_v49 = vsel %vm3677_vm2, %v540_v11, %v544_v29  ;;  %v757_v59 = vunpack.c.l.b16 %v535_v23  ;;  %v718_v17 = vshll.u32 %v3927_v5, 16  ;;  %v3952_v29 = vld [vmem:[%s3654_s14 + $0x24] sm:$0xf] }
  0x53   : > { %v758_v10 = vunpack.c.l.b16 %v545_v49  ;;  %v635_v60 = vor.u32 %v634_v44, %v630_v3  ;;  %v724_v2 = vshll.u32 %v3932_v16, 16  ;;  %v717_v4 = vrot.slane %v715_v30, 4  ;;  %v3962_v44 = vld [vmem:[%s3654_s14 + $0x2c] sm:$0x1] }
  0x54   : > { %v626_v50 = vrot.slane %v625_v26, 4  ;;  %v720_v63 = vrot.slane %v718_v17, 5  ;;  %v728_v15 = vshrl.u32 %v3932_v16, 16  ;;  %v734_v12 = vshll.u32 %v3937_v51, 16  ;;  %v3959_v26 = vld [vmem:[%s3654_s14 + $0x28] sm:$0xf] }
  0x55   : > { %v3954_v11 = vpack.c.b16 %v758_v10, %v757_v59  ;;  %v636_v5 = vrot.slane %v635_v60, 4  ;;  %v726_v49 = vrot.slane %v724_v2, 5  ;;  %v3481_v51 = vld [vmem:[%s5485_s1 + $0x78] sm:$0xff]  ;;  %v430_v60 = vshll.u32 %v3952_v29, 16 }
  0x56   : > { %v631_v23 = vsel %vm3677_vm2, %v626_v50, %v630_v3  ;;  %v721_v30 = vor.u32 %v720_v63, %v717_v4  ;;  %v730_v17 = vrot.slane %v728_v15, 4  ;;  %v3477_v59 = vld [vmem:[%s5485_s1 + $0x58] sm:$0xff]  ;;  %v3483_v3 = vld [vmem:[%s5485_s1 + $0x88] sm:$0xff]  ;;  %v736_v50 = vrot.slane %v734_v12, 5  ;;  %2200 = vmatpush.bf16.msra.mxu3 %v3481_v51 }
  0x57   : > { %5549 = vst [vmem:[#allocation16_spill] sm:$0xff] %v3954_v11  ;;  %v765_v56 = vunpack.c.l.b16 %v631_v23  ;;  %3124 = vmatmul.msk.bf16.gmra.mxu1 %vm803_vm3, %v3954_v11  ;;  %v641_v10 = vsel %vm3677_vm2, %v636_v5, %v640_v45  ;;  %v427_v15 = vshrl.u32 %v3952_v29, 16  ;;  %v436_v23 = vshll.u32 %v3959_v26, 16  ;;  %2352 = vmatpush.bf16.msra.mxu0 %v3483_v3 }
  0x58   : > { %v766_v2 = vunpack.c.l.b16 %v641_v10  ;;  %v722_v4 = vrot.slane %v721_v30, 4  ;;  %v731_v63 = vor.u32 %v730_v17, %v726_v49  ;;  %1886 = vmatpush.bf16.msra.mxu1 %v3477_v59  ;;  %v432_v37 = vrot.slane %v430_v60, 5 }
  0x59   : > { %v429_v16 = vrot.slane %v427_v15, 4  ;;  %v440_v34 = vshrl.u32 %v3959_v26, 16  ;;  %v446_v0 = vshll.u32 %v3962_v44, 16  ;;  %v438_v10 = vrot.slane %v436_v23, 5 }
  0x5a   : > { %v3982_v5 = vpack.c.b16 %v766_v2, %v765_v56  ;;  %v727_v12 = vsel %vm3677_vm2, %v722_v4, %v726_v49  ;;  %v732_v45 = vrot.slane %v731_v63, 4  ;;  %v3221_v56 = vrot.slane %v3687_v57, 9 }
  0x5b   : > { %v773_v30 = vunpack.c.l.b16 %v727_v12  ;;  %v433_v17 = vor.u32 %v432_v37, %v429_v16  ;;  %v442_v35 = vrot.slane %v440_v34, 4  ;;  %v448_v22 = vrot.slane %v446_v0, 5 }
  0x5c   : > { %5550 = vst [vmem:[#allocation17_spill] sm:$0xff] %v3982_v5  ;;  %3128 = vmatmul.msk.bf16.gmra.mxu2 %vm803_vm3, %v3982_v5  ;;  %v737_v51 = vsel %vm3677_vm2, %v732_v45, %v736_v50  ;;  %v1191_v34 = vrot.slane %v3694_v61, 5  ;;  %v1194_v37 = vrot.slane %v3697_v62, 5  ;;  %v3222_v0 = vrot.slane %v3761_v25, 9  ;;  %v3448_v45 = vld [vmem:[%s3654_s14] sm:$0xff] }
  0x5d   : > { %v774_v59 = vunpack.c.l.b16 %v737_v51  ;;  %v434_v3 = vrot.slane %v433_v17, 4  ;;  %v443_v15 = vor.u32 %v442_v35, %v438_v10  ;;  %v1198_v16 = vrot.slane %v3771_v38, 5 }
  0x5e   : > { %v1201_v50 = vrot.slane %v3774_v43, 5  ;;  %v1192_v2 = vsel %vm3991_vm6, %v3221_v56, %v1191_v34  ;;  %v1193_v61 = vrot.slane %v1191_v34, 4  ;;  %v3223_v34 = vrot.slane %v3863_v47, 9 }
  0x5f   : > { %v4000_v60 = vpack.c.b16 %v774_v59, %v773_v30  ;;  %v439_v57 = vsel %vm3677_vm2, %v434_v3, %v438_v10  ;;  %v444_v35 = vrot.slane %v443_v15, 4  ;;  %v1199_v62 = vsel %vm3991_vm6, %v3222_v0, %v1198_v16  ;;  %v3449_v59 = vld [vmem:[%s3654_s14 + $0xc] sm:$0xff]  ;;  %v4034_v15 = vld [vmem:[%s3654_s14 + $0x18] sm:$0xff] }
  0x60   : > { %v749_v4 = vunpack.c.l.b16 %v439_v57  ;;  %v1306_v38 = vunpack.c.l.b16 %v1192_v2  ;;  %v1200_v43 = vrot.slane %v1198_v16, 4  ;;  %v1195_v23 = vsel %vm3991_vm6, %v1193_v61, %v1194_v37  ;;  %v4054_v57 = vld [vmem:[%s3654_s14 + $0x24] sm:$0xff] }
  0x61   : > { %3132 = vmatmul.msk.bf16.gmra.mxu3 %vm803_vm3, %v4000_v60  ;;  %v449_v25 = vsel %vm3677_vm2, %v444_v35, %v448_v22  ;;  %v1308_v12 = vunpack.c.l.b16 %v1199_v62  ;;  %v1307_v10 = vunpack.c.l.b16 %v1195_v23  ;;  %v1205_v3 = vrot.slane %v3868_v52, 5 }
  0x62   : > { %v750_v63 = vunpack.c.l.b16 %v449_v25  ;;  %v1202_v30 = vsel %vm3991_vm6, %v1200_v43, %v1201_v50  ;;  %v1208_v0 = vrot.slane %v3871_v55, 5  ;;  %v1212_v55 = vrot.slane %v3959_v26, 5  ;;  %v4076_v43 = vld [vmem:[%s3654_s14 + $0x30] sm:$0xff] }
  0x63   : > { %v1309_v51 = vunpack.c.l.b16 %v1202_v30  ;;  %v1338_v56 = vpack.c.b16 %v1307_v10, %v1306_v38  ;;  %v1207_v37 = vrot.slane %v1205_v3, 4  ;;  %v3224_v35 = vrot.slane %v3952_v29, 9 }
  0x64   : > { %v4017_v17 = vpack.c.b16 %v750_v63, %v749_v4  ;;  %v1214_v2 = vrot.slane %v1212_v55, 4  ;;  %v1215_v4 = vrot.slane %v3962_v44, 5  ;;  %v1219_v44 = vrot.slane %v3660_v7, 5 }
  0x65   : > { %v4021_v22 = vpack.c.b16 %v1309_v51, %v1308_v12  ;;  %v1209_v52 = vsel %vm3991_vm6, %v1207_v37, %v1208_v0  ;;  %v1213_v61 = vsel %vm3991_vm6, %v3224_v35, %v1212_v55  ;;  %v3225_v63 = vrot.slane %v3657_v6, 9 }
  0x66   : > { %3120 = vmatmul.msk.bf16.gmra.mxu0 %vm803_vm3, %v4017_v17  ;;  %v1311_v50 = vunpack.c.l.b16 %v1209_v52  ;;  %v1216_v26 = vsel %vm3991_vm6, %v1214_v2, %v1215_v4  ;;  %v1312_v62 = vunpack.c.l.b16 %v1213_v61  ;;  %v1221_v23 = vrot.slane %v1219_v44, 4 }
  0x67   : > { %3205 = vmatmul.msk.bf16.vlgmr.msrb.gmra.mxu1 %vm803_vm3, %v3448_v45  ;;  %v1313_v25 = vunpack.c.l.b16 %v1216_v26  ;;  %v1222_v12 = vrot.slane %v3663_v8, 5  ;;  %v1220_v45 = vsel %vm3991_vm6, %v3225_v63, %v1219_v44  ;;  %v3226_v0 = vrot.slane %v3713_v18, 9 }
  0x68   : > { %v1314_v30 = vunpack.c.l.b16 %v1220_v45  ;;  %v1229_v52 = vrot.slane %v3721_v24, 5  ;;  %v1233_v26 = vrot.slane %v3787_v54, 5  ;;  %v3227_v63 = vrot.slane %v3784_v53, 9 }
  0x69   : > { %v4068_v29 = vpack.c.b16 %v1313_v25, %v1312_v62  ;;  %v1223_v7 = vsel %vm3991_vm6, %v1221_v23, %v1222_v12  ;;  %v4138_v25 = vld [vmem:[%s3654_s14 + $0x48] sm:$0xff]  ;;  %v1236_v12 = vrot.slane %v3805_v13, 5 }
  0x6a   : > { %v1315_v51 = vunpack.c.l.b16 %v1223_v7  ;;  %v1235_v23 = vrot.slane %v1233_v26, 4  ;;  %v1234_v7 = vsel %vm3991_vm6, %v3227_v63, %v1233_v26  ;;  %v1243_v26 = vrot.slane %v3893_v41, 5 }
  0x6c   : > { %3249 = vmatmul.msk.bf16.vlgmr.msrb.gmra.mxu2 %vm803_vm3, %v1338_v56  ;;  %v4096_v8 = vpack.c.b16 %v1315_v51, %v1314_v30  ;;  %v1237_v30 = vsel %vm3991_vm6, %v1235_v23, %v1236_v12  ;;  %v1318_v51 = vunpack.c.l.b16 %v1234_v7 }
  0x71   : > { %3281 = vmatmul.msk.bf16.vlgmr.msrb.gmra.mxu3 %vm803_vm3, %v3449_v59 }
  0x76   : > { %3309 = vmatmul.msk.bf16.vlgmr.msrb.gmra.mxu0 %vm803_vm3, %v3841_v9  ;;  %v1206_v9 = vsel %vm3991_vm6, %v3223_v34, %v1205_v3  ;;  %v1226_v3 = vrot.slane %v3716_v19, 5  ;;  %v4104_v34 = vld [vmem:[%s3654_s14 + $0x3c] sm:$0xff] }
  0x77   : > { %3206 = vmatmul.msk.bf16.gmra.mxu1 %vm803_vm3, %v3449_v59  ;;  %v1310_v16 = vunpack.c.l.b16 %v1206_v9 }
  0x78   : > { %v1228_v9 = vrot.slane %v1226_v3, 4  ;;  %v1227_v19 = vsel %vm3991_vm6, %v3226_v0, %v1226_v3  ;;  %v1319_v3 = vunpack.c.l.b16 %v1237_v30 }
  0x79   : > { %v4048_v47 = vpack.c.b16 %v1311_v50, %v1310_v16  ;;  %v1316_v18 = vunpack.c.l.b16 %v1227_v19 }
  0x7a   : > { %v1230_v50 = vsel %vm3991_vm6, %v1228_v9, %v1229_v52  ;;  %v4162_v0 = vpack.c.b16 %v1319_v3, %v1318_v51  ;;  %v1240_v9 = vrot.slane %v3888_v28, 5  ;;  %v3480_v3 = vld [vmem:[%s5485_s1 + $0x70] sm:$0xff] }
  0x7b   : > { %v1317_v2 = vunpack.c.l.b16 %v1230_v50  ;;  %v4172_v50 = vld [vmem:[%s3654_s14 + $0x54] sm:$0xff]  ;;  %2201 = vmatpush.bf16.msra.mxu3 %v3480_v3  ;;  %v3571_v3 = vld [vmem:[%s3654_s14 + $0x60] sm:$0xf] }
  0x7c   : > { %3250 = vmatmul.msk.bf16.gmra.mxu2 %vm803_vm3, %v4021_v22  ;;  %5557 = vst [vmem:[#allocation22_spill] sm:$0xff] %v4162_v0 }
  0x7d   : > { %v4128_v4 = vpack.c.b16 %v1317_v2, %v1316_v18  ;;  %5558 = vst [vmem:[#allocation23_spill] sm:$0xff] %v4172_v50  ;;  %v3228_v18 = vrot.slane %v3883_v20, 9  ;;  %v1242_v2 = vrot.slane %v1240_v9, 4  ;;  %v3478_v20 = vld [vmem:[%s5485_s1 + $0x60] sm:$0xff] }
  0x7e   : > { %2033 = vmatpush.bf16.msra.mxu2 %v3478_v20  ;;  %v3482_v20 = vld [vmem:[%s5485_s1 + $0x80] sm:$0xff] }
  0x7f   : > { %v1241_v28 = vsel %vm3991_vm6, %v3228_v18, %v1240_v9  ;;  %v1244_v12 = vsel %vm3991_vm6, %v1242_v2, %v1243_v26  ;;  %v3476_v9 = vld [vmem:[%s5485_s1 + $0x50] sm:$0xff]  ;;  %v3569_v26 = vld [vmem:[%s3654_s14 + $0x64] sm:$0xf]  ;;  %2353 = vmatpush.bf16.msra.mxu0 %v3482_v20 }
  0x80   : > { %v1320_v41 = vunpack.c.l.b16 %v1241_v28  ;;  %v1321_v30 = vunpack.c.l.b16 %v1244_v12  ;;  %1887 = vmatpush.bf16.msra.mxu1 %v3476_v9  ;;  %v1247_v28 = vrot.slane %v3569_v26, 5  ;;  %v3229_v9 = vrot.slane %v3571_v3, 9 }
  0x81   : > { %3282 = vmatmul.msk.bf16.gmra.mxu3 %vm803_vm3, %v4034_v15 }
  0x82   : > { %v4203_v18 = vpack.c.b16 %v1321_v30, %v1320_v41  ;;  %v4219_v30 = vld [vmem:[%s3654_s14 + $0x60] sm:$0xff] }
  0x83   : > { %5562 = vst [vmem:[#allocation27_spill] sm:$0xff] %v4219_v30 }
  0x84   : > { %5560 = vst [vmem:[#allocation25_spill] sm:$0xff] %v4203_v18 }
  0x86   : > { %3310 = vmatmul.msk.bf16.gmra.mxu0 %vm803_vm3, %v3929_v39 }
  0x87   : > { %3207 = vmatmul.msk.bf16.gmra.mxu1 %vm803_vm3, %v4034_v15 }
  0x8c   : > { %3251 = vmatmul.msk.bf16.gmra.mxu2 %vm803_vm3, %v4048_v47 }
  0x91   : > { %3283 = vmatmul.msk.bf16.gmra.mxu3 %vm803_vm3, %v4054_v57 }
  0x96   : > { %3311 = vmatmul.msk.bf16.gmra.mxu0 %vm803_vm3, %v4017_v17 }
  0x97   : > { %3208 = vmatmul.msk.bf16.gmra.mxu1 %vm803_vm3, %v4054_v57 }
  0x9c   : > { %v4071_v38 = vpop.f32.mrf.mxu1  ;;  %3252 = vmatmul.msk.bf16.gmra.mxu2 %vm803_vm3, %v4068_v29 }
  0xa1   : > { %3284 = vmatmul.msk.bf16.gmra.mxu3 %vm803_vm3, %v4076_v43 }
  0xa4   : > { %v4086_v10 = vpop.f32.mrf.mxu1 }
  0xa6   : > { %v4088_v56 = vpop.f32.mrf.mxu2  ;;  %3312 = vmatmul.msk.bf16.gmra.mxu0 %vm803_vm3, %v3689_v58 }
  0xa7   : > { %3209 = vmatmul.msk.bf16.gmra.mxu1 %vm803_vm3, %v4076_v43 }
  0xa9   : > { %v4094_v6 = vpop.f32.mrf.mxu0 }
  0xaa   : > { %v4098_v59 = vpop.f32.mrf.mxu3 }
  0xab   : > { %5553 = vst [vmem:[#allocation18_spill] sm:$0xff] %v4098_v59 }
  0xac   : > { %3253 = vmatmul.msk.bf16.gmra.mxu2 %vm803_vm3, %v4096_v8 }
  0xae   : > { %v4106_v37 = vpop.f32.mrf.mxu1  ;;  %v4110_v16 = vpop.f32.mrf.mxu2 }
  0xb1   : > { %3285 = vmatmul.msk.bf16.gmra.mxu3 %vm803_vm3, %v4104_v34  ;;  %v4118_v55 = vpop.f32.mrf.mxu0 }
  0xb2   : > { %v4120_v35 = vpop.f32.mrf.mxu3 }
  0xb3   : > { %5554 = vst [vmem:[#allocation19_spill] sm:$0xff] %v4120_v35 }
  0xb6   : > { %3313 = vmatmul.msk.bf16.gmra.mxu0 %vm803_vm3, %v3766_v31  ;;  %v4124_v24 = vpop.f32.mrf.mxu1 }
  0xb7   : > { %3210 = vmatmul.msk.bf16.gmra.mxu1 %vm803_vm3, %v4104_v34 }
  0xb9   : > { %v4130_v61 = vpop.f32.mrf.mxu2 }
  0xbc   : > { %3254 = vmatmul.msk.bf16.gmra.mxu2 %vm803_vm3, %v4128_v4 }
  0xbd   : > { %v4133_v62 = vpop.f32.mrf.mxu0 }
  0xbe   : > { %v4140_v44 = vpop.f32.mrf.mxu3 }
  0xbf   : > { %5555 = vst [vmem:[#allocation20_spill] sm:$0xff] %v4140_v44 }
  0xc0   : > { %v4144_v45 = vpop.f32.mrf.mxu1 }
  0xc1   : > { %3286 = vmatmul.msk.bf16.gmra.mxu3 %vm803_vm3, %v4138_v25  ;;  %v4148_v54 = vpop.f32.mrf.mxu2 }
  0xc5   : > { %v4154_v53 = vpop.f32.mrf.mxu0 }
  0xc6   : > { %3314 = vmatmul.msk.bf16.gmra.mxu0 %vm803_vm3, %v3860_v40  ;;  %v4158_v13 = vpop.f32.mrf.mxu3 }
  0xc7   : > { %5556 = vst [vmem:[#allocation21_spill] sm:$0xff] %v4158_v13  ;;  %3211 = vmatmul.msk.bf16.gmra.mxu1 %vm803_vm3, %v4138_v25  ;;  %v3570_v13 = vld [vmem:[%s3654_s14 + $0x68] sm:$0x1] }
  0xc8   : > { %v4165_v52 = vpop.f32.mrf.mxu1  ;;  %v1250_v41 = vrot.slane %v3570_v13, 5 }
  0xcc   : > { %v4167_v19 = vpop.f32.mrf.mxu2  ;;  %3255 = vmatmul.msk.bf16.gmra.mxu2 %vm803_vm3, %v4162_v0 }
  0xcf   : > { %v4176_v63 = vpop.f32.mrf.mxu0 }
  0xd0   : > { %v4178_v23 = vpop.f32.mrf.mxu3 }
  0xd1   : > { %5559 = vst [vmem:[#allocation24_spill] sm:$0xff] %v4178_v23  ;;  %3287 = vmatmul.msk.bf16.gmra.mxu3 %vm803_vm3, %v4172_v50 }
  0xd4   : > { %v4189_v7 = vpop.f32.mrf.mxu1  ;;  %v4191_v51 = vpop.f32.mrf.mxu2 }
  0xd6   : > { %3315 = vmatmul.msk.bf16.gmra.mxu0 %vm803_vm3, %v3954_v11  ;;  %v1249_v11 = vrot.slane %v1247_v28, 4 }
  0xd7   : > { %3212 = vmatmul.msk.bf16.gmra.mxu1 %vm803_vm3, %v4172_v50  ;;  %v4205_v2 = vpop.f32.mrf.mxu0 }
  0xd8   : > { %v4208_v12 = vpop.f32.mrf.mxu3 }
  0xd9   : > { %5561 = vst [vmem:[#allocation26_spill] sm:$0xff] %v4208_v12  ;;  %v1248_v12 = vsel %vm3991_vm6, %v3229_v9, %v1247_v28 }
  0xda   : > { %v1322_v3 = vunpack.c.l.b16 %v1248_v12 }
  0xdc   : > { %3256 = vmatmul.msk.bf16.gmra.mxu2 %vm803_vm3, %v4203_v18  ;;  %v4215_v23 = vpop.f32.mrf.mxu1  ;;  %v1251_v18 = vsel %vm3991_vm6, %v1249_v11, %v1250_v41  ;;  %v1254_v11 = vrot.slane %v3736_v42, 5 }
  0xdd   : > { %v1323_v35 = vunpack.c.l.b16 %v1251_v18  ;;  %v4252_v18 = vld [vmem:[%s3654_s14 + $0x6c] sm:$0xff] }
  0xdf   : > { %v4222_v26 = vpop.f32.mrf.mxu2  ;;  %v4241_v28 = vpack.c.b16 %v1323_v35, %v1322_v3  ;;  %v1256_v35 = vrot.slane %v1254_v11, 4 }
  0xe1   : > { %3288 = vmatmul.msk.bf16.gmra.mxu3 %vm803_vm3, %v4219_v30  ;;  %5564 = vst [vmem:[#allocation29_spill] sm:$0xff] %v4241_v28 }
  0xe3   : > { %v4230_v44 = vpop.f32.mrf.mxu0 }
  0xe4   : > { %v4232_v13 = vpop.f32.mrf.mxu3  ;;  %v1090_v50 = vpop.f32.mrf.mxu1 }
  0xe5   : > { %5563 = vst [vmem:[#allocation28_spill] sm:$0xff] %v4232_v13  ;;  %v1091_v20 = vadd.f32 %v1090_v50, %v4094_v6  ;;  %v1257_v50 = vrot.slane %v3743_v46, 5  ;;  %v3230_v13 = vrot.slane %v3729_v33, 9 }
  0xe6   : > { %3316 = vmatmul.msk.bf16.gmra.mxu0 %vm803_vm3, %v3708_v14 }
  0xe7   : > { %v4237_v0 = vpop.f32.mrf.mxu2  ;;  %3213 = vmatmul.msk.bf16.gmra.mxu1 %vm803_vm3, %v4219_v30  ;;  %v1255_v42 = vsel %vm3991_vm6, %v3230_v13, %v1254_v11 }
  0xe8   : > { %v1324_v40 = vunpack.c.l.b16 %v1255_v42 }
  0xeb   : > { %v4244_v41 = vpop.f32.mrf.mxu0 }
  0xec   : > { %v4246_v9 = vpop.f32.mrf.mxu3  ;;  %3257 = vmatmul.msk.bf16.gmra.mxu2 %vm803_vm3, %v4241_v28  ;;  %v1092_v6 = vpop.f32.mrf.mxu1 }
  0xed   : > { %5565 = vst [vmem:[#allocation30_spill] sm:$0xff] %v4246_v9  ;;  %v1093_v12 = vadd.f32 %v1092_v6, %v4118_v55  ;;  %v1258_v9 = vsel %vm3991_vm6, %v1256_v35, %v1257_v50  ;;  %v1261_v50 = vrot.slane %v3820_v36, 5 }
  0xee   : > { %v1325_v59 = vunpack.c.l.b16 %v1258_v9  ;;  %v1264_v9 = vrot.slane %v3827_v48, 5 }
  0xef   : > { %v1423_v3 = vpop.f32.mrf.mxu2 }
  0xf0   : > { %v1503_v14 = vadd.f32 %v1423_v3, %v1091_v20  ;;  %v4269_v6 = vpack.c.b16 %v1325_v59, %v1324_v40  ;;  %v4276_v3 = vld [vmem:[%s3654_s14 + $0x78] sm:$0xff] }
  0xf1   : > { %3289 = vmatmul.msk.bf16.gmra.mxu3 %vm803_vm3, %v4252_v18 }
  0xf3   : > { %v1737_v28 = vpop.f32.mrf.mxu0 }
  0xf4   : > { %v1569_v46 = vpop.f32.mrf.mxu3  ;;  %v1095_v30 = vpop.f32.mrf.mxu1 }
  0xf5   : > { %v1649_v55 = vadd.f32 %v1569_v46, %v1503_v14  ;;  %v1096_v33 = vadd.f32 %v1095_v30, %v4133_v62 }
  0xf6   : > { %3317 = vmatmul.msk.bf16.gmra.mxu0 %vm803_vm3, %v3797_v1 }
  0xf7   : > { %v1425_v20 = vpop.f32.mrf.mxu2  ;;  %3214 = vmatmul.msk.bf16.gmra.mxu1 %vm803_vm3, %v4252_v18  ;;  %v4267_v13 = vadd.f32 %v1737_v28, %v1649_v55  ;;  %v3231_v28 = vrot.slane %v3816_v27, 9 }
  0xf8   : > { %v1504_v11 = vadd.f32 %v1425_v20, %v1093_v12  ;;  %v1263_v12 = vrot.slane %v1261_v50, 4 }
  0xf9   : > { %v1262_v48 = vsel %vm3991_vm6, %v3231_v28, %v1261_v50 }
  0xfa   : > { %v1265_v46 = vsel %vm3991_vm6, %v1263_v12, %v1264_v9 }
  0xfb   : > { %v1739_v35 = vpop.f32.mrf.mxu0 }
  0xfc   : > { %v1571_v14 = vpop.f32.mrf.mxu3  ;;  %3258 = vmatmul.msk.bf16.gmra.mxu2 %vm803_vm3, %v4269_v6  ;;  %v1097_v62 = vpop.f32.mrf.mxu1 }
  0xfd   : > { %v1650_v30 = vadd.f32 %v1571_v14, %v1504_v11  ;;  %v1098_v42 = vadd.f32 %v1097_v62, %v4154_v53  ;;  %v1326_v53 = vunpack.c.l.b16 %v1262_v48  ;;  %v1327_v14 = vunpack.c.l.b16 %v1265_v46 }
  0xff   : > { %v1428_v40 = vpop.f32.mrf.mxu2  ;;  %v4280_v59 = vadd.f32 %v1739_v35, %v1650_v30  ;;  %v4295_v9 = vpack.c.b16 %v1327_v14, %v1326_v53  ;;  %v5567_v30 = vld [vmem:[#allocation11_spill] sm:$0xff] }
 0x100   : > { %v1505_v36 = vadd.f32 %v1428_v40, %v1096_v33  ;;  %v1268_v28 = vrot.slane %v5567_v30, 5  ;;  %v5568_v40 = vld [vmem:[#allocation12_spill] sm:$0xff] }
 0x101   : > { %3290 = vmatmul.msk.bf16.gmra.mxu3 %vm803_vm3, %v4276_v3  ;;  %5566 = vst [vmem:[#allocation31_spill] sm:$0xff] %v4295_v9  ;;  %v1271_v48 = vrot.slane %v5568_v40, 5 }
 0x103   : > { %v1742_v55 = vpop.f32.mrf.mxu0 }
 0x104   : > { %v1574_v20 = vpop.f32.mrf.mxu3  ;;  %v1100_v11 = vpop.f32.mrf.mxu1 }
 0x105   : > { %v1651_v27 = vadd.f32 %v1574_v20, %v1505_v36  ;;  %v1101_v35 = vadd.f32 %v1100_v11, %v4176_v63  ;;  %v4302_v20 = vld [vmem:[%s3654_s14 + $0x84] sm:$0xff] }
 0x106   : > { %3318 = vmatmul.msk.bf16.gmra.mxu0 %vm803_vm3, %v3885_v21 }
 0x107   : > { %v1430_v33 = vpop.f32.mrf.mxu2  ;;  %3215 = vmatmul.msk.bf16.gmra.mxu1 %vm803_vm3, %v4276_v3  ;;  %v4293_v50 = vadd.f32 %v1742_v55, %v1651_v27  ;;  %v5569_v55 = vld [vmem:[#allocation9_spill] sm:$0xff] }
 0x108   : > { %v1506_v62 = vadd.f32 %v1430_v33, %v1098_v42  ;;  %v3232_v27 = vrot.slane %v5569_v55, 9  ;;  %v1270_v42 = vrot.slane %v1268_v28, 4 }
 0x10a   : > { %v1269_v30 = vsel %vm3991_vm6, %v3232_v27, %v1268_v28  ;;  %v3572_v27 = vld [vmem:[%s3654_s14 + $0x94] sm:$0xf] }
 0x10b   : > { %v1744_v12 = vpop.f32.mrf.mxu0 }
 0x10c   : > { %v1576_v36 = vpop.f32.mrf.mxu3  ;;  %3259 = vmatmul.msk.bf16.gmra.mxu2 %vm803_vm3, %v4295_v9  ;;  %v1102_v63 = vpop.f32.mrf.mxu1 }
 0x10d   : > { %v1652_v46 = vadd.f32 %v1576_v36, %v1506_v62  ;;  %v1103_v11 = vadd.f32 %v1102_v63, %v4205_v2  ;;  %v1272_v62 = vsel %vm3991_vm6, %v1270_v42, %v1271_v48  ;;  %v1328_v63 = vunpack.c.l.b16 %v1269_v30 }
 0x10e   : > { %v1329_v55 = vunpack.c.l.b16 %v1272_v62  ;;  %v1275_v42 = vrot.slane %v3572_v27, 5 }
 0x10f   : > { %v1433_v53 = vpop.f32.mrf.mxu2  ;;  %v4306_v14 = vadd.f32 %v1744_v12, %v1652_v46 }
 0x110   : > { %v1507_v33 = vadd.f32 %v1433_v53, %v1101_v35  ;;  %v4321_v46 = vpack.c.b16 %v1329_v55, %v1328_v63 }
 0x111   : > { %5570 = vst [vmem:[#allocation11_spill] sm:$0xff] %v4306_v14  ;;  %3291 = vmatmul.msk.bf16.gmra.mxu3 %vm803_vm3, %v4302_v20 }
 0x112   : > { %5572 = vst [vmem:[#allocation9_spill] sm:$0xff] %v4321_v46 }
 0x113   : > { %v1747_v40 = vpop.f32.mrf.mxu0 }
 0x114   : > { %v1579_v2 = vpop.f32.mrf.mxu3  ;;  %v1105_v36 = vpop.f32.mrf.mxu1 }
 0x115   : > { %v1653_v9 = vadd.f32 %v1579_v2, %v1507_v33  ;;  %v1106_v12 = vadd.f32 %v1105_v36, %v4230_v44  ;;  %v3573_v33 = vld [vmem:[%s3654_s14 + $0x98] sm:$0x1]  ;;  %v4328_v36 = vld [vmem:[%s3654_s14 + $0x90] sm:$0xff] }
 0x116   : > { %3319 = vmatmul.msk.bf16.gmra.mxu0 %vm803_vm3, %v3982_v5  ;;  %v1278_v30 = vrot.slane %v3573_v33, 5  ;;  %5573 = vst [vmem:[#allocation32_spill] sm:$0xff] %v4328_v36 }
 0x117   : > { %v1435_v35 = vpop.f32.mrf.mxu2  ;;  %3216 = vmatmul.msk.bf16.gmra.mxu1 %vm803_vm3, %v4302_v20  ;;  %v4319_v28 = vadd.f32 %v1747_v40, %v1653_v9  ;;  %v3574_v9 = vld [vmem:[%s3654_s14 + $0x90] sm:$0xf] }
 0x118   : > { %v1508_v48 = vadd.f32 %v1435_v35, %v1103_v11  ;;  %v3233_v40 = vrot.slane %v3574_v9, 9  ;;  %v1277_v11 = vrot.slane %v1275_v42, 4 }
 0x119   : > { %5571 = vst [vmem:[#allocation12_spill] sm:$0xff] %v4319_v28  ;;  %v3577_v28 = vld [vmem:[%s3654_s14 + $0x9c] sm:$0xf] }
 0x11a   : > { %v1276_v27 = vsel %vm3991_vm6, %v3233_v40, %v1275_v42  ;;  %v3575_v40 = vld [vmem:[%s3654_s14 + $0xa0] sm:$0xf] }
 0x11b   : > { %v1749_v53 = vpop.f32.mrf.mxu0 }
 0x11c   : > { %v1581_v44 = vpop.f32.mrf.mxu3  ;;  %3260 = vmatmul.msk.bf16.gmra.mxu2 %vm803_vm3, %v4321_v46  ;;  %v1107_v62 = vpop.f32.mrf.mxu1 }
 0x11d   : > { %v1654_v2 = vadd.f32 %v1581_v44, %v1508_v48  ;;  %v1108_v5 = vadd.f32 %v1107_v62, %v4244_v41  ;;  %v1279_v48 = vsel %vm3991_vm6, %v1277_v11, %v1278_v30  ;;  %v1330_v62 = vunpack.c.l.b16 %v1276_v27 }
 0x11e   : > { %v1331_v9 = vunpack.c.l.b16 %v1279_v48  ;;  %v1282_v11 = vrot.slane %v3575_v40, 5  ;;  %v3576_v48 = vld [vmem:[%s3654_s14 + $0xa4] sm:$0x1] }
 0x11f   : > { %v1438_v63 = vpop.f32.mrf.mxu2  ;;  %v4332_v55 = vadd.f32 %v1749_v53, %v1654_v2  ;;  %v5575_v53 = vld [vmem:[#allocation3_spill] sm:$0xff] }
 0x120   : > { %v1509_v35 = vadd.f32 %v1438_v63, %v1106_v12  ;;  %v4346_v30 = vpack.c.b16 %v1331_v9, %v1330_v62 }
 0x121   : > { %5574 = vst [vmem:[#allocation33_spill] sm:$0xff] %v4332_v55  ;;  %3292 = vmatmul.msk.bf16.gmra.mxu3 %vm803_vm3, %v4328_v36  ;;  %v4353_v55 = vld [vmem:[%s3654_s14 + $0x9c] sm:$0xff] }
 0x122   : > { %5577 = vst [vmem:[#allocation35_spill] sm:$0xff] %v4346_v30 }
 0x123   : > { %v1752_v33 = vpop.f32.mrf.mxu0  ;;  %5578 = vst [vmem:[#allocation36_spill] sm:$0xff] %v4353_v55 }
 0x124   : > { %v1584_v44 = vpop.f32.mrf.mxu3  ;;  %v1110_v41 = vpop.f32.mrf.mxu1 }
 0x125   : > { %v1655_v46 = vadd.f32 %v1584_v44, %v1509_v35  ;;  %v1285_v44 = vrot.slane %v3576_v48, 5 }
 0x126   : > { %3320 = vmatmul.msk.bf16.gmra.mxu0 %vm803_vm3, %v5575_v53 }
 0x127   : > { %v1440_v12 = vpop.f32.mrf.mxu2  ;;  %3217 = vmatmul.msk.bf16.gmra.mxu1 %vm803_vm3, %v4328_v36  ;;  %v4344_v42 = vadd.f32 %v1752_v33, %v1655_v46  ;;  %v3234_v36 = vrot.slane %v3577_v28, 9  ;;  %v1284_v46 = vrot.slane %v1282_v11, 4 }
 0x128   : > { %v1510_v2 = vadd.f32 %v1440_v12, %v1108_v5  ;;  %v1111_v5 = vadd.f32 %v1110_v41, %v4071_v38  ;;  %v5580_v41 = vld [vmem:[#allocation4_spill] sm:$0xff] }
 0x129   : > { %5576 = vst [vmem:[#allocation34_spill] sm:$0xff] %v4344_v42  ;;  %v1283_v12 = vsel %vm3991_vm6, %v3234_v36, %v1282_v11 }
 0x12a   : > { %v1332_v28 = vunpack.c.l.b16 %v1283_v12 }
 0x12b   : > { %v1754_v63 = vpop.f32.mrf.mxu0 }
 0x12c   : > { %v1586_v27 = vpop.f32.mrf.mxu3  ;;  %3261 = vmatmul.msk.bf16.gmra.mxu2 %vm803_vm3, %v4346_v30  ;;  %v1112_v35 = vpop.f32.mrf.mxu1 }
 0x12d   : > { %v1656_v53 = vadd.f32 %v1586_v27, %v1510_v2  ;;  %v1286_v2 = vsel %vm3991_vm6, %v1284_v46, %v1285_v44  ;;  %v5583_v46 = vld [vmem:[#allocation6_spill] sm:$0xff] }
 0x12e   : > { %v1333_v30 = vunpack.c.l.b16 %v1286_v2  ;;  %v5584_v2 = vld [vmem:[#allocation7_spill] sm:$0xff] }
 0x12f   : > { %v1443_v33 = vpop.f32.mrf.mxu2  ;;  %v4357_v62 = vadd.f32 %v1754_v63, %v1656_v53  ;;  %v1113_v53 = vadd.f32 %v1112_v35, %v4086_v10  ;;  %v4379_v35 = vld [vmem:[%s3654_s14 + $0xa8] sm:$0xff] }
 0x130   : > { %v1511_v9 = vadd.f32 %v1443_v33, %v1111_v5  ;;  %v4372_v44 = vpack.c.b16 %v1333_v30, %v1332_v28  ;;  %v1289_v5 = vrot.slane %v5583_v46, 5  ;;  %5585 = vst [vmem:[#allocation6_spill] sm:$0xff] %v4379_v35 }
 0x131   : > { %5579 = vst [vmem:[#allocation37_spill] sm:$0xff] %v4357_v62  ;;  %3293 = vmatmul.msk.bf16.gmra.mxu3 %vm803_vm3, %v4353_v55 }
 0x132   : > { %5582 = vst [vmem:[#allocation39_spill] sm:$0xff] %v4372_v44 }
 0x133   : > { %v1757_v40 = vpop.f32.mrf.mxu0 }
 0x134   : > { %v1589_v27 = vpop.f32.mrf.mxu3  ;;  %v1115_v48 = vpop.f32.mrf.mxu1 }
 0x135   : > { %v1657_v38 = vadd.f32 %v1589_v27, %v1511_v9  ;;  %v1292_v27 = vrot.slane %v5584_v2, 5 }
 0x136   : > { %3321 = vmatmul.msk.bf16.gmra.mxu0 %vm803_vm3, %v5580_v41  ;;  %v5586_v41 = vld [vmem:[#allocation5_spill] sm:$0xff] }
 0x137   : > { %v1445_v63 = vpop.f32.mrf.mxu2  ;;  %3218 = vmatmul.msk.bf16.gmra.mxu1 %vm803_vm3, %v4353_v55  ;;  %v4370_v36 = vadd.f32 %v1757_v40, %v1657_v38  ;;  %v3235_v62 = vrot.slane %v5586_v41, 9  ;;  %v1291_v40 = vrot.slane %v1289_v5, 4  ;;  %v1116_v38 = vadd.f32 %v1115_v48, %v4106_v37 }
 0x138   : > { %v1512_v11 = vadd.f32 %v1445_v63, %v1113_v53 }
 0x139   : > { %5581 = vst [vmem:[#allocation38_spill] sm:$0xff] %v4370_v36  ;;  %v1290_v63 = vsel %vm3991_vm6, %v3235_v62, %v1289_v5  ;;  %v4397_v62 = vld [vmem:[%s3654_s14 + $0xc0] sm:$0xf] }
 0x13a   : > { %v1334_v2 = vunpack.c.l.b16 %v1290_v63  ;;  %5589 = vst [vmem:[#allocation5_spill] sm:$0xff] %v4397_v62  ;;  %v1682_v63 = vshrl.u32 %v4397_v62, 16 }
 0x13b   : > { %v1759_v33 = vpop.f32.mrf.mxu0 }
 0x13c   : > { %v1591_v12 = vpop.f32.mrf.mxu3  ;;  %3262 = vmatmul.msk.bf16.gmra.mxu2 %vm803_vm3, %v4372_v44  ;;  %v1117_v9 = vpop.f32.mrf.mxu1  ;;  %v5588_v44 = vld [vmem:[#allocation10_spill] sm:$0xff] }
 0x13d   : > { %v1658_v10 = vadd.f32 %v1591_v12, %v1512_v11  ;;  %v1293_v11 = vsel %vm3991_vm6, %v1291_v40, %v1292_v27 }
 0x13e   : > { %v1335_v37 = vunpack.c.l.b16 %v1293_v11 }
 0x13f   : > { %v1448_v30 = vpop.f32.mrf.mxu2  ;;  %v4383_v28 = vadd.f32 %v1759_v33, %v1658_v10  ;;  %v1118_v33 = vadd.f32 %v1117_v9, %v4124_v24  ;;  %v1685_v24 = vshll.u32 %v4397_v62, 16 }
 0x140   : > { %v1513_v53 = vadd.f32 %v1448_v30, %v1116_v38  ;;  %v4401_v40 = vpack.c.b16 %v1335_v37, %v1334_v2  ;;  %v4404_v38 = vld [vmem:[%s3654_s14 + $0xc4] sm:$0xf]  ;;  %v5594_v2 = vld [vmem:[#allocation15_spill] sm:$0xff] }
 0x141   : > { %5587 = vst [vmem:[#allocation7_spill] sm:$0xff] %v4383_v28  ;;  %3294 = vmatmul.msk.bf16.gmra.mxu3 %vm803_vm3, %v4379_v35  ;;  %v5593_v30 = vld [vmem:[#allocation14_spill] sm:$0xff]  ;;  %v1691_v9 = vshll.u32 %v4404_v38, 16  ;;  %v1299_v37 = vrot.slane %v5594_v2, 5  ;;  %v1684_v28 = vrot.slane %v1682_v63, 4  ;;  %v1687_v36 = vrot.slane %v1685_v24, 5 }
 0x142   : > { %5591 = vst [vmem:[#allocation41_spill] sm:$0xff] %v4401_v40 }
 0x143   : > { %v1762_v46 = vpop.f32.mrf.mxu0  ;;  %5592 = vst [vmem:[#allocation42_spill] sm:$0xff] %v4404_v38 }
 0x144   : > { %v1594_v41 = vpop.f32.mrf.mxu3  ;;  %v1120_v12 = vpop.f32.mrf.mxu1 }
 0x145   : > { %v1659_v48 = vadd.f32 %v1594_v41, %v1513_v53  ;;  %v1296_v53 = vrot.slane %v5593_v30, 5  ;;  %v1695_v41 = vshrl.u32 %v4404_v38, 16  ;;  %v1121_v62 = vadd.f32 %v1120_v12, %v4144_v45 }
 0x146   : > { %3322 = vmatmul.msk.bf16.gmra.mxu0 %vm803_vm3, %v5588_v44  ;;  %v1693_v38 = vrot.slane %v1691_v9, 5  ;;  %v1688_v12 = vor.u32 %v1687_v36, %v1684_v28 }
 0x147   : > { %v1450_v10 = vpop.f32.mrf.mxu2  ;;  %3219 = vmatmul.msk.bf16.gmra.mxu1 %vm803_vm3, %v4379_v35  ;;  %v4399_v5 = vadd.f32 %v1762_v46, %v1659_v48  ;;  %v1697_v55 = vrot.slane %v1695_v41, 4 }
 0x148   : > { %v1514_v27 = vadd.f32 %v1450_v10, %v1118_v33  ;;  %v4415_v33 = vld [vmem:[%s3654_s14 + $0xb4] sm:$0xff] }
 0x149   : > { %5590 = vst [vmem:[#allocation40_spill] sm:$0xff] %v4399_v5  ;;  %v5595_v10 = vld [vmem:[#allocation13_spill] sm:$0xff]  ;;  %v1298_v5 = vrot.slane %v1296_v53, 4  ;;  %v1698_v63 = vor.u32 %v1697_v55, %v1693_v38 }
 0x14a   : > { %v3236_v30 = vrot.slane %v5595_v10, 9 }
 0x14b   : > { %v1764_v11 = vpop.f32.mrf.mxu0  ;;  %v1699_v36 = vrot.slane %v1698_v63, 4 }
 0x14c   : > { %v1596_v44 = vpop.f32.mrf.mxu3  ;;  %3263 = vmatmul.msk.bf16.gmra.mxu2 %vm803_vm3, %v4401_v40  ;;  %v1122_v46 = vpop.f32.mrf.mxu1  ;;  %v4422_v40 = vld [vmem:[%s3654_s14 + $0xc8] sm:$0x1] }
 0x14d   : > { %v1660_v48 = vadd.f32 %v1596_v44, %v1514_v27  ;;  %v1297_v44 = vsel %vm3991_vm6, %v3236_v30, %v1296_v53  ;;  %v1300_v27 = vsel %vm3991_vm6, %v1298_v5, %v1299_v37  ;;  %v1701_v24 = vshll.u32 %v4422_v40, 16 }
 0x14e   : > { %v1336_v41 = vunpack.c.l.b16 %v1297_v44  ;;  %v1123_v2 = vadd.f32 %v1122_v46, %v4165_v52  ;;  %v1689_v5 = vrot.slane %v1688_v12, 4 }
 0x14f   : > { %v1453_v35 = vpop.f32.mrf.mxu2  ;;  %v4419_v42 = vadd.f32 %v1764_v11, %v1660_v48  ;;  %v1703_v55 = vrot.slane %v1701_v24, 5 }
 0x150   : > { %v1515_v14 = vadd.f32 %v1453_v35, %v1121_v62  ;;  %v1337_v35 = vunpack.c.l.b16 %v1300_v27  ;;  %v4447_v27 = vld [vmem:[%s3654_s14 + $0xc0] sm:$0xff] }
 0x151   : > { %3295 = vmatmul.msk.bf16.gmra.mxu3 %vm803_vm3, %v4415_v33  ;;  %v1704_v52 = vsel %vm3677_vm2, %v1699_v36, %v1703_v55 }
 0x152   : > { %v4438_v48 = vpack.c.b16 %v1337_v35, %v1336_v41  ;;  %v1711_v63 = vunpack.c.l.b16 %v1704_v52 }
 0x153   : > { %v1767_v45 = vpop.f32.mrf.mxu0 }
 0x154   : > { %v1599_v9 = vpop.f32.mrf.mxu3  ;;  %v1125_v11 = vpop.f32.mrf.mxu1 }
 0x155   : > { %v1661_v62 = vadd.f32 %v1599_v9, %v1515_v14  ;;  %v1694_v14 = vsel %vm3677_vm2, %v1689_v5, %v1693_v38 }
 0x156   : > { %3323 = vmatmul.msk.bf16.gmra.mxu0 %vm803_vm3, %v4000_v60  ;;  %v1710_v12 = vunpack.c.l.b16 %v1694_v14 }
 0x157   : > { %v1455_v53 = vpop.f32.mrf.mxu2  ;;  %3220 = vmatmul.msk.bf16.gmra.mxu1 %vm803_vm3, %v4415_v33  ;;  %v4436_v28 = vadd.f32 %v1767_v45, %v1661_v62  ;;  %v1126_v45 = vadd.f32 %v1125_v11, %v4189_v7 }
 0x158   : > { %v1516_v37 = vadd.f32 %v1455_v53, %v1123_v2  ;;  %v4454_v38 = vpack.c.b16 %v1711_v63, %v1710_v12 }
 0x15b   : > { %v1769_v10 = vpop.f32.mrf.mxu0 }
 0x15c   : > { %v1601_v46 = vpop.f32.mrf.mxu3  ;;  %3264 = vmatmul.msk.bf16.gmra.mxu2 %vm803_vm3, %v4438_v48  ;;  %v1127_v30 = vpop.f32.mrf.mxu1 }
 0x15d   : > { %v1662_v44 = vadd.f32 %v1601_v46, %v1516_v37  ;;  %v1128_v7 = vadd.f32 %v1127_v30, %v4215_v23 }
 0x15f   : > { %v1458_v24 = vpop.f32.mrf.mxu2  ;;  %v4450_v9 = vadd.f32 %v1769_v10, %v1662_v44 }
 0x160   : > { %v1517_v41 = vadd.f32 %v1458_v24, %v1126_v45 }
 0x161   : > { %3296 = vmatmul.msk.bf16.gmra.mxu3 %vm803_vm3, %v4447_v27 }
 0x163   : > { %v1772_v35 = vpop.f32.mrf.mxu0 }
 0x164   : > { %v1604_v62 = vpop.f32.mrf.mxu3  ;;  %v1130_v2 = vpop.f32.mrf.mxu1 }
 0x165   : > { %v1663_v53 = vadd.f32 %v1604_v62, %v1517_v41  ;;  %v1131_v52 = vadd.f32 %v1130_v2, %v4088_v56 }
 0x166   : > { %3324 = vmatmul.msk.bf16.gmra.mxu0 %vm803_vm3, %v4454_v38 }
 0x167   : > { %v1460_v11 = vpop.f32.mrf.mxu2  ;;  %3338 = vmatmul.msk.bf16.vlgmr.msra.gmra.mxu1 %vm803_vm3, %v4021_v22  ;;  %v4461_v5 = vadd.f32 %v1772_v35, %v1663_v53 }
 0x168   : > { %v1518_v36 = vadd.f32 %v1460_v11, %v1128_v7 }
 0x16b   : > { %v1774_v55 = vpop.f32.mrf.mxu0 }
 0x16c   : > { %v1606_v37 = vpop.f32.mrf.mxu3  ;;  %3370 = vmatmul.msk.bf16.vlgmr.msra.gmra.mxu2 %vm803_vm3, %v4034_v15  ;;  %v1132_v10 = vpop.f32.mrf.mxu1 }
 0x16d   : > { %v1664_v14 = vadd.f32 %v1606_v37, %v1518_v36  ;;  %v1133_v15 = vadd.f32 %v1132_v10, %v4110_v16 }
 0x16f   : > { %v1463_v46 = vpop.f32.mrf.mxu2  ;;  %v4466_v44 = vadd.f32 %v1774_v55, %v1664_v14 }
 0x170   : > { %v1519_v23 = vadd.f32 %v1463_v46, %v1131_v52 }
 0x171   : > { %3398 = vmatmul.msk.bf16.vlgmr.msra.gmra.mxu3 %vm803_vm3, %v3929_v39 }
 0x173   : > { %v1777_v22 = vpop.f32.mrf.mxu0 }
 0x174   : > { %v1609_v30 = vpop.f32.mrf.mxu3  ;;  %v1135_v45 = vpop.f32.mrf.mxu1 }
 0x175   : > { %v1665_v12 = vadd.f32 %v1609_v30, %v1519_v23  ;;  %v1136_v2 = vadd.f32 %v1135_v45, %v4130_v61 }
 0x176   : > { %3427 = vmatmul.msk.bf16.vlgmr.msra.gmra.mxu0 %vm803_vm3, %v4048_v47 }
 0x177   : > { %v1465_v63 = vpop.f32.mrf.mxu2  ;;  %3339 = vmatmul.msk.bf16.gmra.mxu1 %vm803_vm3, %v4048_v47  ;;  %v4475_v56 = vadd.f32 %v1777_v22, %v1665_v12 }
 0x178   : > { %v1520_v24 = vadd.f32 %v1465_v63, %v1133_v15 }
 0x17b   : > { %v1779_v41 = vpop.f32.mrf.mxu0 }
 0x17c   : > { %v1611_v35 = vpop.f32.mrf.mxu3  ;;  %3371 = vmatmul.msk.bf16.gmra.mxu2 %vm803_vm3, %v4054_v57  ;;  %v1137_v39 = vpop.f32.mrf.mxu1 }
 0x17d   : > { %v1666_v62 = vadd.f32 %v1611_v35, %v1520_v24  ;;  %v1138_v57 = vadd.f32 %v1137_v39, %v4148_v54 }
 0x17f   : > { %v1468_v53 = vpop.f32.mrf.mxu2  ;;  %v4480_v7 = vadd.f32 %v1779_v41, %v1666_v62 }
 0x180   : > { %v1521_v16 = vadd.f32 %v1468_v53, %v1136_v2 }
 0x181   : > { %3399 = vmatmul.msk.bf16.gmra.mxu3 %vm803_vm3, %v4017_v17 }
 0x183   : > { %v1782_v47 = vpop.f32.mrf.mxu0 }
 0x184   : > { %v1614_v11 = vpop.f32.mrf.mxu3  ;;  %v1140_v36 = vpop.f32.mrf.mxu1 }
 0x185   : > { %v1667_v55 = vadd.f32 %v1614_v11, %v1521_v16  ;;  %v1141_v23 = vadd.f32 %v1140_v36, %v4167_v19 }
 0x186   : > { %3428 = vmatmul.msk.bf16.gmra.mxu0 %vm803_vm3, %v4068_v29 }
 0x187   : > { %v1470_v37 = vpop.f32.mrf.mxu2  ;;  %3340 = vmatmul.msk.bf16.gmra.mxu1 %vm803_vm3, %v4068_v29  ;;  %v4489_v61 = vadd.f32 %v1782_v47, %v1667_v55 }
 0x188   : > { %v1522_v10 = vadd.f32 %v1470_v37, %v1138_v57 }
 0x18b   : > { %v1784_v14 = vpop.f32.mrf.mxu0 }
 0x18c   : > { %v1616_v52 = vpop.f32.mrf.mxu3  ;;  %3372 = vmatmul.msk.bf16.gmra.mxu2 %vm803_vm3, %v4076_v43  ;;  %v1142_v17 = vpop.f32.mrf.mxu1 }
 0x18d   : > { %v1668_v46 = vadd.f32 %v1616_v52, %v1522_v10  ;;  %v1143_v43 = vadd.f32 %v1142_v17, %v4191_v51 }
 0x18f   : > { %v1473_v22 = vpop.f32.mrf.mxu2  ;;  %v4494_v30 = vadd.f32 %v1784_v14, %v1668_v46  ;;  %v5596_v14 = vld [vmem:[#allocation18_spill] sm:$0xff] }
 0x190   : > { %v1523_v54 = vadd.f32 %v1473_v22, %v1141_v23  ;;  %v5597_v23 = vld [vmem:[#allocation8_spill] sm:$0xff] }
 0x191   : > { %3400 = vmatmul.msk.bf16.gmra.mxu3 %vm803_vm3, %v3689_v58 }
 0x193   : > { %v1787_v29 = vpop.f32.mrf.mxu0 }
 0x194   : > { %v1619_v45 = vpop.f32.mrf.mxu3  ;;  %v1145_v12 = vpop.f32.mrf.mxu1 }
 0x195   : > { %v1669_v15 = vadd.f32 %v1619_v45, %v1523_v54  ;;  %v1146_v62 = vadd.f32 %v1145_v12, %v4222_v26  ;;  %v5598_v45 = vld [vmem:[#allocation22_spill] sm:$0xff]  ;;  %v5599_v12 = vld [vmem:[#allocation19_spill] sm:$0xff] }
 0x196   : > { %3429 = vmatmul.msk.bf16.gmra.mxu0 %vm803_vm3, %v4096_v8 }
 0x197   : > { %v1475_v63 = vpop.f32.mrf.mxu2  ;;  %3341 = vmatmul.msk.bf16.gmra.mxu1 %vm803_vm3, %v4096_v8  ;;  %v4503_v19 = vadd.f32 %v1787_v29, %v1669_v15 }
 0x198   : > { %v1524_v24 = vadd.f32 %v1475_v63, %v1143_v43 }
 0x19b   : > { %v1789_v41 = vpop.f32.mrf.mxu0 }
 0x19c   : > { %v1621_v35 = vpop.f32.mrf.mxu3  ;;  %3373 = vmatmul.msk.bf16.gmra.mxu2 %vm803_vm3, %v4104_v34  ;;  %v1147_v58 = vpop.f32.mrf.mxu1 }
 0x19d   : > { %v1670_v39 = vadd.f32 %v1621_v35, %v1524_v24  ;;  %v1148_v34 = vadd.f32 %v1147_v58, %v4237_v0  ;;  %v5600_v35 = vld [vmem:[#allocation23_spill] sm:$0xff] }
 0x19f   : > { %v1478_v2 = vpop.f32.mrf.mxu2  ;;  %v4508_v53 = vadd.f32 %v1789_v41, %v1670_v39 }
 0x1a0   : > { %v1525_v51 = vadd.f32 %v1478_v2, %v1146_v62  ;;  %v5601_v62 = vld [vmem:[#allocation20_spill] sm:$0xff] }
 0x1a1   : > { %3401 = vmatmul.msk.bf16.gmra.mxu3 %vm803_vm3, %v3766_v31 }
 0x1a3   : > { %v1792_v8 = vpop.f32.mrf.mxu0 }
 0x1a4   : > { %v1624_v16 = vpop.f32.mrf.mxu3  ;;  %v1150_v47 = vpop.f32.mrf.mxu1 }
 0x1a5   : > { %v1671_v11 = vadd.f32 %v1624_v16, %v1525_v51  ;;  %v1151_v52 = vadd.f32 %v1150_v47, %v5596_v14  ;;  %v5602_v47 = vld [vmem:[#allocation16_spill] sm:$0xff] }
 0x1a6   : > { %3430 = vmatmul.msk.bf16.gmra.mxu0 %vm803_vm3, %v4128_v4 }
 0x1a7   : > { %v1480_v36 = vpop.f32.mrf.mxu2  ;;  %3342 = vmatmul.msk.bf16.gmra.mxu1 %vm803_vm3, %v4128_v4  ;;  %v4517_v26 = vadd.f32 %v1792_v8, %v1671_v11 }
 0x1a8   : > { %v1526_v55 = vadd.f32 %v1480_v36, %v1148_v34 }
 0x1ab   : > { %v1794_v57 = vpop.f32.mrf.mxu0 }
 0x1ac   : > { %v1626_v37 = vpop.f32.mrf.mxu3  ;;  %3374 = vmatmul.msk.bf16.gmra.mxu2 %vm803_vm3, %v4138_v25  ;;  %v1152_v31 = vpop.f32.mrf.mxu1 }
 0x1ad   : > { %v1672_v10 = vadd.f32 %v1626_v37, %v1526_v55  ;;  %v1153_v25 = vadd.f32 %v1152_v31, %v5599_v12  ;;  %v5604_v37 = vld [vmem:[#allocation21_spill] sm:$0xff] }
 0x1af   : > { %v1483_v17 = vpop.f32.mrf.mxu2  ;;  %v4522_v46 = vadd.f32 %v1794_v57, %v1672_v10  ;;  %v5603_v57 = vld [vmem:[#allocation25_spill] sm:$0xff] }
 0x1b0   : > { %v1527_v0 = vadd.f32 %v1483_v17, %v1151_v52 }
 0x1b1   : > { %3402 = vmatmul.msk.bf16.gmra.mxu3 %vm803_vm3, %v5597_v23  ;;  %v5605_v23 = vld [vmem:[#allocation27_spill] sm:$0xff] }
 0x1b3   : > { %v1797_v4 = vpop.f32.mrf.mxu0 }
 0x1b4   : > { %v1629_v22 = vpop.f32.mrf.mxu3  ;;  %v1155_v54 = vpop.f32.mrf.mxu1 }
 0x1b5   : > { %v1673_v29 = vadd.f32 %v1629_v22, %v1527_v0  ;;  %v1156_v2 = vadd.f32 %v1155_v54, %v5601_v62  ;;  %v5606_v54 = vld [vmem:[#allocation24_spill] sm:$0xff] }
 0x1b6   : > { %3431 = vmatmul.msk.bf16.gmra.mxu0 %vm803_vm3, %v5598_v45 }
 0x1b7   : > { %v1485_v15 = vpop.f32.mrf.mxu2  ;;  %3343 = vmatmul.msk.bf16.gmra.mxu1 %vm803_vm3, %v5598_v45  ;;  %v4531_v43 = vadd.f32 %v1797_v4, %v1673_v29 }
 0x1b8   : > { %v1528_v63 = vadd.f32 %v1485_v15, %v1153_v25  ;;  %v5607_v15 = vld [vmem:[#allocation2_spill] sm:$0xff] }
 0x1bb   : > { %v1799_v24 = vpop.f32.mrf.mxu0 }
 0x1bc   : > { %v1631_v41 = vpop.f32.mrf.mxu3  ;;  %3375 = vmatmul.msk.bf16.gmra.mxu2 %vm803_vm3, %v5600_v35  ;;  %v1157_v58 = vpop.f32.mrf.mxu1 }
 0x1bd   : > { %v1674_v39 = vadd.f32 %v1631_v41, %v1528_v63  ;;  %v1158_v31 = vadd.f32 %v1157_v58, %v5604_v37  ;;  %v5608_v58 = vld [vmem:[#allocation29_spill] sm:$0xff] }
 0x1bf   : > { %v1488_v51 = vpop.f32.mrf.mxu2  ;;  %v4536_v8 = vadd.f32 %v1799_v24, %v1674_v39  ;;  %v5609_v39 = vld [vmem:[#allocation26_spill] sm:$0xff] }
 0x1c0   : > { %v1529_v16 = vadd.f32 %v1488_v51, %v1156_v2 }
 0x1c1   : > { %3403 = vmatmul.msk.bf16.gmra.mxu3 %vm803_vm3, %v5602_v47 }
 0x1c3   : > { %v1802_v11 = vpop.f32.mrf.mxu0 }
 0x1c4   : > { %v1634_v34 = vpop.f32.mrf.mxu3  ;;  %v1160_v36 = vpop.f32.mrf.mxu1 }
 0x1c5   : > { %v1675_v55 = vadd.f32 %v1634_v34, %v1529_v16  ;;  %v1161_v29 = vadd.f32 %v1160_v36, %v5606_v54 }
 0x1c6   : > { %3432 = vmatmul.msk.bf16.gmra.mxu0 %vm803_vm3, %v5603_v57 }
 0x1c7   : > { %v1490_v10 = vpop.f32.mrf.mxu2  ;;  %3344 = vmatmul.msk.bf16.gmra.mxu1 %vm803_vm3, %v5603_v57  ;;  %v4545_v14 = vadd.f32 %v1802_v11, %v1675_v55  ;;  %v5610_v55 = vld [vmem:[#allocation28_spill] sm:$0xff] }
 0x1c8   : > { %v1530_v52 = vadd.f32 %v1490_v10, %v1158_v31 }
 0x1cb   : > { %v1804_v17 = vpop.f32.mrf.mxu0 }
 0x1cc   : > { %v1636_v0 = vpop.f32.mrf.mxu3  ;;  %3376 = vmatmul.msk.bf16.gmra.mxu2 %vm803_vm3, %v5605_v23  ;;  %v1162_v4 = vpop.f32.mrf.mxu1 }
 0x1cd   : > { %v1676_v22 = vadd.f32 %v1636_v0, %v1530_v52  ;;  %v1163_v62 = vadd.f32 %v1162_v4, %v5609_v39 }
 0x1cf   : > { %v1493_v45 = vpop.f32.mrf.mxu2  ;;  %v4550_v12 = vadd.f32 %v1804_v17, %v1676_v22 }
 0x1d0   : > { %v1531_v25 = vadd.f32 %v1493_v45, %v1161_v29 }
 0x1d1   : > { %3404 = vmatmul.msk.bf16.gmra.mxu3 %vm803_vm3, %v5607_v15 }
 0x1d3   : > { %v1807_v63 = vpop.f32.mrf.mxu0 }
 0x1d4   : > { %v1639_v24 = vpop.f32.mrf.mxu3  ;;  %v1165_v41 = vpop.f32.mrf.mxu1 }
 0x1d5   : > { %v1677_v35 = vadd.f32 %v1639_v24, %v1531_v25  ;;  %v1166_v57 = vadd.f32 %v1165_v41, %v5610_v55  ;;  %v5613_v55 = vld [vmem:[#allocation11_spill] sm:$0xff] }
 0x1d6   : > { %3433 = vmatmul.msk.bf16.gmra.mxu0 %vm803_vm3, %v5608_v58 }
 0x1d7   : > { %v1495_v2 = vpop.f32.mrf.mxu2  ;;  %3345 = vmatmul.msk.bf16.gmra.mxu1 %vm803_vm3, %v5608_v58  ;;  %v4559_v51 = vadd.f32 %v1807_v63, %v1677_v35 }
 0x1d8   : > { %v1532_v16 = vadd.f32 %v1495_v2, %v1163_v62 }
 0x1db   : > { %v1809_v47 = vpop.f32.mrf.mxu0 }
 0x1dc   : > { %v1641_v11 = vpop.f32.mrf.mxu3  ;;  %3377 = vmatmul.msk.bf16.gmra.mxu2 %vm803_vm3, %v4252_v18  ;;  %v1167_v34 = vpop.f32.mrf.mxu1  ;;  %v5611_v18 = vld [vmem:[#allocation30_spill] sm:$0xff] }
 0x1dd   : > { %v1678_v36 = vadd.f32 %v1641_v11, %v1532_v16  ;;  %v1168_v22 = vadd.f32 %v1167_v34, %v5611_v18  ;;  %v5612_v16 = vld [vmem:[#allocation31_spill] sm:$0xff]  ;;  %v5615_v18 = vld [vmem:[#allocation12_spill] sm:$0xff] }
 0x1df   : > { %v1498_v37 = vpop.f32.mrf.mxu2  ;;  %v4564_v31 = vadd.f32 %v1809_v47, %v1678_v36 }
 0x1e0   : > { %v1533_v10 = vadd.f32 %v1498_v37, %v1166_v57 }
 0x1e1   : > { %3405 = vmatmul.msk.bf16.gmra.mxu3 %vm803_vm3, %v3797_v1 }
 0x1e3   : > { %v1812_v52 = vpop.f32.mrf.mxu0 }
 0x1e4   : > { %v1644_v17 = vpop.f32.mrf.mxu3  ;;  %v1889_v0 = vpop.f32.mrf.mxu1 }
 0x1e5   : > { %v1679_v23 = vadd.f32 %v1644_v17, %v1533_v10  ;;  %v1969_v4 = vadd.f32 %v1889_v0, %v4267_v13 }
 0x1e6   : > { %3434 = vmatmul.msk.bf16.gmra.mxu0 %vm803_vm3, %v4269_v6 }
 0x1e7   : > { %v1500_v54 = vpop.f32.mrf.mxu2  ;;  %3346 = vmatmul.msk.bf16.gmra.mxu1 %vm803_vm3, %v4269_v6  ;;  %v4574_v29 = vadd.f32 %v1812_v52, %v1679_v23  ;;  %v5614_v52 = vld [vmem:[#allocation17_spill] sm:$0xff] }
 0x1e8   : > { %v1534_v45 = vadd.f32 %v1500_v54, %v1168_v22  ;;  %v5616_v54 = vld [vmem:[#allocation9_spill] sm:$0xff] }
 0x1eb   : > { %v1814_v25 = vpop.f32.mrf.mxu0 }
 0x1ec   : > { %v1646_v1 = vpop.f32.mrf.mxu3  ;;  %3378 = vmatmul.msk.bf16.gmra.mxu2 %vm803_vm3, %v4276_v3  ;;  %v1891_v15 = vpop.f32.mrf.mxu1 }
 0x1ed   : > { %v1680_v63 = vadd.f32 %v1646_v1, %v1534_v45  ;;  %v1970_v13 = vadd.f32 %v1891_v15, %v4280_v59 }
 0x1ef   : > { %v2035_v24 = vpop.f32.mrf.mxu2  ;;  %v4579_v41 = vadd.f32 %v1814_v25, %v1680_v63  ;;  %v5617_v63 = vld [vmem:[#allocation32_spill] sm:$0xff] }
 0x1f0   : > { %v2115_v35 = vadd.f32 %v2035_v24, %v1969_v4 }
 0x1f1   : > { %3406 = vmatmul.msk.bf16.gmra.mxu3 %vm803_vm3, %v3885_v21 }
 0x1f3   : > { %v2355_v6 = vpop.f32.mrf.mxu0 }
 0x1f4   : > { %v2203_v58 = vpop.f32.mrf.mxu3  ;;  %v1894_v39 = vpop.f32.mrf.mxu1 }
 0x1f5   : > { %v2283_v62 = vadd.f32 %v2203_v58, %v2115_v35  ;;  %v1971_v2 = vadd.f32 %v1894_v39, %v4293_v50  ;;  %v5618_v35 = vld [vmem:[#allocation33_spill] sm:$0xff] }
 0x1f6   : > { %3435 = vmatmul.msk.bf16.gmra.mxu0 %vm803_vm3, %v5612_v16 }
 0x1f7   : > { %v4586_v3 = vadd.f32 %v2355_v6, %v2283_v62  ;;  %v2037_v47 = vpop.f32.mrf.mxu2  ;;  %3347 = vmatmul.msk.bf16.gmra.mxu1 %vm803_vm3, %v5612_v16 }
 0x1f8   : > { %v2116_v59 = vadd.f32 %v2037_v47, %v1970_v13 }
 0x1fb   : > { %v2357_v11 = vpop.f32.mrf.mxu0 }
 0x1fc   : > { %v2205_v34 = vpop.f32.mrf.mxu3  ;;  %3379 = vmatmul.msk.bf16.gmra.mxu2 %vm803_vm3, %v4302_v20  ;;  %v1896_v21 = vpop.f32.mrf.mxu1 }
 0x1fd   : > { %v2284_v36 = vadd.f32 %v2205_v34, %v2116_v59  ;;  %v1972_v57 = vadd.f32 %v1896_v21, %v5613_v55  ;;  %v5620_v34 = vld [vmem:[#allocation34_spill] sm:$0xff] }
 0x1ff   : > { %v4593_v50 = vadd.f32 %v2357_v11, %v2284_v36  ;;  %v2040_v37 = vpop.f32.mrf.mxu2  ;;  %v5621_v36 = vld [vmem:[#allocation35_spill] sm:$0xff] }
 0x200   : > { %v2117_v10 = vadd.f32 %v2040_v37, %v1971_v2  ;;  %v5619_v2 = vld [vmem:[#allocation3_spill] sm:$0xff] }
 0x201   : > { %3407 = vmatmul.msk.bf16.gmra.mxu3 %vm803_vm3, %v5614_v52 }
 0x203   : > { %v2360_v17 = vpop.f32.mrf.mxu0 }
 0x204   : > { %v2208_v0 = vpop.f32.mrf.mxu3  ;;  %v1899_v23 = vpop.f32.mrf.mxu1 }
 0x205   : > { %v2285_v4 = vadd.f32 %v2208_v0, %v2117_v10  ;;  %v1973_v22 = vadd.f32 %v1899_v23, %v5615_v18 }
 0x206   : > { %3436 = vmatmul.msk.bf16.gmra.mxu0 %vm803_vm3, %v5616_v54 }
 0x207   : > { %v4600_v20 = vadd.f32 %v2360_v17, %v2285_v4  ;;  %v2042_v45 = vpop.f32.mrf.mxu2  ;;  %3348 = vmatmul.msk.bf16.gmra.mxu1 %vm803_vm3, %v5616_v54  ;;  %v5622_v17 = vld [vmem:[#allocation36_spill] sm:$0xff]  ;;  %v5623_v4 = vld [vmem:[#allocation37_spill] sm:$0xff] }
 0x208   : > { %v2118_v25 = vadd.f32 %v2042_v45, %v1972_v57 }
 0x20b   : > { %v2362_v1 = vpop.f32.mrf.mxu0 }
 0x20c   : > { %v2210_v15 = vpop.f32.mrf.mxu3  ;;  %3380 = vmatmul.msk.bf16.gmra.mxu2 %vm803_vm3, %v5617_v63  ;;  %v1901_v13 = vpop.f32.mrf.mxu1 }
 0x20d   : > { %v2286_v24 = vadd.f32 %v2210_v15, %v2118_v25  ;;  %v1974_v6 = vadd.f32 %v1901_v13, %v5618_v35  ;;  %v5624_v25 = vld [vmem:[#allocation4_spill] sm:$0xff] }
 0x20f   : > { %v4607_v58 = vadd.f32 %v2362_v1, %v2286_v24  ;;  %v2045_v39 = vpop.f32.mrf.mxu2  ;;  %v5625_v24 = vld [vmem:[#allocation38_spill] sm:$0xff] }
 0x210   : > { %v2119_v62 = vadd.f32 %v2045_v39, %v1973_v22 }
 0x211   : > { %3408 = vmatmul.msk.bf16.gmra.mxu3 %vm803_vm3, %v5619_v2 }
 0x213   : > { %v2365_v16 = vpop.f32.mrf.mxu0 }
 0x214   : > { %v2213_v47 = vpop.f32.mrf.mxu3  ;;  %v1904_v59 = vpop.f32.mrf.mxu1 }
 0x215   : > { %v2287_v11 = vadd.f32 %v2213_v47, %v2119_v62  ;;  %v1975_v21 = vadd.f32 %v1904_v59, %v5620_v34  ;;  %v5627_v59 = vld [vmem:[#allocation6_spill] sm:$0xff] }
 0x216   : > { %3437 = vmatmul.msk.bf16.gmra.mxu0 %vm803_vm3, %v5621_v36 }
 0x217   : > { %v4614_v55 = vadd.f32 %v2365_v16, %v2287_v11  ;;  %v2047_v57 = vpop.f32.mrf.mxu2  ;;  %3349 = vmatmul.msk.bf16.gmra.mxu1 %vm803_vm3, %v5621_v36 }
 0x218   : > { %v2120_v37 = vadd.f32 %v2047_v57, %v1974_v6  ;;  %v5626_v6 = vld [vmem:[#allocation39_spill] sm:$0xff] }
 0x21b   : > { %v2367_v10 = vpop.f32.mrf.mxu0 }
 0x21c   : > { %v2215_v52 = vpop.f32.mrf.mxu3  ;;  %3381 = vmatmul.msk.bf16.gmra.mxu2 %vm803_vm3, %v5622_v17  ;;  %v1906_v0 = vpop.f32.mrf.mxu1 }
 0x21d   : > { %v2288_v23 = vadd.f32 %v2215_v52, %v2120_v37  ;;  %v1976_v18 = vadd.f32 %v1906_v0, %v5623_v4  ;;  %v5629_v52 = vld [vmem:[#allocation10_spill] sm:$0xff] }
 0x21f   : > { %v4621_v22 = vadd.f32 %v2367_v10, %v2288_v23  ;;  %v2050_v54 = vpop.f32.mrf.mxu2 }
 0x220   : > { %v2121_v45 = vadd.f32 %v2050_v54, %v1975_v21  ;;  %v5628_v21 = vld [vmem:[#allocation7_spill] sm:$0xff] }
 0x221   : > { %3409 = vmatmul.msk.bf16.gmra.mxu3 %vm803_vm3, %v5624_v25 }
 0x223   : > { %v2370_v1 = vpop.f32.mrf.mxu0 }
 0x224   : > { %v2218_v15 = vpop.f32.mrf.mxu3  ;;  %v1909_v63 = vpop.f32.mrf.mxu1 }
 0x225   : > { %v2289_v13 = vadd.f32 %v2218_v15, %v2121_v45  ;;  %v1977_v35 = vadd.f32 %v1909_v63, %v5625_v24  ;;  %v5631_v45 = vld [vmem:[#allocation41_spill] sm:$0xff] }
 0x226   : > { %3438 = vmatmul.msk.bf16.gmra.mxu0 %vm803_vm3, %v5626_v6 }
 0x227   : > { %v4628_v39 = vadd.f32 %v2370_v1, %v2289_v13  ;;  %v2052_v62 = vpop.f32.mrf.mxu2  ;;  %3350 = vmatmul.msk.bf16.gmra.mxu1 %vm803_vm3, %v5626_v6 }
 0x228   : > { %v2122_v2 = vadd.f32 %v2052_v62, %v1976_v18  ;;  %v5630_v18 = vld [vmem:[#allocation40_spill] sm:$0xff] }
 0x22b   : > { %v2372_v16 = vpop.f32.mrf.mxu0 }
 0x22c   : > { %v2220_v47 = vpop.f32.mrf.mxu3  ;;  %3382 = vmatmul.msk.bf16.gmra.mxu2 %vm803_vm3, %v5627_v59  ;;  %v1911_v11 = vpop.f32.mrf.mxu1  ;;  %v5632_v59 = vld [vmem:[#allocation42_spill] sm:$0xff] }
 0x22d   : > { %v2290_v34 = vadd.f32 %v2220_v47, %v2122_v2  ;;  %v1978_v36 = vadd.f32 %v1911_v11, %v5628_v21  ;;  %v1852_v11 = vrot.slane %v5632_v59, 5  ;;  %v4658_v21 = vld [vmem:[%s3654_s14 + $0xd0] sm:$0xf] }
 0x22f   : > { %v4635_v57 = vadd.f32 %v2372_v16, %v2290_v34  ;;  %v2055_v37 = vpop.f32.mrf.mxu2  ;;  %v4655_v34 = vld [vmem:[%s3654_s14 + $0xcc] sm:$0xf] }
 0x230   : > { %v2123_v10 = vadd.f32 %v2055_v37, %v1977_v35 }
 0x231   : > { %3410 = vmatmul.msk.bf16.gmra.mxu3 %vm803_vm3, %v5629_v52 }
 0x233   : > { %v2375_v17 = vpop.f32.mrf.mxu0 }
 0x234   : > { %v2223_v0 = vpop.f32.mrf.mxu3  ;;  %v1914_v23 = vpop.f32.mrf.mxu1 }
 0x235   : > { %v2291_v4 = vadd.f32 %v2223_v0, %v2123_v10  ;;  %v1979_v54 = vadd.f32 %v1914_v23, %v5630_v18  ;;  %v2157_v0 = vshll.u32 %v4658_v21, 16  ;;  %v2161_v23 = vshrl.u32 %v4658_v21, 16 }
 0x236   : > { %3439 = vmatmul.msk.bf16.gmra.mxu0 %vm803_vm3, %v5631_v45 }
 0x237   : > { %v4642_v25 = vadd.f32 %v2375_v17, %v2291_v4  ;;  %v2057_v1 = vpop.f32.mrf.mxu2  ;;  %3351 = vmatmul.msk.bf16.gmra.mxu1 %vm803_vm3, %v5631_v45  ;;  %v2148_v17 = vshrl.u32 %v4655_v34, 16 }
 0x238   : > { %v2124_v15 = vadd.f32 %v2057_v1, %v1978_v36 }
 0x23b   : > { %v2377_v63 = vpop.f32.mrf.mxu0 }
 0x23c   : > { %v2225_v13 = vpop.f32.mrf.mxu3  ;;  %3383 = vmatmul.msk.bf16.gmra.mxu2 %vm803_vm3, %v4415_v33  ;;  %v1916_v24 = vpop.f32.mrf.mxu1 }
 0x23d   : > { %v2292_v35 = vadd.f32 %v2225_v13, %v2124_v15  ;;  %v1980_v6 = vadd.f32 %v1916_v24, %v4419_v42  ;;  %v5633_v42 = vld [vmem:[#allocation5_spill] sm:$0xff]  ;;  %v2150_v15 = vrot.slane %v2148_v17, 4  ;;  %v2159_v13 = vrot.slane %v2157_v0, 5 }
 0x23e   : > { %v3325_v52 = vrot.slane %v5633_v42, 9  ;;  %v2163_v24 = vrot.slane %v2161_v23, 4 }
 0x23f   : > { %v4649_v62 = vadd.f32 %v2377_v63, %v2292_v35  ;;  %v2060_v2 = vpop.f32.mrf.mxu2 }
 0x240   : > { %v2125_v16 = vadd.f32 %v2060_v2, %v1979_v54  ;;  %v1855_v54 = vrot.slane %v4422_v40, 5  ;;  %v1853_v1 = vsel %vm3991_vm6, %v3325_v52, %v1852_v11 }
 0x241   : > { %3411 = vmatmul.msk.bf16.gmra.mxu3 %vm803_vm3, %v4000_v60  ;;  %v2151_v60 = vshll.u32 %v4655_v34, 16  ;;  %v1862_v40 = vunpack.c.l.b16 %v1853_v1 }
 0x243   : > { %v2380_v47 = vpop.f32.mrf.mxu0  ;;  %v2153_v63 = vrot.slane %v2151_v60, 5 }
 0x244   : > { %v2228_v36 = vpop.f32.mrf.mxu3  ;;  %v1919_v33 = vpop.f32.mrf.mxu1 }
 0x245   : > { %v2293_v37 = vadd.f32 %v2228_v36, %v2125_v16  ;;  %v1981_v10 = vadd.f32 %v1919_v33, %v4436_v28  ;;  %v1854_v28 = vrot.slane %v1852_v11, 4  ;;  %v346_v16 = vld [vmem:[%s3654_s14 + $0xd4] sm:$0x1]  ;;  %v2154_v11 = vor.u32 %v2153_v63, %v2150_v15 }
 0x246   : > { %3440 = vmatmul.msk.bf16.gmra.mxu0 %vm803_vm3, %v4438_v48  ;;  %v2164_v33 = vor.u32 %v2163_v24, %v2159_v13 }
 0x247   : > { %v4668_v4 = vadd.f32 %v2380_v47, %v2293_v37  ;;  %v2062_v18 = vpop.f32.mrf.mxu2  ;;  %3352 = vmatmul.msk.bf16.gmra.mxu1 %vm803_vm3, %v4438_v48  ;;  %v1856_v2 = vsel %vm3991_vm6, %v1854_v28, %v1855_v54  ;;  %v2167_v37 = vshll.u32 %v346_v16, 16  ;;  %v2155_v0 = vrot.slane %v2154_v11, 4 }
 0x248   : > { %v2126_v45 = vadd.f32 %v2062_v18, %v1980_v6  ;;  %v1863_v36 = vunpack.c.l.b16 %v1856_v2  ;;  %v2165_v23 = vrot.slane %v2164_v33, 4  ;;  %v2318_v28 = vrot.slane %v4658_v21, 5 }
 0x249   : > { %v3414_v21 = vrot.slane %v4655_v34, 9 }
 0x24a   : > { %v1864_v60 = vpack.c.b16 %v1863_v36, %v1862_v40  ;;  %v2320_v24 = vrot.slane %v2318_v28, 4 }
 0x24b   : > { %v2382_v35 = vpop.f32.mrf.mxu0 }
 0x24c   : > { %v2230_v47 = vpop.f32.mrf.mxu3  ;;  %3384 = vmatmul.msk.bf16.gmra.mxu2 %vm803_vm3, %v4447_v27  ;;  %v1921_v48 = vpop.f32.mrf.mxu1  ;;  %v2169_v27 = vrot.slane %v2167_v37, 5 }
 0x24d   : > { %v2294_v59 = vadd.f32 %v2230_v47, %v2126_v45  ;;  %v1982_v6 = vadd.f32 %v1921_v48, %v4450_v9  ;;  %v3465_v47 = vld [vmem:[%s3654_s14 + $0xcc] sm:$0xff]  ;;  %s5267_s14 = sshll.u32 %s5635_s22, 8 }
 0x24e   : > { %s5275_s20 = scalar_lea.vmem %s5489_s5, %s5267_s14  ;;  %s5286_s24 = scalar_lea.vmem %s5488_s4, %s5267_s14 }
 0x24f   : > { %v4681_v42 = vadd.f32 %v2382_v35, %v2294_v59  ;;  %v2065_v52 = vpop.f32.mrf.mxu2  ;;  %v2321_v35 = vrot.slane %v346_v16, 5  ;;  %s5345_s27 = scalar_lea.vmem %s5490_s6, %s5267_s14 }
 0x250   : > { %v2127_v17 = vadd.f32 %v2065_v52, %v1981_v10  ;;  %v2160_v10 = vsel %vm3677_vm2, %v2155_v0, %v2159_v13  ;;  %v2319_v13 = vsel %vm3991_vm6, %v3414_v21, %v2318_v28 }
 0x251   : > { %3412 = vmatmul.msk.bf16.gmra.mxu3 %vm803_vm3, %v4454_v38  ;;  %v2170_v38 = vsel %vm3677_vm2, %v2165_v23, %v2169_v27  ;;  %v2322_v32 = vsel %vm3991_vm6, %v2320_v24, %v2321_v35  ;;  %v2328_v16 = vunpack.c.l.b16 %v2319_v13 }
 0x252   : > { %v2177_v48 = vunpack.c.l.b16 %v2170_v38 }
 0x253   : > { %v2385_v18 = vpop.f32.mrf.mxu0 }
 0x254   : > { %v2233_v9 = vpop.f32.mrf.mxu3  ;;  %v1924_v54 = vpop.f32.mrf.mxu1 }
 0x255   : > { %v2295_v45 = vadd.f32 %v2233_v9, %v2127_v17  ;;  %v1983_v1 = vadd.f32 %v1924_v54, %v4461_v5  ;;  %v2176_v5 = vunpack.c.l.b16 %v2160_v10 }
 0x256   : > { %3441 = vmatmul.msk.bf16.gmra.mxu0 %vm803_vm3, %v1864_v60 }
 0x257   : > { %v4692_v15 = vadd.f32 %v2385_v18, %v2295_v45  ;;  %v2067_v63 = vpop.f32.mrf.mxu2  ;;  %3353 = vmatmul.msk.bf16.gmra.mxu1 %vm803_vm3, %v1864_v60  ;;  %v2178_v33 = vpack.c.b16 %v2177_v48, %v2176_v5 }
 0x258   : > { %v2128_v2 = vadd.f32 %v2067_v63, %v1982_v6  ;;  %v2329_v6 = vunpack.c.l.b16 %v2322_v32 }
 0x25a   : > { %v2330_v60 = vpack.c.b16 %v2329_v6, %v2328_v16 }
 0x25b   : > { %v2387_v59 = vpop.f32.mrf.mxu0 }
 0x25c   : > { %v2235_v40 = vpop.f32.mrf.mxu3  ;;  %3385 = vmatmul.msk.bf16.gmra.mxu2 %vm803_vm3, %v3465_v47  ;;  %v1926_v36 = vpop.f32.mrf.mxu1 }
 0x25d   : > { %v2296_v11 = vadd.f32 %v2235_v40, %v2128_v2  ;;  %v1984_v34 = vadd.f32 %v1926_v36, %v4466_v44 }
 0x25f   : > { %v4703_v37 = vadd.f32 %v2387_v59, %v2296_v11  ;;  %v2070_v52 = vpop.f32.mrf.mxu2 }
 0x260   : > { %v2129_v17 = vadd.f32 %v2070_v52, %v1983_v1 }
 0x261   : > { %3413 = vmatmul.msk.bf16.gmra.mxu3 %vm803_vm3, %v2178_v33 }
 0x263   : > { %v2390_v0 = vpop.f32.mrf.mxu0 }
 0x264   : > { %v2238_v49 = vpop.f32.mrf.mxu3  ;;  %v1929_v23 = vpop.f32.mrf.mxu1 }
 0x265   : > { %v2297_v27 = vadd.f32 %v2238_v49, %v2129_v17  ;;  %v1985_v18 = vadd.f32 %v1929_v23, %v4475_v56 }
 0x266   : > { %3442 = vmatmul.msk.bf16.gmra.mxu0 %vm803_vm3, %v2330_v60 }
 0x267   : > { %v4708_v28 = vadd.f32 %v2390_v0, %v2297_v27  ;;  %v2072_v44 = vpop.f32.mrf.mxu2 }
 0x268   : > { %v2130_v9 = vadd.f32 %v2072_v44, %v1984_v34 }
 0x26b   : > { %v2392_v54 = vpop.f32.mrf.mxu0 }
 0x26c   : > { %v2240_v45 = vpop.f32.mrf.mxu3  ;;  %v1931_v10 = vpop.f32.mrf.mxu1 }
 0x26d   : > { %v2298_v38 = vadd.f32 %v2240_v45, %v2130_v9  ;;  %v1986_v1 = vadd.f32 %v1931_v10, %v4480_v7 }
 0x26f   : > { %v4711_v63 = vadd.f32 %v2392_v54, %v2298_v38  ;;  %v2075_v21 = vpop.f32.mrf.mxu2 }
 0x270   : > { %v2131_v24 = vadd.f32 %v2075_v21, %v1985_v18 }
 0x273   : > { %v2395_v35 = vpop.f32.mrf.mxu0 }
 0x274   : > { %v2243_v2 = vpop.f32.mrf.mxu3  ;;  %v1934_v47 = vpop.f32.mrf.mxu1 }
 0x275   : > { %v2299_v56 = vadd.f32 %v2243_v2, %v2131_v24  ;;  %v1987_v5 = vadd.f32 %v1934_v47, %v4489_v61  ;;  %v2504_v47 = vld [vmem:[%s5487_s3 + $0x8] sm:$0xff] }
 0x277   : > { %v4714_v48 = vadd.f32 %v2395_v35, %v2299_v56  ;;  %v2077_v59 = vpop.f32.mrf.mxu2 }
 0x278   : > { %v2132_v13 = vadd.f32 %v2077_v59, %v1986_v1  ;;  %v2503_v59 = vld [vmem:[%s5487_s3] sm:$0xff] }
 0x27b   : > { %v2397_v32 = vpop.f32.mrf.mxu0 }
 0x27c   : > { %v2245_v40 = vpop.f32.mrf.mxu3  ;;  %v1936_v36 = vpop.f32.mrf.mxu1 }
 0x27d   : > { %v2300_v11 = vadd.f32 %v2245_v40, %v2132_v13  ;;  %v1988_v7 = vadd.f32 %v1936_v36, %v4494_v30 }
 0x27f   : > { %v4717_v33 = vadd.f32 %v2397_v32, %v2300_v11  ;;  %v2080_v34 = vpop.f32.mrf.mxu2 }
 0x280   : > { %v2133_v16 = vadd.f32 %v2080_v34, %v1987_v5 }
 0x283   : > { %v2400_v6 = vpop.f32.mrf.mxu0 }
 0x284   : > { %v2248_v52 = vpop.f32.mrf.mxu3  ;;  %v1939_v17 = vpop.f32.mrf.mxu1 }
 0x285   : > { %v2301_v60 = vadd.f32 %v2248_v52, %v2133_v16  ;;  %v1989_v61 = vadd.f32 %v1939_v17, %v4503_v19  ;;  %v4731_v19 = vld [vmem:[%s5486_s2] ss:$0 sm:$0xff] }
 0x286   : > { %v2472_v24 = vadd.f32 %v4731_v19, %v4593_v50  ;;  %v2471_v56 = vadd.f32 %v4731_v19, %v4586_v3  ;;  %v2473_v5 = vadd.f32 %v4731_v19, %v4600_v20  ;;  %v2505_v50 = vld [vmem:[%s5487_s3 + $0x10] sm:$0xff]  ;;  %v2474_v32 = vadd.f32 %v4731_v19, %v4607_v58  ;;  %v2506_v3 = vld [vmem:[%s5487_s3 + $0x18] sm:$0xff]  ;;  %v2507_v58 = vld [vmem:[%s5487_s3 + $0x20] sm:$0xff] }
 0x287   : > { %v4720_v0 = vadd.f32 %v2400_v6, %v2301_v60  ;;  %v2082_v49 = vpop.f32.mrf.mxu2  ;;  %v2475_v34 = vadd.f32 %v4731_v19, %v4614_v55  ;;  %v2476_v52 = vadd.f32 %v4731_v19, %v4621_v22  ;;  %v2508_v60 = vld [vmem:[%s5487_s3 + $0x28] sm:$0xff]  ;;  %v2509_v22 = vld [vmem:[%s5487_s3 + $0x30] sm:$0xff] }
 0x288   : > { %v2134_v23 = vadd.f32 %v2082_v49, %v1988_v7  ;;  %v4752_v13 = vadd.f32 %v2504_v47, %v2472_v24  ;;  %v4765_v11 = vadd.f32 %v2503_v59, %v2471_v56  ;;  %v4767_v7 = vadd.f32 %v2505_v50, %v2473_v5  ;;  %v2511_v5 = vld [vmem:[%s5487_s3 + $0x40] sm:$0xff] }
 0x289   : > { %v4776_v6 = vadd.f32 %v2506_v3, %v2474_v32  ;;  %v4789_v49 = vadd.f32 %v2507_v58, %v2475_v34  ;;  %v2479_v56 = vadd.f32 %v4731_v19, %v4642_v25  ;;  %v2480_v32 = vadd.f32 %v4731_v19, %v4649_v62  ;;  %v2512_v58 = vld [vmem:[%s5487_s3 + $0x48] sm:$0xff] }
 0x28a   : > { %v2569_v16 = vsel %vm2567_vm7, %v4752_v13, 0.0  ;;  %v2568_v55 = vsel %vm2567_vm7, %v4765_v11, 0.0 }
 0x28b   : > { %v2402_v27 = vpop.f32.mrf.mxu0  ;;  %v2575_v24 = vsel %vm2567_vm7, %v4789_v49, 0.0 }
 0x28c   : > { %v2250_v18 = vpop.f32.mrf.mxu3  ;;  %v4722_v44 = vpop.f32.mrf.mxu1 }
 0x28d   : > { %v2302_v9 = vadd.f32 %v2250_v18, %v2134_v23  ;;  %v2477_v23 = vadd.f32 %v4731_v19, %v4628_v39  ;;  %v2573_v18 = vsel %vm2567_vm7, %v4776_v6, 0.0  ;;  %v2510_v39 = vld [vmem:[%s5487_s3 + $0x38] sm:$0xff] }
 0x28f   : > { %v4724_v30 = vadd.f32 %v2402_v27, %v2302_v9  ;;  %v2085_v54 = vpop.f32.mrf.mxu2  ;;  %v2570_v27 = vadd.f32 %v2569_v16, %v2568_v55  ;;  %v4798_v9 = vadd.f32 %v2508_v60, %v2476_v52  ;;  %v4813_v47 = vadd.f32 %v2509_v22, %v2477_v23  ;;  %v2513_v55 = vld [vmem:[%s5487_s3 + $0x50] sm:$0xff] }
 0x290   : > { %v2135_v45 = vadd.f32 %v2085_v54, %v1989_v61  ;;  %v2571_v61 = vsel %vm2567_vm7, %v4767_v7, 0.0  ;;  %v2478_v54 = vadd.f32 %v4731_v19, %v4635_v57  ;;  %v4831_v16 = vadd.f32 %v2511_v5, %v2479_v56 }
 0x291   : > { %v2577_v59 = vsel %vm2567_vm7, %v4798_v9, 0.0  ;;  %v2579_v25 = vsel %vm2567_vm7, %v4813_v47, 0.0  ;;  %v2481_v52 = vadd.f32 %v4731_v19, %v4668_v4  ;;  %v2482_v23 = vadd.f32 %v4731_v19, %v4681_v42  ;;  %v2514_v4 = vld [vmem:[%s5487_s3 + $0x58] sm:$0xff]  ;;  %v2515_v42 = vld [vmem:[%s5487_s3 + $0x60] sm:$0xff] }
 0x292   : > { %v4822_v50 = vadd.f32 %v2510_v39, %v2478_v54 }
 0x293   : > { %v2405_v10 = vpop.f32.mrf.mxu0  ;;  %v4851_v39 = vadd.f32 %v2513_v55, %v2481_v52  ;;  %v4860_v5 = vadd.f32 %v2514_v4, %v2482_v23 }
 0x294   : > { %v2253_v38 = vpop.f32.mrf.mxu3  ;;  %v4726_v1 = vpop.f32.mrf.mxu1  ;;  %v2581_v62 = vsel %vm2567_vm7, %v4822_v50, 0.0 }
 0x295   : > { %v2303_v21 = vadd.f32 %v2253_v38, %v2135_v45  ;;  %v2587_v52 = vsel %vm2567_vm7, %v4851_v39, 0.0  ;;  %v2589_v23 = vsel %vm2567_vm7, %v4860_v5, 0.0 }
 0x297   : > { %v4735_v35 = vadd.f32 %v2405_v10, %v2303_v21  ;;  %v4737_v2 = vpop.f32.mrf.mxu2  ;;  %v2572_v10 = vadd.f32 %v2571_v61, %v2570_v27  ;;  %v4840_v61 = vadd.f32 %v2512_v58, %v2480_v32  ;;  %v2516_v58 = vld [vmem:[%s5487_s3 + $0x68] sm:$0xff] }
 0x299   : > { %v2574_v57 = vadd.f32 %v2573_v18, %v2572_v10  ;;  %v2583_v10 = vsel %vm2567_vm7, %v4831_v16, 0.0 }
 0x29b   : > { %v4756_v40 = vpop.f32.mrf.mxu0  ;;  %v2576_v34 = vadd.f32 %v2575_v24, %v2574_v57  ;;  %v2483_v24 = vadd.f32 %v4731_v19, %v4692_v15  ;;  %v2585_v57 = vsel %vm2567_vm7, %v4840_v61, 0.0  ;;  %v2485_v15 = vadd.f32 %v4731_v19, %v4708_v28 }
 0x29c   : > { %v4761_v20 = vpop.f32.mrf.mxu3  ;;  %v4763_v36 = vpop.f32.mrf.mxu1  ;;  %v1991_v28 = vadd.f32 %v4726_v1, %v4517_v26 }
 0x29d   : > { %v2578_v60 = vadd.f32 %v2577_v59, %v2576_v34  ;;  %v2484_v59 = vadd.f32 %v4731_v19, %v4703_v37  ;;  %v2517_v37 = vld [vmem:[%s5487_s3 + $0x70] sm:$0xff]  ;;  %v1992_v26 = vadd.f32 %v4763_v36, %v4522_v46 }
 0x29f   : > { %v4780_v17 = vpop.f32.mrf.mxu2  ;;  %v2580_v22 = vadd.f32 %v2579_v25, %v2578_v60  ;;  %v1990_v25 = vadd.f32 %v4722_v44, %v4508_v53  ;;  %v4873_v60 = vadd.f32 %v2515_v42, %v2483_v24  ;;  %v2486_v53 = vadd.f32 %v4731_v19, %v4711_v63  ;;  %v2518_v24 = vld [vmem:[%s5487_s3 + $0x78] sm:$0xff] }
 0x2a0   : > { %v2137_v63 = vadd.f32 %v4780_v17, %v1991_v28 }
 0x2a1   : > { %v2582_v56 = vadd.f32 %v2581_v62, %v2580_v22  ;;  %v2136_v62 = vadd.f32 %v4737_v2, %v1990_v25  ;;  %v4881_v22 = vadd.f32 %v2516_v58, %v2484_v59  ;;  %v2591_v42 = vsel %vm2567_vm7, %v4873_v60, 0.0  ;;  %v2519_v59 = vld [vmem:[%s5487_s3 + $0x80] sm:$0xff] }
 0x2a2   : > { %v4907_v25 = vadd.f32 %v2518_v24, %v2486_v53 }
 0x2a3   : > { %v4802_v45 = vpop.f32.mrf.mxu0  ;;  %v2584_v34 = vadd.f32 %v2583_v10, %v2582_v56  ;;  %v4887_v10 = vadd.f32 %v2517_v37, %v2485_v15  ;;  %v2304_v58 = vadd.f32 %v4761_v20, %v2136_v62  ;;  %v2593_v15 = vsel %vm2567_vm7, %v4881_v22, 0.0 }
 0x2a4   : > { %v4807_v38 = vpop.f32.mrf.mxu3  ;;  %v4809_v21 = vpop.f32.mrf.mxu1  ;;  %v2489_v20 = vadd.f32 %v4731_v19, %v4720_v0  ;;  %v2597_v28 = vsel %vm2567_vm7, %v4907_v25, 0.0  ;;  %v2490_v0 = vadd.f32 %v4731_v19, %v4724_v30 }
 0x2a5   : > { %v2586_v55 = vadd.f32 %v2585_v57, %v2584_v34  ;;  %v2487_v57 = vadd.f32 %v4731_v19, %v4714_v48  ;;  %v2488_v34 = vadd.f32 %v4731_v19, %v4717_v33  ;;  %v2520_v48 = vld [vmem:[%s5487_s3 + $0x88] sm:$0xff]  ;;  %v1993_v36 = vadd.f32 %v4809_v21, %v4531_v43 }
 0x2a6   : > { %v2595_v33 = vsel %vm2567_vm7, %v4887_v10, 0.0  ;;  %v2305_v62 = vadd.f32 %v4807_v38, %v2137_v63  ;;  %v2456_v53 = vadd.f32 %v4756_v40, %v2304_v58 }
 0x2a7   : > { %v2092_v3 = vpop.f32.mrf.mxu2  ;;  %v2588_v4 = vadd.f32 %v2587_v52, %v2586_v55  ;;  %v4918_v37 = vadd.f32 %v2519_v59, %v2487_v57  ;;  %v2521_v55 = vld [vmem:[%s5487_s3 + $0x90] sm:$0xff]  ;;  %v4925_v21 = vadd.f32 %v2520_v48, %v2488_v34  ;;  %v2523_v59 = vld [vmem:[%s5487_s3 + $0xa0] sm:$0xff] }
 0x2a8   : > { %v2138_v46 = vadd.f32 %v2092_v3, %v1992_v26  ;;  %v4932_v26 = vadd.f32 %v2521_v55, %v2489_v20  ;;  %v2457_v30 = vadd.f32 %v4802_v45, %v2305_v62  ;;  %v2492_v34 = vadd.f32 %v4731_v19, %v2456_v53 }
 0x2a9   : > { %v2590_v1 = vadd.f32 %v2589_v23, %v2588_v4  ;;  %v2599_v40 = vsel %vm2567_vm7, %v4918_v37, 0.0 }
 0x2ab   : > { %v4844_v27 = vpop.f32.mrf.mxu0  ;;  %v2592_v52 = vadd.f32 %v2591_v42, %v2590_v1  ;;  %v2601_v1 = vsel %vm2567_vm7, %v4925_v21, 0.0 }
 0x2ac   : > { %v2260_v18 = vpop.f32.mrf.mxu3  ;;  %v1951_v54 = vpop.f32.mrf.mxu1 }
 0x2ad   : > { %v1994_v23 = vadd.f32 %v1951_v54, %v4536_v8  ;;  %v2594_v43 = vadd.f32 %v2593_v15, %v2592_v52  ;;  %v2306_v4 = vadd.f32 %v2260_v18, %v2138_v46  ;;  %v2522_v8 = vld [vmem:[%s5487_s3 + $0x98] sm:$0xff]  ;;  %v2524_v15 = vld [vmem:[%s5487_s3 + $0xa8] sm:$0xff]  ;;  %v2493_v52 = vadd.f32 %v4731_v19, %v2457_v30 }
 0x2ae   : > { %v4948_v58 = vadd.f32 %v2522_v8, %v2490_v0  ;;  %v4960_v62 = vadd.f32 %v2524_v15, %v2492_v34 }
 0x2af   : > { %v2095_v32 = vpop.f32.mrf.mxu2  ;;  %v2596_v57 = vadd.f32 %v2595_v33, %v2594_v43 }
 0x2b0   : > { %v2139_v3 = vadd.f32 %v2095_v32, %v1993_v36  ;;  %v2491_v32 = vadd.f32 %v4731_v19, %v4735_v35  ;;  %v2458_v35 = vadd.f32 %v4844_v27, %v2306_v4  ;;  %v2603_v36 = vsel %vm2567_vm7, %v4932_v26, 0.0  ;;  %v2525_v27 = vld [vmem:[%s5487_s3 + $0xb0] sm:$0xff] }
 0x2b1   : > { %v2598_v63 = vadd.f32 %v2597_v28, %v2596_v57  ;;  %v4973_v0 = vadd.f32 %v2525_v27, %v2493_v52 }
 0x2b3   : > { %v2415_v44 = vpop.f32.mrf.mxu0  ;;  %v2600_v46 = vadd.f32 %v2599_v40, %v2598_v63  ;;  %v2611_v34 = vsel %vm2567_vm7, %v4973_v0, 0.0 }
 0x2b4   : > { %v2263_v2 = vpop.f32.mrf.mxu3  ;;  %v1954_v56 = vpop.f32.mrf.mxu1 }
 0x2b5   : > { %v2307_v18 = vadd.f32 %v2263_v2, %v2139_v3  ;;  %v1995_v2 = vadd.f32 %v1954_v56, %v4545_v14  ;;  %v2602_v55 = vadd.f32 %v2601_v1, %v2600_v46  ;;  %v2605_v14 = vsel %vm2567_vm7, %v4948_v58, 0.0 }
 0x2b6   : > { %v2494_v56 = vadd.f32 %v4731_v19, %v2458_v35 }
 0x2b7   : > { %v2097_v17 = vpop.f32.mrf.mxu2  ;;  %v2459_v33 = vadd.f32 %v2415_v44, %v2307_v18  ;;  %v2604_v43 = vadd.f32 %v2603_v36, %v2602_v55  ;;  %v2526_v44 = vld [vmem:[%s5487_s3 + $0xb8] sm:$0xff] }
 0x2b8   : > { %v2140_v42 = vadd.f32 %v2097_v17, %v1994_v23  ;;  %v4957_v17 = vadd.f32 %v2523_v59, %v2491_v32  ;;  %v4981_v40 = vadd.f32 %v2526_v44, %v2494_v56  ;;  %v2528_v59 = vld [vmem:[%s5487_s3 + $0xc8] sm:$0xff] }
 0x2b9   : > { %v2495_v4 = vadd.f32 %v4731_v19, %v2459_v33  ;;  %v2606_v8 = vadd.f32 %v2605_v14, %v2604_v43 }
 0x2ba   : > { %v2607_v28 = vsel %vm2567_vm7, %v4957_v17, 0.0 }
 0x2bb   : > { %v2417_v24 = vpop.f32.mrf.mxu0  ;;  %v2608_v1 = vadd.f32 %v2607_v28, %v2606_v8 }
 0x2bc   : > { %v2265_v38 = vpop.f32.mrf.mxu3  ;;  %v1956_v54 = vpop.f32.mrf.mxu1 }
 0x2bd   : > { %v2308_v45 = vadd.f32 %v2265_v38, %v2140_v42  ;;  %v2527_v38 = vld [vmem:[%s5487_s3 + $0xc0] sm:$0xff]  ;;  %v1996_v18 = vadd.f32 %v1956_v54, %v4550_v12  ;;  %v2613_v12 = vsel %vm2567_vm7, %v4981_v40, 0.0 }
 0x2be   : > { %v4990_v15 = vadd.f32 %v2527_v38, %v2495_v4 }
 0x2bf   : > { %v2100_v48 = vpop.f32.mrf.mxu2  ;;  %v2460_v3 = vadd.f32 %v2417_v24, %v2308_v45  ;;  %v2609_v24 = vsel %vm2567_vm7, %v4960_v62, 0.0 }
 0x2c0   : > { %v2141_v20 = vadd.f32 %v2100_v48, %v1995_v2  ;;  %v2610_v2 = vadd.f32 %v2609_v24, %v2608_v1  ;;  %v2529_v48 = vld [vmem:[%s5487_s3 + $0xd0] sm:$0xff]  ;;  %v2615_v33 = vsel %vm2567_vm7, %v4990_v15, 0.0 }
 0x2c1   : > { %v2496_v32 = vadd.f32 %v4731_v19, %v2460_v3 }
 0x2c2   : > { %v2612_v36 = vadd.f32 %v2611_v34, %v2610_v2  ;;  %v2531_v34 = vld [vmem:[%s5487_s3 + $0xe0] sm:$0xff] }
 0x2c3   : > { %v2420_v23 = vpop.f32.mrf.mxu0  ;;  %v4998_v54 = vadd.f32 %v2528_v59, %v2496_v32 }
 0x2c4   : > { %v2268_v53 = vpop.f32.mrf.mxu3  ;;  %v1959_v57 = vpop.f32.mrf.mxu1  ;;  %v2614_v27 = vadd.f32 %v2613_v12, %v2612_v36 }
 0x2c5   : > { %v2309_v42 = vadd.f32 %v2268_v53, %v2141_v20  ;;  %v2617_v14 = vsel %vm2567_vm7, %v4998_v54, 0.0  ;;  %v1997_v3 = vadd.f32 %v1959_v57, %v4559_v51  ;;  %v2530_v53 = vld [vmem:[%s5487_s3 + $0xd8] sm:$0xff] }
 0x2c6   : > { %v2616_v44 = vadd.f32 %v2615_v33, %v2614_v27 }
 0x2c7   : > { %v2461_v30 = vadd.f32 %v2420_v23, %v2309_v42  ;;  %v2102_v63 = vpop.f32.mrf.mxu2 }
 0x2c8   : > { %v2142_v45 = vadd.f32 %v2102_v63, %v1996_v18  ;;  %v2618_v8 = vadd.f32 %v2617_v14, %v2616_v44  ;;  %v2532_v14 = vld [vmem:[%s5487_s3 + $0xe8] sm:$0xff] }
 0x2c9   : > { %v2497_v35 = vadd.f32 %v4731_v19, %v2461_v30 }
 0x2cb   : > { %v2422_v46 = vpop.f32.mrf.mxu0  ;;  %v5002_v20 = vadd.f32 %v2529_v48, %v2497_v35 }
 0x2cc   : > { %v2270_v52 = vpop.f32.mrf.mxu3  ;;  %v1961_v43 = vpop.f32.mrf.mxu1 }
 0x2cd   : > { %v2310_v55 = vadd.f32 %v2270_v52, %v2142_v45  ;;  %v2619_v28 = vsel %vm2567_vm7, %v5002_v20, 0.0  ;;  %v1998_v1 = vadd.f32 %v1961_v43, %v4564_v31 }
 0x2ce   : > { %v2620_v32 = vadd.f32 %v2619_v28, %v2618_v8 }
 0x2cf   : > { %v2462_v56 = vadd.f32 %v2422_v46, %v2310_v55  ;;  %v2105_v23 = vpop.f32.mrf.mxu2 }
 0x2d0   : > { %v2143_v42 = vadd.f32 %v2105_v23, %v1997_v3 }
 0x2d1   : > { %v2498_v4 = vadd.f32 %v4731_v19, %v2462_v56 }
 0x2d3   : > { %v5013_v24 = vadd.f32 %v2530_v53, %v2498_v4  ;;  %v2425_v38 = vpop.f32.mrf.mxu0 }
 0x2d4   : > { %v2273_v30 = vpop.f32.mrf.mxu3  ;;  %v1964_v2 = vpop.f32.mrf.mxu1 }
 0x2d5   : > { %v2621_v51 = vsel %vm2567_vm7, %v5013_v24, 0.0  ;;  %v2311_v57 = vadd.f32 %v2273_v30, %v2143_v42  ;;  %v1999_v27 = vadd.f32 %v1964_v2, %v4574_v29 }
 0x2d6   : > { %v2622_v18 = vadd.f32 %v2621_v51, %v2620_v32  ;;  %v2533_v32 = vld [vmem:[%s5487_s3 + $0xf0] sm:$0xff] }
 0x2d7   : > { %v2463_v63 = vadd.f32 %v2425_v38, %v2311_v57  ;;  %v2107_v59 = vpop.f32.mrf.mxu2 }
 0x2d8   : > { %v2144_v45 = vadd.f32 %v2107_v59, %v1998_v1 }
 0x2d9   : > { %v2499_v35 = vadd.f32 %v4731_v19, %v2463_v63  ;;  %v3586_v63 = vmov 256.0  }
 0x2da   : > { %3501 = vrcp.f32 %v3586_v63 }
 0x2db   : > { %v2563_v48 = vadd.f32 %v2531_v34, %v2499_v35  ;;  %v2427_v12 = vpop.f32.mrf.mxu0 }
 0x2dc   : > { %v2275_v46 = vpop.f32.mrf.mxu3  ;;  %v1966_v43 = vpop.f32.mrf.mxu1 }
 0x2dd   : > { %v2623_v36 = vsel %vm2567_vm7, %v2563_v48, 0.0  ;;  %v2312_v52 = vadd.f32 %v2275_v46, %v2144_v45  ;;  %v2000_v38 = vadd.f32 %v1966_v43, %v4579_v41  ;;  %v2534_v41 = vld [vmem:[%s5487_s3 + $0xf8] sm:$0xff] }
 0x2de   : > { %v2624_v33 = vadd.f32 %v2623_v36, %v2622_v18 }
 0x2df   : > { %v2464_v55 = vadd.f32 %v2427_v12, %v2312_v52  ;;  %v2110_v31 = vpop.f32.mrf.mxu2 }
 0x2e0   : > { %v2145_v3 = vadd.f32 %v2110_v31, %v1999_v27  ;;  %v3502_v12 = vpop.eup %3501 }
 0x2e1   : > { %v2500_v56 = vadd.f32 %v4731_v19, %v2464_v55  ;;  %v2638_v52 = vmul.f32 256.0, %v3502_v12  ;;  %vm2642_vm8 = vweird.f32 %v3502_v12 }
 0x2e3   : > { %v2564_v23 = vadd.f32 %v2532_v14, %v2500_v56  ;;  %v2430_v44 = vpop.f32.mrf.mxu0  ;;  %v2639_v27 = vsub.f32 1.0, %v2638_v52 }
 0x2e4   : > { %v2278_v53 = vpop.f32.mrf.mxu3 }
 0x2e5   : > { %v2625_v28 = vsel %vm2567_vm7, %v2564_v23, 0.0  ;;  %v2313_v4 = vadd.f32 %v2278_v53, %v2145_v3  ;;  %v2640_v56 = vmul.f32 %v3502_v12, %v2639_v27 }
 0x2e6   : > { %v2626_v42 = vadd.f32 %v2625_v28, %v2624_v33 }
 0x2e7   : > { %v2465_v8 = vadd.f32 %v2430_v44, %v2313_v4  ;;  %v2112_v29 = vpop.f32.mrf.mxu2  ;;  %v2641_v44 = vadd.f32 %v3502_v12, %v2640_v56 }
 0x2e8   : > { %v2146_v51 = vadd.f32 %v2112_v29, %v2000_v38 }
 0x2e9   : > { %v2501_v30 = vadd.f32 %v4731_v19, %v2465_v8  ;;  %v5040_v28 = vsel %vm2642_vm8, %v3502_v12, %v2641_v44 }
 0x2eb   : > { %v2565_v57 = vadd.f32 %v2533_v32, %v2501_v30  ;;  %v2432_v35 = vpop.f32.mrf.mxu0 }
 0x2ec   : > { %v2280_v18 = vpop.f32.mrf.mxu3 }
 0x2ed   : > { %v2627_v1 = vsel %vm2567_vm7, %v2565_v57, 0.0  ;;  %v2314_v59 = vadd.f32 %v2280_v18, %v2146_v51 }
 0x2ee   : > { %v2628_v34 = vadd.f32 %v2627_v1, %v2626_v42 }
 0x2ef   : > { %v2466_v45 = vadd.f32 %v2432_v35, %v2314_v59 }
 0x2f1   : > { %v2502_v2 = vadd.f32 %v4731_v19, %v2466_v45 }
 0x2f3   : > { %v2566_v46 = vadd.f32 %v2534_v41, %v2502_v2 }
 0x2f5   : > { %v2629_v36 = vsel %vm2567_vm7, %v2566_v46, 0.0 }
 0x2f6   : > { %v2630_v33 = vadd.f32 %v2629_v36, %v2628_v34 }
 0x2f8   : > { %v2631_v55 = vrot.slane %v2630_v33, 4 }
 0x2fa   : > { %v2632_v31 = vadd.f32 %v2631_v55, %v2630_v33 }
 0x2fc   : > { %v2633_v14 = vrot.slane %v2632_v31, 2 }
 0x2fe   : > { %v2634_v3 = vadd.f32 %v2633_v14, %v2632_v31 }
 0x300   : > { %v2635_v43 = vrot.slane %v2634_v3, 1 }
 0x302   : > { %v2636_v53 = vadd.f32 %v2635_v43, %v2634_v3 }
 0x304   : > { %v5043_v19 = vmul.f32 %v5040_v28, %v2636_v53 }
 0x306   : > { %v5047_v4 = vsub.f32 %v5002_v20, %v5043_v19  ;;  %v5051_v42 = vsub.f32 %v5013_v24, %v5043_v19  ;;  %v5054_v8 = vsub.f32 %v2563_v48, %v5043_v19  ;;  %v5057_v38 = vsub.f32 %v2564_v23, %v5043_v19 }
 0x307   : > { %v5060_v29 = vsub.f32 %v2565_v57, %v5043_v19  ;;  %v5063_v32 = vsub.f32 %v2566_v46, %v5043_v19  ;;  %v5067_v20 = vsub.f32 %v4765_v11, %v5043_v19  ;;  %v5071_v24 = vsub.f32 %v4752_v13, %v5043_v19 }
 0x308   : > { %v5075_v48 = vsub.f32 %v4767_v7, %v5043_v19  ;;  %v5079_v23 = vsub.f32 %v4776_v6, %v5043_v19  ;;  %v5087_v11 = vsub.f32 %v4789_v49, %v5043_v19  ;;  %v5093_v7 = vsub.f32 %v4798_v9, %v5043_v19 }
 0x309   : > { %v2677_v30 = vmul.f32 %v5067_v20, %v5067_v20  ;;  %v2678_v51 = vmul.f32 %v5071_v24, %v5071_v24  ;;  %v5101_v1 = vsub.f32 %v4813_v47, %v5043_v19  ;;  %v5108_v9 = vsub.f32 %v4822_v50, %v5043_v19 }
 0x30a   : > { %v2679_v13 = vmul.f32 %v5075_v48, %v5075_v48  ;;  %v2680_v6 = vmul.f32 %v5079_v23, %v5079_v23  ;;  %v2681_v49 = vmul.f32 %v5087_v11, %v5087_v11  ;;  %v2682_v35 = vmul.f32 %v5093_v7, %v5093_v7 }
 0x30b   : > { %v2709_v57 = vsel %vm2567_vm7, %v2677_v30, 0.0  ;;  %v2710_v18 = vsel %vm2567_vm7, %v2678_v51, 0.0  ;;  %v5115_v47 = vsub.f32 %v4831_v16, %v5043_v19  ;;  %v2683_v2 = vmul.f32 %v5101_v1, %v5101_v1 }
 0x30c   : > { %v2711_v63 = vadd.f32 %v2710_v18, %v2709_v57  ;;  %v2712_v59 = vsel %vm2567_vm7, %v2679_v13, 0.0  ;;  %v2714_v45 = vsel %vm2567_vm7, %v2680_v6, 0.0  ;;  %v2716_v12 = vsel %vm2567_vm7, %v2681_v49, 0.0 }
 0x30d   : > { %v5122_v50 = vsub.f32 %v4840_v61, %v5043_v19  ;;  %v2684_v36 = vmul.f32 %v5108_v9, %v5108_v9  ;;  %v2718_v52 = vsel %vm2567_vm7, %v2682_v35, 0.0  ;;  %v5129_v16 = vsub.f32 %v4851_v39, %v5043_v19 }
 0x30e   : > { %v2713_v34 = vadd.f32 %v2712_v59, %v2711_v63  ;;  %v2685_v55 = vmul.f32 %v5115_v47, %v5115_v47  ;;  %v2720_v27 = vsel %vm2567_vm7, %v2683_v2, 0.0  ;;  %v5136_v61 = vsub.f32 %v4860_v5, %v5043_v19 }
 0x30f   : > { %v2686_v14 = vmul.f32 %v5122_v50, %v5122_v50  ;;  %v2722_v56 = vsel %vm2567_vm7, %v2684_v36, 0.0  ;;  %v5143_v39 = vsub.f32 %v4873_v60, %v5043_v19  ;;  %v2687_v43 = vmul.f32 %v5129_v16, %v5129_v16 }
 0x310   : > { %v2715_v41 = vadd.f32 %v2714_v45, %v2713_v34  ;;  %v2724_v44 = vsel %vm2567_vm7, %v2685_v55, 0.0  ;;  %v5150_v5 = vsub.f32 %v4881_v22, %v5043_v19  ;;  %v2688_v30 = vmul.f32 %v5136_v61, %v5136_v61 }
 0x311   : > { %v2726_v51 = vsel %vm2567_vm7, %v2686_v14, 0.0  ;;  %v5157_v60 = vsub.f32 %v4887_v10, %v5043_v19  ;;  %v2689_v6 = vmul.f32 %v5143_v39, %v5143_v39  ;;  %v2728_v57 = vsel %vm2567_vm7, %v2687_v43, 0.0 }
 0x312   : > { %v2717_v46 = vadd.f32 %v2716_v12, %v2715_v41  ;;  %v5164_v22 = vsub.f32 %v4907_v25, %v5043_v19  ;;  %v2690_v63 = vmul.f32 %v5150_v5, %v5150_v5  ;;  %v2730_v49 = vsel %vm2567_vm7, %v2688_v30, 0.0 }
 0x313   : > { %v5171_v10 = vsub.f32 %v4918_v37, %v5043_v19  ;;  %v2691_v34 = vmul.f32 %v5157_v60, %v5157_v60  ;;  %v2732_v35 = vsel %vm2567_vm7, %v2689_v6, 0.0  ;;  %v5178_v25 = vsub.f32 %v4925_v21, %v5043_v19 }
 0x314   : > { %v2719_v33 = vadd.f32 %v2718_v52, %v2717_v46  ;;  %v2692_v41 = vmul.f32 %v5164_v22, %v5164_v22  ;;  %v2734_v2 = vsel %vm2567_vm7, %v2690_v63, 0.0  ;;  %v5185_v37 = vsub.f32 %v4932_v26, %v5043_v19 }
 0x315   : > { %v2693_v46 = vmul.f32 %v5171_v10, %v5171_v10  ;;  %v2736_v36 = vsel %vm2567_vm7, %v2691_v34, 0.0  ;;  %v5192_v21 = vsub.f32 %v4948_v58, %v5043_v19  ;;  %v5199_v26 = vsub.f32 %v4957_v17, %v5043_v19 }
 0x316   : > { %v2721_v31 = vadd.f32 %v2720_v27, %v2719_v33  ;;  %v2694_v33 = vmul.f32 %v5178_v25, %v5178_v25  ;;  %v2738_v55 = vsel %vm2567_vm7, %v2692_v41, 0.0  ;;  %v5206_v58 = vsub.f32 %v4960_v62, %v5043_v19 }
 0x317   : > { %v2740_v14 = vsel %vm2567_vm7, %v2693_v46, 0.0  ;;  %v5213_v17 = vsub.f32 %v4973_v0, %v5043_v19  ;;  %v5220_v62 = vsub.f32 %v4981_v40, %v5043_v19  ;;  %v5227_v0 = vsub.f32 %v4990_v15, %v5043_v19 }
 0x318   : > { %v2723_v3 = vadd.f32 %v2722_v56, %v2721_v31  ;;  %v2695_v31 = vmul.f32 %v5185_v37, %v5185_v37  ;;  %v2742_v43 = vsel %vm2567_vm7, %v2694_v33, 0.0  ;;  %v5234_v40 = vsub.f32 %v4998_v54, %v5043_v19 }
 0x319   : > { %v2701_v15 = vmul.f32 %v5227_v0, %v5227_v0  ;;  %v2703_v54 = vmul.f32 %v5047_v4, %v5047_v4 }
 0x31a   : > { %v2725_v53 = vadd.f32 %v2724_v44, %v2723_v3  ;;  %v2696_v3 = vmul.f32 %v5192_v21, %v5192_v21  ;;  %v2744_v30 = vsel %vm2567_vm7, %v2695_v31, 0.0 }
 0x31b   : > { %v2756_v19 = vsel %vm2567_vm7, %v2701_v15, 0.0  ;;  %v2760_v31 = vsel %vm2567_vm7, %v2703_v54, 0.0 }
 0x31c   : > { %v2727_v13 = vadd.f32 %v2726_v51, %v2725_v53  ;;  %v2697_v53 = vmul.f32 %v5199_v26, %v5199_v26  ;;  %v2746_v6 = vsel %vm2567_vm7, %v2696_v3, 0.0 }
 0x31e   : > { %v2729_v18 = vadd.f32 %v2728_v57, %v2727_v13  ;;  %v2698_v13 = vmul.f32 %v5206_v58, %v5206_v58  ;;  %v2748_v63 = vsel %vm2567_vm7, %v2697_v53, 0.0 }
 0x320   : > { %v2731_v59 = vadd.f32 %v2730_v49, %v2729_v18  ;;  %v2699_v18 = vmul.f32 %v5213_v17, %v5213_v17  ;;  %v2750_v34 = vsel %vm2567_vm7, %v2698_v13, 0.0 }
 0x322   : > { %v2733_v45 = vadd.f32 %v2732_v35, %v2731_v59  ;;  %v2700_v59 = vmul.f32 %v5220_v62, %v5220_v62 }
 0x324   : > { %v2735_v12 = vadd.f32 %v2734_v2, %v2733_v45  ;;  %v2752_v45 = vsel %vm2567_vm7, %v2699_v18, 0.0  ;;  %v2702_v2 = vmul.f32 %v5234_v40, %v5234_v40 }
 0x326   : > { %v2737_v52 = vadd.f32 %v2736_v36, %v2735_v12  ;;  %v2754_v12 = vsel %vm2567_vm7, %v2700_v59, 0.0  ;;  %v2758_v33 = vsel %vm2567_vm7, %v2702_v2, 0.0 }
 0x328   : > { %v2739_v27 = vadd.f32 %v2738_v55, %v2737_v52  ;;  %v2704_v52 = vmul.f32 %v5051_v42, %v5051_v42 }
 0x32a   : > { %v2741_v56 = vadd.f32 %v2740_v14, %v2739_v27  ;;  %v2705_v27 = vmul.f32 %v5054_v8, %v5054_v8  ;;  %v2762_v3 = vsel %vm2567_vm7, %v2704_v52, 0.0 }
 0x32c   : > { %v2743_v44 = vadd.f32 %v2742_v43, %v2741_v56  ;;  %v2706_v56 = vmul.f32 %v5057_v38, %v5057_v38  ;;  %v2764_v53 = vsel %vm2567_vm7, %v2705_v27, 0.0 }
 0x32e   : > { %v2745_v51 = vadd.f32 %v2744_v30, %v2743_v44  ;;  %v2707_v44 = vmul.f32 %v5060_v29, %v5060_v29  ;;  %v2766_v13 = vsel %vm2567_vm7, %v2706_v56, 0.0  ;;  %v2855_v56 = vld [vmem:[%s5275_s20 + $0x8] sm:$0xff] }
 0x330   : > { %v2747_v57 = vadd.f32 %v2746_v6, %v2745_v51  ;;  %v2708_v51 = vmul.f32 %v5063_v32, %v5063_v32 }
 0x332   : > { %v2749_v49 = vadd.f32 %v2748_v63, %v2747_v57  ;;  %v2768_v57 = vsel %vm2567_vm7, %v2707_v44, 0.0  ;;  %v2770_v63 = vsel %vm2567_vm7, %v2708_v51, 0.0  ;;  %v2858_v51 = vld [vmem:[%s5275_s20 + $0x20] sm:$0xff] }
 0x334   : > { %v2751_v35 = vadd.f32 %v2750_v34, %v2749_v49 }
 0x336   : > { %v2753_v41 = vadd.f32 %v2752_v45, %v2751_v35 }
 0x338   : > { %v2755_v46 = vadd.f32 %v2754_v12, %v2753_v41 }
 0x33a   : > { %v2757_v36 = vadd.f32 %v2756_v19, %v2755_v46 }
 0x33c   : > { %v2759_v55 = vadd.f32 %v2758_v33, %v2757_v36 }
 0x33e   : > { %v2761_v14 = vadd.f32 %v2760_v31, %v2759_v55  ;;  %v2854_v31 = vld [vmem:[%s5275_s20] sm:$0xff] }
 0x340   : > { %v2763_v43 = vadd.f32 %v2762_v3, %v2761_v14  ;;  %v2856_v3 = vld [vmem:[%s5275_s20 + $0x10] sm:$0xff] }
 0x342   : > { %v2765_v30 = vadd.f32 %v2764_v53, %v2763_v43  ;;  %v2857_v43 = vld [vmem:[%s5275_s20 + $0x18] sm:$0xff] }
 0x344   : > { %v2767_v6 = vadd.f32 %v2766_v13, %v2765_v30  ;;  %v2822_v30 = vld [vmem:[%s5286_s24] sm:$0xff] }
 0x346   : > { %v2769_v18 = vadd.f32 %v2768_v57, %v2767_v6  ;;  %v2859_v6 = vld [vmem:[%s5275_s20 + $0x28] sm:$0xff] }
 0x348   : > { %v2771_v49 = vadd.f32 %v2770_v63, %v2769_v18  ;;  %v2824_v18 = vld [vmem:[%s5286_s24 + $0x10] sm:$0xff] }
 0x349   : > { %v2860_v63 = vld [vmem:[%s5275_s20 + $0x30] sm:$0xff] }
 0x34a   : > { %v2772_v59 = vrot.slane %v2771_v49, 4 }
 0x34c   : > { %v2773_v34 = vadd.f32 %v2772_v59, %v2771_v49  ;;  %v2825_v59 = vld [vmem:[%s5286_s24 + $0x18] sm:$0xff] }
 0x34e   : > { %v2774_v35 = vrot.slane %v2773_v34, 2 }
 0x350   : > { %v2775_v15 = vadd.f32 %v2774_v35, %v2773_v34  ;;  %v2861_v34 = vld [vmem:[%s5275_s20 + $0x38] sm:$0xff] }
 0x352   : > { %v2776_v45 = vrot.slane %v2775_v15, 1 }
 0x354   : > { %v2777_v41 = vadd.f32 %v2776_v45, %v2775_v15  ;;  %v2826_v45 = vld [vmem:[%s5286_s24 + $0x20] sm:$0xff] }
 0x356   : > { %v2778_v2 = vmul.f32 %v2777_v41, %v5040_v28 }
 0x358   : > { %v2779_v12 = vadd.f32 1e-05, %v2778_v2 }
 0x35a   : > { %3503 = vrsqrt.f32 %v2779_v12  ;;  %vm2786_vm10 = vweird.f32 %v2779_v12 }
 0x360   : > { %v3504_v46 = vpop.eup %3503 }
 0x361   : > { %v2781_v54 = vmul.f32 %v3504_v46, %v2779_v12  ;;  %vm2787_vm9 = vweird.f32 %v3504_v46 }
 0x362   : > { %vm2788_vm11 = vmor %vm2786_vm10, %vm2787_vm9 }
 0x363   : > { %v2782_v19 = vmul.f32 %v3504_v46, %v2781_v54 }
 0x365   : > { %v2783_v36 = vmul.f32 0.5, %v2782_v19 }
 0x367   : > { %v2784_v52 = vsub.f32 1.5, %v2783_v36 }
 0x369   : > { %v2785_v33 = vmul.f32 %v3504_v46, %v2784_v52  ;;  %v2828_v52 = vld [vmem:[%s5286_s24 + $0x30] sm:$0xff] }
 0x36b   : > { %v5269_v55 = vsel %vm2788_vm11, %v3504_v46, %v2785_v33  ;;  %v2827_v46 = vld [vmem:[%s5286_s24 + $0x28] sm:$0xff] }
 0x36c   : > { %v2790_v28 = vmul.f32 %v5269_v55, %v5067_v20  ;;  %v2791_v27 = vmul.f32 %v5269_v55, %v5071_v24  ;;  %v2792_v14 = vmul.f32 %v5269_v55, %v5075_v48  ;;  %v2793_v20 = vmul.f32 %v5269_v55, %v5079_v23  ;;  %v2823_v23 = vld [vmem:[%s5286_s24 + $0x8] sm:$0xff] }
 0x36d   : > { %v2794_v24 = vmul.f32 %v5269_v55, %v5087_v11  ;;  %v2795_v53 = vmul.f32 %v5269_v55, %v5093_v7  ;;  %v2796_v13 = vmul.f32 %v5269_v55, %v5101_v1  ;;  %v2797_v11 = vmul.f32 %v5269_v55, %v5108_v9  ;;  %v2862_v9 = vld [vmem:[%s5275_s20 + $0x40] sm:$0xff] }
 0x36e   : > { %v2886_v44 = vmul.f32 %v2854_v31, %v2790_v28  ;;  %v2887_v48 = vmul.f32 %v2855_v56, %v2791_v27  ;;  %v2888_v57 = vmul.f32 %v2856_v3, %v2792_v14  ;;  %v2889_v49 = vmul.f32 %v2857_v43, %v2793_v20  ;;  %v2829_v31 = vld [vmem:[%s5286_s24 + $0x38] sm:$0xff]  ;;  %v2866_v3 = vld [vmem:[%s5275_s20 + $0x60] sm:$0xff] }
 0x36f   : > { %v2798_v7 = vmul.f32 %v5269_v55, %v5115_v47  ;;  %v2890_v35 = vmul.f32 %v2858_v51, %v2794_v24  ;;  %v2799_v15 = vmul.f32 %v5269_v55, %v5122_v50  ;;  %v2891_v41 = vmul.f32 %v2859_v6, %v2795_v53  ;;  %v2863_v47 = vld [vmem:[%s5275_s20 + $0x48] sm:$0xff]  ;;  %v2864_v50 = vld [vmem:[%s5275_s20 + $0x50] sm:$0xff] }
 0x370   : > { %v2918_v1 = vadd.f32 %v2886_v44, %v2822_v30  ;;  %v2919_v2 = vadd.f32 %v2887_v48, %v2823_v23  ;;  %v2800_v12 = vmul.f32 %v5269_v55, %v5129_v16  ;;  %v2892_v54 = vmul.f32 %v2860_v63, %v2796_v13  ;;  %v2865_v16 = vld [vmem:[%s5275_s20 + $0x58] sm:$0xff]  ;;  %v2831_v44 = vld [vmem:[%s5286_s24 + $0x48] sm:$0xff]  ;;  %v2832_v48 = vld [vmem:[%s5286_s24 + $0x50] sm:$0xff] }
 0x371   : > { %v2920_v19 = vadd.f32 %v2888_v57, %v2824_v18  ;;  %v2801_v36 = vmul.f32 %v5269_v55, %v5136_v61  ;;  %v2893_v33 = vmul.f32 %v2861_v34, %v2797_v11  ;;  %v2921_v28 = vadd.f32 %v2889_v49, %v2825_v59  ;;  %v2830_v61 = vld [vmem:[%s5286_s24 + $0x40] sm:$0xff]  ;;  %v2867_v53 = vld [vmem:[%s5275_s20 + $0x68] sm:$0xff]  ;;  %v2868_v13 = vld [vmem:[%s5275_s20 + $0x70] sm:$0xff] }
 0x372   : > { %v2802_v27 = vmul.f32 %v5269_v55, %v5143_v39  ;;  %v2894_v14 = vmul.f32 %v2862_v9, %v2798_v7  ;;  %v2922_v56 = vadd.f32 %v2890_v35, %v2826_v45  ;;  %3505 = vtanh.f32 %v2918_v1  ;;  %v2833_v57 = vld [vmem:[%s5286_s24 + $0x58] sm:$0xff]  ;;  %v2834_v49 = vld [vmem:[%s5286_s24 + $0x60] sm:$0xff]  ;;  %v2835_v1 = vld [vmem:[%s5286_s24 + $0x68] sm:$0xff] }
 0x373   : > { %v2803_v20 = vmul.f32 %v5269_v55, %v5150_v5  ;;  %v2895_v24 = vmul.f32 %v2863_v47, %v2799_v15  ;;  %v2923_v43 = vadd.f32 %v2891_v41, %v2827_v46  ;;  %3507 = vtanh.f32 %v2919_v2  ;;  %v2869_v11 = vld [vmem:[%s5275_s20 + $0x78] sm:$0xff]  ;;  %v2870_v7 = vld [vmem:[%s5275_s20 + $0x80] sm:$0xff]  ;;  %v2871_v15 = vld [vmem:[%s5275_s20 + $0x88] sm:$0xff] }
 0x374   : > { %v2804_v39 = vmul.f32 %v5269_v55, %v5157_v60  ;;  %v2896_v30 = vmul.f32 %v2864_v50, %v2800_v12  ;;  %v2924_v51 = vadd.f32 %v2892_v54, %v2828_v52  ;;  %3509 = vtanh.f32 %v2920_v19  ;;  %v2836_v2 = vld [vmem:[%s5286_s24 + $0x70] sm:$0xff]  ;;  %v2837_v19 = vld [vmem:[%s5286_s24 + $0x78] sm:$0xff] }
 0x375   : > { %v2805_v5 = vmul.f32 %v5269_v55, %v5164_v22  ;;  %v2897_v23 = vmul.f32 %v2865_v16, %v2801_v36  ;;  %v2925_v6 = vadd.f32 %v2893_v33, %v2829_v31  ;;  %3511 = vtanh.f32 %v2921_v28  ;;  %v2872_v12 = vld [vmem:[%s5275_s20 + $0x90] sm:$0xff]  ;;  %v2873_v36 = vld [vmem:[%s5275_s20 + $0x98] sm:$0xff]  ;;  %v2838_v28 = vld [vmem:[%s5286_s24 + $0x80] sm:$0xff] }
 0x376   : > { %v2806_v60 = vmul.f32 %v5269_v55, %v5171_v10  ;;  %v2898_v18 = vmul.f32 %v2866_v3, %v2802_v27  ;;  %v2926_v63 = vadd.f32 %v2894_v14, %v2830_v61  ;;  %3513 = vtanh.f32 %v2922_v56  ;;  %v2874_v27 = vld [vmem:[%s5275_s20 + $0xa0] sm:$0xff]  ;;  %v2839_v56 = vld [vmem:[%s5286_s24 + $0x88] sm:$0xff] }
 0x377   : > { %v2807_v22 = vmul.f32 %v5269_v55, %v5178_v25  ;;  %v2899_v59 = vmul.f32 %v2867_v53, %v2803_v20  ;;  %v2927_v34 = vadd.f32 %v2895_v24, %v2831_v44  ;;  %3515 = vtanh.f32 %v2923_v43  ;;  %v2875_v20 = vld [vmem:[%s5275_s20 + $0xa8] sm:$0xff]  ;;  %v2840_v43 = vld [vmem:[%s5286_s24 + $0x90] sm:$0xff] }
 0x378   : > { %v3506_v35 = vpop.eup %3505  ;;  %v2808_v10 = vmul.f32 %v5269_v55, %v5185_v37  ;;  %v2900_v45 = vmul.f32 %v2868_v13, %v2804_v39  ;;  %v2928_v9 = vadd.f32 %v2896_v30, %v2832_v48  ;;  %3517 = vtanh.f32 %v2924_v51  ;;  %v2876_v39 = vld [vmem:[%s5275_s20 + $0xb0] sm:$0xff]  ;;  %v2841_v51 = vld [vmem:[%s5286_s24 + $0x98] sm:$0xff] }
 0x379   : > { %v3508_v25 = vpop.eup %3507  ;;  %v2809_v41 = vmul.f32 %v5269_v55, %v5192_v21  ;;  %v2901_v46 = vmul.f32 %v2869_v11, %v2805_v5  ;;  %v2929_v47 = vadd.f32 %v2897_v23, %v2833_v57  ;;  %3519 = vtanh.f32 %v2925_v6  ;;  %2982 = vst.msk [vmem:[%s5345_s27] sm:$0xff] %vm2567_vm7, %v3506_v35  ;;  %v2877_v5 = vld [vmem:[%s5275_s20 + $0xb8] sm:$0xff]  ;;  %v2842_v6 = vld [vmem:[%s5286_s24 + $0xa0] sm:$0xff]  ;;  %v2880_v35 = vld [vmem:[%s5275_s20 + $0xd0] sm:$0xff] }
 0x37a   : > { %v3510_v37 = vpop.eup %3509  ;;  %v2810_v54 = vmul.f32 %v5269_v55, %v5199_v26  ;;  %v2902_v52 = vmul.f32 %v2870_v7, %v2806_v60  ;;  %v2930_v21 = vadd.f32 %v2898_v18, %v2834_v49  ;;  %3521 = vtanh.f32 %v2926_v63  ;;  %2983 = vst.msk [vmem:[%s5345_s27 + $0x8] sm:$0xff] %vm2567_vm7, %v3508_v25  ;;  %v2878_v60 = vld [vmem:[%s5275_s20 + $0xc0] sm:$0xff]  ;;  %v2843_v63 = vld [vmem:[%s5286_s24 + $0xa8] sm:$0xff] }
 0x37b   : > { %v3512_v50 = vpop.eup %3511  ;;  %v2811_v33 = vmul.f32 %v5269_v55, %v5206_v58  ;;  %v2903_v31 = vmul.f32 %v2871_v15, %v2807_v22  ;;  %v2931_v26 = vadd.f32 %v2899_v59, %v2835_v1  ;;  %3523 = vtanh.f32 %v2927_v34  ;;  %2984 = vst.msk [vmem:[%s5345_s27 + $0x10] sm:$0xff] %vm2567_vm7, %v3510_v37  ;;  %v2879_v22 = vld [vmem:[%s5275_s20 + $0xc8] sm:$0xff]  ;;  %v2844_v34 = vld [vmem:[%s5286_s24 + $0xb0] sm:$0xff] }
 0x37c   : > { %v3514_v16 = vpop.eup %3513  ;;  %v2812_v14 = vmul.f32 %v5269_v55, %v5213_v17  ;;  %v2904_v61 = vmul.f32 %v2872_v12, %v2808_v10  ;;  %v2932_v58 = vadd.f32 %v2900_v45, %v2836_v2  ;;  %3525 = vtanh.f32 %v2928_v9  ;;  %2985 = vst.msk [vmem:[%s5345_s27 + $0x18] sm:$0xff] %vm2567_vm7, %v3512_v50  ;;  %v2845_v45 = vld [vmem:[%s5286_s24 + $0xb8] sm:$0xff]  ;;  %v2846_v12 = vld [vmem:[%s5286_s24 + $0xc0] sm:$0xff] }
 0x37d   : > { %v3516_v3 = vpop.eup %3515  ;;  %v2813_v24 = vmul.f32 %v5269_v55, %v5220_v62  ;;  %v2905_v44 = vmul.f32 %v2873_v36, %v2809_v41  ;;  %v2933_v17 = vadd.f32 %v2901_v46, %v2837_v19  ;;  %3527 = vtanh.f32 %v2929_v47  ;;  %2986 = vst.msk [vmem:[%s5345_s27 + $0x20] sm:$0xff] %vm2567_vm7, %v3514_v16  ;;  %v2881_v9 = vld [vmem:[%s5275_s20 + $0xd8] sm:$0xff]  ;;  %v2882_v46 = vld [vmem:[%s5275_s20 + $0xe0] sm:$0xff]  ;;  %v2847_v19 = vld [vmem:[%s5286_s24 + $0xc8] sm:$0xff] }
 0x37e   : > { %v3518_v53 = vpop.eup %3517  ;;  %v2814_v30 = vmul.f32 %v5269_v55, %v5227_v0  ;;  %v2906_v48 = vmul.f32 %v2874_v27, %v2810_v54  ;;  %v2934_v62 = vadd.f32 %v2902_v52, %v2838_v28  ;;  %3529 = vtanh.f32 %v2930_v21  ;;  %2987 = vst.msk [vmem:[%s5345_s27 + $0x28] sm:$0xff] %vm2567_vm7, %v3516_v3  ;;  %v2883_v36 = vld [vmem:[%s5275_s20 + $0xe8] sm:$0xff]  ;;  %v2884_v28 = vld [vmem:[%s5275_s20 + $0xf0] sm:$0xff]  ;;  %v2885_v16 = vld [vmem:[%s5275_s20 + $0xf8] sm:$0xff] }
 0x37f   : > { %v3520_v13 = vpop.eup %3519  ;;  %v2815_v23 = vmul.f32 %v5269_v55, %v5234_v40  ;;  %v2907_v57 = vmul.f32 %v2875_v20, %v2811_v33  ;;  %v2935_v0 = vadd.f32 %v2903_v31, %v2839_v56  ;;  %3531 = vtanh.f32 %v2931_v26  ;;  %2988 = vst.msk [vmem:[%s5345_s27 + $0x30] sm:$0xff] %vm2567_vm7, %v3518_v53  ;;  %v2848_v33 = vld [vmem:[%s5286_s24 + $0xd0] sm:$0xff]  ;;  %v2849_v26 = vld [vmem:[%s5286_s24 + $0xd8] sm:$0xff]  ;;  %v2851_v3 = vld [vmem:[%s5286_s24 + $0xe8] sm:$0xff] }
 0x380   : > { %v3522_v11 = vpop.eup %3521  ;;  %v2816_v18 = vmul.f32 %v5269_v55, %v5047_v4  ;;  %v2908_v49 = vmul.f32 %v2876_v39, %v2812_v14  ;;  %v2936_v40 = vadd.f32 %v2904_v61, %v2840_v43  ;;  %3533 = vtanh.f32 %v2932_v58  ;;  %2989 = vst.msk [vmem:[%s5345_s27 + $0x38] sm:$0xff] %vm2567_vm7, %v3520_v13 }
 0x381   : > { %v3524_v7 = vpop.eup %3523  ;;  %v2817_v59 = vmul.f32 %v5269_v55, %v5051_v42  ;;  %v2909_v10 = vmul.f32 %v2877_v5, %v2813_v24  ;;  %v2937_v4 = vadd.f32 %v2905_v44, %v2841_v51  ;;  %3535 = vtanh.f32 %v2933_v17  ;;  %2990 = vst.msk [vmem:[%s5345_s27 + $0x40] sm:$0xff] %vm2567_vm7, %v3522_v11  ;;  %v2852_v44 = vld [vmem:[%s5286_s24 + $0xf0] sm:$0xff]  ;;  %v2853_v51 = vld [vmem:[%s5286_s24 + $0xf8] sm:$0xff] }
 0x382   : > { %v3526_v1 = vpop.eup %3525  ;;  %v2818_v15 = vmul.f32 %v5269_v55, %v5054_v8  ;;  %v2910_v25 = vmul.f32 %v2878_v60, %v2814_v30  ;;  %v2938_v42 = vadd.f32 %v2906_v48, %v2842_v6  ;;  %3537 = vtanh.f32 %v2934_v62  ;;  %2991 = vst.msk [vmem:[%s5345_s27 + $0x48] sm:$0xff] %vm2567_vm7, %v3524_v7 }
 0x383   : > { %v3528_v41 = vpop.eup %3527  ;;  %v2819_v2 = vmul.f32 %v5269_v55, %v5057_v38  ;;  %v2911_v47 = vmul.f32 %v2879_v22, %v2815_v23  ;;  %v2939_v8 = vadd.f32 %v2907_v57, %v2843_v63  ;;  %3539 = vtanh.f32 %v2935_v0  ;;  %2992 = vst.msk [vmem:[%s5345_s27 + $0x50] sm:$0xff] %vm2567_vm7, %v3526_v1 }
 0x384   : > { %v3530_v37 = vpop.eup %3529  ;;  %v2820_v54 = vmul.f32 %v5269_v55, %v5060_v29  ;;  %v2912_v52 = vmul.f32 %v2880_v35, %v2816_v18  ;;  %v2940_v38 = vadd.f32 %v2908_v49, %v2844_v34  ;;  %3541 = vtanh.f32 %v2936_v40  ;;  %2993 = vst.msk [vmem:[%s5345_s27 + $0x58] sm:$0xff] %vm2567_vm7, %v3528_v41 }
 0x385   : > { %v3532_v21 = vpop.eup %3531  ;;  %v2821_v50 = vmul.f32 %v5269_v55, %v5063_v32  ;;  %v2913_v27 = vmul.f32 %v2881_v9, %v2817_v59  ;;  %v2941_v29 = vadd.f32 %v2909_v10, %v2845_v45  ;;  %3543 = vtanh.f32 %v2937_v4  ;;  %2994 = vst.msk [vmem:[%s5345_s27 + $0x60] sm:$0xff] %vm2567_vm7, %v3530_v37  ;;  %v2850_v55 = vld [vmem:[%s5286_s24 + $0xe0] sm:$0xff] }
 0x386   : > { %v3534_v31 = vpop.eup %3533  ;;  %v2914_v14 = vmul.f32 %v2882_v46, %v2818_v15  ;;  %v2942_v56 = vadd.f32 %v2910_v25, %v2846_v12  ;;  %3545 = vtanh.f32 %v2938_v42  ;;  %2995 = vst.msk [vmem:[%s5345_s27 + $0x68] sm:$0xff] %vm2567_vm7, %v3532_v21  ;;  %v2915_v20 = vmul.f32 %v2883_v36, %v2819_v2 }
 0x387   : > { %v3536_v32 = vpop.eup %3535  ;;  %v2943_v61 = vadd.f32 %v2911_v47, %v2847_v19  ;;  %3547 = vtanh.f32 %v2939_v8  ;;  %2996 = vst.msk [vmem:[%s5345_s27 + $0x70] sm:$0xff] %vm2567_vm7, %v3534_v31  ;;  %v2916_v24 = vmul.f32 %v2884_v28, %v2820_v54  ;;  %v2944_v43 = vadd.f32 %v2912_v52, %v2848_v33 }
 0x388   : > { %v3538_v58 = vpop.eup %3537  ;;  %3549 = vtanh.f32 %v2940_v38  ;;  %2997 = vst.msk [vmem:[%s5345_s27 + $0x78] sm:$0xff] %vm2567_vm7, %v3536_v32  ;;  %v2917_v17 = vmul.f32 %v2885_v16, %v2821_v50  ;;  %v2945_v53 = vadd.f32 %v2913_v27, %v2849_v26  ;;  %v2946_v5 = vadd.f32 %v2914_v14, %v2850_v55 }
 0x389   : > { %v3540_v39 = vpop.eup %3539  ;;  %3551 = vtanh.f32 %v2941_v29  ;;  %2998 = vst.msk [vmem:[%s5345_s27 + $0x80] sm:$0xff] %vm2567_vm7, %v3538_v58  ;;  %v2947_v62 = vadd.f32 %v2915_v20, %v2851_v3  ;;  %v2948_v23 = vadd.f32 %v2916_v24, %v2852_v44 }
 0x38a   : > { %v3542_v30 = vpop.eup %3541  ;;  %3553 = vtanh.f32 %v2942_v56  ;;  %2999 = vst.msk [vmem:[%s5345_s27 + $0x88] sm:$0xff] %vm2567_vm7, %v3540_v39  ;;  %v2949_v60 = vadd.f32 %v2917_v17, %v2853_v51 }
 0x38b   : > { %v3544_v48 = vpop.eup %3543  ;;  %3555 = vtanh.f32 %v2943_v61  ;;  %3000 = vst.msk [vmem:[%s5345_s27 + $0x90] sm:$0xff] %vm2567_vm7, %v3542_v30 }
 0x38c   : > { %v3546_v13 = vpop.eup %3545  ;;  %3557 = vtanh.f32 %v2944_v43  ;;  %3001 = vst.msk [vmem:[%s5345_s27 + $0x98] sm:$0xff] %vm2567_vm7, %v3544_v48 }
 0x38d   : > { %v3548_v6 = vpop.eup %3547  ;;  %3559 = vtanh.f32 %v2945_v53  ;;  %3002 = vst.msk [vmem:[%s5345_s27 + $0xa0] sm:$0xff] %vm2567_vm7, %v3546_v13 }
 0x38e   : > { %v3550_v57 = vpop.eup %3549  ;;  %3561 = vtanh.f32 %v2946_v5  ;;  %3003 = vst.msk [vmem:[%s5345_s27 + $0xa8] sm:$0xff] %vm2567_vm7, %v3548_v6 }
 0x38f   : > { %v3552_v0 = vpop.eup %3551  ;;  %3563 = vtanh.f32 %v2947_v62  ;;  %3004 = vst.msk [vmem:[%s5345_s27 + $0xb0] sm:$0xff] %vm2567_vm7, %v3550_v57 }
 0x390   : > { %v3554_v11 = vpop.eup %3553  ;;  %3565 = vtanh.f32 %v2948_v23  ;;  %3005 = vst.msk [vmem:[%s5345_s27 + $0xb8] sm:$0xff] %vm2567_vm7, %v3552_v0 }
 0x391   : > { %v3556_v18 = vpop.eup %3555  ;;  %3567 = vtanh.f32 %v2949_v60  ;;  %3006 = vst.msk [vmem:[%s5345_s27 + $0xc0] sm:$0xff] %vm2567_vm7, %v3554_v11 }
 0x392   : > { %v3558_v63 = vpop.eup %3557  ;;  %3007 = vst.msk [vmem:[%s5345_s27 + $0xc8] sm:$0xff] %vm2567_vm7, %v3556_v18 }
 0x393   : > { %v3560_v22 = vpop.eup %3559  ;;  %3008 = vst.msk [vmem:[%s5345_s27 + $0xd0] sm:$0xff] %vm2567_vm7, %v3558_v63 }
 0x394   : > { %v3562_v49 = vpop.eup %3561  ;;  %3009 = vst.msk [vmem:[%s5345_s27 + $0xd8] sm:$0xff] %vm2567_vm7, %v3560_v22 }
 0x395   : > { %v3564_v40 = vpop.eup %3563  ;;  %3010 = vst.msk [vmem:[%s5345_s27 + $0xe0] sm:$0xff] %vm2567_vm7, %v3562_v49 }
 0x396   : > { %v3566_v7 = vpop.eup %3565  ;;  %3011 = vst.msk [vmem:[%s5345_s27 + $0xe8] sm:$0xff] %vm2567_vm7, %v3564_v40 }
 0x397   : > { %v3568_v59 = vpop.eup %3567  ;;  %3012 = vst.msk [vmem:[%s5345_s27 + $0xf0] sm:$0xff] %vm2567_vm7, %v3566_v7 }
 0x398   : > { %3013 = vst.msk [vmem:[%s5345_s27 + $0xf8] sm:$0xff] %vm2567_vm7, %v3568_v59 }
 0x399 PF: > { %s16_s21 = sadd.s32 1, %s3584_s21  }
 0x39a   : > { %p13_p4 = scmp.ge.s32.totalorder %s16_s21, 4  }
 0x39c   :  { %15 = sbr.rel (!%p13_p4) target bundleno = 1 (0x1), region = 88 }

</bundles_post_ra>
